<compile_context>
chip_gen: v5e
topology: v5e:2x2
jax: 0.10.0
libtpu: 0.0.40
codegen_flags: <defaults>
</compile_context>

<pallas_src>
import math
import jax
import jax.numpy as jnp
from jax import lax
from jax.experimental import pallas as pl
from jax.experimental.pallas import tpu as pltpu


def _round_up(x, m):
    return ((x + m - 1) // m) * m


# ----------------------------- fused kernel -----------------------------------
def make_fused_kernel(num_layers, T, Bt, Hp):
    H4 = 4 * Hp
    # Full unroll for short sequences; sweep {4,8,16} for long T (vreg pressure).
    unroll = T if T <= 32 else 8

    def kernel(*refs):
        # inputs : x (1, T*Bt, Dp) bf16,
        #          [wih (Din_p,4Hp) bf16, whh (Hp,4Hp) bf16, b (1,4Hp) f32] * L,
        #          fc_w (Hp, Cp) bf16, fc_b (1, Cp) f32
        # output : out (1, Bt, Cp) f32
        # scratch: pre (T*Bt, 4Hp) f32, seq (T*Bt, Hp) bf16
        x_ref = refs[0]
        layer_refs = refs[1:1 + 3 * num_layers]
        fcw_ref = refs[1 + 3 * num_layers]
        fcb_ref = refs[2 + 3 * num_layers]
        out_ref = refs[3 + 3 * num_layers]
        pre_ref, seq_ref = refs[4 + 3 * num_layers:]

        def run_layer(layer, in_flat, store_seq):
            wih_ref = layer_refs[3 * layer + 0]
            whh_ref = layer_refs[3 * layer + 1]
            b_ref = layer_refs[3 * layer + 2]

            # (1) Input projection for ALL timesteps in one MXU matmul,
            #     bias folded in. The recurrence then only does h @ Whh.
            pre_ref[...] = jnp.dot(in_flat, wih_ref[...],
                                   preferred_element_type=jnp.float32) + b_ref[...]

            whh = whh_ref[...]                       # (Hp, 4Hp) bf16, hoisted
            h0 = jnp.zeros((Bt, Hp), jnp.bfloat16)   # h/c live in vregs (carries)
            c0 = jnp.zeros((Bt, Hp), jnp.float32)

            # (2) Serial recurrence: one small matmul + EUP/VPU work per step.
            #     Padded gate lanes see gates==0 -> i=f=o=0.5, g=0, so padded
            #     lanes of h/c stay exactly 0 (c starts at 0) and never leak.
            def step(t, carry):
                h_bf, c = carry
                row = pl.multiple_of(t * Bt, Bt)
                gates = pre_ref[pl.ds(row, Bt), :] + jnp.dot(
                    h_bf, whh, preferred_element_type=jnp.float32)   # (Bt,4Hp) f32
                i_g = jax.nn.sigmoid(gates[:, 0 * Hp:1 * Hp])
                f_g = jax.nn.sigmoid(gates[:, 1 * Hp:2 * Hp])
                g_g = jnp.tanh(gates[:, 2 * Hp:3 * Hp])
                o_g = jax.nn.sigmoid(gates[:, 3 * Hp:4 * Hp])
                c_new = f_g * c + i_g * g_g                          # f32 state
                h_new = o_g * jnp.tanh(c_new)
                h_bf_new = h_new.astype(jnp.bfloat16)                # pack now, not
                if store_seq:                                        # before next dot
                    # ReLU after every LSTM layer (module semantics); bf16 is
                    # only a matmul operand for the next layer.
                    seq_ref[pl.ds(row, Bt), :] = jnp.maximum(h_bf_new, 0)
                return (h_bf_new, c_new)

            h_fin, _ = lax.fori_loop(0, T, step, (h0, c0), unroll=unroll)
            return h_fin

        h_last = run_layer(0, x_ref[0], store_seq=(num_layers > 1))
        for l in range(1, num_layers):
            # seq (layer l-1 output) is fully read into the projection before
            # layer l's recurrence overwrites it -> one ping buffer suffices.
            h_last = run_layer(l, seq_ref[...], store_seq=(l < num_layers - 1))

        # Fused FC head on ReLU(h_T). Cp is a multiple of 128 -> lane-dense store.
        h_last = jnp.maximum(h_last, 0)
        out_ref[0] = (jnp.dot(h_last, fcw_ref[...],
                              preferred_element_type=jnp.float32) + fcb_ref[...])

    return kernel


def _build_call(T, Bt, n_tiles, Dp, Hp, num_layers, Cp):
    kernel = make_fused_kernel(num_layers, T, Bt, Hp)
    in_specs = [pl.BlockSpec((1, T * Bt, Dp), lambda b: (b, 0, 0))]
    for layer in range(num_layers):
        din_p = Dp if layer == 0 else Hp
        in_specs += [
            pl.BlockSpec((din_p, 4 * Hp), lambda b: (0, 0)),
            pl.BlockSpec((Hp, 4 * Hp), lambda b: (0, 0)),
            pl.BlockSpec((1, 4 * Hp), lambda b: (0, 0)),
        ]
    in_specs += [
        pl.BlockSpec((Hp, Cp), lambda b: (0, 0)),
        pl.BlockSpec((1, Cp), lambda b: (0, 0)),
    ]
    scratch_shapes = [
        pltpu.VMEM((T * Bt, 4 * Hp), jnp.float32),   # pre-gates (reused per layer)
        pltpu.VMEM((T * Bt, Hp), jnp.bfloat16),      # inter-layer activations
    ]
    return pl.pallas_call(
        kernel,
        out_shape=jax.ShapeDtypeStruct((n_tiles, Bt, Cp), jnp.float32),
        grid=(n_tiles,),
        in_specs=in_specs,
        out_specs=pl.BlockSpec((1, Bt, Cp), lambda b: (b, 0, 0)),
        scratch_shapes=scratch_shapes,
        compiler_params=pltpu.CompilerParams(
            dimension_semantics=("parallel",)),      # batch tiles are independent
    )


# --------------------------- param prep (one-time) -----------------------------
def prepare_params(params):
    """Hoisted weight prep: transpose, fold biases (b_ih + b_hh), pad every gate
    to 128 lanes, pad input features to 128 lanes, pad the FC head to 128 output
    lanes, cast matmul operands to bf16. PyTorch gate order [i, f, g, o] kept."""
    H = params["lstm"][0][1].shape[1]
    D = params["lstm"][0][0].shape[1]
    C = params["fc_w"].shape[0]
    Hp = _round_up(H, 128)
    Dp = _round_up(D, 128)
    Cp = _round_up(C, 128)

    def pad_gates_cols(mat_t, rows_valid, rows_p):
        # mat_t: (Din, 4H) -> (rows_p, 4*Hp) with gate g at columns [g*Hp, g*Hp+H)
        out = jnp.zeros((rows_p, 4 * Hp), jnp.float32)
        for g in range(4):
            out = out.at[:rows_valid, g * Hp:g * Hp + H].set(
                mat_t[:, g * H:(g + 1) * H])
        return out

    layers = []
    for li, (w_ih, w_hh, b_ih, b_hh) in enumerate(params["lstm"]):
        din = D if li == 0 else H
        din_p = Dp if li == 0 else Hp
        wih_t = jnp.asarray(w_ih, jnp.float32).T          # (Din, 4H)
        whh_t = jnp.asarray(w_hh, jnp.float32).T          # (H, 4H)
        bias = (jnp.asarray(b_ih, jnp.float32)
                + jnp.asarray(b_hh, jnp.float32)).reshape(1, -1)  # (1, 4H)
        wih_p = pad_gates_cols(wih_t, din, din_p).astype(jnp.bfloat16)
        whh_p = pad_gates_cols(whh_t, H, Hp).astype(jnp.bfloat16)
        b_p = pad_gates_cols(bias, 1, 1)                  # (1, 4*Hp) f32
        layers.append((wih_p, whh_p, b_p))

    fc_w = jnp.zeros((Hp, Cp), jnp.float32).at[:H, :C].set(
        jnp.asarray(params["fc_w"], jnp.float32).T).astype(jnp.bfloat16)
    fc_b = jnp.zeros((1, Cp), jnp.float32).at[0, :C].set(
        jnp.asarray(params["fc_b"], jnp.float32))
    return {"layers": layers, "fc_w": fc_w, "fc_b": fc_b,
            "hidden": H, "hidden_p": Hp, "input_p": Dp, "num_classes": C}


# ------------------------------- full forward ----------------------------------
def lstm_model_forward(x_btd, prepped):
    """x_btd: (B, T, input_size), batch_first like the PyTorch module."""
    B, T, D = x_btd.shape
    layers = prepped["layers"]
    Hp = prepped["hidden_p"]
    Dp = prepped["input_p"]
    C = prepped["num_classes"]
    Cp = prepped["fc_w"].shape[1]

    # Batch tile = multiple of 16 (bf16 sublane tile); extra tiles run as
    # "parallel" grid steps (second TensorCore on v7x for large batches).
    Bt = min(_round_up(B, 16), 128)
    n_tiles = -(-B // Bt)
    Bp = n_tiles * Bt

    # Time-major, pad batch & feature lanes, group into independent batch tiles,
    # flatten (T, Bt) -> rows so the kernel never reshapes. Padded batch rows
    # produce garbage h/c (sigmoid(0)=0.5 etc.) but are sliced off below.
    x_tm = jnp.transpose(x_btd, (1, 0, 2)).astype(jnp.float32)      # (T, B, D)
    x_tm = jnp.pad(x_tm, ((0, 0), (0, Bp - B), (0, Dp - D)))
    x_tiles = (x_tm.reshape(T, n_tiles, Bt, Dp)
               .transpose(1, 0, 2, 3)
               .reshape(n_tiles, T * Bt, Dp)
               .astype(jnp.bfloat16))

    call = _build_call(T, Bt, n_tiles, Dp, Hp, len(layers), Cp)
    args = [x_tiles]
    for lw in layers:
        args.extend(lw)
    args += [prepped["fc_w"], prepped["fc_b"]]
    out = call(*args)                                               # (n_tiles, Bt, Cp)
    return out.reshape(n_tiles * Bt, Cp)[:B, :C]


# --------------------------- pure-JAX f32 reference ----------------------------
def reference_forward(x_btd, params):
    out = jnp.transpose(x_btd, (1, 0, 2)).astype(jnp.float32)
    for (w_ih, w_hh, b_ih, b_hh) in params["lstm"]:
        T, B, _ = out.shape
        H = w_hh.shape[1]
        h = jnp.zeros((B, H), jnp.float32)
        c = jnp.zeros((B, H), jnp.float32)
        ys = []
        for t in range(T):
            g = out[t] @ w_ih.T + h @ w_hh.T + b_ih + b_hh
            i_g = jax.nn.sigmoid(g[:, 0 * H:1 * H])
            f_g = jax.nn.sigmoid(g[:, 1 * H:2 * H])
            g_g = jnp.tanh(g[:, 2 * H:3 * H])
            o_g = jax.nn.sigmoid(g[:, 3 * H:4 * H])
            c = f_g * c + i_g * g_g
            h = o_g * jnp.tanh(c)
            ys.append(jnp.maximum(h, 0.0))
        out = jnp.stack(ys, axis=0)
    return out[-1] @ params["fc_w"].T + params["fc_b"]


# ---------------------------------- params -------------------------------------
def init_params(key, input_size, hidden_size, num_layers, num_classes):
    params = {"lstm": []}
    k = 1.0 / math.sqrt(hidden_size)
    in_dim = input_size
    for _ in range(num_layers):
        key, k1, k2, k3, k4 = jax.random.split(key, 5)
        w_ih = jax.random.uniform(k1, (4 * hidden_size, in_dim), jnp.float32, -k, k)
        w_hh = jax.random.uniform(k2, (4 * hidden_size, hidden_size), jnp.float32, -k, k)
        b_ih = jax.random.uniform(k3, (4 * hidden_size,), jnp.float32, -k, k)
        b_hh = jax.random.uniform(k4, (4 * hidden_size,), jnp.float32, -k, k)
        params["lstm"].append((w_ih, w_hh, b_ih, b_hh))
        in_dim = hidden_size
    key, k5, k6 = jax.random.split(key, 3)
    kf = 1.0 / math.sqrt(hidden_size)
    params["fc_w"] = jax.random.uniform(k5, (num_classes, hidden_size), jnp.float32, -kf, kf)
    params["fc_b"] = jax.random.uniform(k6, (num_classes,), jnp.float32, -kf, kf)
    return params


if __name__ == "__main__":
    B, T = 2, 8
    input_size, hidden_size, num_layers = 32, 32, 2
    class_names = ["a", "b", "c", "d", "e"]       # 5 classes

    key = jax.random.PRNGKey(0)
    key, kx = jax.random.split(key)
    x = jax.random.normal(kx, (B, T, input_size), jnp.float32)

    params = init_params(key, input_size, hidden_size, num_layers, len(class_names))
    prepped = prepare_params(params)              # one-time weight prep

    out = lstm_model_forward(x, prepped)
    out = jax.block_until_ready(out)

    ref = reference_forward(x, params)
    assert out.shape == (B, len(class_names)), out.shape
    # bf16 matmul operands (f32 accumulation/state) vs the f32 reference.
    assert jnp.allclose(out, ref, atol=2e-2, rtol=2e-2), (out, ref)

    print("KERNEL_OK")
</pallas_src>

<mosaic_0001>
module attributes {stable_mosaic.version = 11 : i64} {
  func.func @kernel(%arg0: i32, %arg1: memref<1x128x128xbf16, #tpu.memory_space<vmem>>, %arg2: memref<128x512xbf16, #tpu.memory_space<vmem>>, %arg3: memref<128x512xbf16, #tpu.memory_space<vmem>>, %arg4: memref<1x512xf32, #tpu.memory_space<vmem>>, %arg5: memref<128x512xbf16, #tpu.memory_space<vmem>>, %arg6: memref<128x512xbf16, #tpu.memory_space<vmem>>, %arg7: memref<1x512xf32, #tpu.memory_space<vmem>>, %arg8: memref<128x128xbf16, #tpu.memory_space<vmem>>, %arg9: memref<1x128xf32, #tpu.memory_space<vmem>>, %arg10: memref<1x16x128xf32, #tpu.memory_space<vmem>>, %arg11: memref<128x512xf32, #tpu.memory_space<vmem>>, %arg12: memref<128x128xbf16, #tpu.memory_space<vmem>>) attributes {dimension_semantics = [#tpu.dimension_semantics<parallel>], iteration_bounds = array<i64: 1>, scalar_prefetch = 0 : i64, scratch_operands = 2 : i64, tpu.core_type = #tpu.core_type<tc>, window_params = [{transform_indices = @transform_0, window_bounds = array<i64: 1, 128, 128>}, {pipeline_mode = #tpu.pipeline_mode<synchronous>, transform_indices = @transform_1, window_bounds = array<i64: 128, 512>}, {pipeline_mode = #tpu.pipeline_mode<synchronous>, transform_indices = @transform_2, window_bounds = array<i64: 128, 512>}, {pipeline_mode = #tpu.pipeline_mode<synchronous>, transform_indices = @transform_3, window_bounds = array<i64: 1, 512>}, {pipeline_mode = #tpu.pipeline_mode<synchronous>, transform_indices = @transform_4, window_bounds = array<i64: 128, 512>}, {pipeline_mode = #tpu.pipeline_mode<synchronous>, transform_indices = @transform_5, window_bounds = array<i64: 128, 512>}, {pipeline_mode = #tpu.pipeline_mode<synchronous>, transform_indices = @transform_6, window_bounds = array<i64: 1, 512>}, {pipeline_mode = #tpu.pipeline_mode<synchronous>, transform_indices = @transform_7, window_bounds = array<i64: 128, 128>}, {pipeline_mode = #tpu.pipeline_mode<synchronous>, transform_indices = @transform_8, window_bounds = array<i64: 1, 128>}, {transform_indices = @transform_9, window_bounds = array<i64: 1, 16, 128>}]} {
    %c0 = arith.constant 0 : index
    %c0_0 = arith.constant 0 : index
    %c0_1 = arith.constant 0 : index
    %0 = vector.load %arg1[%c0, %c0_0, %c0_1] : memref<1x128x128xbf16, #tpu.memory_space<vmem>>, vector<1x128x128xbf16>
    %1 = vector.shape_cast %0 : vector<1x128x128xbf16> to vector<128x128xbf16>
    %c0_2 = arith.constant 0 : index
    %c0_3 = arith.constant 0 : index
    %2 = vector.load %arg2[%c0_2, %c0_3] : memref<128x512xbf16, #tpu.memory_space<vmem>>, vector<128x512xbf16>
    %cst = arith.constant dense<0.000000e+00> : vector<128x512xf32>
    %3 = tpu.matmul %1, %2, %cst {dimension_numbers = #tpu.dot_dimension_numbers<[1], [0], [0], [1], [0, 0, 1, 1], [], []>} : vector<128x128xbf16>, vector<128x512xbf16>, vector<128x512xf32> -> vector<128x512xf32>
    %c0_4 = arith.constant 0 : index
    %c0_5 = arith.constant 0 : index
    %4 = vector.load %arg4[%c0_4, %c0_5] : memref<1x512xf32, #tpu.memory_space<vmem>>, vector<1x512xf32>
    %5 = vector.broadcast %4 : vector<1x512xf32> to vector<128x512xf32>
    %6 = arith.addf %3, %5 : vector<128x512xf32>
    %c0_6 = arith.constant 0 : index
    %c0_7 = arith.constant 0 : index
    %7 = vector.load %arg11[%c0_6, %c0_7] : memref<128x512xf32, #tpu.memory_space<vmem>>, vector<128x512xf32>
    tpu.vector_store %arg11[%c0_6, %c0_7], %6 {strides = array<i32>} : memref<128x512xf32, #tpu.memory_space<vmem>>, vector<128x512xf32>,
    %c0_8 = arith.constant 0 : index
    %c0_9 = arith.constant 0 : index
    %8 = vector.load %arg3[%c0_8, %c0_9] : memref<128x512xbf16, #tpu.memory_space<vmem>>, vector<128x512xbf16>
    %cst_10 = arith.constant 0.000000e+00 : bf16
    %9 = vector.broadcast %cst_10 : bf16 to vector<16x128xbf16>
    %cst_11 = arith.constant 0.000000e+00 : f32
    %10 = vector.broadcast %cst_11 : f32 to vector<16x128xf32>
    %c0_i32 = arith.constant 0 : i32
    %c16_i32 = arith.constant 16 : i32
    %11 = arith.muli %c0_i32, %c16_i32 : i32
    %12 = tpu.assume_multiple %11, 16 : i32
    %13 = arith.index_cast %12 : i32 to index
    %c0_12 = arith.constant 0 : index
    %14 = vector.load %arg11[%13, %c0_12] : memref<128x512xf32, #tpu.memory_space<vmem>>, vector<16x512xf32>
    %cst_13 = arith.constant dense<0.000000e+00> : vector<16x512xf32>
    %15 = tpu.matmul %9, %8, %cst_13 {dimension_numbers = #tpu.dot_dimension_numbers<[1], [0], [0], [1], [0, 0, 1, 1], [], []>} : vector<16x128xbf16>, vector<128x512xbf16>, vector<16x512xf32> -> vector<16x512xf32>
    %16 = arith.addf %14, %15 : vector<16x512xf32>
    %17 = vector.extract_strided_slice %16 {offsets = [0, 0], sizes = [16, 128], strides = [1, 1]} : vector<16x512xf32> to vector<16x128xf32>
    %18 = arith.negf %17 : vector<16x128xf32>
    %19 = math.exp %18 : vector<16x128xf32>
    %cst_14 = arith.constant 1.000000e+00 : f32
    %20 = vector.broadcast %cst_14 : f32 to vector<16x128xf32>
    %21 = arith.addf %20, %19 : vector<16x128xf32>
    %22 = arith.divf %20, %21 : vector<16x128xf32>
    %23 = vector.extract_strided_slice %16 {offsets = [0, 128], sizes = [16, 128], strides = [1, 1]} : vector<16x512xf32> to vector<16x128xf32>
    %24 = arith.negf %23 : vector<16x128xf32>
    %25 = math.exp %24 : vector<16x128xf32>
    %cst_15 = arith.constant 1.000000e+00 : f32
    %26 = vector.broadcast %cst_15 : f32 to vector<16x128xf32>
    %27 = arith.addf %26, %25 : vector<16x128xf32>
    %28 = arith.divf %26, %27 : vector<16x128xf32>
    %29 = vector.extract_strided_slice %16 {offsets = [0, 256], sizes = [16, 128], strides = [1, 1]} : vector<16x512xf32> to vector<16x128xf32>
    %30 = math.tanh %29 : vector<16x128xf32>
    %31 = vector.extract_strided_slice %16 {offsets = [0, 384], sizes = [16, 128], strides = [1, 1]} : vector<16x512xf32> to vector<16x128xf32>
    %32 = arith.negf %31 : vector<16x128xf32>
    %33 = math.exp %32 : vector<16x128xf32>
    %cst_16 = arith.constant 1.000000e+00 : f32
    %34 = vector.broadcast %cst_16 : f32 to vector<16x128xf32>
    %35 = arith.addf %34, %33 : vector<16x128xf32>
    %36 = arith.divf %34, %35 : vector<16x128xf32>
    %37 = arith.mulf %28, %10 : vector<16x128xf32>
    %38 = arith.mulf %22, %30 : vector<16x128xf32>
    %39 = arith.addf %37, %38 : vector<16x128xf32>
    %40 = math.tanh %39 : vector<16x128xf32>
    %41 = arith.mulf %36, %40 : vector<16x128xf32>
    %42 = arith.truncf %41 : vector<16x128xf32> to vector<16x128xbf16>
    %cst_17 = arith.constant 0.000000e+00 : bf16
    %43 = vector.broadcast %cst_17 : bf16 to vector<16x128xbf16>
    %44 = arith.maximumf %42, %43 : vector<16x128xbf16>
    %45 = arith.index_cast %12 : i32 to index
    %c0_18 = arith.constant 0 : index
    %46 = vector.load %arg12[%45, %c0_18] : memref<128x128xbf16, #tpu.memory_space<vmem>>, vector<16x128xbf16>
    tpu.vector_store %arg12[%45, %c0_18], %44 {strides = array<i32>} : memref<128x128xbf16, #tpu.memory_space<vmem>>, vector<16x128xbf16>,
    %c1_i32 = arith.constant 1 : i32
    %c16_i32_19 = arith.constant 16 : i32
    %47 = arith.muli %c1_i32, %c16_i32_19 : i32
    %48 = tpu.assume_multiple %47, 16 : i32
    %49 = arith.index_cast %48 : i32 to index
    %c0_20 = arith.constant 0 : index
    %50 = vector.load %arg11[%49, %c0_20] : memref<128x512xf32, #tpu.memory_space<vmem>>, vector<16x512xf32>
    %cst_21 = arith.constant dense<0.000000e+00> : vector<16x512xf32>
    %51 = tpu.matmul %42, %8, %cst_21 {dimension_numbers = #tpu.dot_dimension_numbers<[1], [0], [0], [1], [0, 0, 1, 1], [], []>} : vector<16x128xbf16>, vector<128x512xbf16>, vector<16x512xf32> -> vector<16x512xf32>
    %52 = arith.addf %50, %51 : vector<16x512xf32>
    %53 = vector.extract_strided_slice %52 {offsets = [0, 0], sizes = [16, 128], strides = [1, 1]} : vector<16x512xf32> to vector<16x128xf32>
    %54 = arith.negf %53 : vector<16x128xf32>
    %55 = math.exp %54 : vector<16x128xf32>
    %cst_22 = arith.constant 1.000000e+00 : f32
    %56 = vector.broadcast %cst_22 : f32 to vector<16x128xf32>
    %57 = arith.addf %56, %55 : vector<16x128xf32>
    %58 = arith.divf %56, %57 : vector<16x128xf32>
    %59 = vector.extract_strided_slice %52 {offsets = [0, 128], sizes = [16, 128], strides = [1, 1]} : vector<16x512xf32> to vector<16x128xf32>
    %60 = arith.negf %59 : vector<16x128xf32>
    %61 = math.exp %60 : vector<16x128xf32>
    %cst_23 = arith.constant 1.000000e+00 : f32
    %62 = vector.broadcast %cst_23 : f32 to vector<16x128xf32>
    %63 = arith.addf %62, %61 : vector<16x128xf32>
    %64 = arith.divf %62, %63 : vector<16x128xf32>
    %65 = vector.extract_strided_slice %52 {offsets = [0, 256], sizes = [16, 128], strides = [1, 1]} : vector<16x512xf32> to vector<16x128xf32>
    %66 = math.tanh %65 : vector<16x128xf32>
    %67 = vector.extract_strided_slice %52 {offsets = [0, 384], sizes = [16, 128], strides = [1, 1]} : vector<16x512xf32> to vector<16x128xf32>
    %68 = arith.negf %67 : vector<16x128xf32>
    %69 = math.exp %68 : vector<16x128xf32>
    %cst_24 = arith.constant 1.000000e+00 : f32
    %70 = vector.broadcast %cst_24 : f32 to vector<16x128xf32>
    %71 = arith.addf %70, %69 : vector<16x128xf32>
    %72 = arith.divf %70, %71 : vector<16x128xf32>
    %73 = arith.mulf %64, %39 : vector<16x128xf32>
    %74 = arith.mulf %58, %66 : vector<16x128xf32>
    %75 = arith.addf %73, %74 : vector<16x128xf32>
    %76 = math.tanh %75 : vector<16x128xf32>
    %77 = arith.mulf %72, %76 : vector<16x128xf32>
    %78 = arith.truncf %77 : vector<16x128xf32> to vector<16x128xbf16>
    %cst_25 = arith.constant 0.000000e+00 : bf16
    %79 = vector.broadcast %cst_25 : bf16 to vector<16x128xbf16>
    %80 = arith.maximumf %78, %79 : vector<16x128xbf16>
    %81 = arith.index_cast %48 : i32 to index
    %c0_26 = arith.constant 0 : index
    %82 = vector.load %arg12[%81, %c0_26] : memref<128x128xbf16, #tpu.memory_space<vmem>>, vector<16x128xbf16>
    tpu.vector_store %arg12[%81, %c0_26], %80 {strides = array<i32>} : memref<128x128xbf16, #tpu.memory_space<vmem>>, vector<16x128xbf16>,
    %c2_i32 = arith.constant 2 : i32
    %c16_i32_27 = arith.constant 16 : i32
    %83 = arith.muli %c2_i32, %c16_i32_27 : i32
    %84 = tpu.assume_multiple %83, 16 : i32
    %85 = arith.index_cast %84 : i32 to index
    %c0_28 = arith.constant 0 : index
    %86 = vector.load %arg11[%85, %c0_28] : memref<128x512xf32, #tpu.memory_space<vmem>>, vector<16x512xf32>
    %cst_29 = arith.constant dense<0.000000e+00> : vector<16x512xf32>
    %87 = tpu.matmul %78, %8, %cst_29 {dimension_numbers = #tpu.dot_dimension_numbers<[1], [0], [0], [1], [0, 0, 1, 1], [], []>} : vector<16x128xbf16>, vector<128x512xbf16>, vector<16x512xf32> -> vector<16x512xf32>
    %88 = arith.addf %86, %87 : vector<16x512xf32>
    %89 = vector.extract_strided_slice %88 {offsets = [0, 0], sizes = [16, 128], strides = [1, 1]} : vector<16x512xf32> to vector<16x128xf32>
    %90 = arith.negf %89 : vector<16x128xf32>
    %91 = math.exp %90 : vector<16x128xf32>
    %cst_30 = arith.constant 1.000000e+00 : f32
    %92 = vector.broadcast %cst_30 : f32 to vector<16x128xf32>
    %93 = arith.addf %92, %91 : vector<16x128xf32>
    %94 = arith.divf %92, %93 : vector<16x128xf32>
    %95 = vector.extract_strided_slice %88 {offsets = [0, 128], sizes = [16, 128], strides = [1, 1]} : vector<16x512xf32> to vector<16x128xf32>
    %96 = arith.negf %95 : vector<16x128xf32>
    %97 = math.exp %96 : vector<16x128xf32>
    %cst_31 = arith.constant 1.000000e+00 : f32
    %98 = vector.broadcast %cst_31 : f32 to vector<16x128xf32>
    %99 = arith.addf %98, %97 : vector<16x128xf32>
    %100 = arith.divf %98, %99 : vector<16x128xf32>
    %101 = vector.extract_strided_slice %88 {offsets = [0, 256], sizes = [16, 128], strides = [1, 1]} : vector<16x512xf32> to vector<16x128xf32>
    %102 = math.tanh %101 : vector<16x128xf32>
    %103 = vector.extract_strided_slice %88 {offsets = [0, 384], sizes = [16, 128], strides = [1, 1]} : vector<16x512xf32> to vector<16x128xf32>
    %104 = arith.negf %103 : vector<16x128xf32>
    %105 = math.exp %104 : vector<16x128xf32>
    %cst_32 = arith.constant 1.000000e+00 : f32
    %106 = vector.broadcast %cst_32 : f32 to vector<16x128xf32>
    %107 = arith.addf %106, %105 : vector<16x128xf32>
    %108 = arith.divf %106, %107 : vector<16x128xf32>
    %109 = arith.mulf %100, %75 : vector<16x128xf32>
    %110 = arith.mulf %94, %102 : vector<16x128xf32>
    %111 = arith.addf %109, %110 : vector<16x128xf32>
    %112 = math.tanh %111 : vector<16x128xf32>
    %113 = arith.mulf %108, %112 : vector<16x128xf32>
    %114 = arith.truncf %113 : vector<16x128xf32> to vector<16x128xbf16>
    %cst_33 = arith.constant 0.000000e+00 : bf16
    %115 = vector.broadcast %cst_33 : bf16 to vector<16x128xbf16>
    %116 = arith.maximumf %114, %115 : vector<16x128xbf16>
    %117 = arith.index_cast %84 : i32 to index
    %c0_34 = arith.constant 0 : index
    %118 = vector.load %arg12[%117, %c0_34] : memref<128x128xbf16, #tpu.memory_space<vmem>>, vector<16x128xbf16>
    tpu.vector_store %arg12[%117, %c0_34], %116 {strides = array<i32>} : memref<128x128xbf16, #tpu.memory_space<vmem>>, vector<16x128xbf16>,
    %c3_i32 = arith.constant 3 : i32
    %c16_i32_35 = arith.constant 16 : i32
    %119 = arith.muli %c3_i32, %c16_i32_35 : i32
    %120 = tpu.assume_multiple %119, 16 : i32
    %121 = arith.index_cast %120 : i32 to index
    %c0_36 = arith.constant 0 : index
    %122 = vector.load %arg11[%121, %c0_36] : memref<128x512xf32, #tpu.memory_space<vmem>>, vector<16x512xf32>
    %cst_37 = arith.constant dense<0.000000e+00> : vector<16x512xf32>
    %123 = tpu.matmul %114, %8, %cst_37 {dimension_numbers = #tpu.dot_dimension_numbers<[1], [0], [0], [1], [0, 0, 1, 1], [], []>} : vector<16x128xbf16>, vector<128x512xbf16>, vector<16x512xf32> -> vector<16x512xf32>
    %124 = arith.addf %122, %123 : vector<16x512xf32>
    %125 = vector.extract_strided_slice %124 {offsets = [0, 0], sizes = [16, 128], strides = [1, 1]} : vector<16x512xf32> to vector<16x128xf32>
    %126 = arith.negf %125 : vector<16x128xf32>
    %127 = math.exp %126 : vector<16x128xf32>
    %cst_38 = arith.constant 1.000000e+00 : f32
    %128 = vector.broadcast %cst_38 : f32 to vector<16x128xf32>
    %129 = arith.addf %128, %127 : vector<16x128xf32>
    %130 = arith.divf %128, %129 : vector<16x128xf32>
    %131 = vector.extract_strided_slice %124 {offsets = [0, 128], sizes = [16, 128], strides = [1, 1]} : vector<16x512xf32> to vector<16x128xf32>
    %132 = arith.negf %131 : vector<16x128xf32>
    %133 = math.exp %132 : vector<16x128xf32>
    %cst_39 = arith.constant 1.000000e+00 : f32
    %134 = vector.broadcast %cst_39 : f32 to vector<16x128xf32>
    %135 = arith.addf %134, %133 : vector<16x128xf32>
    %136 = arith.divf %134, %135 : vector<16x128xf32>
    %137 = vector.extract_strided_slice %124 {offsets = [0, 256], sizes = [16, 128], strides = [1, 1]} : vector<16x512xf32> to vector<16x128xf32>
    %138 = math.tanh %137 : vector<16x128xf32>
    %139 = vector.extract_strided_slice %124 {offsets = [0, 384], sizes = [16, 128], strides = [1, 1]} : vector<16x512xf32> to vector<16x128xf32>
    %140 = arith.negf %139 : vector<16x128xf32>
    %141 = math.exp %140 : vector<16x128xf32>
    %cst_40 = arith.constant 1.000000e+00 : f32
    %142 = vector.broadcast %cst_40 : f32 to vector<16x128xf32>
    %143 = arith.addf %142, %141 : vector<16x128xf32>
    %144 = arith.divf %142, %143 : vector<16x128xf32>
    %145 = arith.mulf %136, %111 : vector<16x128xf32>
    %146 = arith.mulf %130, %138 : vector<16x128xf32>
    %147 = arith.addf %145, %146 : vector<16x128xf32>
    %148 = math.tanh %147 : vector<16x128xf32>
    %149 = arith.mulf %144, %148 : vector<16x128xf32>
    %150 = arith.truncf %149 : vector<16x128xf32> to vector<16x128xbf16>
    %cst_41 = arith.constant 0.000000e+00 : bf16
    %151 = vector.broadcast %cst_41 : bf16 to vector<16x128xbf16>
    %152 = arith.maximumf %150, %151 : vector<16x128xbf16>
    %153 = arith.index_cast %120 : i32 to index
    %c0_42 = arith.constant 0 : index
    %154 = vector.load %arg12[%153, %c0_42] : memref<128x128xbf16, #tpu.memory_space<vmem>>, vector<16x128xbf16>
    tpu.vector_store %arg12[%153, %c0_42], %152 {strides = array<i32>} : memref<128x128xbf16, #tpu.memory_space<vmem>>, vector<16x128xbf16>,
    %c4_i32 = arith.constant 4 : i32
    %c16_i32_43 = arith.constant 16 : i32
    %155 = arith.muli %c4_i32, %c16_i32_43 : i32
    %156 = tpu.assume_multiple %155, 16 : i32
    %157 = arith.index_cast %156 : i32 to index
    %c0_44 = arith.constant 0 : index
    %158 = vector.load %arg11[%157, %c0_44] : memref<128x512xf32, #tpu.memory_space<vmem>>, vector<16x512xf32>
    %cst_45 = arith.constant dense<0.000000e+00> : vector<16x512xf32>
    %159 = tpu.matmul %150, %8, %cst_45 {dimension_numbers = #tpu.dot_dimension_numbers<[1], [0], [0], [1], [0, 0, 1, 1], [], []>} : vector<16x128xbf16>, vector<128x512xbf16>, vector<16x512xf32> -> vector<16x512xf32>
    %160 = arith.addf %158, %159 : vector<16x512xf32>
    %161 = vector.extract_strided_slice %160 {offsets = [0, 0], sizes = [16, 128], strides = [1, 1]} : vector<16x512xf32> to vector<16x128xf32>
    %162 = arith.negf %161 : vector<16x128xf32>
    %163 = math.exp %162 : vector<16x128xf32>
    %cst_46 = arith.constant 1.000000e+00 : f32
    %164 = vector.broadcast %cst_46 : f32 to vector<16x128xf32>
    %165 = arith.addf %164, %163 : vector<16x128xf32>
    %166 = arith.divf %164, %165 : vector<16x128xf32>
    %167 = vector.extract_strided_slice %160 {offsets = [0, 128], sizes = [16, 128], strides = [1, 1]} : vector<16x512xf32> to vector<16x128xf32>
    %168 = arith.negf %167 : vector<16x128xf32>
    %169 = math.exp %168 : vector<16x128xf32>
    %cst_47 = arith.constant 1.000000e+00 : f32
    %170 = vector.broadcast %cst_47 : f32 to vector<16x128xf32>
    %171 = arith.addf %170, %169 : vector<16x128xf32>
    %172 = arith.divf %170, %171 : vector<16x128xf32>
    %173 = vector.extract_strided_slice %160 {offsets = [0, 256], sizes = [16, 128], strides = [1, 1]} : vector<16x512xf32> to vector<16x128xf32>
    %174 = math.tanh %173 : vector<16x128xf32>
    %175 = vector.extract_strided_slice %160 {offsets = [0, 384], sizes = [16, 128], strides = [1, 1]} : vector<16x512xf32> to vector<16x128xf32>
    %176 = arith.negf %175 : vector<16x128xf32>
    %177 = math.exp %176 : vector<16x128xf32>
    %cst_48 = arith.constant 1.000000e+00 : f32
    %178 = vector.broadcast %cst_48 : f32 to vector<16x128xf32>
    %179 = arith.addf %178, %177 : vector<16x128xf32>
    %180 = arith.divf %178, %179 : vector<16x128xf32>
    %181 = arith.mulf %172, %147 : vector<16x128xf32>
    %182 = arith.mulf %166, %174 : vector<16x128xf32>
    %183 = arith.addf %181, %182 : vector<16x128xf32>
    %184 = math.tanh %183 : vector<16x128xf32>
    %185 = arith.mulf %180, %184 : vector<16x128xf32>
    %186 = arith.truncf %185 : vector<16x128xf32> to vector<16x128xbf16>
    %cst_49 = arith.constant 0.000000e+00 : bf16
    %187 = vector.broadcast %cst_49 : bf16 to vector<16x128xbf16>
    %188 = arith.maximumf %186, %187 : vector<16x128xbf16>
    %189 = arith.index_cast %156 : i32 to index
    %c0_50 = arith.constant 0 : index
    %190 = vector.load %arg12[%189, %c0_50] : memref<128x128xbf16, #tpu.memory_space<vmem>>, vector<16x128xbf16>
    tpu.vector_store %arg12[%189, %c0_50], %188 {strides = array<i32>} : memref<128x128xbf16, #tpu.memory_space<vmem>>, vector<16x128xbf16>,
    %c5_i32 = arith.constant 5 : i32
    %c16_i32_51 = arith.constant 16 : i32
    %191 = arith.muli %c5_i32, %c16_i32_51 : i32
    %192 = tpu.assume_multiple %191, 16 : i32
    %193 = arith.index_cast %192 : i32 to index
    %c0_52 = arith.constant 0 : index
    %194 = vector.load %arg11[%193, %c0_52] : memref<128x512xf32, #tpu.memory_space<vmem>>, vector<16x512xf32>
    %cst_53 = arith.constant dense<0.000000e+00> : vector<16x512xf32>
    %195 = tpu.matmul %186, %8, %cst_53 {dimension_numbers = #tpu.dot_dimension_numbers<[1], [0], [0], [1], [0, 0, 1, 1], [], []>} : vector<16x128xbf16>, vector<128x512xbf16>, vector<16x512xf32> -> vector<16x512xf32>
    %196 = arith.addf %194, %195 : vector<16x512xf32>
    %197 = vector.extract_strided_slice %196 {offsets = [0, 0], sizes = [16, 128], strides = [1, 1]} : vector<16x512xf32> to vector<16x128xf32>
    %198 = arith.negf %197 : vector<16x128xf32>
    %199 = math.exp %198 : vector<16x128xf32>
    %cst_54 = arith.constant 1.000000e+00 : f32
    %200 = vector.broadcast %cst_54 : f32 to vector<16x128xf32>
    %201 = arith.addf %200, %199 : vector<16x128xf32>
    %202 = arith.divf %200, %201 : vector<16x128xf32>
    %203 = vector.extract_strided_slice %196 {offsets = [0, 128], sizes = [16, 128], strides = [1, 1]} : vector<16x512xf32> to vector<16x128xf32>
    %204 = arith.negf %203 : vector<16x128xf32>
    %205 = math.exp %204 : vector<16x128xf32>
    %cst_55 = arith.constant 1.000000e+00 : f32
    %206 = vector.broadcast %cst_55 : f32 to vector<16x128xf32>
    %207 = arith.addf %206, %205 : vector<16x128xf32>
    %208 = arith.divf %206, %207 : vector<16x128xf32>
    %209 = vector.extract_strided_slice %196 {offsets = [0, 256], sizes = [16, 128], strides = [1, 1]} : vector<16x512xf32> to vector<16x128xf32>
    %210 = math.tanh %209 : vector<16x128xf32>
    %211 = vector.extract_strided_slice %196 {offsets = [0, 384], sizes = [16, 128], strides = [1, 1]} : vector<16x512xf32> to vector<16x128xf32>
    %212 = arith.negf %211 : vector<16x128xf32>
    %213 = math.exp %212 : vector<16x128xf32>
    %cst_56 = arith.constant 1.000000e+00 : f32
    %214 = vector.broadcast %cst_56 : f32 to vector<16x128xf32>
    %215 = arith.addf %214, %213 : vector<16x128xf32>
    %216 = arith.divf %214, %215 : vector<16x128xf32>
    %217 = arith.mulf %208, %183 : vector<16x128xf32>
    %218 = arith.mulf %202, %210 : vector<16x128xf32>
    %219 = arith.addf %217, %218 : vector<16x128xf32>
    %220 = math.tanh %219 : vector<16x128xf32>
    %221 = arith.mulf %216, %220 : vector<16x128xf32>
    %222 = arith.truncf %221 : vector<16x128xf32> to vector<16x128xbf16>
    %cst_57 = arith.constant 0.000000e+00 : bf16
    %223 = vector.broadcast %cst_57 : bf16 to vector<16x128xbf16>
    %224 = arith.maximumf %222, %223 : vector<16x128xbf16>
    %225 = arith.index_cast %192 : i32 to index
    %c0_58 = arith.constant 0 : index
    %226 = vector.load %arg12[%225, %c0_58] : memref<128x128xbf16, #tpu.memory_space<vmem>>, vector<16x128xbf16>
    tpu.vector_store %arg12[%225, %c0_58], %224 {strides = array<i32>} : memref<128x128xbf16, #tpu.memory_space<vmem>>, vector<16x128xbf16>,
    %c6_i32 = arith.constant 6 : i32
    %c16_i32_59 = arith.constant 16 : i32
    %227 = arith.muli %c6_i32, %c16_i32_59 : i32
    %228 = tpu.assume_multiple %227, 16 : i32
    %229 = arith.index_cast %228 : i32 to index
    %c0_60 = arith.constant 0 : index
    %230 = vector.load %arg11[%229, %c0_60] : memref<128x512xf32, #tpu.memory_space<vmem>>, vector<16x512xf32>
    %cst_61 = arith.constant dense<0.000000e+00> : vector<16x512xf32>
    %231 = tpu.matmul %222, %8, %cst_61 {dimension_numbers = #tpu.dot_dimension_numbers<[1], [0], [0], [1], [0, 0, 1, 1], [], []>} : vector<16x128xbf16>, vector<128x512xbf16>, vector<16x512xf32> -> vector<16x512xf32>
    %232 = arith.addf %230, %231 : vector<16x512xf32>
    %233 = vector.extract_strided_slice %232 {offsets = [0, 0], sizes = [16, 128], strides = [1, 1]} : vector<16x512xf32> to vector<16x128xf32>
    %234 = arith.negf %233 : vector<16x128xf32>
    %235 = math.exp %234 : vector<16x128xf32>
    %cst_62 = arith.constant 1.000000e+00 : f32
    %236 = vector.broadcast %cst_62 : f32 to vector<16x128xf32>
    %237 = arith.addf %236, %235 : vector<16x128xf32>
    %238 = arith.divf %236, %237 : vector<16x128xf32>
    %239 = vector.extract_strided_slice %232 {offsets = [0, 128], sizes = [16, 128], strides = [1, 1]} : vector<16x512xf32> to vector<16x128xf32>
    %240 = arith.negf %239 : vector<16x128xf32>
    %241 = math.exp %240 : vector<16x128xf32>
    %cst_63 = arith.constant 1.000000e+00 : f32
    %242 = vector.broadcast %cst_63 : f32 to vector<16x128xf32>
    %243 = arith.addf %242, %241 : vector<16x128xf32>
    %244 = arith.divf %242, %243 : vector<16x128xf32>
    %245 = vector.extract_strided_slice %232 {offsets = [0, 256], sizes = [16, 128], strides = [1, 1]} : vector<16x512xf32> to vector<16x128xf32>
    %246 = math.tanh %245 : vector<16x128xf32>
    %247 = vector.extract_strided_slice %232 {offsets = [0, 384], sizes = [16, 128], strides = [1, 1]} : vector<16x512xf32> to vector<16x128xf32>
    %248 = arith.negf %247 : vector<16x128xf32>
    %249 = math.exp %248 : vector<16x128xf32>
    %cst_64 = arith.constant 1.000000e+00 : f32
    %250 = vector.broadcast %cst_64 : f32 to vector<16x128xf32>
    %251 = arith.addf %250, %249 : vector<16x128xf32>
    %252 = arith.divf %250, %251 : vector<16x128xf32>
    %253 = arith.mulf %244, %219 : vector<16x128xf32>
    %254 = arith.mulf %238, %246 : vector<16x128xf32>
    %255 = arith.addf %253, %254 : vector<16x128xf32>
    %256 = math.tanh %255 : vector<16x128xf32>
    %257 = arith.mulf %252, %256 : vector<16x128xf32>
    %258 = arith.truncf %257 : vector<16x128xf32> to vector<16x128xbf16>
    %cst_65 = arith.constant 0.000000e+00 : bf16
    %259 = vector.broadcast %cst_65 : bf16 to vector<16x128xbf16>
    %260 = arith.maximumf %258, %259 : vector<16x128xbf16>
    %261 = arith.index_cast %228 : i32 to index
    %c0_66 = arith.constant 0 : index
    %262 = vector.load %arg12[%261, %c0_66] : memref<128x128xbf16, #tpu.memory_space<vmem>>, vector<16x128xbf16>
    tpu.vector_store %arg12[%261, %c0_66], %260 {strides = array<i32>} : memref<128x128xbf16, #tpu.memory_space<vmem>>, vector<16x128xbf16>,
    %c7_i32 = arith.constant 7 : i32
    %c16_i32_67 = arith.constant 16 : i32
    %263 = arith.muli %c7_i32, %c16_i32_67 : i32
    %264 = tpu.assume_multiple %263, 16 : i32
    %265 = arith.index_cast %264 : i32 to index
    %c0_68 = arith.constant 0 : index
    %266 = vector.load %arg11[%265, %c0_68] : memref<128x512xf32, #tpu.memory_space<vmem>>, vector<16x512xf32>
    %cst_69 = arith.constant dense<0.000000e+00> : vector<16x512xf32>
    %267 = tpu.matmul %258, %8, %cst_69 {dimension_numbers = #tpu.dot_dimension_numbers<[1], [0], [0], [1], [0, 0, 1, 1], [], []>} : vector<16x128xbf16>, vector<128x512xbf16>, vector<16x512xf32> -> vector<16x512xf32>
    %268 = arith.addf %266, %267 : vector<16x512xf32>
    %269 = vector.extract_strided_slice %268 {offsets = [0, 0], sizes = [16, 128], strides = [1, 1]} : vector<16x512xf32> to vector<16x128xf32>
    %270 = arith.negf %269 : vector<16x128xf32>
    %271 = math.exp %270 : vector<16x128xf32>
    %cst_70 = arith.constant 1.000000e+00 : f32
    %272 = vector.broadcast %cst_70 : f32 to vector<16x128xf32>
    %273 = arith.addf %272, %271 : vector<16x128xf32>
    %274 = arith.divf %272, %273 : vector<16x128xf32>
    %275 = vector.extract_strided_slice %268 {offsets = [0, 128], sizes = [16, 128], strides = [1, 1]} : vector<16x512xf32> to vector<16x128xf32>
    %276 = arith.negf %275 : vector<16x128xf32>
    %277 = math.exp %276 : vector<16x128xf32>
    %cst_71 = arith.constant 1.000000e+00 : f32
    %278 = vector.broadcast %cst_71 : f32 to vector<16x128xf32>
    %279 = arith.addf %278, %277 : vector<16x128xf32>
    %280 = arith.divf %278, %279 : vector<16x128xf32>
    %281 = vector.extract_strided_slice %268 {offsets = [0, 256], sizes = [16, 128], strides = [1, 1]} : vector<16x512xf32> to vector<16x128xf32>
    %282 = math.tanh %281 : vector<16x128xf32>
    %283 = vector.extract_strided_slice %268 {offsets = [0, 384], sizes = [16, 128], strides = [1, 1]} : vector<16x512xf32> to vector<16x128xf32>
    %284 = arith.negf %283 : vector<16x128xf32>
    %285 = math.exp %284 : vector<16x128xf32>
    %cst_72 = arith.constant 1.000000e+00 : f32
    %286 = vector.broadcast %cst_72 : f32 to vector<16x128xf32>
    %287 = arith.addf %286, %285 : vector<16x128xf32>
    %288 = arith.divf %286, %287 : vector<16x128xf32>
    %289 = arith.mulf %280, %255 : vector<16x128xf32>
    %290 = arith.mulf %274, %282 : vector<16x128xf32>
    %291 = arith.addf %289, %290 : vector<16x128xf32>
    %292 = math.tanh %291 : vector<16x128xf32>
    %293 = arith.mulf %288, %292 : vector<16x128xf32>
    %294 = arith.truncf %293 : vector<16x128xf32> to vector<16x128xbf16>
    %cst_73 = arith.constant 0.000000e+00 : bf16
    %295 = vector.broadcast %cst_73 : bf16 to vector<16x128xbf16>
    %296 = arith.maximumf %294, %295 : vector<16x128xbf16>
    %297 = arith.index_cast %264 : i32 to index
    %c0_74 = arith.constant 0 : index
    %298 = vector.load %arg12[%297, %c0_74] : memref<128x128xbf16, #tpu.memory_space<vmem>>, vector<16x128xbf16>
    tpu.vector_store %arg12[%297, %c0_74], %296 {strides = array<i32>} : memref<128x128xbf16, #tpu.memory_space<vmem>>, vector<16x128xbf16>,
    %c8_i32 = arith.constant 8 : i32
    %c0_75 = arith.constant 0 : index
    %c0_76 = arith.constant 0 : index
    %299 = vector.load %arg12[%c0_75, %c0_76] : memref<128x128xbf16, #tpu.memory_space<vmem>>, vector<128x128xbf16>
    %c0_77 = arith.constant 0 : index
    %c0_78 = arith.constant 0 : index
    %300 = vector.load %arg5[%c0_77, %c0_78] : memref<128x512xbf16, #tpu.memory_space<vmem>>, vector<128x512xbf16>
    %cst_79 = arith.constant dense<0.000000e+00> : vector<128x512xf32>
    %301 = tpu.matmul %299, %300, %cst_79 {dimension_numbers = #tpu.dot_dimension_numbers<[1], [0], [0], [1], [0, 0, 1, 1], [], []>} : vector<128x128xbf16>, vector<128x512xbf16>, vector<128x512xf32> -> vector<128x512xf32>
    %c0_80 = arith.constant 0 : index
    %c0_81 = arith.constant 0 : index
    %302 = vector.load %arg7[%c0_80, %c0_81] : memref<1x512xf32, #tpu.memory_space<vmem>>, vector<1x512xf32>
    %303 = vector.broadcast %302 : vector<1x512xf32> to vector<128x512xf32>
    %304 = arith.addf %301, %303 : vector<128x512xf32>
    %c0_82 = arith.constant 0 : index
    %c0_83 = arith.constant 0 : index
    %305 = vector.load %arg11[%c0_82, %c0_83] : memref<128x512xf32, #tpu.memory_space<vmem>>, vector<128x512xf32>
    tpu.vector_store %arg11[%c0_82, %c0_83], %304 {strides = array<i32>} : memref<128x512xf32, #tpu.memory_space<vmem>>, vector<128x512xf32>,
    %c0_84 = arith.constant 0 : index
    %c0_85 = arith.constant 0 : index
    %306 = vector.load %arg6[%c0_84, %c0_85] : memref<128x512xbf16, #tpu.memory_space<vmem>>, vector<128x512xbf16>
    %cst_86 = arith.constant 0.000000e+00 : bf16
    %307 = vector.broadcast %cst_86 : bf16 to vector<16x128xbf16>
    %cst_87 = arith.constant 0.000000e+00 : f32
    %308 = vector.broadcast %cst_87 : f32 to vector<16x128xf32>
    %c0_i32_88 = arith.constant 0 : i32
    %c16_i32_89 = arith.constant 16 : i32
    %309 = arith.muli %c0_i32_88, %c16_i32_89 : i32
    %310 = tpu.assume_multiple %309, 16 : i32
    %311 = arith.index_cast %310 : i32 to index
    %c0_90 = arith.constant 0 : index
    %312 = vector.load %arg11[%311, %c0_90] : memref<128x512xf32, #tpu.memory_space<vmem>>, vector<16x512xf32>
    %cst_91 = arith.constant dense<0.000000e+00> : vector<16x512xf32>
    %313 = tpu.matmul %307, %306, %cst_91 {dimension_numbers = #tpu.dot_dimension_numbers<[1], [0], [0], [1], [0, 0, 1, 1], [], []>} : vector<16x128xbf16>, vector<128x512xbf16>, vector<16x512xf32> -> vector<16x512xf32>
    %314 = arith.addf %312, %313 : vector<16x512xf32>
    %315 = vector.extract_strided_slice %314 {offsets = [0, 0], sizes = [16, 128], strides = [1, 1]} : vector<16x512xf32> to vector<16x128xf32>
    %316 = arith.negf %315 : vector<16x128xf32>
    %317 = math.exp %316 : vector<16x128xf32>
    %cst_92 = arith.constant 1.000000e+00 : f32
    %318 = vector.broadcast %cst_92 : f32 to vector<16x128xf32>
    %319 = arith.addf %318, %317 : vector<16x128xf32>
    %320 = arith.divf %318, %319 : vector<16x128xf32>
    %321 = vector.extract_strided_slice %314 {offsets = [0, 128], sizes = [16, 128], strides = [1, 1]} : vector<16x512xf32> to vector<16x128xf32>
    %322 = arith.negf %321 : vector<16x128xf32>
    %323 = math.exp %322 : vector<16x128xf32>
    %cst_93 = arith.constant 1.000000e+00 : f32
    %324 = vector.broadcast %cst_93 : f32 to vector<16x128xf32>
    %325 = arith.addf %324, %323 : vector<16x128xf32>
    %326 = arith.divf %324, %325 : vector<16x128xf32>
    %327 = vector.extract_strided_slice %314 {offsets = [0, 256], sizes = [16, 128], strides = [1, 1]} : vector<16x512xf32> to vector<16x128xf32>
    %328 = math.tanh %327 : vector<16x128xf32>
    %329 = vector.extract_strided_slice %314 {offsets = [0, 384], sizes = [16, 128], strides = [1, 1]} : vector<16x512xf32> to vector<16x128xf32>
    %330 = arith.negf %329 : vector<16x128xf32>
    %331 = math.exp %330 : vector<16x128xf32>
    %cst_94 = arith.constant 1.000000e+00 : f32
    %332 = vector.broadcast %cst_94 : f32 to vector<16x128xf32>
    %333 = arith.addf %332, %331 : vector<16x128xf32>
    %334 = arith.divf %332, %333 : vector<16x128xf32>
    %335 = arith.mulf %326, %308 : vector<16x128xf32>
    %336 = arith.mulf %320, %328 : vector<16x128xf32>
    %337 = arith.addf %335, %336 : vector<16x128xf32>
    %338 = math.tanh %337 : vector<16x128xf32>
    %339 = arith.mulf %334, %338 : vector<16x128xf32>
    %340 = arith.truncf %339 : vector<16x128xf32> to vector<16x128xbf16>
    %c1_i32_95 = arith.constant 1 : i32
    %c16_i32_96 = arith.constant 16 : i32
    %341 = arith.muli %c1_i32_95, %c16_i32_96 : i32
    %342 = tpu.assume_multiple %341, 16 : i32
    %343 = arith.index_cast %342 : i32 to index
    %c0_97 = arith.constant 0 : index
    %344 = vector.load %arg11[%343, %c0_97] : memref<128x512xf32, #tpu.memory_space<vmem>>, vector<16x512xf32>
    %cst_98 = arith.constant dense<0.000000e+00> : vector<16x512xf32>
    %345 = tpu.matmul %340, %306, %cst_98 {dimension_numbers = #tpu.dot_dimension_numbers<[1], [0], [0], [1], [0, 0, 1, 1], [], []>} : vector<16x128xbf16>, vector<128x512xbf16>, vector<16x512xf32> -> vector<16x512xf32>
    %346 = arith.addf %344, %345 : vector<16x512xf32>
    %347 = vector.extract_strided_slice %346 {offsets = [0, 0], sizes = [16, 128], strides = [1, 1]} : vector<16x512xf32> to vector<16x128xf32>
    %348 = arith.negf %347 : vector<16x128xf32>
    %349 = math.exp %348 : vector<16x128xf32>
    %cst_99 = arith.constant 1.000000e+00 : f32
    %350 = vector.broadcast %cst_99 : f32 to vector<16x128xf32>
    %351 = arith.addf %350, %349 : vector<16x128xf32>
    %352 = arith.divf %350, %351 : vector<16x128xf32>
    %353 = vector.extract_strided_slice %346 {offsets = [0, 128], sizes = [16, 128], strides = [1, 1]} : vector<16x512xf32> to vector<16x128xf32>
    %354 = arith.negf %353 : vector<16x128xf32>
    %355 = math.exp %354 : vector<16x128xf32>
    %cst_100 = arith.constant 1.000000e+00 : f32
    %356 = vector.broadcast %cst_100 : f32 to vector<16x128xf32>
    %357 = arith.addf %356, %355 : vector<16x128xf32>
    %358 = arith.divf %356, %357 : vector<16x128xf32>
    %359 = vector.extract_strided_slice %346 {offsets = [0, 256], sizes = [16, 128], strides = [1, 1]} : vector<16x512xf32> to vector<16x128xf32>
    %360 = math.tanh %359 : vector<16x128xf32>
    %361 = vector.extract_strided_slice %346 {offsets = [0, 384], sizes = [16, 128], strides = [1, 1]} : vector<16x512xf32> to vector<16x128xf32>
    %362 = arith.negf %361 : vector<16x128xf32>
    %363 = math.exp %362 : vector<16x128xf32>
    %cst_101 = arith.constant 1.000000e+00 : f32
    %364 = vector.broadcast %cst_101 : f32 to vector<16x128xf32>
    %365 = arith.addf %364, %363 : vector<16x128xf32>
    %366 = arith.divf %364, %365 : vector<16x128xf32>
    %367 = arith.mulf %358, %337 : vector<16x128xf32>
    %368 = arith.mulf %352, %360 : vector<16x128xf32>
    %369 = arith.addf %367, %368 : vector<16x128xf32>
    %370 = math.tanh %369 : vector<16x128xf32>
    %371 = arith.mulf %366, %370 : vector<16x128xf32>
    %372 = arith.truncf %371 : vector<16x128xf32> to vector<16x128xbf16>
    %c2_i32_102 = arith.constant 2 : i32
    %c16_i32_103 = arith.constant 16 : i32
    %373 = arith.muli %c2_i32_102, %c16_i32_103 : i32
    %374 = tpu.assume_multiple %373, 16 : i32
    %375 = arith.index_cast %374 : i32 to index
    %c0_104 = arith.constant 0 : index
    %376 = vector.load %arg11[%375, %c0_104] : memref<128x512xf32, #tpu.memory_space<vmem>>, vector<16x512xf32>
    %cst_105 = arith.constant dense<0.000000e+00> : vector<16x512xf32>
    %377 = tpu.matmul %372, %306, %cst_105 {dimension_numbers = #tpu.dot_dimension_numbers<[1], [0], [0], [1], [0, 0, 1, 1], [], []>} : vector<16x128xbf16>, vector<128x512xbf16>, vector<16x512xf32> -> vector<16x512xf32>
    %378 = arith.addf %376, %377 : vector<16x512xf32>
    %379 = vector.extract_strided_slice %378 {offsets = [0, 0], sizes = [16, 128], strides = [1, 1]} : vector<16x512xf32> to vector<16x128xf32>
    %380 = arith.negf %379 : vector<16x128xf32>
    %381 = math.exp %380 : vector<16x128xf32>
    %cst_106 = arith.constant 1.000000e+00 : f32
    %382 = vector.broadcast %cst_106 : f32 to vector<16x128xf32>
    %383 = arith.addf %382, %381 : vector<16x128xf32>
    %384 = arith.divf %382, %383 : vector<16x128xf32>
    %385 = vector.extract_strided_slice %378 {offsets = [0, 128], sizes = [16, 128], strides = [1, 1]} : vector<16x512xf32> to vector<16x128xf32>
    %386 = arith.negf %385 : vector<16x128xf32>
    %387 = math.exp %386 : vector<16x128xf32>
    %cst_107 = arith.constant 1.000000e+00 : f32
    %388 = vector.broadcast %cst_107 : f32 to vector<16x128xf32>
    %389 = arith.addf %388, %387 : vector<16x128xf32>
    %390 = arith.divf %388, %389 : vector<16x128xf32>
    %391 = vector.extract_strided_slice %378 {offsets = [0, 256], sizes = [16, 128], strides = [1, 1]} : vector<16x512xf32> to vector<16x128xf32>
    %392 = math.tanh %391 : vector<16x128xf32>
    %393 = vector.extract_strided_slice %378 {offsets = [0, 384], sizes = [16, 128], strides = [1, 1]} : vector<16x512xf32> to vector<16x128xf32>
    %394 = arith.negf %393 : vector<16x128xf32>
    %395 = math.exp %394 : vector<16x128xf32>
    %cst_108 = arith.constant 1.000000e+00 : f32
    %396 = vector.broadcast %cst_108 : f32 to vector<16x128xf32>
    %397 = arith.addf %396, %395 : vector<16x128xf32>
    %398 = arith.divf %396, %397 : vector<16x128xf32>
    %399 = arith.mulf %390, %369 : vector<16x128xf32>
    %400 = arith.mulf %384, %392 : vector<16x128xf32>
    %401 = arith.addf %399, %400 : vector<16x128xf32>
    %402 = math.tanh %401 : vector<16x128xf32>
    %403 = arith.mulf %398, %402 : vector<16x128xf32>
    %404 = arith.truncf %403 : vector<16x128xf32> to vector<16x128xbf16>
    %c3_i32_109 = arith.constant 3 : i32
    %c16_i32_110 = arith.constant 16 : i32
    %405 = arith.muli %c3_i32_109, %c16_i32_110 : i32
    %406 = tpu.assume_multiple %405, 16 : i32
    %407 = arith.index_cast %406 : i32 to index
    %c0_111 = arith.constant 0 : index
    %408 = vector.load %arg11[%407, %c0_111] : memref<128x512xf32, #tpu.memory_space<vmem>>, vector<16x512xf32>
    %cst_112 = arith.constant dense<0.000000e+00> : vector<16x512xf32>
    %409 = tpu.matmul %404, %306, %cst_112 {dimension_numbers = #tpu.dot_dimension_numbers<[1], [0], [0], [1], [0, 0, 1, 1], [], []>} : vector<16x128xbf16>, vector<128x512xbf16>, vector<16x512xf32> -> vector<16x512xf32>
    %410 = arith.addf %408, %409 : vector<16x512xf32>
    %411 = vector.extract_strided_slice %410 {offsets = [0, 0], sizes = [16, 128], strides = [1, 1]} : vector<16x512xf32> to vector<16x128xf32>
    %412 = arith.negf %411 : vector<16x128xf32>
    %413 = math.exp %412 : vector<16x128xf32>
    %cst_113 = arith.constant 1.000000e+00 : f32
    %414 = vector.broadcast %cst_113 : f32 to vector<16x128xf32>
    %415 = arith.addf %414, %413 : vector<16x128xf32>
    %416 = arith.divf %414, %415 : vector<16x128xf32>
    %417 = vector.extract_strided_slice %410 {offsets = [0, 128], sizes = [16, 128], strides = [1, 1]} : vector<16x512xf32> to vector<16x128xf32>
    %418 = arith.negf %417 : vector<16x128xf32>
    %419 = math.exp %418 : vector<16x128xf32>
    %cst_114 = arith.constant 1.000000e+00 : f32
    %420 = vector.broadcast %cst_114 : f32 to vector<16x128xf32>
    %421 = arith.addf %420, %419 : vector<16x128xf32>
    %422 = arith.divf %420, %421 : vector<16x128xf32>
    %423 = vector.extract_strided_slice %410 {offsets = [0, 256], sizes = [16, 128], strides = [1, 1]} : vector<16x512xf32> to vector<16x128xf32>
    %424 = math.tanh %423 : vector<16x128xf32>
    %425 = vector.extract_strided_slice %410 {offsets = [0, 384], sizes = [16, 128], strides = [1, 1]} : vector<16x512xf32> to vector<16x128xf32>
    %426 = arith.negf %425 : vector<16x128xf32>
    %427 = math.exp %426 : vector<16x128xf32>
    %cst_115 = arith.constant 1.000000e+00 : f32
    %428 = vector.broadcast %cst_115 : f32 to vector<16x128xf32>
    %429 = arith.addf %428, %427 : vector<16x128xf32>
    %430 = arith.divf %428, %429 : vector<16x128xf32>
    %431 = arith.mulf %422, %401 : vector<16x128xf32>
    %432 = arith.mulf %416, %424 : vector<16x128xf32>
    %433 = arith.addf %431, %432 : vector<16x128xf32>
    %434 = math.tanh %433 : vector<16x128xf32>
    %435 = arith.mulf %430, %434 : vector<16x128xf32>
    %436 = arith.truncf %435 : vector<16x128xf32> to vector<16x128xbf16>
    %c4_i32_116 = arith.constant 4 : i32
    %c16_i32_117 = arith.constant 16 : i32
    %437 = arith.muli %c4_i32_116, %c16_i32_117 : i32
    %438 = tpu.assume_multiple %437, 16 : i32
    %439 = arith.index_cast %438 : i32 to index
    %c0_118 = arith.constant 0 : index
    %440 = vector.load %arg11[%439, %c0_118] : memref<128x512xf32, #tpu.memory_space<vmem>>, vector<16x512xf32>
    %cst_119 = arith.constant dense<0.000000e+00> : vector<16x512xf32>
    %441 = tpu.matmul %436, %306, %cst_119 {dimension_numbers = #tpu.dot_dimension_numbers<[1], [0], [0], [1], [0, 0, 1, 1], [], []>} : vector<16x128xbf16>, vector<128x512xbf16>, vector<16x512xf32> -> vector<16x512xf32>
    %442 = arith.addf %440, %441 : vector<16x512xf32>
    %443 = vector.extract_strided_slice %442 {offsets = [0, 0], sizes = [16, 128], strides = [1, 1]} : vector<16x512xf32> to vector<16x128xf32>
    %444 = arith.negf %443 : vector<16x128xf32>
    %445 = math.exp %444 : vector<16x128xf32>
    %cst_120 = arith.constant 1.000000e+00 : f32
    %446 = vector.broadcast %cst_120 : f32 to vector<16x128xf32>
    %447 = arith.addf %446, %445 : vector<16x128xf32>
    %448 = arith.divf %446, %447 : vector<16x128xf32>
    %449 = vector.extract_strided_slice %442 {offsets = [0, 128], sizes = [16, 128], strides = [1, 1]} : vector<16x512xf32> to vector<16x128xf32>
    %450 = arith.negf %449 : vector<16x128xf32>
    %451 = math.exp %450 : vector<16x128xf32>
    %cst_121 = arith.constant 1.000000e+00 : f32
    %452 = vector.broadcast %cst_121 : f32 to vector<16x128xf32>
    %453 = arith.addf %452, %451 : vector<16x128xf32>
    %454 = arith.divf %452, %453 : vector<16x128xf32>
    %455 = vector.extract_strided_slice %442 {offsets = [0, 256], sizes = [16, 128], strides = [1, 1]} : vector<16x512xf32> to vector<16x128xf32>
    %456 = math.tanh %455 : vector<16x128xf32>
    %457 = vector.extract_strided_slice %442 {offsets = [0, 384], sizes = [16, 128], strides = [1, 1]} : vector<16x512xf32> to vector<16x128xf32>
    %458 = arith.negf %457 : vector<16x128xf32>
    %459 = math.exp %458 : vector<16x128xf32>
    %cst_122 = arith.constant 1.000000e+00 : f32
    %460 = vector.broadcast %cst_122 : f32 to vector<16x128xf32>
    %461 = arith.addf %460, %459 : vector<16x128xf32>
    %462 = arith.divf %460, %461 : vector<16x128xf32>
    %463 = arith.mulf %454, %433 : vector<16x128xf32>
    %464 = arith.mulf %448, %456 : vector<16x128xf32>
    %465 = arith.addf %463, %464 : vector<16x128xf32>
    %466 = math.tanh %465 : vector<16x128xf32>
    %467 = arith.mulf %462, %466 : vector<16x128xf32>
    %468 = arith.truncf %467 : vector<16x128xf32> to vector<16x128xbf16>
    %c5_i32_123 = arith.constant 5 : i32
    %c16_i32_124 = arith.constant 16 : i32
    %469 = arith.muli %c5_i32_123, %c16_i32_124 : i32
    %470 = tpu.assume_multiple %469, 16 : i32
    %471 = arith.index_cast %470 : i32 to index
    %c0_125 = arith.constant 0 : index
    %472 = vector.load %arg11[%471, %c0_125] : memref<128x512xf32, #tpu.memory_space<vmem>>, vector<16x512xf32>
    %cst_126 = arith.constant dense<0.000000e+00> : vector<16x512xf32>
    %473 = tpu.matmul %468, %306, %cst_126 {dimension_numbers = #tpu.dot_dimension_numbers<[1], [0], [0], [1], [0, 0, 1, 1], [], []>} : vector<16x128xbf16>, vector<128x512xbf16>, vector<16x512xf32> -> vector<16x512xf32>
    %474 = arith.addf %472, %473 : vector<16x512xf32>
    %475 = vector.extract_strided_slice %474 {offsets = [0, 0], sizes = [16, 128], strides = [1, 1]} : vector<16x512xf32> to vector<16x128xf32>
    %476 = arith.negf %475 : vector<16x128xf32>
    %477 = math.exp %476 : vector<16x128xf32>
    %cst_127 = arith.constant 1.000000e+00 : f32
    %478 = vector.broadcast %cst_127 : f32 to vector<16x128xf32>
    %479 = arith.addf %478, %477 : vector<16x128xf32>
    %480 = arith.divf %478, %479 : vector<16x128xf32>
    %481 = vector.extract_strided_slice %474 {offsets = [0, 128], sizes = [16, 128], strides = [1, 1]} : vector<16x512xf32> to vector<16x128xf32>
    %482 = arith.negf %481 : vector<16x128xf32>
    %483 = math.exp %482 : vector<16x128xf32>
    %cst_128 = arith.constant 1.000000e+00 : f32
    %484 = vector.broadcast %cst_128 : f32 to vector<16x128xf32>
    %485 = arith.addf %484, %483 : vector<16x128xf32>
    %486 = arith.divf %484, %485 : vector<16x128xf32>
    %487 = vector.extract_strided_slice %474 {offsets = [0, 256], sizes = [16, 128], strides = [1, 1]} : vector<16x512xf32> to vector<16x128xf32>
    %488 = math.tanh %487 : vector<16x128xf32>
    %489 = vector.extract_strided_slice %474 {offsets = [0, 384], sizes = [16, 128], strides = [1, 1]} : vector<16x512xf32> to vector<16x128xf32>
    %490 = arith.negf %489 : vector<16x128xf32>
    %491 = math.exp %490 : vector<16x128xf32>
    %cst_129 = arith.constant 1.000000e+00 : f32
    %492 = vector.broadcast %cst_129 : f32 to vector<16x128xf32>
    %493 = arith.addf %492, %491 : vector<16x128xf32>
    %494 = arith.divf %492, %493 : vector<16x128xf32>
    %495 = arith.mulf %486, %465 : vector<16x128xf32>
    %496 = arith.mulf %480, %488 : vector<16x128xf32>
    %497 = arith.addf %495, %496 : vector<16x128xf32>
    %498 = math.tanh %497 : vector<16x128xf32>
    %499 = arith.mulf %494, %498 : vector<16x128xf32>
    %500 = arith.truncf %499 : vector<16x128xf32> to vector<16x128xbf16>
    %c6_i32_130 = arith.constant 6 : i32
    %c16_i32_131 = arith.constant 16 : i32
    %501 = arith.muli %c6_i32_130, %c16_i32_131 : i32
    %502 = tpu.assume_multiple %501, 16 : i32
    %503 = arith.index_cast %502 : i32 to index
    %c0_132 = arith.constant 0 : index
    %504 = vector.load %arg11[%503, %c0_132] : memref<128x512xf32, #tpu.memory_space<vmem>>, vector<16x512xf32>
    %cst_133 = arith.constant dense<0.000000e+00> : vector<16x512xf32>
    %505 = tpu.matmul %500, %306, %cst_133 {dimension_numbers = #tpu.dot_dimension_numbers<[1], [0], [0], [1], [0, 0, 1, 1], [], []>} : vector<16x128xbf16>, vector<128x512xbf16>, vector<16x512xf32> -> vector<16x512xf32>
    %506 = arith.addf %504, %505 : vector<16x512xf32>
    %507 = vector.extract_strided_slice %506 {offsets = [0, 0], sizes = [16, 128], strides = [1, 1]} : vector<16x512xf32> to vector<16x128xf32>
    %508 = arith.negf %507 : vector<16x128xf32>
    %509 = math.exp %508 : vector<16x128xf32>
    %cst_134 = arith.constant 1.000000e+00 : f32
    %510 = vector.broadcast %cst_134 : f32 to vector<16x128xf32>
    %511 = arith.addf %510, %509 : vector<16x128xf32>
    %512 = arith.divf %510, %511 : vector<16x128xf32>
    %513 = vector.extract_strided_slice %506 {offsets = [0, 128], sizes = [16, 128], strides = [1, 1]} : vector<16x512xf32> to vector<16x128xf32>
    %514 = arith.negf %513 : vector<16x128xf32>
    %515 = math.exp %514 : vector<16x128xf32>
    %cst_135 = arith.constant 1.000000e+00 : f32
    %516 = vector.broadcast %cst_135 : f32 to vector<16x128xf32>
    %517 = arith.addf %516, %515 : vector<16x128xf32>
    %518 = arith.divf %516, %517 : vector<16x128xf32>
    %519 = vector.extract_strided_slice %506 {offsets = [0, 256], sizes = [16, 128], strides = [1, 1]} : vector<16x512xf32> to vector<16x128xf32>
    %520 = math.tanh %519 : vector<16x128xf32>
    %521 = vector.extract_strided_slice %506 {offsets = [0, 384], sizes = [16, 128], strides = [1, 1]} : vector<16x512xf32> to vector<16x128xf32>
    %522 = arith.negf %521 : vector<16x128xf32>
    %523 = math.exp %522 : vector<16x128xf32>
    %cst_136 = arith.constant 1.000000e+00 : f32
    %524 = vector.broadcast %cst_136 : f32 to vector<16x128xf32>
    %525 = arith.addf %524, %523 : vector<16x128xf32>
    %526 = arith.divf %524, %525 : vector<16x128xf32>
    %527 = arith.mulf %518, %497 : vector<16x128xf32>
    %528 = arith.mulf %512, %520 : vector<16x128xf32>
    %529 = arith.addf %527, %528 : vector<16x128xf32>
    %530 = math.tanh %529 : vector<16x128xf32>
    %531 = arith.mulf %526, %530 : vector<16x128xf32>
    %532 = arith.truncf %531 : vector<16x128xf32> to vector<16x128xbf16>
    %c7_i32_137 = arith.constant 7 : i32
    %c16_i32_138 = arith.constant 16 : i32
    %533 = arith.muli %c7_i32_137, %c16_i32_138 : i32
    %534 = tpu.assume_multiple %533, 16 : i32
    %535 = arith.index_cast %534 : i32 to index
    %c0_139 = arith.constant 0 : index
    %536 = vector.load %arg11[%535, %c0_139] : memref<128x512xf32, #tpu.memory_space<vmem>>, vector<16x512xf32>
    %cst_140 = arith.constant dense<0.000000e+00> : vector<16x512xf32>
    %537 = tpu.matmul %532, %306, %cst_140 {dimension_numbers = #tpu.dot_dimension_numbers<[1], [0], [0], [1], [0, 0, 1, 1], [], []>} : vector<16x128xbf16>, vector<128x512xbf16>, vector<16x512xf32> -> vector<16x512xf32>
    %538 = arith.addf %536, %537 : vector<16x512xf32>
    %539 = vector.extract_strided_slice %538 {offsets = [0, 0], sizes = [16, 128], strides = [1, 1]} : vector<16x512xf32> to vector<16x128xf32>
    %540 = arith.negf %539 : vector<16x128xf32>
    %541 = math.exp %540 : vector<16x128xf32>
    %cst_141 = arith.constant 1.000000e+00 : f32
    %542 = vector.broadcast %cst_141 : f32 to vector<16x128xf32>
    %543 = arith.addf %542, %541 : vector<16x128xf32>
    %544 = arith.divf %542, %543 : vector<16x128xf32>
    %545 = vector.extract_strided_slice %538 {offsets = [0, 128], sizes = [16, 128], strides = [1, 1]} : vector<16x512xf32> to vector<16x128xf32>
    %546 = arith.negf %545 : vector<16x128xf32>
    %547 = math.exp %546 : vector<16x128xf32>
    %cst_142 = arith.constant 1.000000e+00 : f32
    %548 = vector.broadcast %cst_142 : f32 to vector<16x128xf32>
    %549 = arith.addf %548, %547 : vector<16x128xf32>
    %550 = arith.divf %548, %549 : vector<16x128xf32>
    %551 = vector.extract_strided_slice %538 {offsets = [0, 256], sizes = [16, 128], strides = [1, 1]} : vector<16x512xf32> to vector<16x128xf32>
    %552 = math.tanh %551 : vector<16x128xf32>
    %553 = vector.extract_strided_slice %538 {offsets = [0, 384], sizes = [16, 128], strides = [1, 1]} : vector<16x512xf32> to vector<16x128xf32>
    %554 = arith.negf %553 : vector<16x128xf32>
    %555 = math.exp %554 : vector<16x128xf32>
    %cst_143 = arith.constant 1.000000e+00 : f32
    %556 = vector.broadcast %cst_143 : f32 to vector<16x128xf32>
    %557 = arith.addf %556, %555 : vector<16x128xf32>
    %558 = arith.divf %556, %557 : vector<16x128xf32>
    %559 = arith.mulf %550, %529 : vector<16x128xf32>
    %560 = arith.mulf %544, %552 : vector<16x128xf32>
    %561 = arith.addf %559, %560 : vector<16x128xf32>
    %562 = math.tanh %561 : vector<16x128xf32>
    %563 = arith.mulf %558, %562 : vector<16x128xf32>
    %564 = arith.truncf %563 : vector<16x128xf32> to vector<16x128xbf16>
    %c8_i32_144 = arith.constant 8 : i32
    %cst_145 = arith.constant 0.000000e+00 : bf16
    %565 = vector.broadcast %cst_145 : bf16 to vector<16x128xbf16>
    %566 = arith.maximumf %564, %565 : vector<16x128xbf16>
    %c0_146 = arith.constant 0 : index
    %c0_147 = arith.constant 0 : index
    %567 = vector.load %arg8[%c0_146, %c0_147] : memref<128x128xbf16, #tpu.memory_space<vmem>>, vector<128x128xbf16>
    %cst_148 = arith.constant dense<0.000000e+00> : vector<16x128xf32>
    %568 = tpu.matmul %566, %567, %cst_148 {dimension_numbers = #tpu.dot_dimension_numbers<[1], [0], [0], [1], [0, 0, 1, 1], [], []>} : vector<16x128xbf16>, vector<128x128xbf16>, vector<16x128xf32> -> vector<16x128xf32>
    %c0_149 = arith.constant 0 : index
    %c0_150 = arith.constant 0 : index
    %569 = vector.load %arg9[%c0_149, %c0_150] : memref<1x128xf32, #tpu.memory_space<vmem>>, vector<1x128xf32>
    %570 = vector.broadcast %569 : vector<1x128xf32> to vector<16x128xf32>
    %571 = arith.addf %568, %570 : vector<16x128xf32>
    %c0_151 = arith.constant 0 : index
    %c0_152 = arith.constant 0 : index
    %c0_153 = arith.constant 0 : index
    %572 = vector.load %arg10[%c0_151, %c0_152, %c0_153] : memref<1x16x128xf32, #tpu.memory_space<vmem>>, vector<1x16x128xf32>
    %573 = vector.shape_cast %572 : vector<1x16x128xf32> to vector<16x128xf32>
    %574 = vector.shape_cast %571 : vector<16x128xf32> to vector<1x16x128xf32>
    tpu.vector_store %arg10[%c0_151, %c0_152, %c0_153], %574 {strides = array<i32>} : memref<1x16x128xf32, #tpu.memory_space<vmem>>, vector<1x16x128xf32>,
    return
  }
  func.func @transform_0(%arg0: i32) -> (i32, i32, i32) {
    %c0_i32 = arith.constant 0 : i32
    %c0_i32_0 = arith.constant 0 : i32
    %c0_i32_1 = arith.constant 0 : i32
    return %arg0, %c0_i32, %c0_i32_0 : i32, i32, i32
  }
  func.func @transform_1(%arg0: i32) -> (i32, i32) {
    %c0_i32 = arith.constant 0 : i32
    %c0_i32_0 = arith.constant 0 : i32
    %c0_i32_1 = arith.constant 0 : i32
    return %c0_i32, %c0_i32_0 : i32, i32
  }
  func.func @transform_2(%arg0: i32) -> (i32, i32) {
    %c0_i32 = arith.constant 0 : i32
    %c0_i32_0 = arith.constant 0 : i32
    %c0_i32_1 = arith.constant 0 : i32
    return %c0_i32, %c0_i32_0 : i32, i32
  }
  func.func @transform_3(%arg0: i32) -> (i32, i32) {
    %c0_i32 = arith.constant 0 : i32
    %c0_i32_0 = arith.constant 0 : i32
    %c0_i32_1 = arith.constant 0 : i32
    return %c0_i32, %c0_i32_0 : i32, i32
  }
  func.func @transform_4(%arg0: i32) -> (i32, i32) {
    %c0_i32 = arith.constant 0 : i32
    %c0_i32_0 = arith.constant 0 : i32
    %c0_i32_1 = arith.constant 0 : i32
    return %c0_i32, %c0_i32_0 : i32, i32
  }
  func.func @transform_5(%arg0: i32) -> (i32, i32) {
    %c0_i32 = arith.constant 0 : i32
    %c0_i32_0 = arith.constant 0 : i32
    %c0_i32_1 = arith.constant 0 : i32
    return %c0_i32, %c0_i32_0 : i32, i32
  }
  func.func @transform_6(%arg0: i32) -> (i32, i32) {
    %c0_i32 = arith.constant 0 : i32
    %c0_i32_0 = arith.constant 0 : i32
    %c0_i32_1 = arith.constant 0 : i32
    return %c0_i32, %c0_i32_0 : i32, i32
  }
  func.func @transform_7(%arg0: i32) -> (i32, i32) {
    %c0_i32 = arith.constant 0 : i32
    %c0_i32_0 = arith.constant 0 : i32
    %c0_i32_1 = arith.constant 0 : i32
    return %c0_i32, %c0_i32_0 : i32, i32
  }
  func.func @transform_8(%arg0: i32) -> (i32, i32) {
    %c0_i32 = arith.constant 0 : i32
    %c0_i32_0 = arith.constant 0 : i32
    %c0_i32_1 = arith.constant 0 : i32
    return %c0_i32, %c0_i32_0 : i32, i32
  }
  func.func @transform_9(%arg0: i32) -> (i32, i32, i32) {
    %c0_i32 = arith.constant 0 : i32
    %c0_i32_0 = arith.constant 0 : i32
    %c0_i32_1 = arith.constant 0 : i32
    return %arg0, %c0_i32, %c0_i32_0 : i32, i32, i32
  }
}

</mosaic_0001>

<bundles_post_ra>
// kernel: tpu_custom_call.1
= control target key start
LH: loop header
LB: loop body
LE: loop exit
PB: predicated region body
PF: predicated region fallthrough
CT: control target
= control target key end

     0   :  { %14 = vsyncpa [#allocation5], 0  ;;  %s8753_s0 = inlined_call_operand.hbm [shape: bf16[1,128,128], index: 0, kind: input, shape index: {}]   ;;  %s8754_s1 = inlined_call_operand.hbm [shape: bf16[128,512], index: 1, kind: input, shape index: {}]   ;;  %s8755_s2 = inlined_call_operand.hbm [shape: bf16[128,512], index: 2, kind: input, shape index: {}]   ;;  %s8756_s3 = inlined_call_operand.hbm [shape: f32[1,512], index: 3, kind: input, shape index: {}]   ;;  %s8757_s4 = inlined_call_operand.hbm [shape: bf16[128,512], index: 4, kind: input, shape index: {}]   ;;  %s8758_s5 = inlined_call_operand.hbm [shape: bf16[128,512], index: 5, kind: input, shape index: {}]   ;;  %s8759_s6 = inlined_call_operand.vmem [shape: f32[1,512], index: 6, kind: input, shape index: {}]   ;;  %s8760_s7 = inlined_call_operand.hbm [shape: bf16[128,128], index: 7, kind: input, shape index: {}]   ;;  %s8761_s8 = inlined_call_operand.vmem [shape: f32[1,128], index: 8, kind: input, shape index: {}]   ;;  %s8762_s9 = inlined_call_operand.hbm [shape: f32[1,16,128], index: 9, kind: output, shape index: {}]  }
   0x1   :  { %15 = vsyncpa [#allocation8], 0 }
   0x2   :  { %16 = vsyncpa [#allocation11], 0 }
   0x3   :  { %17 = vsyncpa [#allocation14], 0  ;;  %s36_s11 = sshll.u32 %s8754_s1, 4  ;;  %s37_s11 = int_to_ptr.hbm [resolvable:$true] %s36_s11 }
   0x4   :  { %18 = vsyncpa [#allocation6], 0  ;;  %s6651_s12 = smov [#allocation7]   ;;  %s63_s16 = sshll.u32 %s8756_s3, 4  ;;  %s64_s16 = int_to_ptr.hbm [resolvable:$true] %s63_s16 }
   0x5   :  { %s38_s13 = sshll.u32 %s6651_s12, 4  ;;  %s6652_s17 = smov 256   ;;  %s39_s13 = int_to_ptr.vmem [resolvable:$true] %s38_s13 }
   0x6   :  { %s6653_s18 = smov 16   ;;  %s6654_s19 = smov [#allocation10]  }
   0x7   :  { %44 = dma.hbm_to_vmem [thread:$0]  %s37_s11, 4096, %s39_s13, [#allocation8], %s6652_s17, %s6652_s17, %s6653_s18  }
   0x8   :  { %s65_s20 = sshll.u32 %s6654_s19, 4  ;;  %s86_s22 = sshll.u32 %s8758_s5, 4  ;;  %s66_s20 = int_to_ptr.vmem [resolvable:$true] %s65_s20  ;;  %s87_s22 = int_to_ptr.hbm [resolvable:$true] %s86_s22 }
   0x9   :  { %68 = dma.hbm_to_vmem [thread:$0]  %s64_s16, 64, %s66_s20, [#allocation11]  }
   0xa   :  { %s23_s3 = sshll.u32 %s8753_s0, 4  ;;  %s6655_s25 = smov [#allocation13]   ;;  %s24_s3 = int_to_ptr.hbm [resolvable:$true] %s23_s3 }
   0xb   :  { %s88_s26 = sshll.u32 %s6655_s25, 4  ;;  %s6656_s27 = smov [#allocation4]   ;;  %s89_s26 = int_to_ptr.vmem [resolvable:$true] %s88_s26 }
   0xc   :  { %94 = dma.hbm_to_vmem [thread:$0]  %s87_s22, 4096, %s89_s26, [#allocation14], %s6652_s17, %s6652_s17, %s6653_s18  }
   0xd   :  { %s25_s28 = sshll.u32 %s6656_s27, 4  ;;  %s6657_s29 = smov 64   ;;  %s26_s28 = int_to_ptr.vmem [resolvable:$true] %s25_s28 }
   0xe   :  { %s6658_s5 = smov 4   ;;  %s49_s11 = sshll.u32 %s8755_s2, 4  ;;  %s50_s11 = int_to_ptr.hbm [resolvable:$true] %s49_s11 }
   0xf   :  { %31 = dma.hbm_to_vmem [thread:$0]  %s24_s3, 1024, %s26_s28, [#allocation5], %s6657_s29, %s6657_s29, %s6658_s5  }
  0x10   :  { %s6659_s0 = smov [#allocation9]   ;;  %s73_s15 = sshll.u32 %s8757_s4, 4  ;;  %s74_s15 = int_to_ptr.hbm [resolvable:$true] %s73_s15 }
  0x11   :  { %s51_s12 = sshll.u32 %s6659_s0, 4  ;;  %s6660_s16 = smov [#allocation12]   ;;  %s52_s12 = int_to_ptr.vmem [resolvable:$true] %s51_s12 }
  0x12   :  { %57 = dma.hbm_to_vmem [thread:$0]  %s50_s11, 4096, %s52_s12, [#allocation8], %s6652_s17, %s6652_s17, %s6653_s18  }
  0x13   :  { %s75_s19 = sshll.u32 %s6660_s16, 4  ;;  %s101_s1 = sshll.u32 %s8760_s7, 4  ;;  %s76_s19 = int_to_ptr.vmem [resolvable:$true] %s75_s19  ;;  %s102_s1 = int_to_ptr.hbm [resolvable:$true] %s101_s1 }
  0x14   :  { %81 = dma.hbm_to_vmem [thread:$0]  %s74_s15, 4096, %s76_s19, [#allocation11], %s6652_s17, %s6652_s17, %s6653_s18  }
  0x15   :  { %s6661_s2 = smov [#allocation15]  }
  0x16   :  { %s103_s22 = sshll.u32 %s6661_s2, 4  ;;  %s104_s22 = int_to_ptr.vmem [resolvable:$true] %s103_s22 }
  0x17   :  { %109 = dma.hbm_to_vmem [thread:$0]  %s102_s1, 1024, %s104_s22, [#allocation14], %s6657_s29, %s6657_s29, %s6658_s5  }
  0x18   :  { %6641 = dma.done.wait [#allocation5], 1024  }
  0x19   :  { %6642 = vsyncadd [#allocation5], 4294966272 }
  0x1a   :  { %6643 = dma.done.wait [#allocation8], 8192  }
  0x1b   :  { %6644 = vsyncadd [#allocation8], 4294959104 }
  0x1c   :  { %6645 = dma.done.wait [#allocation11], 4160  }
  0x1d   :  { %6646 = vsyncadd [#allocation11], 4294963136 }
  0x1e   :  { %6647 = dma.done.wait [#allocation14], 5120  }
  0x1f   :  { %6648 = vsyncadd [#allocation14], 4294962176  ;;  %v5171_v0 = vld [vmem:[#allocation7 + $0xe0] sm:$0xf]  ;;  %v5767_v1 = vld [vmem:[#allocation7 + $0xec] sm:$0xf0] }
  0x20   :  { %v5765_v2 = vld [vmem:[#allocation7 + $0xe4] sm:$0xf]  ;;  %v5172_v3 = vor.u32 %v5767_v1, %v5171_v0  ;;  %v5173_v4 = vld [vmem:[#allocation7 + $0xf0] sm:$0xf0]  ;;  %v5179_v5 = vld [vmem:[#allocation7 + $0xe8] sm:$0xf] }
  0x21   :  { %v5768_v6 = vld [vmem:[#allocation7 + $0xf4] sm:$0xf0]  ;;  %v5176_v7 = vor.u32 %v5765_v2, %v5173_v4  ;;  %v5766_v9 = vld [vmem:[#allocation7 + $0xec] sm:$0xf]  ;;  %v5181_v10 = vld [vmem:[#allocation7 + $0xf8] sm:$0xf0] }
  0x22   :  { %v5180_v8 = vor.u32 %v5768_v6, %v5179_v5  ;;  %v5155_v11 = vld [vmem:[#allocation7 + $0xc0] sm:$0xf]  ;;  %407 = vmatpush.bf16.msra.mxu0 %v5172_v3  ;;  %v5184_v12 = vor.u32 %v5766_v9, %v5181_v10  ;;  %v5763_v13 = vld [vmem:[#allocation7 + $0xcc] sm:$0xf0]  ;;  %v5761_v14 = vld [vmem:[#allocation7 + $0xc4] sm:$0xf] }
  0x23   :  { %v5157_v15 = vld [vmem:[#allocation7 + $0xd0] sm:$0xf0]  ;;  %456 = vmatpush.bf16.msra.mxu1 %v5176_v7  ;;  %v5156_v16 = vor.u32 %v5763_v13, %v5155_v11  ;;  %v5163_v18 = vld [vmem:[#allocation7 + $0xc8] sm:$0xf]  ;;  %v5764_v19 = vld [vmem:[#allocation7 + $0xd4] sm:$0xf0] }
  0x24   :  { %505 = vmatpush.bf16.msra.mxu2 %v5180_v8  ;;  %v5160_v17 = vor.u32 %v5761_v14, %v5157_v15  ;;  %v5762_v20 = vld [vmem:[#allocation7 + $0xcc] sm:$0xf]  ;;  %554 = vmatpush.bf16.msra.mxu3 %v5184_v12  ;;  %v5164_v21 = vor.u32 %v5764_v19, %v5163_v18  ;;  %v5165_v22 = vld [vmem:[#allocation7 + $0xd8] sm:$0xf0]  ;;  %v5139_v23 = vld [vmem:[#allocation7 + $0xa0] sm:$0xf] }
  0x25   :  { %v5759_v24 = vld [vmem:[#allocation7 + $0xac] sm:$0xf0]  ;;  %v5168_v25 = vor.u32 %v5762_v20, %v5165_v22  ;;  %v5757_v26 = vld [vmem:[#allocation7 + $0xa4] sm:$0xf]  ;;  %v5141_v27 = vld [vmem:[#allocation7 + $0xb0] sm:$0xf0] }
  0x26   :  { %v5147_v28 = vld [vmem:[#allocation7 + $0xa8] sm:$0xf]  ;;  %408 = vmatpush.bf16.msra.mxu0 %v5156_v16  ;;  %v5140_v29 = vor.u32 %v5759_v24, %v5139_v23  ;;  %v5760_v30 = vld [vmem:[#allocation7 + $0xb4] sm:$0xf0]  ;;  %v5758_v31 = vld [vmem:[#allocation7 + $0xac] sm:$0xf]  ;;  %v5144_v33 = vor.u32 %v5757_v26, %v5141_v27 }
  0x27   :  { %v5149_v32 = vld [vmem:[#allocation7 + $0xb8] sm:$0xf0]  ;;  %457 = vmatpush.bf16.msra.mxu1 %v5160_v17  ;;  %v5148_v34 = vor.u32 %v5760_v30, %v5147_v28  ;;  %v5123_v35 = vld [vmem:[#allocation7 + $0x80] sm:$0xf]  ;;  %v5755_v36 = vld [vmem:[#allocation7 + $0x8c] sm:$0xf0] }
  0x28   :  { %506 = vmatpush.bf16.msra.mxu2 %v5164_v21  ;;  %v5753_v37 = vld [vmem:[#allocation7 + $0x84] sm:$0xf]  ;;  %555 = vmatpush.bf16.msra.mxu3 %v5168_v25  ;;  %v5152_v38 = vor.u32 %v5758_v31, %v5149_v32  ;;  %v5125_v39 = vld [vmem:[#allocation7 + $0x90] sm:$0xf0]  ;;  %v5131_v40 = vld [vmem:[#allocation7 + $0x88] sm:$0xf]  ;;  %v5124_v44 = vor.u32 %v5755_v36, %v5123_v35 }
  0x29   :  { %v5756_v41 = vld [vmem:[#allocation7 + $0x94] sm:$0xf0]  ;;  %v5754_v42 = vld [vmem:[#allocation7 + $0x8c] sm:$0xf]  ;;  %v5133_v43 = vld [vmem:[#allocation7 + $0x98] sm:$0xf0]  ;;  %v5128_v45 = vor.u32 %v5753_v37, %v5125_v39 }
  0x2a   :  { %409 = vmatpush.bf16.msra.mxu0 %v5140_v29  ;;  %v5132_v46 = vor.u32 %v5756_v41, %v5131_v40  ;;  %v5107_v47 = vld [vmem:[#allocation7 + $0x60] sm:$0xf]  ;;  %v5751_v48 = vld [vmem:[#allocation7 + $0x6c] sm:$0xf0]  ;;  %v5749_v49 = vld [vmem:[#allocation7 + $0x64] sm:$0xf]  ;;  %v5136_v50 = vor.u32 %v5754_v42, %v5133_v43 }
  0x2b   :  { %458 = vmatpush.bf16.msra.mxu1 %v5144_v33  ;;  %v5109_v51 = vld [vmem:[#allocation7 + $0x70] sm:$0xf0]  ;;  %v5115_v52 = vld [vmem:[#allocation7 + $0x68] sm:$0xf]  ;;  %v5752_v53 = vld [vmem:[#allocation7 + $0x74] sm:$0xf0]  ;;  %v5108_v56 = vor.u32 %v5751_v48, %v5107_v47 }
  0x2c   :  { %507 = vmatpush.bf16.msra.mxu2 %v5148_v34  ;;  %556 = vmatpush.bf16.msra.mxu3 %v5152_v38  ;;  %v5750_v54 = vld [vmem:[#allocation7 + $0x6c] sm:$0xf]  ;;  %v5117_v55 = vld [vmem:[#allocation7 + $0x78] sm:$0xf0]  ;;  %v5112_v57 = vor.u32 %v5749_v49, %v5109_v51  ;;  %v5116_v58 = vor.u32 %v5752_v53, %v5115_v52  ;;  %v5091_v59 = vld [vmem:[#allocation7 + $0x40] sm:$0xf] }
  0x2d   :  { %v5747_v60 = vld [vmem:[#allocation7 + $0x4c] sm:$0xf0]  ;;  %v5745_v61 = vld [vmem:[#allocation7 + $0x44] sm:$0xf]  ;;  %v5120_v62 = vor.u32 %v5750_v54, %v5117_v55  ;;  %v5093_v63 = vld [vmem:[#allocation7 + $0x50] sm:$0xf0] }
  0x2e   :  { %410 = vmatpush.bf16.msra.mxu0 %v5124_v44  ;;  %v5099_v0 = vld [vmem:[#allocation7 + $0x48] sm:$0xf]  ;;  %v5748_v1 = vld [vmem:[#allocation7 + $0x54] sm:$0xf0]  ;;  %v5746_v2 = vld [vmem:[#allocation7 + $0x4c] sm:$0xf]  ;;  %v5092_v4 = vor.u32 %v5747_v60, %v5091_v59  ;;  %v5096_v5 = vor.u32 %v5745_v61, %v5093_v63 }
  0x2f   :  { %459 = vmatpush.bf16.msra.mxu1 %v5128_v45  ;;  %v5101_v3 = vld [vmem:[#allocation7 + $0x58] sm:$0xf0]  ;;  %v5100_v6 = vor.u32 %v5748_v1, %v5099_v0  ;;  %v5075_v7 = vld [vmem:[#allocation7 + $0x20] sm:$0xf]  ;;  %v5743_v8 = vld [vmem:[#allocation7 + $0x2c] sm:$0xf0] }
  0x30   :  { %508 = vmatpush.bf16.msra.mxu2 %v5132_v46  ;;  %557 = vmatpush.bf16.msra.mxu3 %v5136_v50  ;;  %v5741_v9 = vld [vmem:[#allocation7 + $0x24] sm:$0xf]  ;;  %v5104_v10 = vor.u32 %v5746_v2, %v5101_v3  ;;  %v5077_v11 = vld [vmem:[#allocation7 + $0x30] sm:$0xf0]  ;;  %v5083_v12 = vld [vmem:[#allocation7 + $0x28] sm:$0xf]  ;;  %v5076_v16 = vor.u32 %v5743_v8, %v5075_v7 }
  0x31   :  { %v5744_v13 = vld [vmem:[#allocation7 + $0x34] sm:$0xf0]  ;;  %v5742_v14 = vld [vmem:[#allocation7 + $0x2c] sm:$0xf]  ;;  %v5085_v15 = vld [vmem:[#allocation7 + $0x38] sm:$0xf0]  ;;  %v5080_v18 = vor.u32 %v5741_v9, %v5077_v11 }
  0x32   :  { %411 = vmatpush.bf16.msra.mxu0 %v5108_v56  ;;  %v5059_v17 = vld [vmem:[#allocation7] sm:$0xf]  ;;  %v5084_v19 = vor.u32 %v5744_v13, %v5083_v12  ;;  %v5739_v20 = vld [vmem:[#allocation7 + $0xc] sm:$0xf0]  ;;  %v5737_v21 = vld [vmem:[#allocation7 + $0x4] sm:$0xf]  ;;  %v5088_v23 = vor.u32 %v5742_v14, %v5085_v15 }
  0x33   :  { %460 = vmatpush.bf16.msra.mxu1 %v5112_v57  ;;  %v5061_v22 = vld [vmem:[#allocation7 + $0x10] sm:$0xf0]  ;;  %v5067_v24 = vld [vmem:[#allocation7 + $0x8] sm:$0xf]  ;;  %v5740_v25 = vld [vmem:[#allocation7 + $0x14] sm:$0xf0]  ;;  %v5060_v30 = vor.u32 %v5739_v20, %v5059_v17 }
  0x34   :  { %509 = vmatpush.bf16.msra.mxu2 %v5116_v58  ;;  %558 = vmatpush.bf16.msra.mxu3 %v5120_v62  ;;  %v5738_v26 = vld [vmem:[#allocation7 + $0xc] sm:$0xf]  ;;  %v5069_v27 = vld [vmem:[#allocation7 + $0x18] sm:$0xf0]  ;;  %v5299_v28 = vld [vmem:[#allocation9 + $0xe0] sm:$0xf]  ;;  %v5064_v33 = vor.u32 %v5737_v21, %v5061_v22  ;;  %v5068_v34 = vor.u32 %v5740_v25, %v5067_v24 }
  0x35   :  { %v5799_v29 = vld [vmem:[#allocation9 + $0xec] sm:$0xf0]  ;;  %v5797_v31 = vld [vmem:[#allocation9 + $0xe4] sm:$0xf]  ;;  %v5301_v32 = vld [vmem:[#allocation9 + $0xf0] sm:$0xf0]  ;;  %v5072_v36 = vor.u32 %v5738_v26, %v5069_v27 }
  0x36   :  { %412 = vmatpush.bf16.msra.mxu0 %v5092_v4  ;;  %v5729_v35 = vld [vmem:[#allocation4] sm:$0xff]  ;;  %v6749_v37 = vor.u32 %v5799_v29, %v5299_v28  ;;  %v5798_v38 = vld [vmem:[#allocation9 + $0xec] sm:$0xf]  ;;  %v5307_v39 = vld [vmem:[#allocation9 + $0xe8] sm:$0xf]  ;;  %v6751_v41 = vor.u32 %v5797_v31, %v5301_v32  ;;  %s6663_s18 = smov [#allocation16]  }
  0x37   :  { %461 = vmatpush.bf16.msra.mxu1 %v5096_v5  ;;  %v5800_v40 = vld [vmem:[#allocation9 + $0xf4] sm:$0xf0]  ;;  %v5309_v42 = vld [vmem:[#allocation9 + $0xf8] sm:$0xf0]  ;;  %v5283_v43 = vld [vmem:[#allocation9 + $0xc0] sm:$0xf] }
  0x38   :  { %510 = vmatpush.bf16.msra.mxu2 %v5100_v6  ;;  %559 = vmatpush.bf16.msra.mxu3 %v5104_v10  ;;  %v5795_v44 = vld [vmem:[#allocation9 + $0xcc] sm:$0xf0]  ;;  %v5793_v45 = vld [vmem:[#allocation9 + $0xc4] sm:$0xf]  ;;  %v5285_v46 = vld [vmem:[#allocation9 + $0xd0] sm:$0xf0]  ;;  %v6753_v47 = vor.u32 %v5800_v40, %v5307_v39  ;;  %v6756_v48 = vor.u32 %v5798_v38, %v5309_v42 }
  0x39   :  { %v6758_v49 = vor.u32 %v5795_v44, %v5283_v43  ;;  %v5291_v50 = vld [vmem:[#allocation9 + $0xc8] sm:$0xf]  ;;  %v5796_v51 = vld [vmem:[#allocation9 + $0xd4] sm:$0xf0]  ;;  %v6761_v52 = vor.u32 %v5793_v45, %v5285_v46  ;;  %v5794_v53 = vld [vmem:[#allocation9 + $0xcc] sm:$0xf] }
  0x3a   :  { %413 = vmatpush.bf16.msra.mxu0 %v5076_v16  ;;  %v5293_v54 = vld [vmem:[#allocation9 + $0xd8] sm:$0xf0]  ;;  %v6764_v55 = vor.u32 %v5796_v51, %v5291_v50  ;;  %v5267_v56 = vld [vmem:[#allocation9 + $0xa0] sm:$0xf]  ;;  %v5791_v57 = vld [vmem:[#allocation9 + $0xac] sm:$0xf0] }
  0x3b   :  { %462 = vmatpush.bf16.msra.mxu1 %v5080_v18  ;;  %v5789_v58 = vld [vmem:[#allocation9 + $0xa4] sm:$0xf]  ;;  %v6768_v59 = vor.u32 %v5794_v53, %v5293_v54  ;;  %v6770_v60 = vor.u32 %v5791_v57, %v5267_v56  ;;  %v5269_v61 = vld [vmem:[#allocation9 + $0xb0] sm:$0xf0]  ;;  %v5790_v62 = vld [vmem:[#allocation9 + $0xac] sm:$0xf] }
  0x3c   :  { %511 = vmatpush.bf16.msra.mxu2 %v5084_v19  ;;  %560 = vmatpush.bf16.msra.mxu3 %v5088_v23  ;;  %v6773_v63 = vor.u32 %v5789_v58, %v5269_v61  ;;  %v5277_v0 = vld [vmem:[#allocation9 + $0xb8] sm:$0xf0]  ;;  %v5275_v1 = vld [vmem:[#allocation9 + $0xa8] sm:$0xf]  ;;  %v5792_v2 = vld [vmem:[#allocation9 + $0xb4] sm:$0xf0] }
  0x3d   :  { %v6776_v3 = vor.u32 %v5792_v2, %v5275_v1  ;;  %v6780_v4 = vor.u32 %v5790_v62, %v5277_v0  ;;  %v5730_v5 = vld [vmem:[#allocation4 + $0x8] sm:$0xff]  ;;  %v5251_v6 = vld [vmem:[#allocation9 + $0x80] sm:$0xf]  ;;  %v5787_v7 = vld [vmem:[#allocation9 + $0x8c] sm:$0xf0]  ;;  %s5000_s23 = sshll.u32 %s6663_s18, 4  ;;  %s5001_s23 = int_to_ptr.vmem [resolvable:$true] %s5000_s23 }
  0x3e   :  { %414 = vmatpush.bf16.msra.mxu0 %v5060_v30  ;;  %v5785_v8 = vld [vmem:[#allocation9 + $0x84] sm:$0xf]  ;;  %v6785_v9 = vor.u32 %v5787_v7, %v5251_v6  ;;  %v5253_v10 = vld [vmem:[#allocation9 + $0x90] sm:$0xf0]  ;;  %v5786_v11 = vld [vmem:[#allocation9 + $0x8c] sm:$0xf] }
  0x3f   :  { %463 = vmatpush.bf16.msra.mxu1 %v5064_v33  ;;  %v5261_v12 = vld [vmem:[#allocation9 + $0x98] sm:$0xf0]  ;;  %v6787_v13 = vor.u32 %v5785_v8, %v5253_v10  ;;  %v5259_v15 = vld [vmem:[#allocation9 + $0x88] sm:$0xf]  ;;  %v5788_v16 = vld [vmem:[#allocation9 + $0x94] sm:$0xf0] }
  0x40   :  { %512 = vmatpush.bf16.msra.mxu2 %v5068_v34  ;;  %561 = vmatpush.bf16.msra.mxu3 %v5072_v36  ;;  %v6789_v14 = vor.u32 %v5786_v11, %v5261_v12  ;;  %v6792_v17 = vor.u32 %v5788_v16, %v5259_v15  ;;  %v5731_v18 = vld [vmem:[#allocation4 + $0x10] sm:$0xff]  ;;  %v5235_v19 = vld [vmem:[#allocation9 + $0x60] sm:$0xf]  ;;  %v5781_v21 = vld [vmem:[#allocation9 + $0x64] sm:$0xf]  ;;  %s5002_s25 = sshll.u32 %s8762_s9, 4  ;;  %s5003_s25 = int_to_ptr.hbm [resolvable:$true] %s5002_s25 }
  0x41   :  { %415 = vmatmul.bf16.vlgmr.msra.gmra.mxu0 %v5729_v35  ;;  %v5783_v20 = vld [vmem:[#allocation9 + $0x6c] sm:$0xf0]  ;;  %v5237_v23 = vld [vmem:[#allocation9 + $0x70] sm:$0xf0]  ;;  %v5782_v24 = vld [vmem:[#allocation9 + $0x6c] sm:$0xf] }
  0x42   :  { %870 = vmatpush.bf16.msrb.mxu0 %v6749_v37  ;;  %464 = vmatmul.bf16.vlgmr.msra.gmra.mxu1 %v5729_v35  ;;  %v6797_v22 = vor.u32 %v5783_v20, %v5235_v19  ;;  %v5245_v25 = vld [vmem:[#allocation9 + $0x78] sm:$0xf0]  ;;  %v6799_v26 = vor.u32 %v5781_v21, %v5237_v23  ;;  %v5243_v28 = vld [vmem:[#allocation9 + $0x68] sm:$0xf]  ;;  %v5784_v29 = vld [vmem:[#allocation9 + $0x74] sm:$0xf0] }
  0x43   :  { %884 = vmatpush.bf16.msrb.mxu1 %v6751_v41  ;;  %513 = vmatmul.bf16.vlgmr.msra.gmra.mxu2 %v5729_v35  ;;  %v6801_v27 = vor.u32 %v5782_v24, %v5245_v25  ;;  %v6804_v30 = vor.u32 %v5784_v29, %v5243_v28  ;;  %v5732_v31 = vld [vmem:[#allocation4 + $0x18] sm:$0xff]  ;;  %v5219_v32 = vld [vmem:[#allocation9 + $0x40] sm:$0xf]  ;;  %v5779_v33 = vld [vmem:[#allocation9 + $0x4c] sm:$0xf0]  ;;  %v8763_v29 = vmov 0  }
  0x44   :  { %562 = vmatmul.bf16.vlgmr.msra.gmra.mxu3 %v5729_v35  ;;  %898 = vmatpush.bf16.msrb.mxu2 %v6753_v47  ;;  %v5777_v34 = vld [vmem:[#allocation9 + $0x44] sm:$0xf]  ;;  %v6809_v35 = vor.u32 %v5779_v33, %v5219_v32  ;;  %v5221_v36 = vld [vmem:[#allocation9 + $0x50] sm:$0xf0]  ;;  %v5778_v38 = vld [vmem:[#allocation9 + $0x4c] sm:$0xf] }
  0x45   :  { %912 = vmatpush.bf16.msrb.mxu3 %v6756_v48  ;;  %v5229_v39 = vld [vmem:[#allocation9 + $0x58] sm:$0xf0]  ;;  %v6811_v40 = vor.u32 %v5777_v34, %v5221_v36  ;;  %v5227_v43 = vld [vmem:[#allocation9 + $0x48] sm:$0xf]  ;;  %v5780_v44 = vld [vmem:[#allocation9 + $0x54] sm:$0xf0] }
  0x46   :  { %871 = vmatpush.bf16.msrb.mxu0 %v6758_v49  ;;  %v6813_v42 = vor.u32 %v5778_v38, %v5229_v39  ;;  %v6816_v45 = vor.u32 %v5780_v44, %v5227_v43  ;;  %v5733_v46 = vld [vmem:[#allocation4 + $0x20] sm:$0xff]  ;;  %v5775_v51 = vld [vmem:[#allocation9 + $0x2c] sm:$0xf0]  ;;  %v5205_v56 = vld [vmem:[#allocation9 + $0x30] sm:$0xf0]  ;;  %s6664_s26 = smov 128  }
  0x47   :  { %885 = vmatpush.bf16.msrb.mxu1 %v6761_v52  ;;  %v5203_v50 = vld [vmem:[#allocation9 + $0x20] sm:$0xf]  ;;  %v5773_v53 = vld [vmem:[#allocation9 + $0x24] sm:$0xf]  ;;  %v5774_v57 = vld [vmem:[#allocation9 + $0x2c] sm:$0xf] }
  0x48   :  { %899 = vmatpush.bf16.msrb.mxu2 %v6764_v55  ;;  %v6821_v54 = vor.u32 %v5775_v51, %v5203_v50  ;;  %v5213_v58 = vld [vmem:[#allocation9 + $0x38] sm:$0xf0]  ;;  %v6823_v61 = vor.u32 %v5773_v53, %v5205_v56  ;;  %v5211_v0 = vld [vmem:[#allocation9 + $0x28] sm:$0xf]  ;;  %v5776_v1 = vld [vmem:[#allocation9 + $0x34] sm:$0xf0] }
  0x49   :  { %913 = vmatpush.bf16.msrb.mxu3 %v6768_v59  ;;  %v6825_v62 = vor.u32 %v5774_v57, %v5213_v58  ;;  %v6828_v2 = vor.u32 %v5776_v1, %v5211_v0  ;;  %v5187_v6 = vld [vmem:[#allocation9] sm:$0xf]  ;;  %v5771_v7 = vld [vmem:[#allocation9 + $0xc] sm:$0xf0]  ;;  %v5769_v8 = vld [vmem:[#allocation9 + $0x4] sm:$0xf] }
  0x4a   :  { %872 = vmatpush.bf16.msrb.mxu0 %v6770_v60  ;;  %v6833_v10 = vor.u32 %v5771_v7, %v5187_v6  ;;  %v5189_v11 = vld [vmem:[#allocation9 + $0x10] sm:$0xf0]  ;;  %v5770_v12 = vld [vmem:[#allocation9 + $0xc] sm:$0xf]  ;;  %v5197_v15 = vld [vmem:[#allocation9 + $0x18] sm:$0xf0] }
  0x4b   :  { %886 = vmatpush.bf16.msrb.mxu1 %v6773_v63  ;;  %v6835_v16 = vor.u32 %v5769_v8, %v5189_v11  ;;  %v5735_v19 = vld [vmem:[#allocation4 + $0x30] sm:$0xff]  ;;  %v5195_v20 = vld [vmem:[#allocation9 + $0x8] sm:$0xf]  ;;  %v5772_v21 = vld [vmem:[#allocation9 + $0x14] sm:$0xf0]  ;;  %s6665_s27 = smov 8  }
  0x4c   :  { %900 = vmatpush.bf16.msrb.mxu2 %v6776_v3  ;;  %v6848_v23 = vor.u32 %v5772_v21, %v5195_v20  ;;  %v5736_v24 = vld [vmem:[#allocation4 + $0x38] sm:$0xff] }
  0x4d   :  { %914 = vmatpush.bf16.msrb.mxu3 %v6780_v4 }
  0x4e   :  { %873 = vmatpush.bf16.msrb.mxu0 %v6785_v9 }
  0x4f   :  { %887 = vmatpush.bf16.msrb.mxu1 %v6787_v13 }
  0x50   :  { %901 = vmatpush.bf16.msrb.mxu2 %v6792_v17 }
  0x51   :  { %420 = vmatmul.bf16.gmra.mxu0 %v5730_v5  ;;  %915 = vmatpush.bf16.msrb.mxu3 %v6789_v14 }
  0x52   :  { %469 = vmatmul.bf16.gmra.mxu1 %v5730_v5  ;;  %874 = vmatpush.bf16.msrb.mxu0 %v6797_v22 }
  0x53   :  { %518 = vmatmul.bf16.gmra.mxu2 %v5730_v5  ;;  %888 = vmatpush.bf16.msrb.mxu1 %v6799_v26 }
  0x54   :  { %567 = vmatmul.bf16.gmra.mxu3 %v5730_v5  ;;  %902 = vmatpush.bf16.msrb.mxu2 %v6804_v30  ;;  %v5734_v5 = vld [vmem:[#allocation4 + $0x28] sm:$0xff] }
  0x55   :  { %916 = vmatpush.bf16.msrb.mxu3 %v6801_v27 }
  0x56   :  { %875 = vmatpush.bf16.msrb.mxu0 %v6809_v35 }
  0x57   :  { %889 = vmatpush.bf16.msrb.mxu1 %v6811_v40 }
  0x58   :  { %903 = vmatpush.bf16.msrb.mxu2 %v6816_v45 }
  0x59   :  { %917 = vmatpush.bf16.msrb.mxu3 %v6813_v42 }
  0x5a   :  { %876 = vmatpush.bf16.msrb.mxu0 %v6821_v54 }
  0x5b   :  { %890 = vmatpush.bf16.msrb.mxu1 %v6823_v61 }
  0x5c   :  { %904 = vmatpush.bf16.msrb.mxu2 %v6828_v2 }
  0x5d   :  { %918 = vmatpush.bf16.msrb.mxu3 %v6825_v62 }
  0x5e   :  { %877 = vmatpush.bf16.msrb.mxu0 %v6833_v10 }
  0x5f   :  { %891 = vmatpush.bf16.msrb.mxu1 %v6835_v16 }
  0x60   :  { %905 = vmatpush.bf16.msrb.mxu2 %v6848_v23 }
  0x61   :  { %425 = vmatmul.bf16.gmra.mxu0 %v5731_v18 }
  0x62   :  { %474 = vmatmul.bf16.gmra.mxu1 %v5731_v18  ;;  %1087 = vmatpush.bf16.msra.mxu0 %v6749_v37 }
  0x63   :  { %523 = vmatmul.bf16.gmra.mxu2 %v5731_v18  ;;  %1101 = vmatpush.bf16.msra.mxu1 %v6751_v41 }
  0x64   :  { %572 = vmatmul.bf16.gmra.mxu3 %v5731_v18  ;;  %v6837_v18 = vor.u32 %v5770_v12, %v5197_v15  ;;  %1115 = vmatpush.bf16.msra.mxu2 %v6753_v47 }
  0x66   :  { %919 = vmatpush.bf16.msrb.mxu3 %v6837_v18  ;;  %1088 = vmatpush.bf16.msra.mxu0 %v6758_v49 }
  0x67   :  { %1102 = vmatpush.bf16.msra.mxu1 %v6761_v52 }
  0x68   :  { %1116 = vmatpush.bf16.msra.mxu2 %v6764_v55 }
  0x6a   :  { %1129 = vmatpush.bf16.msra.mxu3 %v6756_v48  ;;  %1089 = vmatpush.bf16.msra.mxu0 %v6770_v60 }
  0x6b   :  { %1103 = vmatpush.bf16.msra.mxu1 %v6773_v63 }
  0x6c   :  { %1117 = vmatpush.bf16.msra.mxu2 %v6776_v3 }
  0x6e   :  { %1130 = vmatpush.bf16.msra.mxu3 %v6768_v59  ;;  %1090 = vmatpush.bf16.msra.mxu0 %v6785_v9 }
  0x6f   :  { %1104 = vmatpush.bf16.msra.mxu1 %v6787_v13 }
  0x70   :  { %1118 = vmatpush.bf16.msra.mxu2 %v6792_v17 }
  0x71   :  { %430 = vmatmul.bf16.gmra.mxu0 %v5732_v31 }
  0x72   :  { %479 = vmatmul.bf16.gmra.mxu1 %v5732_v31  ;;  %1131 = vmatpush.bf16.msra.mxu3 %v6780_v4 }
  0x73   :  { %528 = vmatmul.bf16.gmra.mxu2 %v5732_v31  ;;  %1091 = vmatpush.bf16.msra.mxu0 %v6797_v22 }
  0x74   :  { %577 = vmatmul.bf16.gmra.mxu3 %v5732_v31  ;;  %1105 = vmatpush.bf16.msra.mxu1 %v6799_v26 }
  0x75   :  { %1119 = vmatpush.bf16.msra.mxu2 %v6804_v30 }
  0x76   :  { %1132 = vmatpush.bf16.msra.mxu3 %v6789_v14 }
  0x77   :  { %1092 = vmatpush.bf16.msra.mxu0 %v6809_v35 }
  0x78   :  { %1106 = vmatpush.bf16.msra.mxu1 %v6811_v40 }
  0x79   :  { %1120 = vmatpush.bf16.msra.mxu2 %v6816_v45 }
  0x7a   :  { %1133 = vmatpush.bf16.msra.mxu3 %v6801_v27 }
  0x7b   :  { %1093 = vmatpush.bf16.msra.mxu0 %v6821_v54 }
  0x7c   :  { %1107 = vmatpush.bf16.msra.mxu1 %v6823_v61 }
  0x7d   :  { %1121 = vmatpush.bf16.msra.mxu2 %v6828_v2 }
  0x7e   :  { %1134 = vmatpush.bf16.msra.mxu3 %v6813_v42 }
  0x7f   :  { %1094 = vmatpush.bf16.msra.mxu0 %v6833_v10 }
  0x80   :  { %1108 = vmatpush.bf16.msra.mxu1 %v6835_v16 }
  0x81   :  { %435 = vmatmul.bf16.gmra.mxu0 %v5733_v46  ;;  %1122 = vmatpush.bf16.msra.mxu2 %v6848_v23 }
  0x82   :  { %484 = vmatmul.bf16.gmra.mxu1 %v5733_v46  ;;  %1135 = vmatpush.bf16.msra.mxu3 %v6825_v62 }
  0x83   :  { %533 = vmatmul.bf16.gmra.mxu2 %v5733_v46 }
  0x84   :  { %582 = vmatmul.bf16.gmra.mxu3 %v5733_v46 }
  0x86   :  { %1136 = vmatpush.bf16.msra.mxu3 %v6837_v18 }
  0x91   :  { %440 = vmatmul.bf16.gmra.mxu0 %v5734_v5 }
  0x92   :  { %489 = vmatmul.bf16.gmra.mxu1 %v5734_v5 }
  0x93   :  { %538 = vmatmul.bf16.gmra.mxu2 %v5734_v5 }
  0x94   :  { %587 = vmatmul.bf16.gmra.mxu3 %v5734_v5 }
  0xa1   :  { %445 = vmatmul.bf16.gmra.mxu0 %v5735_v19 }
  0xa2   :  { %494 = vmatmul.bf16.gmra.mxu1 %v5735_v19 }
  0xa3   :  { %543 = vmatmul.bf16.gmra.mxu2 %v5735_v19 }
  0xa4   :  { %592 = vmatmul.bf16.gmra.mxu3 %v5735_v19 }
  0xb1   :  { %450 = vmatmul.bf16.gmra.mxu0 %v5736_v24 }
  0xb2   :  { %499 = vmatmul.bf16.gmra.mxu1 %v5736_v24 }
  0xb3   :  { %548 = vmatmul.bf16.gmra.mxu2 %v5736_v24 }
  0xb4   :  { %597 = vmatmul.bf16.gmra.mxu3 %v5736_v24 }
  0xbe   :  { %v6877_v25 = vpop.f32.mrf.mxu0 }
  0xbf   :  { %v6879_v28 = vpop.f32.mrf.mxu1 }
  0xc1   :  { %878 = vmatmul.bf16.vlgmr.msrb.gmra.mxu0 %v8763_v29 }
  0xc2   :  { %892 = vmatmul.bf16.vlgmr.msrb.gmra.mxu1 %v8763_v29  ;;  %1305 = vmatpush.bf16.msrb.mxu0 %v6749_v37 }
  0xc3   :  { %906 = vmatmul.bf16.vlgmr.msrb.gmra.mxu2 %v8763_v29  ;;  %1319 = vmatpush.bf16.msrb.mxu1 %v6751_v41 }
  0xc4   :  { %920 = vmatmul.bf16.vlgmr.msrb.gmra.mxu3 %v8763_v29  ;;  %1333 = vmatpush.bf16.msrb.mxu2 %v6753_v47 }
  0xc5   :  { %1347 = vmatpush.bf16.msrb.mxu3 %v6756_v48 }
  0xc6   :  { %v6888_v31 = vpop.f32.mrf.mxu2  ;;  %v6893_v33 = vpop.f32.mrf.mxu0  ;;  %1306 = vmatpush.bf16.msrb.mxu0 %v6758_v49 }
  0xc7   :  { %v6891_v32 = vpop.f32.mrf.mxu3  ;;  %v6895_v34 = vpop.f32.mrf.mxu1  ;;  %1320 = vmatpush.bf16.msrb.mxu1 %v6761_v52 }
  0xc8   :  { %1334 = vmatpush.bf16.msrb.mxu2 %v6764_v55 }
  0xc9   :  { %1348 = vmatpush.bf16.msrb.mxu3 %v6768_v59 }
  0xca   :  { %1307 = vmatpush.bf16.msrb.mxu0 %v6770_v60 }
  0xcb   :  { %1321 = vmatpush.bf16.msrb.mxu1 %v6773_v63 }
  0xcc   :  { %1335 = vmatpush.bf16.msrb.mxu2 %v6776_v3 }
  0xcd   :  { %1349 = vmatpush.bf16.msrb.mxu3 %v6780_v4 }
  0xce   :  { %v6904_v36 = vpop.f32.mrf.mxu2  ;;  %v6909_v39 = vpop.f32.mrf.mxu0  ;;  %1308 = vmatpush.bf16.msrb.mxu0 %v6785_v9 }
  0xcf   :  { %v6907_v38 = vpop.f32.mrf.mxu3  ;;  %v6911_v43 = vpop.f32.mrf.mxu1  ;;  %1322 = vmatpush.bf16.msrb.mxu1 %v6787_v13 }
  0xd0   :  { %8798 = vst [vmem:[#allocation22_spill] sm:$0xff] %v6911_v43  ;;  %1336 = vmatpush.bf16.msrb.mxu2 %v6792_v17 }
  0xd1   :  { %1350 = vmatpush.bf16.msrb.mxu3 %v6789_v14 }
  0xd2   :  { %1309 = vmatpush.bf16.msrb.mxu0 %v6797_v22 }
  0xd3   :  { %1323 = vmatpush.bf16.msrb.mxu1 %v6799_v26 }
  0xd4   :  { %1337 = vmatpush.bf16.msrb.mxu2 %v6804_v30 }
  0xd5   :  { %1351 = vmatpush.bf16.msrb.mxu3 %v6801_v27 }
  0xd6   :  { %v6920_v44 = vpop.f32.mrf.mxu2  ;;  %v6925_v50 = vpop.f32.mrf.mxu0  ;;  %1310 = vmatpush.bf16.msrb.mxu0 %v6809_v35 }
  0xd7   :  { %8799 = vst [vmem:[#allocation23_spill] sm:$0xff] %v6920_v44  ;;  %v6923_v46 = vpop.f32.mrf.mxu3  ;;  %v6927_v51 = vpop.f32.mrf.mxu1  ;;  %1324 = vmatpush.bf16.msrb.mxu1 %v6811_v40 }
  0xd8   :  { %8800 = vst [vmem:[#allocation24_spill] sm:$0xff] %v6923_v46  ;;  %1338 = vmatpush.bf16.msrb.mxu2 %v6816_v45 }
  0xd9   :  { %8801 = vst [vmem:[#allocation25_spill] sm:$0xff] %v6925_v50  ;;  %1352 = vmatpush.bf16.msrb.mxu3 %v6813_v42 }
  0xda   :  { %8802 = vst [vmem:[#allocation26_spill] sm:$0xff] %v6927_v51  ;;  %1311 = vmatpush.bf16.msrb.mxu0 %v6821_v54 }
  0xdb   :  { %1325 = vmatpush.bf16.msrb.mxu1 %v6823_v61 }
  0xdc   :  { %1339 = vmatpush.bf16.msrb.mxu2 %v6828_v2 }
  0xdd   :  { %1353 = vmatpush.bf16.msrb.mxu3 %v6825_v62 }
  0xde   :  { %v6936_v53 = vpop.f32.mrf.mxu2  ;;  %v6941_v57 = vpop.f32.mrf.mxu0  ;;  %1312 = vmatpush.bf16.msrb.mxu0 %v6833_v10 }
  0xdf   :  { %8803 = vst [vmem:[#allocation27_spill] sm:$0xff] %v6936_v53  ;;  %v6939_v56 = vpop.f32.mrf.mxu3  ;;  %v6943_v58 = vpop.f32.mrf.mxu1  ;;  %1326 = vmatpush.bf16.msrb.mxu1 %v6835_v16 }
  0xe0   :  { %8804 = vst [vmem:[#allocation28_spill] sm:$0xff] %v6939_v56  ;;  %1340 = vmatpush.bf16.msrb.mxu2 %v6848_v23 }
  0xe1   :  { %8805 = vst [vmem:[#allocation29_spill] sm:$0xff] %v6941_v57  ;;  %1354 = vmatpush.bf16.msrb.mxu3 %v6837_v18 }
  0xe2   :  { %8806 = vst [vmem:[#allocation30_spill] sm:$0xff] %v6943_v58 }
  0xe6   :  { %v6949_v0 = vpop.f32.mrf.mxu2  ;;  %v6953_v5 = vpop.f32.mrf.mxu0 }
  0xe7   :  { %8807 = vst [vmem:[#allocation31_spill] sm:$0xff] %v6949_v0  ;;  %v6951_v1 = vpop.f32.mrf.mxu3  ;;  %v6955_v6 = vpop.f32.mrf.mxu1 }
  0xe8   :  { %8808 = vst [vmem:[#allocation32_spill] sm:$0xff] %v6951_v1 }
  0xe9   :  { %8809 = vst [vmem:[#allocation33_spill] sm:$0xff] %v6953_v5 }
  0xea   :  { %8810 = vst [vmem:[#allocation34_spill] sm:$0xff] %v6955_v6 }
  0xee   :  { %v6957_v7 = vpop.f32.mrf.mxu2  ;;  %v6961_v11 = vpop.f32.mrf.mxu0 }
  0xef   :  { %8811 = vst [vmem:[#allocation35_spill] sm:$0xff] %v6957_v7  ;;  %v6959_v8 = vpop.f32.mrf.mxu3  ;;  %v6963_v12 = vpop.f32.mrf.mxu1 }
  0xf0   :  { %8812 = vst [vmem:[#allocation36_spill] sm:$0xff] %v6959_v8 }
  0xf1   :  { %8813 = vst [vmem:[#allocation37_spill] sm:$0xff] %v6961_v11 }
  0xf2   :  { %8814 = vst [vmem:[#allocation38_spill] sm:$0xff] %v6963_v12 }
  0xf6   :  { %v6965_v15 = vpop.f32.mrf.mxu2  ;;  %v6969_v20 = vpop.f32.mrf.mxu0 }
  0xf7   :  { %8815 = vst [vmem:[#allocation39_spill] sm:$0xff] %v6965_v15  ;;  %v6967_v19 = vpop.f32.mrf.mxu3  ;;  %v6971_v21 = vpop.f32.mrf.mxu1 }
  0xf8   :  { %8816 = vst [vmem:[#allocation40_spill] sm:$0xff] %v6967_v19 }
  0xf9   :  { %8817 = vst [vmem:[#allocation41_spill] sm:$0xff] %v6969_v20 }
  0xfa   :  { %8818 = vst [vmem:[#allocation42_spill] sm:$0xff] %v6971_v21 }
  0xfe   :  { %v6973_v24 = vpop.f32.mrf.mxu2  ;;  %v6977_v0 = vpop.f32.mrf.mxu0 }
  0xff   :  { %8819 = vst [vmem:[#allocation43_spill] sm:$0xff] %v6973_v24  ;;  %v6975_v29 = vpop.f32.mrf.mxu3  ;;  %v6979_v7 = vpop.f32.mrf.mxu1 }
 0x100   :  { %8820 = vst [vmem:[#allocation44_spill] sm:$0xff] %v6975_v29 }
 0x101   :  { %8821 = vst [vmem:[#allocation45_spill] sm:$0xff] %v6977_v0 }
 0x102   :  { %8822 = vst [vmem:[#allocation46_spill] sm:$0xff] %v6979_v7 }
 0x106   :  { %v6981_v8 = vpop.f32.mrf.mxu2  ;;  %v6985_v12 = vpop.f32.mrf.mxu0 }
 0x107   :  { %8823 = vst [vmem:[#allocation47_spill] sm:$0xff] %v6981_v8  ;;  %v6983_v11 = vpop.f32.mrf.mxu3  ;;  %v6987_v15 = vpop.f32.mrf.mxu1 }
 0x108   :  { %8824 = vst [vmem:[#allocation48_spill] sm:$0xff] %v6983_v11 }
 0x109   :  { %8825 = vst [vmem:[#allocation49_spill] sm:$0xff] %v6985_v12 }
 0x10a   :  { %8826 = vst [vmem:[#allocation50_spill] sm:$0xff] %v6987_v15 }
 0x10e   :  { %v6989_v19 = vpop.f32.mrf.mxu2  ;;  %v6993_v21 = vpop.f32.mrf.mxu0 }
 0x10f   :  { %8827 = vst [vmem:[#allocation51_spill] sm:$0xff] %v6989_v19  ;;  %v6991_v20 = vpop.f32.mrf.mxu3  ;;  %v6995_v24 = vpop.f32.mrf.mxu1 }
 0x110   :  { %8828 = vst [vmem:[#allocation52_spill] sm:$0xff] %v6991_v20 }
 0x111   :  { %8829 = vst [vmem:[#allocation53_spill] sm:$0xff] %v6993_v21 }
 0x112   :  { %8830 = vst [vmem:[#allocation54_spill] sm:$0xff] %v6995_v24 }
 0x116   :  { %v6997_v29 = vpop.f32.mrf.mxu2  ;;  %v7001_v7 = vpop.f32.mrf.mxu0 }
 0x117   :  { %8831 = vst [vmem:[#allocation55_spill] sm:$0xff] %v6997_v29  ;;  %v6999_v0 = vpop.f32.mrf.mxu3  ;;  %v7003_v8 = vpop.f32.mrf.mxu1 }
 0x118   :  { %8832 = vst [vmem:[#allocation56_spill] sm:$0xff] %v6999_v0 }
 0x119   :  { %8833 = vst [vmem:[#allocation57_spill] sm:$0xff] %v7001_v7 }
 0x11a   :  { %8834 = vst [vmem:[#allocation58_spill] sm:$0xff] %v7003_v8 }
 0x11e   :  { %v7005_v11 = vpop.f32.mrf.mxu2  ;;  %v7009_v15 = vpop.f32.mrf.mxu0 }
 0x11f   :  { %8835 = vst [vmem:[#allocation59_spill] sm:$0xff] %v7005_v11  ;;  %v7007_v12 = vpop.f32.mrf.mxu3  ;;  %v7011_v19 = vpop.f32.mrf.mxu1 }
 0x120   :  { %8836 = vst [vmem:[#allocation60_spill] sm:$0xff] %v7007_v12  ;;  %v189_v12 = vld [vmem:[#allocation10] sm:$0xf] }
 0x121   :  { %8837 = vst [vmem:[#allocation61_spill] sm:$0xff] %v7009_v15  ;;  %v7047_v5 = vperm.slane %v189_v12, 3  ;;  %v7057_v53 = vperm.slane %v189_v12, 2 }
 0x122   :  { %8838 = vst [vmem:[#allocation62_spill] sm:$0xff] %v7011_v19 }
 0x123   :  { %8854 = vst [vmem:[#allocation78_spill] sm:$0xff] %v7047_v5 }
 0x124   :  { %8856 = vst [vmem:[#allocation80_spill] sm:$0xff] %v7057_v53 }
 0x126   :  { %v7013_v20 = vpop.f32.mrf.mxu2  ;;  %v7017_v24 = vpop.f32.mrf.mxu0 }
 0x127   :  { %8839 = vst [vmem:[#allocation63_spill] sm:$0xff] %v7013_v20  ;;  %v7015_v21 = vpop.f32.mrf.mxu3  ;;  %v7019_v29 = vpop.f32.mrf.mxu1 }
 0x128   :  { %8840 = vst [vmem:[#allocation64_spill] sm:$0xff] %v7015_v21  ;;  %v7035_v21 = vperm.slane %v189_v12, 0 }
 0x129   :  { %8841 = vst [vmem:[#allocation65_spill] sm:$0xff] %v7017_v24  ;;  %v7037_v24 = vperm.slane %v189_v12, 1 }
 0x12a   :  { %8842 = vst [vmem:[#allocation66_spill] sm:$0xff] %v7019_v29 }
 0x12b   :  { %8850 = vst [vmem:[#allocation74_spill] sm:$0xff] %v7035_v21 }
 0x12c   :  { %8851 = vst [vmem:[#allocation75_spill] sm:$0xff] %v7037_v24 }
 0x12e   :  { %v7023_v7 = vpop.f32.mrf.mxu0  ;;  %v7027_v11 = vpop.f32.mrf.mxu2 }
 0x12f   :  { %v7021_v0 = vpop.f32.mrf.mxu3  ;;  %8844 = vst [vmem:[#allocation68_spill] sm:$0xff] %v7023_v7  ;;  %v7025_v8 = vpop.f32.mrf.mxu1  ;;  %v417_v7 = vadd.f32 %v6877_v25, %v7035_v21  ;;  %v564_v25 = vadd.f32 %v6891_v32, %v7047_v5 }
 0x130   :  { %8843 = vst [vmem:[#allocation67_spill] sm:$0xff] %v7021_v0 }
 0x131   :  { %8845 = vst [vmem:[#allocation69_spill] sm:$0xff] %v7025_v8  ;;  %v466_v8 = vadd.f32 %v6879_v28, %v7037_v24  ;;  %v419_v28 = vadd.f32 %v6893_v33, %v7035_v21  ;;  %v566_v33 = vadd.f32 %v6907_v38, %v7047_v5 }
 0x132   :  { %8846 = vst [vmem:[#allocation70_spill] sm:$0xff] %v7027_v11 }
 0x136   :  { %v7031_v19 = vpop.f32.mrf.mxu0  ;;  %v7039_v29 = vpop.f32.mrf.mxu2 }
 0x137   :  { %v7029_v15 = vpop.f32.mrf.mxu3  ;;  %8848 = vst [vmem:[#allocation72_spill] sm:$0xff] %v7031_v19  ;;  %v7033_v20 = vpop.f32.mrf.mxu1 }
 0x138   :  { %8847 = vst [vmem:[#allocation71_spill] sm:$0xff] %v7029_v15 }
 0x139   :  { %8849 = vst [vmem:[#allocation73_spill] sm:$0xff] %v7033_v20 }
 0x13a   :  { %8852 = vst [vmem:[#allocation76_spill] sm:$0xff] %v7039_v29 }
 0x13e   :  { %v879_v0 = vpop.f32.mrf.mxu0  ;;  %v7049_v58 = vpop.f32.mrf.mxu2 }
 0x13f   :  { %v7045_v11 = vpop.f32.mrf.mxu3  ;;  %v926_v15 = vadd.f32 %v879_v0, %v417_v7  ;;  %v893_v6 = vpop.f32.mrf.mxu1  ;;  %8855 = vst [vmem:[#allocation79_spill] sm:$0xff] %v7049_v58 }
 0x140   :  { %8853 = vst [vmem:[#allocation77_spill] sm:$0xff] %v7045_v11  ;;  %v927_v19 = vadd.f32 %v893_v6, %v466_v8  ;;  %v468_v11 = vadd.f32 %v6895_v34, %v7037_v24 }
 0x141   :  { %v5313_v20 = vmul.f32 -1.442695, %v926_v15 }
 0x142   :  { %v5315_v1 = vmul.f32 -1.442695, %v927_v19 }
 0x143   :  { %5937 = vpow2.f32 %v5313_v20 }
 0x144   :  { %5939 = vpow2.f32 %v5315_v1 }
 0x146   :  { %v881_v7 = vpop.f32.mrf.mxu0  ;;  %v907_v34 = vpop.f32.mrf.mxu2 }
 0x147   :  { %v921_v0 = vpop.f32.mrf.mxu3  ;;  %v930_v8 = vadd.f32 %v881_v7, %v419_v28  ;;  %v895_v29 = vpop.f32.mrf.mxu1 }
 0x148   :  { %v929_v6 = vadd.f32 %v921_v0, %v564_v25  ;;  %v931_v15 = vadd.f32 %v895_v29, %v468_v11  ;;  %v515_v29 = vadd.f32 %v6888_v31, %v7057_v53 }
 0x149   :  { %v5938_v19 = vpop.eup %5937  ;;  %v5314_v1 = vmul.f32 -1.442695, %v930_v8 }
 0x14a   :  { %v5317_v20 = vmul.f32 -1.442695, %v929_v6  ;;  %v5940_v57 = vpop.eup %5939  ;;  %v940_v58 = vadd.f32 1.0, %v5938_v19  ;;  %v5316_v44 = vmul.f32 -1.442695, %v931_v15  ;;  %v928_v0 = vadd.f32 %v907_v34, %v515_v29 }
 0x14b   :  { %v978_v32 = vadd.f32 1.0, %v5940_v57 }
 0x14c   :  { %5941 = vpow2.f32 %v5317_v20  ;;  %vm947_vm2 = vweird.f32 %v940_v58 }
 0x14d   :  { %5943 = vrcp.f32 %v940_v58  ;;  %vm985_vm3 = vweird.f32 %v978_v32 }
 0x14e   :  { %5945 = vrcp.f32 %v978_v32 }
 0x14f   :  { %5947 = vpow2.f32 %v5314_v1  ;;  %v923_v25 = vpop.f32.mrf.mxu3 }
 0x150   :  { %5949 = vpow2.f32 %v5316_v44  ;;  %v933_v11 = vadd.f32 %v923_v25, %v566_v33  ;;  %v951_v44 = vand.u32 2147483647, %v940_v58  ;;  %v953_v33 = vand.u32 2147483648, %v940_v58 }
 0x151   :  { %v991_v25 = vand.u32 2147483648, %v978_v32 }
 0x152   :  { %v5942_v28 = vpop.eup %5941  ;;  %v5318_v12 = vmul.f32 -1.442695, %v933_v11  ;;  %vm952_vm5 = vcmp.eq.f32.partialorder %v951_v44, 8.507059e+37 }
 0x153   :  { %v5944_v7 = vpop.eup %5943  ;;  %v7063_v57 = vadd.f32 1.0, %v5942_v28  ;;  %v989_v28 = vand.u32 2147483647, %v978_v32  ;;  %v992_v51 = vor.u32 1.1754944e-38, %v991_v25 }
 0x154   :  { %v5946_v6 = vpop.eup %5945  ;;  %v943_v8 = vmul.f32 %v5944_v7, %v940_v58  ;;  %5951 = vpow2.f32 %v5318_v12  ;;  %vm948_vm0 = vweird.f32 %v5944_v7 }
 0x155   :  { %v5948_v15 = vpop.eup %5947  ;;  %v981_v38 = vmul.f32 %v5946_v6, %v978_v32  ;;  %5953 = vrcp.f32 %v7063_v57  ;;  %vm986_vm1 = vweird.f32 %v5946_v6  ;;  %vm949_vm4 = vmor %vm947_vm2, %vm948_vm0  ;;  %vm990_vm7 = vcmp.eq.f32.partialorder %v989_v28, 8.507059e+37 }
 0x156   :  { %v5950_v19 = vpop.eup %5949  ;;  %v944_v20 = vsub.f32 1.0, %v943_v8  ;;  %5955 = vtanh.f32 %v928_v0  ;;  %v7066_v1 = vadd.f32 1.0, %v5948_v15  ;;  %v954_v15 = vor.u32 1.1754944e-38, %v953_v33  ;;  %vm987_vm6 = vmor %vm985_vm3, %vm986_vm1 }
 0x157   :  { %v982_v31 = vsub.f32 1.0, %v981_v38  ;;  %v7068_v34 = vadd.f32 1.0, %v5950_v19  ;;  %v909_v19 = vpop.f32.mrf.mxu2  ;;  %vm1025_vm1 = vweird.f32 %v7063_v57 }
 0x158   :  { %v945_v29 = vmul.f32 %v5944_v7, %v944_v20  ;;  %5957 = vrcp.f32 %v7066_v1  ;;  %vm962_vm10 = vweird.f32 %v7066_v1 }
 0x159   :  { %v983_v11 = vmul.f32 %v5946_v6, %v982_v31  ;;  %5959 = vrcp.f32 %v7068_v34  ;;  %v517_v31 = vadd.f32 %v6904_v36, %v7057_v53  ;;  %v1006_v28 = vand.u32 2147483648, %v7068_v34 }
 0x15a   :  { %v5952_v12 = vpop.eup %5951  ;;  %v946_v8 = vadd.f32 %v5944_v7, %v945_v29  ;;  %vm1000_vm11 = vweird.f32 %v7068_v34 }
 0x15b   :  { %v7072_v0 = vpop.eup %5953  ;;  %v984_v38 = vadd.f32 %v5946_v6, %v983_v11  ;;  %v7074_v56 = vadd.f32 1.0, %v5952_v12  ;;  %v932_v12 = vadd.f32 %v909_v19, %v517_v31 }
 0x15c   :  { %v5956_v20 = vpop.eup %5955  ;;  %v950_v50 = vsel %vm949_vm4, %v5944_v7, %v946_v8  ;;  %v1021_v32 = vmul.f32 %v7072_v0, %v7063_v57  ;;  %v968_v8 = vand.u32 2147483648, %v7066_v1  ;;  %vm1026_vm13 = vweird.f32 %v7072_v0 }
 0x15d   :  { %v955_v29 = vsel %vm952_vm5, %v954_v15, %v950_v50  ;;  %v988_v58 = vsel %vm987_vm6, %v5946_v6, %v984_v38  ;;  %5961 = vrcp.f32 %v7074_v56  ;;  %v966_v15 = vand.u32 2147483647, %v7066_v1  ;;  %vm1027_vm2 = vmor %vm1025_vm1, %vm1026_vm13 }
 0x15e   :  { %v5958_v33 = vpop.eup %5957  ;;  %v993_v11 = vsel %vm990_vm7, %v992_v51, %v988_v58  ;;  %v1052_v46 = vmul.f32 %v5956_v20, %v955_v29  ;;  %v1022_v50 = vsub.f32 1.0, %v1021_v32  ;;  %5963 = vtanh.f32 %v932_v12 }
 0x15f   :  { %v5960_v5 = vpop.eup %5959  ;;  %v1050_v43 = vmul.f32 0.0, %v993_v11  ;;  %v958_v36 = vmul.f32 %v5958_v33, %v7066_v1  ;;  %vm963_vm8 = vweird.f32 %v5958_v33  ;;  %v1004_v20 = vand.u32 2147483647, %v7068_v34 }
 0x160   :  { %v996_v7 = vmul.f32 %v5960_v5, %v7068_v34  ;;  %vm1001_vm9 = vweird.f32 %v5960_v5  ;;  %v1007_v29 = vor.u32 1.1754944e-38, %v1006_v28  ;;  %vm964_vm12 = vmor %vm962_vm10, %vm963_vm8  ;;  %v969_v58 = vor.u32 1.1754944e-38, %v968_v8 }
 0x161   :  { %v7084_v44 = vadd.f32 %v1052_v46, %v1050_v43  ;;  %v959_v6 = vsub.f32 1.0, %v958_v36  ;;  %v1023_v43 = vmul.f32 %v7072_v0, %v1022_v50  ;;  %vm967_vm14 = vcmp.eq.f32.partialorder %v966_v15, 8.507059e+37  ;;  %vm1002_vm15 = vmor %vm1000_vm11, %vm1001_vm9 }
 0x162   :  { %v997_v25 = vsub.f32 1.0, %v996_v7  ;;  %vm1005_vm0 = vcmp.eq.f32.partialorder %v1004_v20, 8.507059e+37  ;;  %v1031_v28 = vand.u32 2147483648, %v7063_v57  ;;  %vm1040_vm4 = vweird.f32 %v7074_v56 }
 0x163   :  { %v960_v51 = vmul.f32 %v5958_v33, %v959_v6  ;;  %v5962_v38 = vpop.eup %5961  ;;  %5965 = vtanh.f32 %v7084_v44  ;;  %v1024_v34 = vadd.f32 %v7072_v0, %v1023_v43  ;;  %v1046_v43 = vand.u32 2147483648, %v7074_v56 }
 0x164   :  { %v998_v19 = vmul.f32 %v5960_v5, %v997_v25  ;;  %v1036_v31 = vmul.f32 %v5962_v38, %v7074_v56  ;;  %v5964_v36 = vpop.eup %5963  ;;  %vm1041_vm3 = vweird.f32 %v5962_v38  ;;  %v1032_v20 = vor.u32 1.1754944e-38, %v1031_v28 }
 0x165   :  { %v961_v46 = vadd.f32 %v5958_v33, %v960_v51  ;;  %vm1042_vm6 = vmor %vm1040_vm4, %vm1041_vm3 }
 0x166   :  { %v999_v32 = vadd.f32 %v5960_v5, %v998_v19  ;;  %v1037_v12 = vsub.f32 1.0, %v1036_v31 }
 0x167   :  { %v965_v11 = vsel %vm964_vm12, %v5958_v33, %v961_v46  ;;  %v1029_v33 = vand.u32 2147483647, %v7063_v57  ;;  %v1044_v57 = vand.u32 2147483647, %v7074_v56  ;;  %v422_v56 = vadd.f32 %v6909_v39, %v7035_v21 }
 0x168   :  { %v970_v7 = vsel %vm967_vm14, %v969_v58, %v965_v11  ;;  %v1003_v50 = vsel %vm1002_vm15, %v5960_v5, %v999_v32  ;;  %v1038_v25 = vmul.f32 %v5962_v38, %v1037_v12  ;;  %v1028_v5 = vsel %vm1027_vm2, %v7072_v0, %v1024_v34 }
 0x169   :  { %v1008_v1 = vsel %vm1005_vm0, %v1007_v29, %v1003_v50  ;;  %v1053_v6 = vmul.f32 %v5964_v36, %v970_v7  ;;  %v5966_v19 = vpop.eup %5965  ;;  %vm1030_vm5 = vcmp.eq.f32.partialorder %v1029_v33, 8.507059e+37  ;;  %v1047_v58 = vor.u32 1.1754944e-38, %v1046_v43  ;;  %v8858_v43 = vld [vmem:[#allocation78_spill] sm:$0xff] }
 0x16a   :  { %v1051_v8 = vmul.f32 0.0, %v1008_v1  ;;  %v1039_v15 = vadd.f32 %v5962_v38, %v1038_v25  ;;  %v1033_v46 = vsel %vm1030_vm5, %v1032_v20, %v1028_v5  ;;  %vm1045_vm7 = vcmp.eq.f32.partialorder %v1044_v57, 8.507059e+37  ;;  %v8859_v57 = vld [vmem:[#allocation24_spill] sm:$0xff] }
 0x16b   :  { %v1058_v29 = vmul.f32 %v5966_v19, %v1033_v46  ;;  %v569_v46 = vadd.f32 %v8859_v57, %v8858_v43 }
 0x16c   :  { %v7102_v51 = vadd.f32 %v1053_v6, %v1051_v8  ;;  %v1043_v31 = vsel %vm1042_vm6, %v5962_v38, %v1039_v15  ;;  %v8857_v38 = vld [vmem:[#allocation22_spill] sm:$0xff] }
 0x16d   :  { %v1048_v32 = vsel %vm1045_vm7, %v1047_v58, %v1043_v31  ;;  %v1060_v12 = vpack.c.bf16 %v1058_v29, %v1058_v29  ;;  %v1064_v7 = vmax.f32 %v1058_v29, 0.0  ;;  %v471_v28 = vadd.f32 %v8857_v38, %v7037_v24  ;;  %v8860_v31 = vld [vmem:[#allocation25_spill] sm:$0xff]  ;;  %v8861_v58 = vld [vmem:[#allocation26_spill] sm:$0xff] }
 0x16e   :  { %5967 = vtanh.f32 %v7102_v51  ;;  %v424_v29 = vadd.f32 %v8860_v31, %v7035_v21  ;;  %v473_v39 = vadd.f32 %v8861_v58, %v7037_v24 }
 0x16f   :  { %v1083_v6 = vunpack.c.l.b16 %v1060_v12 }
 0x174   :  { %v5968_v0 = vpop.eup %5967 }
 0x175   :  { %v1059_v11 = vmul.f32 %v5968_v0, %v1048_v32 }
 0x177   :  { %v1061_v36 = vpack.c.bf16 %v1059_v11, %v1059_v11  ;;  %v1065_v50 = vmax.f32 %v1059_v11, 0.0 }
 0x179   :  { %v5884_v1 = vpack.c.bf16 %v1065_v50, %v1064_v7  ;;  %v1084_v25 = vunpack.c.l.b16 %v1061_v36 }
 0x17b   :  { %5885 = vst [vmem:[#allocation3 + $0x30] sm:$0xff] %v5884_v1   ;;  %v1085_v34 = vpack.c.b16 %v1084_v25, %v1083_v6 }
 0x17d   :  { %1095 = vmatmul.bf16.vlgmr.msra.gmra.mxu0 %v1085_v34  ;;  %1109 = vmatmul.bf16.vlgmr.msra.gmra.mxu1 %v1085_v34 }
 0x17e   :  { %1123 = vmatmul.bf16.vlgmr.msra.gmra.mxu2 %v1085_v34  ;;  %1137 = vmatmul.bf16.vlgmr.msra.gmra.mxu3 %v1085_v34 }
 0x17f   :  { %1523 = vmatpush.bf16.msra.mxu0 %v6749_v37  ;;  %1537 = vmatpush.bf16.msra.mxu1 %v6751_v41 }
 0x180   :  { %1551 = vmatpush.bf16.msra.mxu2 %v6753_v47  ;;  %1565 = vmatpush.bf16.msra.mxu3 %v6756_v48 }
 0x183   :  { %1524 = vmatpush.bf16.msra.mxu0 %v6758_v49  ;;  %1538 = vmatpush.bf16.msra.mxu1 %v6761_v52 }
 0x184   :  { %1552 = vmatpush.bf16.msra.mxu2 %v6764_v55  ;;  %1566 = vmatpush.bf16.msra.mxu3 %v6768_v59 }
 0x187   :  { %1525 = vmatpush.bf16.msra.mxu0 %v6770_v60  ;;  %1539 = vmatpush.bf16.msra.mxu1 %v6773_v63 }
 0x188   :  { %1553 = vmatpush.bf16.msra.mxu2 %v6776_v3  ;;  %1567 = vmatpush.bf16.msra.mxu3 %v6780_v4 }
 0x18b   :  { %1526 = vmatpush.bf16.msra.mxu0 %v6785_v9  ;;  %1540 = vmatpush.bf16.msra.mxu1 %v6787_v13 }
 0x18c   :  { %1554 = vmatpush.bf16.msra.mxu2 %v6792_v17  ;;  %1568 = vmatpush.bf16.msra.mxu3 %v6789_v14 }
 0x18f   :  { %1527 = vmatpush.bf16.msra.mxu0 %v6797_v22  ;;  %1541 = vmatpush.bf16.msra.mxu1 %v6799_v26 }
 0x190   :  { %1555 = vmatpush.bf16.msra.mxu2 %v6804_v30  ;;  %1569 = vmatpush.bf16.msra.mxu3 %v6801_v27 }
 0x193   :  { %1528 = vmatpush.bf16.msra.mxu0 %v6809_v35  ;;  %1542 = vmatpush.bf16.msra.mxu1 %v6811_v40 }
 0x194   :  { %1556 = vmatpush.bf16.msra.mxu2 %v6816_v45  ;;  %1570 = vmatpush.bf16.msra.mxu3 %v6813_v42 }
 0x197   :  { %1529 = vmatpush.bf16.msra.mxu0 %v6821_v54  ;;  %1543 = vmatpush.bf16.msra.mxu1 %v6823_v61 }
 0x198   :  { %1557 = vmatpush.bf16.msra.mxu2 %v6828_v2  ;;  %1571 = vmatpush.bf16.msra.mxu3 %v6825_v62 }
 0x19b   :  { %1530 = vmatpush.bf16.msra.mxu0 %v6833_v10  ;;  %1544 = vmatpush.bf16.msra.mxu1 %v6835_v16 }
 0x19c   :  { %1558 = vmatpush.bf16.msra.mxu2 %v6848_v23  ;;  %1572 = vmatpush.bf16.msra.mxu3 %v6837_v18 }
 0x1fa   :  { %v1096_v8 = vpop.f32.mrf.mxu0  ;;  %v1110_v33 = vpop.f32.mrf.mxu1 }
 0x1fb   :  { %v1143_v5 = vadd.f32 %v1096_v8, %v422_v56  ;;  %v1144_v15 = vadd.f32 %v1110_v33, %v471_v28  ;;  %v8862_v8 = vld [vmem:[#allocation28_spill] sm:$0xff] }
 0x1fc   :  { %v571_v33 = vadd.f32 %v8862_v8, %v8858_v43 }
 0x1fd   :  { %v5319_v19 = vmul.f32 -1.442695, %v1143_v5  ;;  %v5321_v20 = vmul.f32 -1.442695, %v1144_v15  ;;  %v8863_v15 = vld [vmem:[#allocation23_spill] sm:$0xff] }
 0x1ff   :  { %5969 = vpow2.f32 %v5319_v19  ;;  %v520_v19 = vadd.f32 %v8863_v15, %v7057_v53 }
 0x200   :  { %5971 = vpow2.f32 %v5321_v20 }
 0x201   :  { %v1138_v0 = vpop.f32.mrf.mxu3  ;;  %v1124_v28 = vpop.f32.mrf.mxu2 }
 0x202   :  { %v1146_v32 = vadd.f32 %v1138_v0, %v569_v46  ;;  %v1098_v11 = vpop.f32.mrf.mxu0  ;;  %v1112_v12 = vpop.f32.mrf.mxu1  ;;  %v1145_v31 = vadd.f32 %v1124_v28, %v520_v19 }
 0x203   :  { %v1147_v36 = vadd.f32 %v1098_v11, %v424_v29  ;;  %v1148_v7 = vadd.f32 %v1112_v12, %v473_v39 }
 0x204   :  { %v5323_v50 = vmul.f32 -1.442695, %v1146_v32 }
 0x205   :  { %v5970_v1 = vpop.eup %5969  ;;  %v5320_v6 = vmul.f32 -1.442695, %v1147_v36  ;;  %v5322_v56 = vmul.f32 -1.442695, %v1148_v7  ;;  %v8864_v7 = vld [vmem:[#allocation27_spill] sm:$0xff] }
 0x206   :  { %v5972_v25 = vpop.eup %5971  ;;  %v1157_v34 = vadd.f32 1.0, %v5970_v1  ;;  %5973 = vpow2.f32 %v5323_v50  ;;  %v522_v50 = vadd.f32 %v8864_v7, %v7057_v53 }
 0x207   :  { %v1195_v38 = vadd.f32 1.0, %v5972_v25  ;;  %5975 = vpow2.f32 %v5320_v6 }
 0x208   :  { %5977 = vrcp.f32 %v1157_v34  ;;  %v1168_v28 = vand.u32 2147483647, %v1157_v34  ;;  %v1170_v8 = vand.u32 2147483648, %v1157_v34  ;;  %vm1164_vm10 = vweird.f32 %v1157_v34 }
 0x209   :  { %5979 = vrcp.f32 %v1195_v38  ;;  %v1140_v5 = vpop.f32.mrf.mxu3  ;;  %v1126_v25 = vpop.f32.mrf.mxu2  ;;  %v1206_v19 = vand.u32 2147483647, %v1195_v38  ;;  %vm1202_vm11 = vweird.f32 %v1195_v38 }
 0x20a   :  { %5981 = vpow2.f32 %v5322_v56  ;;  %v1150_v20 = vadd.f32 %v1140_v5, %v571_v33  ;;  %v1208_v33 = vand.u32 2147483648, %v1195_v38  ;;  %vm1169_vm13 = vcmp.eq.f32.partialorder %v1168_v28, 8.507059e+37 }
 0x20b   :  { %vm1207_vm15 = vcmp.eq.f32.partialorder %v1206_v19, 8.507059e+37 }
 0x20c   :  { %v5974_v57 = vpop.eup %5973  ;;  %v5324_v0 = vmul.f32 -1.442695, %v1150_v20  ;;  %v1149_v20 = vadd.f32 %v1126_v25, %v522_v50 }
 0x20d   :  { %v5976_v46 = vpop.eup %5975  ;;  %v7155_v29 = vadd.f32 1.0, %v5974_v57 }
 0x20e   :  { %v5978_v58 = vpop.eup %5977  ;;  %v7157_v39 = vadd.f32 1.0, %v5976_v46 }
 0x20f   :  { %v5980_v32 = vpop.eup %5979  ;;  %v1160_v11 = vmul.f32 %v5978_v58, %v1157_v34  ;;  %5983 = vrcp.f32 %v7155_v29  ;;  %vm1165_vm8 = vweird.f32 %v5978_v58 }
 0x210   :  { %v5982_v12 = vpop.eup %5981  ;;  %v1198_v36 = vmul.f32 %v5980_v32, %v1195_v38  ;;  %5985 = vrcp.f32 %v7157_v39  ;;  %vm1203_vm9 = vweird.f32 %v5980_v32  ;;  %vm1166_vm12 = vmor %vm1164_vm10, %vm1165_vm8  ;;  %vm1179_vm1 = vweird.f32 %v7157_v39 }
 0x211   :  { %v1161_v1 = vsub.f32 1.0, %v1160_v11  ;;  %5987 = vtanh.f32 %v1145_v31  ;;  %v7163_v6 = vadd.f32 1.0, %v5982_v12  ;;  %v1171_v11 = vor.u32 1.1754944e-38, %v1170_v8  ;;  %vm1204_vm14 = vmor %vm1202_vm11, %vm1203_vm9 }
 0x212   :  { %v1199_v56 = vsub.f32 1.0, %v1198_v36  ;;  %5989 = vpow2.f32 %v5324_v0  ;;  %v1209_v36 = vor.u32 1.1754944e-38, %v1208_v33  ;;  %vm1242_vm9 = vweird.f32 %v7155_v29 }
 0x213   :  { %v1162_v5 = vmul.f32 %v5978_v58, %v1161_v1  ;;  %5991 = vrcp.f32 %v7163_v6  ;;  %vm1217_vm5 = vweird.f32 %v7163_v6 }
 0x214   :  { %v1200_v15 = vmul.f32 %v5980_v32, %v1199_v56  ;;  %5993 = vtanh.f32 %v1149_v20 }
 0x215   :  { %v7166_v57 = vpop.eup %5983  ;;  %v1163_v46 = vadd.f32 %v5978_v58, %v1162_v5 }
 0x216   :  { %v5986_v31 = vpop.eup %5985  ;;  %v1201_v12 = vadd.f32 %v5980_v32, %v1200_v15  ;;  %v1238_v1 = vmul.f32 %v7166_v57, %v7155_v29  ;;  %vm1243_vm8 = vweird.f32 %v7166_v57 }
 0x217   :  { %v5988_v0 = vpop.eup %5987  ;;  %v1167_v7 = vsel %vm1166_vm12, %v5978_v58, %v1163_v46  ;;  %v1175_v56 = vmul.f32 %v5986_v31, %v7157_v39  ;;  %v1183_v58 = vand.u32 2147483647, %v7157_v39  ;;  %v1185_v46 = vand.u32 2147483648, %v7157_v39  ;;  %vm1244_vm10 = vmor %vm1242_vm9, %vm1243_vm8 }
 0x218   :  { %v5990_v50 = vpop.eup %5989  ;;  %v1172_v25 = vsel %vm1169_vm13, %v1171_v11, %v1167_v7  ;;  %v1205_v53 = vsel %vm1204_vm14, %v5980_v32, %v1201_v12  ;;  %v1239_v43 = vsub.f32 1.0, %v1238_v1  ;;  %vm1180_vm0 = vweird.f32 %v5986_v31 }
 0x219   :  { %v5992_v34 = vpop.eup %5991  ;;  %v1210_v38 = vsel %vm1207_vm15, %v1209_v36, %v1205_v53  ;;  %v1269_v5 = vmul.f32 %v5988_v0, %v1172_v25  ;;  %v1176_v28 = vsub.f32 1.0, %v1175_v56  ;;  %v1236_v8 = vadd.f32 1.0, %v5990_v50  ;;  %vm1181_vm3 = vmor %vm1179_vm1, %vm1180_vm0 }
 0x21a   :  { %v1267_v15 = vmul.f32 %v1210_v38, %v7084_v44  ;;  %v1213_v33 = vmul.f32 %v5992_v34, %v7163_v6  ;;  %v1223_v53 = vand.u32 2147483648, %v7163_v6  ;;  %v1221_v44 = vand.u32 2147483647, %v7163_v6  ;;  %v5994_v11 = vpop.eup %5993 }
 0x21b   :  { %v1177_v24 = vmul.f32 %v5986_v31, %v1176_v28  ;;  %5995 = vrcp.f32 %v1236_v8  ;;  %vm1218_vm2 = vweird.f32 %v5992_v34  ;;  %v1186_v0 = vor.u32 1.1754944e-38, %v1185_v46 }
 0x21c   :  { %v7175_v32 = vadd.f32 %v1269_v5, %v1267_v15  ;;  %v1214_v19 = vsub.f32 1.0, %v1213_v33  ;;  %v1240_v36 = vmul.f32 %v7166_v57, %v1239_v43  ;;  %vm1184_vm4 = vcmp.eq.f32.partialorder %v1183_v58, 8.507059e+37  ;;  %vm1219_vm6 = vmor %vm1217_vm5, %vm1218_vm2 }
 0x21d   :  { %v1178_v20 = vadd.f32 %v5986_v31, %v1177_v24  ;;  %v1224_v24 = vor.u32 1.1754944e-38, %v1223_v53  ;;  %vm1222_vm7 = vcmp.eq.f32.partialorder %v1221_v44, 8.507059e+37  ;;  %v1246_v15 = vand.u32 2147483647, %v7155_v29 }
 0x21e   :  { %v1215_v12 = vmul.f32 %v5992_v34, %v1214_v19  ;;  %5997 = vtanh.f32 %v7175_v32  ;;  %v1241_v43 = vadd.f32 %v7166_v57, %v1240_v36  ;;  %v1263_v53 = vand.u32 2147483648, %v1236_v8 }
 0x21f   :  { %v1182_v7 = vsel %vm1181_vm3, %v5986_v31, %v1178_v20  ;;  %v1248_v31 = vand.u32 2147483648, %v7155_v29  ;;  %vm1257_vm12 = vweird.f32 %v1236_v8  ;;  %vm1247_vm13 = vcmp.eq.f32.partialorder %v1246_v15, 8.507059e+37 }
 0x220   :  { %v1187_v1 = vsel %vm1184_vm4, %v1186_v0, %v1182_v7  ;;  %v1216_v56 = vadd.f32 %v5992_v34, %v1215_v12  ;;  %v1245_v58 = vsel %vm1244_vm10, %v7166_v57, %v1241_v43  ;;  %v1264_v12 = vor.u32 1.1754944e-38, %v1263_v53  ;;  %v8866_v43 = vld [vmem:[#allocation75_spill] sm:$0xff]  ;;  %v8868_v53 = vld [vmem:[#allocation78_spill] sm:$0xff] }
 0x221   :  { %v5996_v50 = vpop.eup %5995  ;;  %v1270_v25 = vmul.f32 %v5994_v11, %v1187_v1  ;;  %v1249_v19 = vor.u32 1.1754944e-38, %v1248_v31  ;;  %v8867_v31 = vld [vmem:[#allocation30_spill] sm:$0xff] }
 0x222   :  { %v1220_v39 = vsel %vm1219_vm6, %v5992_v34, %v1216_v56  ;;  %v1253_v38 = vmul.f32 %v5996_v50, %v1236_v8  ;;  %vm1258_vm11 = vweird.f32 %v5996_v50 }
 0x223   :  { %v1225_v5 = vsel %vm1222_vm7, %v1224_v24, %v1220_v39  ;;  %v1250_v44 = vsel %vm1247_vm13, %v1249_v19, %v1245_v58  ;;  %vm1259_vm14 = vmor %vm1257_vm12, %vm1258_vm11 }
 0x224   :  { %v1268_v6 = vmul.f32 %v1225_v5, %v7102_v51  ;;  %v1254_v28 = vsub.f32 1.0, %v1253_v38  ;;  %v5998_v46 = vpop.eup %5997  ;;  %v1261_v51 = vand.u32 2147483647, %v1236_v8  ;;  %v8865_v8 = vld [vmem:[#allocation29_spill] sm:$0xff] }
 0x225   :  { %v1275_v29 = vmul.f32 %v5998_v46, %v1250_v44  ;;  %v8870_v44 = vld [vmem:[#allocation33_spill] sm:$0xff] }
 0x226   :  { %v7189_v33 = vadd.f32 %v1270_v25, %v1268_v6  ;;  %v1255_v34 = vmul.f32 %v5996_v50, %v1254_v28  ;;  %vm1262_vm15 = vcmp.eq.f32.partialorder %v1261_v51, 8.507059e+37  ;;  %v476_v6 = vadd.f32 %v8867_v31, %v8866_v43 }
 0x227   :  { %v1277_v57 = vpack.c.bf16 %v1275_v29, %v1275_v29  ;;  %v1281_v56 = vmax.f32 %v1275_v29, 0.0  ;;  %v8871_v29 = vld [vmem:[#allocation34_spill] sm:$0xff] }
 0x228   :  { %5999 = vtanh.f32 %v7189_v33  ;;  %v1256_v20 = vadd.f32 %v5996_v50, %v1255_v34 }
 0x229   :  { %v1301_v25 = vunpack.c.l.b16 %v1277_v57 }
 0x22a   :  { %v1260_v11 = vsel %vm1259_vm14, %v5996_v50, %v1256_v20  ;;  %v427_v50 = vadd.f32 %v8865_v8, %v7035_v21  ;;  %v8869_v20 = vld [vmem:[#allocation32_spill] sm:$0xff] }
 0x22b   :  { %v1265_v36 = vsel %vm1262_vm15, %v1264_v12, %v1260_v11  ;;  %v574_v51 = vadd.f32 %v8869_v20, %v8868_v53  ;;  %v429_v11 = vadd.f32 %v8870_v44, %v7035_v21  ;;  %v478_v12 = vadd.f32 %v8871_v29, %v8866_v43 }
 0x22e   :  { %v6000_v0 = vpop.eup %5999 }
 0x22f   :  { %v1276_v7 = vmul.f32 %v6000_v0, %v1265_v36 }
 0x231   :  { %v1278_v1 = vpack.c.bf16 %v1276_v7, %v1276_v7  ;;  %v1282_v24 = vmax.f32 %v1276_v7, 0.0 }
 0x233   :  { %v5889_v39 = vpack.c.bf16 %v1282_v24, %v1281_v56  ;;  %v1302_v38 = vunpack.c.l.b16 %v1278_v1 }
 0x235   :  { %5890 = vst [vmem:[#allocation3] sm:$0xff] %v5889_v39   ;;  %v1303_v5 = vpack.c.b16 %v1302_v38, %v1301_v25 }
 0x237   :  { %1313 = vmatmul.bf16.vlgmr.msrb.gmra.mxu0 %v1303_v5  ;;  %1327 = vmatmul.bf16.vlgmr.msrb.gmra.mxu1 %v1303_v5 }
 0x238   :  { %1341 = vmatmul.bf16.vlgmr.msrb.gmra.mxu2 %v1303_v5  ;;  %1355 = vmatmul.bf16.vlgmr.msrb.gmra.mxu3 %v1303_v5 }
 0x239   :  { %1741 = vmatpush.bf16.msrb.mxu0 %v6749_v37  ;;  %1755 = vmatpush.bf16.msrb.mxu1 %v6751_v41 }
 0x23a   :  { %1769 = vmatpush.bf16.msrb.mxu2 %v6753_v47  ;;  %1783 = vmatpush.bf16.msrb.mxu3 %v6756_v48 }
 0x23d   :  { %1742 = vmatpush.bf16.msrb.mxu0 %v6758_v49  ;;  %1756 = vmatpush.bf16.msrb.mxu1 %v6761_v52 }
 0x23e   :  { %1770 = vmatpush.bf16.msrb.mxu2 %v6764_v55  ;;  %1784 = vmatpush.bf16.msrb.mxu3 %v6768_v59 }
 0x241   :  { %1743 = vmatpush.bf16.msrb.mxu0 %v6770_v60  ;;  %1757 = vmatpush.bf16.msrb.mxu1 %v6773_v63 }
 0x242   :  { %1771 = vmatpush.bf16.msrb.mxu2 %v6776_v3  ;;  %1785 = vmatpush.bf16.msrb.mxu3 %v6780_v4 }
 0x245   :  { %1744 = vmatpush.bf16.msrb.mxu0 %v6785_v9  ;;  %1758 = vmatpush.bf16.msrb.mxu1 %v6787_v13 }
 0x246   :  { %1772 = vmatpush.bf16.msrb.mxu2 %v6792_v17  ;;  %1786 = vmatpush.bf16.msrb.mxu3 %v6789_v14 }
 0x249   :  { %1745 = vmatpush.bf16.msrb.mxu0 %v6797_v22  ;;  %1759 = vmatpush.bf16.msrb.mxu1 %v6799_v26 }
 0x24a   :  { %1773 = vmatpush.bf16.msrb.mxu2 %v6804_v30  ;;  %1787 = vmatpush.bf16.msrb.mxu3 %v6801_v27 }
 0x24d   :  { %1746 = vmatpush.bf16.msrb.mxu0 %v6809_v35  ;;  %1760 = vmatpush.bf16.msrb.mxu1 %v6811_v40 }
 0x24e   :  { %1774 = vmatpush.bf16.msrb.mxu2 %v6816_v45  ;;  %1788 = vmatpush.bf16.msrb.mxu3 %v6813_v42 }
 0x251   :  { %1747 = vmatpush.bf16.msrb.mxu0 %v6821_v54  ;;  %1761 = vmatpush.bf16.msrb.mxu1 %v6823_v61 }
 0x252   :  { %1775 = vmatpush.bf16.msrb.mxu2 %v6828_v2  ;;  %1789 = vmatpush.bf16.msrb.mxu3 %v6825_v62 }
 0x255   :  { %1748 = vmatpush.bf16.msrb.mxu0 %v6833_v10  ;;  %1762 = vmatpush.bf16.msrb.mxu1 %v6835_v16 }
 0x256   :  { %1776 = vmatpush.bf16.msrb.mxu2 %v6848_v23  ;;  %1790 = vmatpush.bf16.msrb.mxu3 %v6837_v18 }
 0x2b4   :  { %v1314_v28 = vpop.f32.mrf.mxu0  ;;  %v1328_v15 = vpop.f32.mrf.mxu1 }
 0x2b5   :  { %v1361_v34 = vadd.f32 %v1314_v28, %v427_v50  ;;  %v1362_v58 = vadd.f32 %v1328_v15, %v476_v6  ;;  %v8872_v6 = vld [vmem:[#allocation36_spill] sm:$0xff] }
 0x2b6   :  { %v576_v28 = vadd.f32 %v8872_v6, %v8868_v53 }
 0x2b7   :  { %v5325_v46 = vmul.f32 -1.442695, %v1361_v34  ;;  %v5327_v19 = vmul.f32 -1.442695, %v1362_v58  ;;  %v8873_v34 = vld [vmem:[#allocation80_spill] sm:$0xff]  ;;  %v8874_v58 = vld [vmem:[#allocation31_spill] sm:$0xff] }
 0x2b9   :  { %6001 = vpow2.f32 %v5325_v46  ;;  %v525_v46 = vadd.f32 %v8874_v58, %v8873_v34 }
 0x2ba   :  { %6003 = vpow2.f32 %v5327_v19 }
 0x2bb   :  { %v1356_v0 = vpop.f32.mrf.mxu3  ;;  %v1342_v31 = vpop.f32.mrf.mxu2 }
 0x2bc   :  { %v1364_v36 = vadd.f32 %v1356_v0, %v574_v51  ;;  %v1316_v7 = vpop.f32.mrf.mxu0  ;;  %v1330_v57 = vpop.f32.mrf.mxu1  ;;  %v1363_v44 = vadd.f32 %v1342_v31, %v525_v46 }
 0x2bd   :  { %v1365_v1 = vadd.f32 %v1316_v7, %v429_v11  ;;  %v1366_v56 = vadd.f32 %v1330_v57, %v478_v12 }
 0x2be   :  { %v5329_v24 = vmul.f32 -1.442695, %v1364_v36 }
 0x2bf   :  { %v6002_v39 = vpop.eup %6001  ;;  %v5326_v25 = vmul.f32 -1.442695, %v1365_v1  ;;  %v5328_v8 = vmul.f32 -1.442695, %v1366_v56  ;;  %v8875_v56 = vld [vmem:[#allocation35_spill] sm:$0xff] }
 0x2c0   :  { %v6004_v38 = vpop.eup %6003  ;;  %v1375_v5 = vadd.f32 1.0, %v6002_v39  ;;  %6005 = vpow2.f32 %v5329_v24  ;;  %v527_v24 = vadd.f32 %v8875_v56, %v8873_v34 }
 0x2c1   :  { %v1413_v50 = vadd.f32 1.0, %v6004_v38  ;;  %6007 = vpow2.f32 %v5326_v25 }
 0x2c2   :  { %6009 = vrcp.f32 %v1375_v5  ;;  %v1386_v31 = vand.u32 2147483647, %v1375_v5  ;;  %v1388_v6 = vand.u32 2147483648, %v1375_v5  ;;  %vm1382_vm2 = vweird.f32 %v1375_v5 }
 0x2c3   :  { %6011 = vrcp.f32 %v1413_v50  ;;  %v1358_v15 = vpop.f32.mrf.mxu3  ;;  %v1344_v38 = vpop.f32.mrf.mxu2  ;;  %v1424_v46 = vand.u32 2147483647, %v1413_v50  ;;  %vm1420_vm3 = vweird.f32 %v1413_v50 }
 0x2c4   :  { %6013 = vpow2.f32 %v5328_v8  ;;  %v1368_v19 = vadd.f32 %v1358_v15, %v576_v28  ;;  %v1426_v28 = vand.u32 2147483648, %v1413_v50  ;;  %vm1387_vm5 = vcmp.eq.f32.partialorder %v1386_v31, 8.507059e+37 }
 0x2c5   :  { %vm1425_vm7 = vcmp.eq.f32.partialorder %v1424_v46, 8.507059e+37 }
 0x2c6   :  { %v6006_v20 = vpop.eup %6005  ;;  %v5330_v0 = vmul.f32 -1.442695, %v1368_v19  ;;  %v1367_v19 = vadd.f32 %v1344_v38, %v527_v24 }
 0x2c7   :  { %v6008_v51 = vpop.eup %6007  ;;  %v7239_v11 = vadd.f32 1.0, %v6006_v20 }
 0x2c8   :  { %v6010_v29 = vpop.eup %6009  ;;  %v7241_v12 = vadd.f32 1.0, %v6008_v51 }
 0x2c9   :  { %v6012_v36 = vpop.eup %6011  ;;  %v1378_v7 = vmul.f32 %v6010_v29, %v1375_v5  ;;  %6015 = vrcp.f32 %v7239_v11  ;;  %vm1383_vm0 = vweird.f32 %v6010_v29 }
 0x2ca   :  { %v6014_v57 = vpop.eup %6013  ;;  %v1416_v1 = vmul.f32 %v6012_v36, %v1413_v50  ;;  %6017 = vrcp.f32 %v7241_v12  ;;  %vm1421_vm1 = vweird.f32 %v6012_v36  ;;  %vm1384_vm4 = vmor %vm1382_vm2, %vm1383_vm0  ;;  %vm1397_vm9 = vweird.f32 %v7241_v12 }
 0x2cb   :  { %v1379_v39 = vsub.f32 1.0, %v1378_v7  ;;  %6019 = vtanh.f32 %v1363_v44  ;;  %v7247_v25 = vadd.f32 1.0, %v6014_v57  ;;  %v1389_v7 = vor.u32 1.1754944e-38, %v1388_v6  ;;  %vm1422_vm6 = vmor %vm1420_vm3, %vm1421_vm1 }
 0x2cc   :  { %v1417_v8 = vsub.f32 1.0, %v1416_v1  ;;  %6021 = vpow2.f32 %v5330_v0  ;;  %v1427_v1 = vor.u32 1.1754944e-38, %v1426_v28  ;;  %vm1460_vm1 = vweird.f32 %v7239_v11 }
 0x2cd   :  { %v1380_v15 = vmul.f32 %v6010_v29, %v1379_v39  ;;  %6023 = vrcp.f32 %v7247_v25  ;;  %vm1435_vm13 = vweird.f32 %v7247_v25 }
 0x2ce   :  { %v1418_v58 = vmul.f32 %v6012_v36, %v1417_v8  ;;  %6025 = vtanh.f32 %v1367_v19 }
 0x2cf   :  { %v7250_v20 = vpop.eup %6015  ;;  %v1381_v51 = vadd.f32 %v6010_v29, %v1380_v15 }
 0x2d0   :  { %v6018_v44 = vpop.eup %6017  ;;  %v1419_v57 = vadd.f32 %v6012_v36, %v1418_v58  ;;  %v1456_v39 = vmul.f32 %v7250_v20, %v7239_v11  ;;  %vm1461_vm0 = vweird.f32 %v7250_v20 }
 0x2d1   :  { %v6020_v0 = vpop.eup %6019  ;;  %v1385_v56 = vsel %vm1384_vm4, %v6010_v29, %v1381_v51  ;;  %v1393_v8 = vmul.f32 %v6018_v44, %v7241_v12  ;;  %v1401_v29 = vand.u32 2147483647, %v7241_v12  ;;  %v1403_v51 = vand.u32 2147483648, %v7241_v12  ;;  %vm1462_vm2 = vmor %vm1460_vm1, %vm1461_vm0 }
 0x2d2   :  { %v6022_v24 = vpop.eup %6021  ;;  %v1390_v38 = vsel %vm1387_vm5, %v1389_v7, %v1385_v56  ;;  %v1423_v34 = vsel %vm1422_vm6, %v6012_v36, %v1419_v57  ;;  %v1457_v53 = vsub.f32 1.0, %v1456_v39  ;;  %vm1398_vm8 = vweird.f32 %v6018_v44 }
 0x2d3   :  { %v6024_v5 = vpop.eup %6023  ;;  %v1428_v50 = vsel %vm1425_vm7, %v1427_v1, %v1423_v34  ;;  %v1487_v15 = vmul.f32 %v6020_v0, %v1390_v38  ;;  %v1394_v31 = vsub.f32 1.0, %v1393_v8  ;;  %v1454_v6 = vadd.f32 1.0, %v6022_v24  ;;  %vm1399_vm11 = vmor %vm1397_vm9, %vm1398_vm8 }
 0x2d4   :  { %v1485_v58 = vmul.f32 %v1428_v50, %v7175_v32  ;;  %v1431_v28 = vmul.f32 %v6024_v5, %v7247_v25  ;;  %v1441_v34 = vand.u32 2147483648, %v7247_v25  ;;  %v1439_v32 = vand.u32 2147483647, %v7247_v25  ;;  %v6026_v7 = vpop.eup %6025 }
 0x2d5   :  { %v1395_v43 = vmul.f32 %v6018_v44, %v1394_v31  ;;  %6027 = vrcp.f32 %v1454_v6  ;;  %vm1436_vm10 = vweird.f32 %v6024_v5  ;;  %v1404_v0 = vor.u32 1.1754944e-38, %v1403_v51 }
 0x2d6   :  { %v7259_v36 = vadd.f32 %v1487_v15, %v1485_v58  ;;  %v1432_v46 = vsub.f32 1.0, %v1431_v28  ;;  %v1458_v1 = vmul.f32 %v7250_v20, %v1457_v53  ;;  %vm1402_vm12 = vcmp.eq.f32.partialorder %v1401_v29, 8.507059e+37  ;;  %vm1437_vm14 = vmor %vm1435_vm13, %vm1436_vm10 }
 0x2d7   :  { %v1396_v19 = vadd.f32 %v6018_v44, %v1395_v43  ;;  %v1442_v43 = vor.u32 1.1754944e-38, %v1441_v34  ;;  %vm1440_vm15 = vcmp.eq.f32.partialorder %v1439_v32, 8.507059e+37  ;;  %v1464_v58 = vand.u32 2147483647, %v7239_v11 }
 0x2d8   :  { %v1433_v57 = vmul.f32 %v6024_v5, %v1432_v46  ;;  %6029 = vtanh.f32 %v7259_v36  ;;  %v1459_v53 = vadd.f32 %v7250_v20, %v1458_v1  ;;  %v1481_v34 = vand.u32 2147483648, %v1454_v6 }
 0x2d9   :  { %v1400_v56 = vsel %vm1399_vm11, %v6018_v44, %v1396_v19  ;;  %v1466_v44 = vand.u32 2147483648, %v7239_v11  ;;  %vm1475_vm4 = vweird.f32 %v1454_v6  ;;  %vm1465_vm5 = vcmp.eq.f32.partialorder %v1464_v58, 8.507059e+37 }
 0x2da   :  { %v1405_v39 = vsel %vm1402_vm12, %v1404_v0, %v1400_v56  ;;  %v1434_v8 = vadd.f32 %v6024_v5, %v1433_v57  ;;  %v1463_v29 = vsel %vm1462_vm2, %v7250_v20, %v1459_v53  ;;  %v1482_v57 = vor.u32 1.1754944e-38, %v1481_v34  ;;  %v8877_v53 = vld [vmem:[#allocation75_spill] sm:$0xff]  ;;  %v8879_v34 = vld [vmem:[#allocation78_spill] sm:$0xff] }
 0x2db   :  { %v6028_v24 = vpop.eup %6027  ;;  %v1488_v38 = vmul.f32 %v6026_v7, %v1405_v39  ;;  %v1467_v46 = vor.u32 1.1754944e-38, %v1466_v44  ;;  %v8878_v44 = vld [vmem:[#allocation38_spill] sm:$0xff] }
 0x2dc   :  { %v1438_v12 = vsel %vm1437_vm14, %v6024_v5, %v1434_v8  ;;  %v1471_v50 = vmul.f32 %v6028_v24, %v1454_v6  ;;  %vm1476_vm3 = vweird.f32 %v6028_v24 }
 0x2dd   :  { %v1443_v15 = vsel %vm1440_vm15, %v1442_v43, %v1438_v12  ;;  %v1468_v32 = vsel %vm1465_vm5, %v1467_v46, %v1463_v29  ;;  %vm1477_vm6 = vmor %vm1475_vm4, %vm1476_vm3 }
 0x2de   :  { %v1486_v25 = vmul.f32 %v1443_v15, %v7189_v33  ;;  %v1472_v31 = vsub.f32 1.0, %v1471_v50  ;;  %v6030_v51 = vpop.eup %6029  ;;  %v1479_v33 = vand.u32 2147483647, %v1454_v6  ;;  %v8876_v6 = vld [vmem:[#allocation37_spill] sm:$0xff] }
 0x2df   :  { %v1493_v11 = vmul.f32 %v6030_v51, %v1468_v32  ;;  %v8881_v32 = vld [vmem:[#allocation41_spill] sm:$0xff] }
 0x2e0   :  { %v7273_v28 = vadd.f32 %v1488_v38, %v1486_v25  ;;  %v1473_v5 = vmul.f32 %v6028_v24, %v1472_v31  ;;  %vm1480_vm7 = vcmp.eq.f32.partialorder %v1479_v33, 8.507059e+37  ;;  %v481_v25 = vadd.f32 %v8878_v44, %v8877_v53 }
 0x2e1   :  { %v1495_v20 = vpack.c.bf16 %v1493_v11, %v1493_v11  ;;  %v1499_v8 = vmax.f32 %v1493_v11, 0.0  ;;  %v8882_v11 = vld [vmem:[#allocation42_spill] sm:$0xff] }
 0x2e2   :  { %6031 = vtanh.f32 %v7273_v28  ;;  %v1474_v19 = vadd.f32 %v6028_v24, %v1473_v5 }
 0x2e3   :  { %v1519_v38 = vunpack.c.l.b16 %v1495_v20 }
 0x2e4   :  { %v1478_v7 = vsel %vm1477_vm6, %v6028_v24, %v1474_v19  ;;  %v432_v24 = vadd.f32 %v8876_v6, %v7035_v21  ;;  %v8880_v19 = vld [vmem:[#allocation40_spill] sm:$0xff] }
 0x2e5   :  { %v1483_v1 = vsel %vm1480_vm7, %v1482_v57, %v1478_v7  ;;  %v579_v33 = vadd.f32 %v8880_v19, %v8879_v34  ;;  %v434_v7 = vadd.f32 %v8881_v32, %v7035_v21  ;;  %v483_v57 = vadd.f32 %v8882_v11, %v8877_v53 }
 0x2e8   :  { %v6032_v0 = vpop.eup %6031 }
 0x2e9   :  { %v1494_v56 = vmul.f32 %v6032_v0, %v1483_v1 }
 0x2eb   :  { %v1496_v39 = vpack.c.bf16 %v1494_v56, %v1494_v56  ;;  %v1500_v43 = vmax.f32 %v1494_v56, 0.0 }
 0x2ed   :  { %v5894_v12 = vpack.c.bf16 %v1500_v43, %v1499_v8  ;;  %v1520_v50 = vunpack.c.l.b16 %v1496_v39 }
 0x2ef   :  { %5895 = vst [vmem:[#allocation3 + $0x18] sm:$0xff] %v5894_v12   ;;  %v1521_v15 = vpack.c.b16 %v1520_v50, %v1519_v38 }
 0x2f1   :  { %1531 = vmatmul.bf16.vlgmr.msra.gmra.mxu0 %v1521_v15  ;;  %1545 = vmatmul.bf16.vlgmr.msra.gmra.mxu1 %v1521_v15 }
 0x2f2   :  { %1559 = vmatmul.bf16.vlgmr.msra.gmra.mxu2 %v1521_v15  ;;  %1573 = vmatmul.bf16.vlgmr.msra.gmra.mxu3 %v1521_v15 }
 0x2f3   :  { %1959 = vmatpush.bf16.msra.mxu0 %v6749_v37  ;;  %1973 = vmatpush.bf16.msra.mxu1 %v6751_v41 }
 0x2f4   :  { %1987 = vmatpush.bf16.msra.mxu2 %v6753_v47  ;;  %2001 = vmatpush.bf16.msra.mxu3 %v6756_v48 }
 0x2f7   :  { %1960 = vmatpush.bf16.msra.mxu0 %v6758_v49  ;;  %1974 = vmatpush.bf16.msra.mxu1 %v6761_v52 }
 0x2f8   :  { %1988 = vmatpush.bf16.msra.mxu2 %v6764_v55  ;;  %2002 = vmatpush.bf16.msra.mxu3 %v6768_v59 }
 0x2fb   :  { %1961 = vmatpush.bf16.msra.mxu0 %v6770_v60  ;;  %1975 = vmatpush.bf16.msra.mxu1 %v6773_v63 }
 0x2fc   :  { %1989 = vmatpush.bf16.msra.mxu2 %v6776_v3  ;;  %2003 = vmatpush.bf16.msra.mxu3 %v6780_v4 }
 0x2ff   :  { %1962 = vmatpush.bf16.msra.mxu0 %v6785_v9  ;;  %1976 = vmatpush.bf16.msra.mxu1 %v6787_v13 }
 0x300   :  { %1990 = vmatpush.bf16.msra.mxu2 %v6792_v17  ;;  %2004 = vmatpush.bf16.msra.mxu3 %v6789_v14 }
 0x303   :  { %1963 = vmatpush.bf16.msra.mxu0 %v6797_v22  ;;  %1977 = vmatpush.bf16.msra.mxu1 %v6799_v26 }
 0x304   :  { %1991 = vmatpush.bf16.msra.mxu2 %v6804_v30  ;;  %2005 = vmatpush.bf16.msra.mxu3 %v6801_v27 }
 0x307   :  { %1964 = vmatpush.bf16.msra.mxu0 %v6809_v35  ;;  %1978 = vmatpush.bf16.msra.mxu1 %v6811_v40 }
 0x308   :  { %1992 = vmatpush.bf16.msra.mxu2 %v6816_v45  ;;  %2006 = vmatpush.bf16.msra.mxu3 %v6813_v42 }
 0x30b   :  { %1965 = vmatpush.bf16.msra.mxu0 %v6821_v54  ;;  %1979 = vmatpush.bf16.msra.mxu1 %v6823_v61 }
 0x30c   :  { %1993 = vmatpush.bf16.msra.mxu2 %v6828_v2  ;;  %2007 = vmatpush.bf16.msra.mxu3 %v6825_v62 }
 0x30f   :  { %1966 = vmatpush.bf16.msra.mxu0 %v6833_v10  ;;  %1980 = vmatpush.bf16.msra.mxu1 %v6835_v16 }
 0x310   :  { %1994 = vmatpush.bf16.msra.mxu2 %v6848_v23  ;;  %2008 = vmatpush.bf16.msra.mxu3 %v6837_v18 }
 0x36e   :  { %v1532_v31 = vpop.f32.mrf.mxu0  ;;  %v1546_v58 = vpop.f32.mrf.mxu1 }
 0x36f   :  { %v1579_v5 = vadd.f32 %v1532_v31, %v432_v24  ;;  %v1580_v29 = vadd.f32 %v1546_v58, %v481_v25  ;;  %v8883_v31 = vld [vmem:[#allocation44_spill] sm:$0xff] }
 0x370   :  { %v581_v58 = vadd.f32 %v8883_v31, %v8879_v34 }
 0x371   :  { %v5331_v51 = vmul.f32 -1.442695, %v1579_v5  ;;  %v5333_v46 = vmul.f32 -1.442695, %v1580_v29  ;;  %v8884_v29 = vld [vmem:[#allocation80_spill] sm:$0xff] }
 0x373   :  { %6033 = vpow2.f32 %v5331_v51  ;;  %v8885_v51 = vld [vmem:[#allocation39_spill] sm:$0xff] }
 0x374   :  { %6035 = vpow2.f32 %v5333_v46  ;;  %v530_v46 = vadd.f32 %v8885_v51, %v8884_v29  ;;  %v8886_v51 = vld [vmem:[#allocation43_spill] sm:$0xff] }
 0x375   :  { %v1574_v0 = vpop.f32.mrf.mxu3  ;;  %v1560_v44 = vpop.f32.mrf.mxu2 }
 0x376   :  { %v1582_v1 = vadd.f32 %v1574_v0, %v579_v33  ;;  %v1534_v56 = vpop.f32.mrf.mxu0  ;;  %v1548_v20 = vpop.f32.mrf.mxu1  ;;  %v1581_v11 = vadd.f32 %v1560_v44, %v530_v46  ;;  %v532_v46 = vadd.f32 %v8886_v51, %v8884_v29 }
 0x377   :  { %v1583_v39 = vadd.f32 %v1534_v56, %v434_v7  ;;  %v1584_v8 = vadd.f32 %v1548_v20, %v483_v57 }
 0x378   :  { %v5335_v43 = vmul.f32 -1.442695, %v1582_v1 }
 0x379   :  { %v6034_v12 = vpop.eup %6033  ;;  %v5332_v38 = vmul.f32 -1.442695, %v1583_v39  ;;  %v5334_v6 = vmul.f32 -1.442695, %v1584_v8 }
 0x37a   :  { %v6036_v50 = vpop.eup %6035  ;;  %v1593_v15 = vadd.f32 1.0, %v6034_v12  ;;  %6037 = vpow2.f32 %v5335_v43 }
 0x37b   :  { %v1631_v24 = vadd.f32 1.0, %v6036_v50  ;;  %6039 = vpow2.f32 %v5332_v38 }
 0x37c   :  { %6041 = vrcp.f32 %v1593_v15  ;;  %v1604_v38 = vand.u32 2147483647, %v1593_v15  ;;  %v1606_v50 = vand.u32 2147483648, %v1593_v15  ;;  %vm1600_vm10 = vweird.f32 %v1593_v15 }
 0x37d   :  { %6043 = vrcp.f32 %v1631_v24  ;;  %v1576_v25 = vpop.f32.mrf.mxu3  ;;  %v1642_v31 = vand.u32 2147483647, %v1631_v24  ;;  %vm1638_vm11 = vweird.f32 %v1631_v24 }
 0x37e   :  { %6045 = vpow2.f32 %v5334_v6  ;;  %v1586_v32 = vadd.f32 %v1576_v25, %v581_v58  ;;  %v1644_v6 = vand.u32 2147483648, %v1631_v24  ;;  %v1562_v58 = vpop.f32.mrf.mxu2  ;;  %vm1605_vm13 = vcmp.eq.f32.partialorder %v1604_v38, 8.507059e+37 }
 0x37f   :  { %vm1643_vm15 = vcmp.eq.f32.partialorder %v1642_v31, 8.507059e+37 }
 0x380   :  { %v6038_v5 = vpop.eup %6037  ;;  %v5336_v43 = vmul.f32 -1.442695, %v1586_v32  ;;  %v1607_v32 = vor.u32 1.1754944e-38, %v1606_v50 }
 0x381   :  { %v6040_v19 = vpop.eup %6039  ;;  %v7323_v33 = vadd.f32 1.0, %v6038_v5 }
 0x382   :  { %v6042_v7 = vpop.eup %6041  ;;  %v7325_v57 = vadd.f32 1.0, %v6040_v19 }
 0x383   :  { %v6044_v0 = vpop.eup %6043  ;;  %v1596_v1 = vmul.f32 %v6042_v7, %v1593_v15  ;;  %6047 = vrcp.f32 %v7323_v33  ;;  %vm1601_vm8 = vweird.f32 %v6042_v7 }
 0x384   :  { %v6046_v56 = vpop.eup %6045  ;;  %v1634_v20 = vmul.f32 %v6044_v0, %v1631_v24  ;;  %6049 = vrcp.f32 %v7325_v57  ;;  %vm1639_vm9 = vweird.f32 %v6044_v0  ;;  %vm1602_vm12 = vmor %vm1600_vm10, %vm1601_vm8  ;;  %v1619_v51 = vand.u32 2147483647, %v7325_v57 }
 0x385   :  { %v1597_v39 = vsub.f32 1.0, %v1596_v1  ;;  %v7329_v8 = vadd.f32 1.0, %v6046_v56  ;;  %6051 = vtanh.f32 %v1581_v11  ;;  %vm1640_vm14 = vmor %vm1638_vm11, %vm1639_vm9  ;;  %v1645_v56 = vor.u32 1.1754944e-38, %v1644_v6 }
 0x386   :  { %v1635_v12 = vsub.f32 1.0, %v1634_v20  ;;  %vm1615_vm1 = vweird.f32 %v7325_v57  ;;  %vm1620_vm5 = vcmp.eq.f32.partialorder %v1619_v51, 8.507059e+37  ;;  %vm1678_vm9 = vweird.f32 %v7323_v33 }
 0x387   :  { %v1598_v44 = vmul.f32 %v6042_v7, %v1597_v39  ;;  %6053 = vrcp.f32 %v7329_v8  ;;  %vm1653_vm3 = vweird.f32 %v7329_v8 }
 0x388   :  { %v1636_v25 = vmul.f32 %v6044_v0, %v1635_v12  ;;  %6055 = vpow2.f32 %v5336_v43  ;;  %v1585_v12 = vadd.f32 %v1562_v58, %v532_v46  ;;  %v1621_v58 = vand.u32 2147483648, %v7325_v57 }
 0x389   :  { %v7332_v5 = vpop.eup %6047  ;;  %v1599_v19 = vadd.f32 %v6042_v7, %v1598_v44 }
 0x38a   :  { %v1637_v11 = vadd.f32 %v6044_v0, %v1636_v25  ;;  %v6050_v1 = vpop.eup %6049  ;;  %v1674_v39 = vmul.f32 %v7332_v5, %v7323_v33  ;;  %6057 = vtanh.f32 %v1585_v12  ;;  %vm1679_vm8 = vweird.f32 %v7332_v5 }
 0x38b   :  { %v1603_v20 = vsel %vm1602_vm12, %v6042_v7, %v1599_v19  ;;  %v6052_v34 = vpop.eup %6051  ;;  %v1611_v15 = vmul.f32 %v6050_v1, %v7325_v57  ;;  %vm1616_vm0 = vweird.f32 %v6050_v1  ;;  %v1657_v19 = vand.u32 2147483647, %v7329_v8  ;;  %vm1680_vm10 = vmor %vm1678_vm9, %vm1679_vm8 }
 0x38c   :  { %v1608_v53 = vsel %vm1605_vm13, %v1607_v32, %v1603_v20  ;;  %v1641_v21 = vsel %vm1640_vm14, %v6044_v0, %v1637_v11  ;;  %v1675_v7 = vsub.f32 1.0, %v1674_v39  ;;  %vm1617_vm4 = vmor %vm1615_vm1, %vm1616_vm0  ;;  %v1622_v32 = vor.u32 1.1754944e-38, %v1621_v58 }
 0x38d   :  { %v6054_v43 = vpop.eup %6053  ;;  %v1646_v24 = vsel %vm1643_vm15, %v1645_v56, %v1641_v21  ;;  %v1705_v44 = vmul.f32 %v6052_v34, %v1608_v53  ;;  %v1612_v50 = vsub.f32 1.0, %v1611_v15  ;;  %v1659_v21 = vand.u32 2147483648, %v7329_v8 }
 0x38e   :  { %v1703_v38 = vmul.f32 %v1646_v24, %v7259_v36  ;;  %v1649_v25 = vmul.f32 %v6054_v43, %v7329_v8  ;;  %v6056_v6 = vpop.eup %6055  ;;  %vm1654_vm2 = vweird.f32 %v6054_v43  ;;  %v1676_v11 = vmul.f32 %v7332_v5, %v1675_v7 }
 0x38f   :  { %v1613_v31 = vmul.f32 %v6050_v1, %v1612_v50  ;;  %v1672_v36 = vadd.f32 1.0, %v6056_v6  ;;  %vm1655_vm6 = vmor %vm1653_vm3, %vm1654_vm2  ;;  %v1660_v12 = vor.u32 1.1754944e-38, %v1659_v21  ;;  %vm1658_vm7 = vcmp.eq.f32.partialorder %v1657_v19, 8.507059e+37 }
 0x390   :  { %v7343_v46 = vadd.f32 %v1705_v44, %v1703_v38  ;;  %v1650_v0 = vsub.f32 1.0, %v1649_v25  ;;  %v6058_v39 = vpop.eup %6057  ;;  %v1677_v8 = vadd.f32 %v7332_v5, %v1676_v11  ;;  %v1682_v25 = vand.u32 2147483647, %v7323_v33 }
 0x391   :  { %v1614_v34 = vadd.f32 %v6050_v1, %v1613_v31  ;;  %6059 = vrcp.f32 %v1672_v36  ;;  %v1699_v31 = vand.u32 2147483648, %v1672_v36  ;;  %v1697_v21 = vand.u32 2147483647, %v1672_v36 }
 0x392   :  { %v1651_v53 = vmul.f32 %v6054_v43, %v1650_v0  ;;  %6061 = vtanh.f32 %v7343_v46  ;;  %v1681_v7 = vsel %vm1680_vm10, %v7332_v5, %v1677_v8  ;;  %vm1683_vm11 = vcmp.eq.f32.partialorder %v1682_v25, 8.507059e+37  ;;  %v8890_v25 = vld [vmem:[#allocation46_spill] sm:$0xff] }
 0x393   :  { %v1618_v56 = vsel %vm1617_vm4, %v6050_v1, %v1614_v34  ;;  %v1684_v1 = vand.u32 2147483648, %v7323_v33  ;;  %vm1693_vm13 = vweird.f32 %v1672_v36  ;;  %v1700_v19 = vor.u32 1.1754944e-38, %v1699_v31 }
 0x394   :  { %v1652_v20 = vadd.f32 %v6054_v43, %v1651_v53  ;;  %v1623_v57 = vsel %vm1620_vm5, %v1622_v32, %v1618_v56  ;;  %vm1698_vm15 = vcmp.eq.f32.partialorder %v1697_v21, 8.507059e+37  ;;  %v8891_v21 = vld [vmem:[#allocation78_spill] sm:$0xff] }
 0x395   :  { %v1706_v24 = vmul.f32 %v6058_v39, %v1623_v57  ;;  %v1685_v0 = vor.u32 1.1754944e-38, %v1684_v1  ;;  %v8889_v1 = vld [vmem:[#allocation75_spill] sm:$0xff] }
 0x396   :  { %v1656_v15 = vsel %vm1655_vm6, %v6054_v43, %v1652_v20 }
 0x397   :  { %v1661_v44 = vsel %vm1658_vm7, %v1660_v12, %v1656_v15  ;;  %v6060_v50 = vpop.eup %6059  ;;  %v1686_v53 = vsel %vm1683_vm11, %v1685_v0, %v1681_v7 }
 0x398   :  { %v1704_v38 = vmul.f32 %v1661_v44, %v7273_v28  ;;  %v1689_v43 = vmul.f32 %v6060_v50, %v1672_v36  ;;  %v6062_v58 = vpop.eup %6061  ;;  %vm1694_vm12 = vweird.f32 %v6060_v50  ;;  %v8887_v36 = vld [vmem:[#allocation74_spill] sm:$0xff] }
 0x399   :  { %v1711_v33 = vmul.f32 %v6062_v58, %v1686_v53  ;;  %vm1695_vm14 = vmor %vm1693_vm13, %vm1694_vm12  ;;  %v8892_v53 = vld [vmem:[#allocation48_spill] sm:$0xff] }
 0x39a   :  { %v7357_v6 = vadd.f32 %v1706_v24, %v1704_v38  ;;  %v1690_v51 = vsub.f32 1.0, %v1689_v43  ;;  %v8888_v38 = vld [vmem:[#allocation45_spill] sm:$0xff]  ;;  %v486_v43 = vadd.f32 %v8890_v25, %v8889_v1 }
 0x39b   :  { %v1713_v20 = vpack.c.bf16 %v1711_v33, %v1711_v33  ;;  %v1717_v12 = vmax.f32 %v1711_v33, 0.0  ;;  %v8893_v33 = vld [vmem:[#allocation49_spill] sm:$0xff] }
 0x39c   :  { %6063 = vtanh.f32 %v7357_v6  ;;  %v1691_v28 = vmul.f32 %v6060_v50, %v1690_v51 }
 0x39d   :  { %v1737_v24 = vunpack.c.l.b16 %v1713_v20 }
 0x39e   :  { %v1692_v34 = vadd.f32 %v6060_v50, %v1691_v28 }
 0x3a0   :  { %v1696_v11 = vsel %vm1695_vm14, %v6060_v50, %v1692_v34  ;;  %v437_v50 = vadd.f32 %v8888_v38, %v8887_v36  ;;  %v584_v34 = vadd.f32 %v8892_v53, %v8891_v21 }
 0x3a1   :  { %v1701_v5 = vsel %vm1698_vm15, %v1700_v19, %v1696_v11  ;;  %v439_v19 = vadd.f32 %v8893_v33, %v8887_v36 }
 0x3a2   :  { %v6064_v32 = vpop.eup %6063 }
 0x3a3   :  { %v1712_v56 = vmul.f32 %v6064_v32, %v1701_v5  ;;  %v8894_v32 = vld [vmem:[#allocation50_spill] sm:$0xff] }
 0x3a4   :  { %v488_v11 = vadd.f32 %v8894_v32, %v8889_v1 }
 0x3a5   :  { %v1714_v39 = vpack.c.bf16 %v1712_v56, %v1712_v56  ;;  %v1718_v57 = vmax.f32 %v1712_v56, 0.0 }
 0x3a7   :  { %v5899_v15 = vpack.c.bf16 %v1718_v57, %v1717_v12  ;;  %v1738_v44 = vunpack.c.l.b16 %v1714_v39 }
 0x3a9   :  { %5900 = vst [vmem:[#allocation3 + $0x10] sm:$0xff] %v5899_v15   ;;  %v1739_v8 = vpack.c.b16 %v1738_v44, %v1737_v24 }
 0x3ab   :  { %1749 = vmatmul.bf16.vlgmr.msrb.gmra.mxu0 %v1739_v8  ;;  %1763 = vmatmul.bf16.vlgmr.msrb.gmra.mxu1 %v1739_v8 }
 0x3ac   :  { %1777 = vmatmul.bf16.vlgmr.msrb.gmra.mxu2 %v1739_v8  ;;  %1791 = vmatmul.bf16.vlgmr.msrb.gmra.mxu3 %v1739_v8 }
 0x3ad   :  { %2177 = vmatpush.bf16.msrb.mxu0 %v6749_v37  ;;  %2191 = vmatpush.bf16.msrb.mxu1 %v6751_v41 }
 0x3ae   :  { %2205 = vmatpush.bf16.msrb.mxu2 %v6753_v47  ;;  %2219 = vmatpush.bf16.msrb.mxu3 %v6756_v48 }
 0x3b1   :  { %2178 = vmatpush.bf16.msrb.mxu0 %v6758_v49  ;;  %2192 = vmatpush.bf16.msrb.mxu1 %v6761_v52 }
 0x3b2   :  { %2206 = vmatpush.bf16.msrb.mxu2 %v6764_v55  ;;  %2220 = vmatpush.bf16.msrb.mxu3 %v6768_v59 }
 0x3b5   :  { %2179 = vmatpush.bf16.msrb.mxu0 %v6770_v60  ;;  %2193 = vmatpush.bf16.msrb.mxu1 %v6773_v63 }
 0x3b6   :  { %2207 = vmatpush.bf16.msrb.mxu2 %v6776_v3  ;;  %2221 = vmatpush.bf16.msrb.mxu3 %v6780_v4 }
 0x3b9   :  { %2180 = vmatpush.bf16.msrb.mxu0 %v6785_v9  ;;  %2194 = vmatpush.bf16.msrb.mxu1 %v6787_v13 }
 0x3ba   :  { %2208 = vmatpush.bf16.msrb.mxu2 %v6792_v17  ;;  %2222 = vmatpush.bf16.msrb.mxu3 %v6789_v14 }
 0x3bd   :  { %2181 = vmatpush.bf16.msrb.mxu0 %v6797_v22  ;;  %2195 = vmatpush.bf16.msrb.mxu1 %v6799_v26 }
 0x3be   :  { %2209 = vmatpush.bf16.msrb.mxu2 %v6804_v30  ;;  %2223 = vmatpush.bf16.msrb.mxu3 %v6801_v27 }
 0x3c1   :  { %2182 = vmatpush.bf16.msrb.mxu0 %v6809_v35  ;;  %2196 = vmatpush.bf16.msrb.mxu1 %v6811_v40 }
 0x3c2   :  { %2210 = vmatpush.bf16.msrb.mxu2 %v6816_v45  ;;  %2224 = vmatpush.bf16.msrb.mxu3 %v6813_v42 }
 0x3c5   :  { %2183 = vmatpush.bf16.msrb.mxu0 %v6821_v54  ;;  %2197 = vmatpush.bf16.msrb.mxu1 %v6823_v61 }
 0x3c6   :  { %2211 = vmatpush.bf16.msrb.mxu2 %v6828_v2  ;;  %2225 = vmatpush.bf16.msrb.mxu3 %v6825_v62 }
 0x3c9   :  { %2184 = vmatpush.bf16.msrb.mxu0 %v6833_v10  ;;  %2198 = vmatpush.bf16.msrb.mxu1 %v6835_v16 }
 0x3ca   :  { %2212 = vmatpush.bf16.msrb.mxu2 %v6848_v23  ;;  %2226 = vmatpush.bf16.msrb.mxu3 %v6837_v18 }
 0x428   :  { %v1750_v7 = vpop.f32.mrf.mxu0  ;;  %v1764_v51 = vpop.f32.mrf.mxu1 }
 0x429   :  { %v1797_v58 = vadd.f32 %v1750_v7, %v437_v50  ;;  %v1798_v0 = vadd.f32 %v1764_v51, %v486_v43  ;;  %v8895_v51 = vld [vmem:[#allocation52_spill] sm:$0xff] }
 0x42b   :  { %v5337_v31 = vmul.f32 -1.442695, %v1797_v58  ;;  %v5339_v28 = vmul.f32 -1.442695, %v1798_v0  ;;  %v586_v58 = vadd.f32 %v8895_v51, %v8891_v21 }
 0x42d   :  { %6065 = vpow2.f32 %v5337_v31  ;;  %v8896_v31 = vld [vmem:[#allocation47_spill] sm:$0xff] }
 0x42e   :  { %6067 = vpow2.f32 %v5339_v28  ;;  %v535_v28 = vadd.f32 %v8896_v31, %v8884_v29  ;;  %v8897_v31 = vld [vmem:[#allocation51_spill] sm:$0xff] }
 0x42f   :  { %v1792_v5 = vpop.f32.mrf.mxu3  ;;  %v1778_v43 = vpop.f32.mrf.mxu2 }
 0x430   :  { %v1800_v56 = vadd.f32 %v1792_v5, %v584_v34  ;;  %v1752_v20 = vpop.f32.mrf.mxu0  ;;  %v1766_v39 = vpop.f32.mrf.mxu1  ;;  %v1799_v32 = vadd.f32 %v1778_v43, %v535_v28  ;;  %v537_v28 = vadd.f32 %v8897_v31, %v8884_v29 }
 0x431   :  { %v1801_v12 = vadd.f32 %v1752_v20, %v439_v19  ;;  %v1802_v57 = vadd.f32 %v1766_v39, %v488_v11 }
 0x432   :  { %v5341_v15 = vmul.f32 -1.442695, %v1800_v56 }
 0x433   :  { %v6066_v24 = vpop.eup %6065  ;;  %v5338_v44 = vmul.f32 -1.442695, %v1801_v12  ;;  %v5340_v50 = vmul.f32 -1.442695, %v1802_v57 }
 0x434   :  { %v6068_v8 = vpop.eup %6067  ;;  %v1811_v38 = vadd.f32 1.0, %v6066_v24  ;;  %6069 = vpow2.f32 %v5341_v15 }
 0x435   :  { %v1849_v25 = vadd.f32 1.0, %v6068_v8  ;;  %6071 = vpow2.f32 %v5338_v44 }
 0x436   :  { %6073 = vrcp.f32 %v1811_v38  ;;  %v1822_v44 = vand.u32 2147483647, %v1811_v38  ;;  %v1824_v8 = vand.u32 2147483648, %v1811_v38  ;;  %vm1818_vm2 = vweird.f32 %v1811_v38 }
 0x437   :  { %6075 = vrcp.f32 %v1849_v25  ;;  %v1794_v7 = vpop.f32.mrf.mxu3  ;;  %v1860_v51 = vand.u32 2147483647, %v1849_v25  ;;  %vm1856_vm3 = vweird.f32 %v1849_v25 }
 0x438   :  { %6077 = vpow2.f32 %v5340_v50  ;;  %v1804_v33 = vadd.f32 %v1794_v7, %v586_v58  ;;  %v1862_v50 = vand.u32 2147483648, %v1849_v25  ;;  %v1780_v58 = vpop.f32.mrf.mxu2  ;;  %vm1823_vm5 = vcmp.eq.f32.partialorder %v1822_v44, 8.507059e+37 }
 0x439   :  { %vm1861_vm7 = vcmp.eq.f32.partialorder %v1860_v51, 8.507059e+37 }
 0x43a   :  { %v6070_v0 = vpop.eup %6069  ;;  %v5342_v15 = vmul.f32 -1.442695, %v1804_v33  ;;  %v1825_v33 = vor.u32 1.1754944e-38, %v1824_v8 }
 0x43b   :  { %v6072_v53 = vpop.eup %6071  ;;  %v7407_v34 = vadd.f32 1.0, %v6070_v0 }
 0x43c   :  { %v6074_v19 = vpop.eup %6073  ;;  %v7409_v11 = vadd.f32 1.0, %v6072_v53 }
 0x43d   :  { %v6076_v5 = vpop.eup %6075  ;;  %v1814_v56 = vmul.f32 %v6074_v19, %v1811_v38  ;;  %6079 = vrcp.f32 %v7407_v34  ;;  %vm1819_vm0 = vweird.f32 %v6074_v19 }
 0x43e   :  { %v6078_v20 = vpop.eup %6077  ;;  %v1852_v39 = vmul.f32 %v6076_v5, %v1849_v25  ;;  %6081 = vrcp.f32 %v7409_v11  ;;  %vm1857_vm1 = vweird.f32 %v6076_v5  ;;  %vm1820_vm4 = vmor %vm1818_vm2, %vm1819_vm0  ;;  %v1837_v31 = vand.u32 2147483647, %v7409_v11 }
 0x43f   :  { %v1815_v12 = vsub.f32 1.0, %v1814_v56  ;;  %v7413_v57 = vadd.f32 1.0, %v6078_v20  ;;  %6083 = vtanh.f32 %v1799_v32  ;;  %vm1858_vm6 = vmor %vm1856_vm3, %vm1857_vm1  ;;  %v1863_v20 = vor.u32 1.1754944e-38, %v1862_v50 }
 0x440   :  { %v1853_v24 = vsub.f32 1.0, %v1852_v39  ;;  %vm1833_vm9 = vweird.f32 %v7409_v11  ;;  %vm1838_vm13 = vcmp.eq.f32.partialorder %v1837_v31, 8.507059e+37  ;;  %vm1896_vm1 = vweird.f32 %v7407_v34 }
 0x441   :  { %v1816_v43 = vmul.f32 %v6074_v19, %v1815_v12  ;;  %6085 = vrcp.f32 %v7413_v57  ;;  %vm1871_vm11 = vweird.f32 %v7413_v57 }
 0x442   :  { %v1854_v7 = vmul.f32 %v6076_v5, %v1853_v24  ;;  %6087 = vpow2.f32 %v5342_v15  ;;  %v1803_v24 = vadd.f32 %v1780_v58, %v537_v28  ;;  %v1839_v58 = vand.u32 2147483648, %v7409_v11 }
 0x443   :  { %v7416_v0 = vpop.eup %6079  ;;  %v1817_v53 = vadd.f32 %v6074_v19, %v1816_v43 }
 0x444   :  { %v1855_v32 = vadd.f32 %v6076_v5, %v1854_v7  ;;  %v6082_v56 = vpop.eup %6081  ;;  %v1892_v12 = vmul.f32 %v7416_v0, %v7407_v34  ;;  %6089 = vtanh.f32 %v1803_v24  ;;  %vm1897_vm0 = vweird.f32 %v7416_v0 }
 0x445   :  { %v1821_v39 = vsel %vm1820_vm4, %v6074_v19, %v1817_v53  ;;  %v6084_v21 = vpop.eup %6083  ;;  %v1829_v38 = vmul.f32 %v6082_v56, %v7409_v11  ;;  %vm1834_vm8 = vweird.f32 %v6082_v56  ;;  %v1875_v53 = vand.u32 2147483647, %v7413_v57  ;;  %vm1898_vm2 = vmor %vm1896_vm1, %vm1897_vm0 }
 0x446   :  { %v1826_v1 = vsel %vm1823_vm5, %v1825_v33, %v1821_v39  ;;  %v1859_v36 = vsel %vm1858_vm6, %v6076_v5, %v1855_v32  ;;  %v1893_v19 = vsub.f32 1.0, %v1892_v12  ;;  %vm1835_vm12 = vmor %vm1833_vm9, %vm1834_vm8  ;;  %v1840_v33 = vor.u32 1.1754944e-38, %v1839_v58 }
 0x447   :  { %v6086_v15 = vpop.eup %6085  ;;  %v1864_v25 = vsel %vm1861_vm7, %v1863_v20, %v1859_v36  ;;  %v1923_v43 = vmul.f32 %v6084_v21, %v1826_v1  ;;  %v1830_v8 = vsub.f32 1.0, %v1829_v38  ;;  %v1877_v36 = vand.u32 2147483648, %v7413_v57 }
 0x448   :  { %v1921_v44 = vmul.f32 %v1864_v25, %v7343_v46  ;;  %v1867_v7 = vmul.f32 %v6086_v15, %v7413_v57  ;;  %v6088_v50 = vpop.eup %6087  ;;  %vm1872_vm10 = vweird.f32 %v6086_v15  ;;  %v1894_v32 = vmul.f32 %v7416_v0, %v1893_v19 }
 0x449   :  { %v1831_v51 = vmul.f32 %v6082_v56, %v1830_v8  ;;  %v1890_v46 = vadd.f32 1.0, %v6088_v50  ;;  %vm1873_vm14 = vmor %vm1871_vm11, %vm1872_vm10  ;;  %v1878_v24 = vor.u32 1.1754944e-38, %v1877_v36  ;;  %vm1876_vm15 = vcmp.eq.f32.partialorder %v1875_v53, 8.507059e+37 }
 0x44a   :  { %v7427_v28 = vadd.f32 %v1923_v43, %v1921_v44  ;;  %v1868_v5 = vsub.f32 1.0, %v1867_v7  ;;  %v6090_v12 = vpop.eup %6089  ;;  %v1895_v57 = vadd.f32 %v7416_v0, %v1894_v32  ;;  %v1900_v7 = vand.u32 2147483647, %v7407_v34 }
 0x44b   :  { %v1832_v21 = vadd.f32 %v6082_v56, %v1831_v51  ;;  %6091 = vrcp.f32 %v1890_v46  ;;  %v1917_v51 = vand.u32 2147483648, %v1890_v46  ;;  %v1915_v36 = vand.u32 2147483647, %v1890_v46 }
 0x44c   :  { %v1869_v1 = vmul.f32 %v6086_v15, %v1868_v5  ;;  %6093 = vtanh.f32 %v7427_v28  ;;  %v1899_v19 = vsel %vm1898_vm2, %v7416_v0, %v1895_v57  ;;  %vm1901_vm3 = vcmp.eq.f32.partialorder %v1900_v7, 8.507059e+37 }
 0x44d   :  { %v1836_v20 = vsel %vm1835_vm12, %v6082_v56, %v1832_v21  ;;  %v1902_v56 = vand.u32 2147483648, %v7407_v34  ;;  %vm1911_vm5 = vweird.f32 %v1890_v46  ;;  %v1918_v53 = vor.u32 1.1754944e-38, %v1917_v51 }
 0x44e   :  { %v1870_v39 = vadd.f32 %v6086_v15, %v1869_v1  ;;  %v1841_v11 = vsel %vm1838_vm13, %v1840_v33, %v1836_v20  ;;  %vm1916_vm7 = vcmp.eq.f32.partialorder %v1915_v36, 8.507059e+37 }
 0x44f   :  { %v1924_v25 = vmul.f32 %v6090_v12, %v1841_v11  ;;  %v1903_v5 = vor.u32 1.1754944e-38, %v1902_v56 }
 0x450   :  { %v1874_v38 = vsel %vm1873_vm14, %v6086_v15, %v1870_v39 }
 0x451   :  { %v1879_v43 = vsel %vm1876_vm15, %v1878_v24, %v1874_v38  ;;  %v6092_v8 = vpop.eup %6091  ;;  %v1904_v1 = vsel %vm1901_vm3, %v1903_v5, %v1899_v19 }
 0x452   :  { %v1922_v44 = vmul.f32 %v1879_v43, %v7357_v6  ;;  %v1907_v15 = vmul.f32 %v6092_v8, %v1890_v46  ;;  %v6094_v58 = vpop.eup %6093  ;;  %vm1912_vm4 = vweird.f32 %v6092_v8 }
 0x453   :  { %v1929_v34 = vmul.f32 %v6094_v58, %v1904_v1  ;;  %vm1913_vm6 = vmor %vm1911_vm5, %vm1912_vm4 }
 0x454   :  { %v7441_v50 = vadd.f32 %v1924_v25, %v1922_v44  ;;  %v1908_v31 = vsub.f32 1.0, %v1907_v15  ;;  %v8907_v15 = vld [vmem:[#allocation55_spill] sm:$0xff] }
 0x455   :  { %v1931_v39 = vpack.c.bf16 %v1929_v34, %v1929_v34  ;;  %v1935_v24 = vmax.f32 %v1929_v34, 0.0  ;;  %v540_v19 = vadd.f32 %v8907_v15, %v8884_v29 }
 0x456   :  { %6095 = vtanh.f32 %v7441_v50  ;;  %v1909_v6 = vmul.f32 %v6092_v8, %v1908_v31 }
 0x457   :  { %v1955_v25 = vunpack.c.l.b16 %v1931_v39 }
 0x458   :  { %v1910_v21 = vadd.f32 %v6092_v8, %v1909_v6 }
 0x45a   :  { %v1914_v32 = vsel %vm1913_vm6, %v6092_v8, %v1910_v21  ;;  %v8906_v8 = vld [vmem:[#allocation60_spill] sm:$0xff] }
 0x45b   :  { %v1919_v0 = vsel %vm1916_vm7, %v1918_v53, %v1914_v32 }
 0x45c   :  { %v6096_v33 = vpop.eup %6095 }
 0x45d   :  { %v1930_v20 = vmul.f32 %v6096_v33, %v1919_v0 }
 0x45f   :  { %v1932_v12 = vpack.c.bf16 %v1930_v20, %v1930_v20  ;;  %v1936_v11 = vmax.f32 %v1930_v20, 0.0 }
 0x461   :  { %v5904_v38 = vpack.c.bf16 %v1936_v11, %v1935_v24  ;;  %v1956_v43 = vunpack.c.l.b16 %v1932_v12 }
 0x463   :  { %5905 = vst [vmem:[#allocation3 + $0x8] sm:$0xff] %v5904_v38   ;;  %v1957_v57 = vpack.c.b16 %v1956_v43, %v1955_v25 }
 0x465   :  { %1967 = vmatmul.bf16.vlgmr.msra.gmra.mxu0 %v1957_v57  ;;  %1981 = vmatmul.bf16.vlgmr.msra.gmra.mxu1 %v1957_v57 }
 0x466   :  { %1995 = vmatmul.bf16.vlgmr.msra.gmra.mxu2 %v1957_v57  ;;  %2009 = vmatmul.bf16.vlgmr.msra.gmra.mxu3 %v1957_v57 }
 0x467   :  { %2395 = vmatpush.bf16.msra.mxu0 %v6749_v37  ;;  %2409 = vmatpush.bf16.msra.mxu1 %v6751_v41  ;;  %v8898_v37 = vld [vmem:[#allocation74_spill] sm:$0xff]  ;;  %v8899_v41 = vld [vmem:[#allocation53_spill] sm:$0xff] }
 0x468   :  { %2423 = vmatpush.bf16.msra.mxu2 %v6753_v47  ;;  %2437 = vmatpush.bf16.msra.mxu3 %v6756_v48  ;;  %v442_v47 = vadd.f32 %v8899_v41, %v8898_v37  ;;  %v8900_v48 = vld [vmem:[#allocation75_spill] sm:$0xff] }
 0x469   :  { %v8908_v41 = vld [vmem:[#allocation59_spill] sm:$0xff] }
 0x46b   :  { %2396 = vmatpush.bf16.msra.mxu0 %v6758_v49  ;;  %2410 = vmatpush.bf16.msra.mxu1 %v6761_v52  ;;  %v8901_v49 = vld [vmem:[#allocation54_spill] sm:$0xff] }
 0x46c   :  { %2424 = vmatpush.bf16.msra.mxu2 %v6764_v55  ;;  %2438 = vmatpush.bf16.msra.mxu3 %v6768_v59  ;;  %v491_v52 = vadd.f32 %v8901_v49, %v8900_v48 }
 0x46f   :  { %2397 = vmatpush.bf16.msra.mxu0 %v6770_v60  ;;  %2411 = vmatpush.bf16.msra.mxu1 %v6773_v63 }
 0x470   :  { %2425 = vmatpush.bf16.msra.mxu2 %v6776_v3  ;;  %2439 = vmatpush.bf16.msra.mxu3 %v6780_v4 }
 0x473   :  { %2398 = vmatpush.bf16.msra.mxu0 %v6785_v9  ;;  %2412 = vmatpush.bf16.msra.mxu1 %v6787_v13  ;;  %v8902_v9 = vld [vmem:[#allocation78_spill] sm:$0xff]  ;;  %v8903_v13 = vld [vmem:[#allocation56_spill] sm:$0xff] }
 0x474   :  { %2426 = vmatpush.bf16.msra.mxu2 %v6792_v17  ;;  %2440 = vmatpush.bf16.msra.mxu3 %v6789_v14  ;;  %v589_v14 = vadd.f32 %v8903_v13, %v8902_v9  ;;  %v8904_v17 = vld [vmem:[#allocation57_spill] sm:$0xff]  ;;  %v591_v56 = vadd.f32 %v8906_v8, %v8902_v9 }
 0x477   :  { %2399 = vmatpush.bf16.msra.mxu0 %v6797_v22  ;;  %2413 = vmatpush.bf16.msra.mxu1 %v6799_v26  ;;  %v444_v22 = vadd.f32 %v8904_v17, %v8898_v37  ;;  %v8905_v26 = vld [vmem:[#allocation58_spill] sm:$0xff] }
 0x478   :  { %2427 = vmatpush.bf16.msra.mxu2 %v6804_v30  ;;  %2441 = vmatpush.bf16.msra.mxu3 %v6801_v27  ;;  %v493_v27 = vadd.f32 %v8905_v26, %v8900_v48 }
 0x47b   :  { %2400 = vmatpush.bf16.msra.mxu0 %v6809_v35  ;;  %2414 = vmatpush.bf16.msra.mxu1 %v6811_v40 }
 0x47c   :  { %2428 = vmatpush.bf16.msra.mxu2 %v6816_v45  ;;  %2442 = vmatpush.bf16.msra.mxu3 %v6813_v42 }
 0x47f   :  { %2401 = vmatpush.bf16.msra.mxu0 %v6821_v54  ;;  %2415 = vmatpush.bf16.msra.mxu1 %v6823_v61 }
 0x480   :  { %2429 = vmatpush.bf16.msra.mxu2 %v6828_v2  ;;  %2443 = vmatpush.bf16.msra.mxu3 %v6825_v62 }
 0x483   :  { %2402 = vmatpush.bf16.msra.mxu0 %v6833_v10  ;;  %2416 = vmatpush.bf16.msra.mxu1 %v6835_v16 }
 0x484   :  { %2430 = vmatpush.bf16.msra.mxu2 %v6848_v23  ;;  %2444 = vmatpush.bf16.msra.mxu3 %v6837_v18 }
 0x4e2   :  { %v1968_v55 = vpop.f32.mrf.mxu0  ;;  %v1982_v59 = vpop.f32.mrf.mxu1 }
 0x4e3   :  { %v2015_v60 = vadd.f32 %v1968_v55, %v442_v47  ;;  %v2016_v63 = vadd.f32 %v1982_v59, %v491_v52  ;;  %v542_v47 = vadd.f32 %v8908_v41, %v8884_v29 }
 0x4e5   :  { %v5343_v3 = vmul.f32 -1.442695, %v2015_v60  ;;  %v5345_v4 = vmul.f32 -1.442695, %v2016_v63 }
 0x4e7   :  { %6097 = vpow2.f32 %v5343_v3 }
 0x4e8   :  { %6099 = vpow2.f32 %v5345_v4 }
 0x4e9   :  { %v2010_v30 = vpop.f32.mrf.mxu3  ;;  %v1996_v46 = vpop.f32.mrf.mxu2 }
 0x4ea   :  { %v2018_v35 = vadd.f32 %v2010_v30, %v589_v14  ;;  %v1970_v40 = vpop.f32.mrf.mxu0  ;;  %v1984_v42 = vpop.f32.mrf.mxu1  ;;  %v2017_v6 = vadd.f32 %v1996_v46, %v540_v19 }
 0x4eb   :  { %v2019_v45 = vadd.f32 %v1970_v40, %v444_v22  ;;  %v2020_v54 = vadd.f32 %v1984_v42, %v493_v27 }
 0x4ec   :  { %v5347_v61 = vmul.f32 -1.442695, %v2018_v35 }
 0x4ed   :  { %v6098_v62 = vpop.eup %6097  ;;  %v5344_v2 = vmul.f32 -1.442695, %v2019_v45  ;;  %v5346_v18 = vmul.f32 -1.442695, %v2020_v54 }
 0x4ee   :  { %v6100_v10 = vpop.eup %6099  ;;  %v2029_v16 = vadd.f32 1.0, %v6098_v62  ;;  %6101 = vpow2.f32 %v5347_v61 }
 0x4ef   :  { %v2067_v23 = vadd.f32 1.0, %v6100_v10  ;;  %6103 = vpow2.f32 %v5344_v2 }
 0x4f0   :  { %6105 = vrcp.f32 %v2029_v16  ;;  %v2040_v39 = vand.u32 2147483647, %v2029_v16  ;;  %v2042_v12 = vand.u32 2147483648, %v2029_v16  ;;  %vm2036_vm10 = vweird.f32 %v2029_v16 }
 0x4f1   :  { %6107 = vrcp.f32 %v2067_v23  ;;  %v2012_v44 = vpop.f32.mrf.mxu3  ;;  %v2080_v24 = vand.u32 2147483648, %v2067_v23  ;;  %v2078_v25 = vand.u32 2147483647, %v2067_v23  ;;  %v1998_v43 = vpop.f32.mrf.mxu2  ;;  %vm2074_vm11 = vweird.f32 %v2067_v23 }
 0x4f2   :  { %6109 = vpow2.f32 %v5346_v18  ;;  %v2022_v5 = vadd.f32 %v2012_v44, %v591_v56  ;;  %vm2041_vm13 = vcmp.eq.f32.partialorder %v2040_v39, 8.507059e+37  ;;  %v2043_v52 = vor.u32 1.1754944e-38, %v2042_v12 }
 0x4f3   :  { %v2081_v60 = vor.u32 1.1754944e-38, %v2080_v24  ;;  %v2021_v4 = vadd.f32 %v1998_v43, %v542_v47  ;;  %vm2079_vm15 = vcmp.eq.f32.partialorder %v2078_v25, 8.507059e+37 }
 0x4f4   :  { %v6102_v7 = vpop.eup %6101  ;;  %v5348_v0 = vmul.f32 -1.442695, %v2022_v5 }
 0x4f5   :  { %v6104_v31 = vpop.eup %6103  ;;  %v7491_v58 = vadd.f32 1.0, %v6102_v7 }
 0x4f6   :  { %v6106_v51 = vpop.eup %6105  ;;  %v7493_v36 = vadd.f32 1.0, %v6104_v31 }
 0x4f7   :  { %v6108_v1 = vpop.eup %6107  ;;  %v2032_v21 = vmul.f32 %v6106_v51, %v2029_v16  ;;  %6111 = vrcp.f32 %v7491_v58  ;;  %vm2037_vm8 = vweird.f32 %v6106_v51 }
 0x4f8   :  { %v6110_v34 = vpop.eup %6109  ;;  %v2070_v53 = vmul.f32 %v6108_v1, %v2067_v23  ;;  %6113 = vrcp.f32 %v7493_v36  ;;  %vm2075_vm9 = vweird.f32 %v6108_v1  ;;  %vm2038_vm12 = vmor %vm2036_vm10, %vm2037_vm8  ;;  %v2055_v61 = vand.u32 2147483647, %v7493_v36 }
 0x4f9   :  { %v2033_v33 = vsub.f32 1.0, %v2032_v21  ;;  %v7497_v32 = vadd.f32 1.0, %v6110_v34  ;;  %6115 = vtanh.f32 %v2017_v6  ;;  %vm2076_vm14 = vmor %vm2074_vm11, %vm2075_vm9  ;;  %v2057_v62 = vand.u32 2147483648, %v7493_v36 }
 0x4fa   :  { %v2071_v20 = vsub.f32 1.0, %v2070_v53  ;;  %vm2051_vm1 = vweird.f32 %v7493_v36  ;;  %vm2056_vm5 = vcmp.eq.f32.partialorder %v2055_v61, 8.507059e+37  ;;  %v2120_v53 = vand.u32 2147483648, %v7491_v58  ;;  %v8911_v61 = vld [vmem:[#allocation64_spill] sm:$0xff] }
 0x4fb   :  { %v2034_v11 = vmul.f32 %v6106_v51, %v2033_v33  ;;  %6117 = vrcp.f32 %v7497_v32  ;;  %v2095_v18 = vand.u32 2147483648, %v7497_v32  ;;  %v2093_v44 = vand.u32 2147483647, %v7497_v32 }
 0x4fc   :  { %v2072_v38 = vmul.f32 %v6108_v1, %v2071_v20  ;;  %6119 = vpow2.f32 %v5348_v0  ;;  %vm2089_vm3 = vweird.f32 %v7497_v32  ;;  %v2058_v8 = vor.u32 1.1754944e-38, %v2057_v62 }
 0x4fd   :  { %v7500_v57 = vpop.eup %6111  ;;  %v2035_v49 = vadd.f32 %v6106_v51, %v2034_v11  ;;  %6121 = vtanh.f32 %v2021_v4  ;;  %v2096_v31 = vor.u32 1.1754944e-38, %v2095_v18  ;;  %vm2094_vm7 = vcmp.eq.f32.partialorder %v2093_v44, 8.507059e+37  ;;  %v8913_v18 = vld [vmem:[#allocation66_spill] sm:$0xff] }
 0x4fe   :  { %v2073_v55 = vadd.f32 %v6108_v1, %v2072_v38  ;;  %v6114_v59 = vpop.eup %6113  ;;  %v2110_v3 = vmul.f32 %v7500_v57, %v7491_v58  ;;  %vm2115_vm8 = vweird.f32 %v7500_v57  ;;  %vm2114_vm9 = vweird.f32 %v7491_v58 }
 0x4ff   :  { %v2039_v63 = vsel %vm2038_vm12, %v6106_v51, %v2035_v49  ;;  %v6116_v13 = vpop.eup %6115  ;;  %v2047_v22 = vmul.f32 %v6114_v59, %v7493_v36  ;;  %vm2052_vm0 = vweird.f32 %v6114_v59  ;;  %v2118_v33 = vand.u32 2147483647, %v7491_v58  ;;  %vm2116_vm10 = vmor %vm2114_vm9, %vm2115_vm8 }
 0x500   :  { %v2044_v14 = vsel %vm2041_vm13, %v2043_v52, %v2039_v63  ;;  %v2077_v17 = vsel %vm2076_vm14, %v6108_v1, %v2073_v55  ;;  %v2111_v54 = vsub.f32 1.0, %v2110_v3  ;;  %vm2053_vm4 = vmor %vm2051_vm1, %vm2052_vm0  ;;  %v2121_v24 = vor.u32 1.1754944e-38, %v2120_v53 }
 0x501   :  { %v6118_v26 = vpop.eup %6117  ;;  %v2082_v27 = vsel %vm2079_vm15, %v2081_v60, %v2077_v17  ;;  %v2141_v30 = vmul.f32 %v6116_v13, %v2044_v14  ;;  %v2048_v40 = vsub.f32 1.0, %v2047_v22  ;;  %vm2119_vm11 = vcmp.eq.f32.partialorder %v2118_v33, 8.507059e+37  ;;  %v8909_v17 = vld [vmem:[#allocation61_spill] sm:$0xff] }
 0x502   :  { %v2139_v35 = vmul.f32 %v2082_v27, %v7427_v28  ;;  %v2085_v42 = vmul.f32 %v6118_v26, %v7497_v32  ;;  %v6120_v45 = vpop.eup %6119  ;;  %vm2090_vm2 = vweird.f32 %v6118_v26  ;;  %v2112_v56 = vmul.f32 %v7500_v57, %v2111_v54 }
 0x503   :  { %v2049_v16 = vmul.f32 %v6114_v59, %v2048_v40  ;;  %v2108_v28 = vadd.f32 1.0, %v6120_v45  ;;  %v6122_v19 = vpop.eup %6121  ;;  %vm2091_vm6 = vmor %vm2089_vm3, %vm2090_vm2  ;;  %v447_v22 = vadd.f32 %v8909_v17, %v8898_v37  ;;  %v594_v62 = vadd.f32 %v8911_v61, %v8902_v9 }
 0x504   :  { %v7511_v2 = vadd.f32 %v2141_v30, %v2139_v35  ;;  %v2086_v10 = vsub.f32 1.0, %v2085_v42  ;;  %v2113_v1 = vadd.f32 %v7500_v57, %v2112_v56 }
 0x505   :  { %v2050_v46 = vadd.f32 %v6114_v59, %v2049_v16  ;;  %6123 = vrcp.f32 %v2108_v28  ;;  %v2135_v11 = vand.u32 2147483648, %v2108_v28  ;;  %v2133_v38 = vand.u32 2147483647, %v2108_v28 }
 0x506   :  { %v2087_v23 = vmul.f32 %v6118_v26, %v2086_v10  ;;  %6125 = vtanh.f32 %v7511_v2  ;;  %v2117_v20 = vsel %vm2116_vm10, %v7500_v57, %v2113_v1  ;;  %vm2129_vm13 = vweird.f32 %v2108_v28  ;;  %v8912_v10 = vld [vmem:[#allocation65_spill] sm:$0xff] }
 0x507   :  { %v2054_v7 = vsel %vm2053_vm4, %v6114_v59, %v2050_v46  ;;  %v2122_v25 = vsel %vm2119_vm11, %v2121_v24, %v2117_v20  ;;  %v2136_v41 = vor.u32 1.1754944e-38, %v2135_v11  ;;  %vm2134_vm15 = vcmp.eq.f32.partialorder %v2133_v38, 8.507059e+37  ;;  %v5839_v24 = vld [vmem:[#allocation12 + $0xec] sm:$0xf0] }
 0x508   :  { %v2088_v15 = vadd.f32 %v6118_v26, %v2087_v23  ;;  %v2059_v5 = vsel %vm2056_vm5, %v2058_v8, %v2054_v7  ;;  %v449_v16 = vadd.f32 %v8912_v10, %v8898_v37  ;;  %v5517_v10 = vld [vmem:[#allocation12 + $0xf8] sm:$0xf0] }
 0x509   :  { %v2142_v6 = vmul.f32 %v6122_v19, %v2059_v5 }
 0x50a   :  { %v2092_v51 = vsel %vm2091_vm6, %v6118_v26, %v2088_v15  ;;  %v8910_v26 = vld [vmem:[#allocation62_spill] sm:$0xff] }
 0x50b   :  { %v2097_v36 = vsel %vm2094_vm7, %v2096_v31, %v2092_v51  ;;  %v6124_v34 = vpop.eup %6123  ;;  %v496_v27 = vadd.f32 %v8910_v26, %v8900_v48 }
 0x50c   :  { %v2140_v21 = vmul.f32 %v2097_v36, %v7441_v50  ;;  %v2125_v0 = vmul.f32 %v6124_v34, %v2108_v28  ;;  %v6126_v12 = vpop.eup %6125  ;;  %vm2130_vm12 = vweird.f32 %v6124_v34  ;;  %v498_v28 = vadd.f32 %v8913_v18, %v8900_v48  ;;  %v5437_v18 = vld [vmem:[#allocation12 + $0x58] sm:$0xf0] }
 0x50d   :  { %v2147_v58 = vmul.f32 %v6126_v12, %v2122_v25  ;;  %vm2131_vm14 = vmor %vm2129_vm13, %vm2130_vm12  ;;  %v5507_v12 = vld [vmem:[#allocation12 + $0xe0] sm:$0xf]  ;;  %v5837_v25 = vld [vmem:[#allocation12 + $0xe4] sm:$0xf] }
 0x50e   :  { %v7525_v32 = vadd.f32 %v2142_v6, %v2140_v21  ;;  %v2126_v39 = vsub.f32 1.0, %v2125_v0  ;;  %v8914_v21 = vld [vmem:[#allocation63_spill] sm:$0xff]  ;;  %v5508_v38 = vor.u32 %v5839_v24, %v5507_v12 }
 0x50f   :  { %v2149_v55 = vpack.c.bf16 %v2147_v58, %v2147_v58  ;;  %v2153_v60 = vmax.f32 %v2147_v58, 0.0  ;;  %v8915_v0 = vld [vmem:[#allocation67_spill] sm:$0xff]  ;;  %v5515_v58 = vld [vmem:[#allocation12 + $0xe8] sm:$0xf] }
 0x510   :  { %6127 = vtanh.f32 %v7525_v32  ;;  %v2127_v50 = vmul.f32 %v6124_v34, %v2126_v39  ;;  %v596_v20 = vadd.f32 %v8915_v0, %v8902_v9  ;;  %v5501_v12 = vld [vmem:[#allocation12 + $0xd8] sm:$0xf0] }
 0x511   :  { %v2173_v4 = vunpack.c.l.b16 %v2149_v55 }
 0x512   :  { %v2128_v43 = vadd.f32 %v6124_v34, %v2127_v50 }
 0x514   :  { %v2132_v49 = vsel %vm2131_vm14, %v6124_v34, %v2128_v43  ;;  %v545_v34 = vadd.f32 %v8914_v21, %v8884_v29  ;;  %v5509_v43 = vld [vmem:[#allocation12 + $0xf0] sm:$0xf0] }
 0x515   :  { %v2137_v57 = vsel %vm2134_vm15, %v2136_v41, %v2132_v49 }
 0x516   :  { %v6128_v47 = vpop.eup %6127 }
 0x517   :  { %v2148_v52 = vmul.f32 %v6128_v47, %v2137_v57  ;;  %v5512_v57 = vor.u32 %v5837_v25, %v5509_v43  ;;  %v5475_v43 = vld [vmem:[#allocation12 + $0xa0] sm:$0xf] }
 0x519   :  { %v2150_v59 = vpack.c.bf16 %v2148_v52, %v2148_v52  ;;  %v2154_v63 = vmax.f32 %v2148_v52, 0.0  ;;  %v5840_v52 = vld [vmem:[#allocation12 + $0xf4] sm:$0xf0] }
 0x51b   :  { %v5909_v3 = vpack.c.bf16 %v2154_v63, %v2153_v60  ;;  %v2174_v13 = vunpack.c.l.b16 %v2150_v59  ;;  %v5516_v63 = vor.u32 %v5840_v52, %v5515_v58  ;;  %v5831_v58 = vld [vmem:[#allocation12 + $0xac] sm:$0xf0]  ;;  %v5477_v52 = vld [vmem:[#allocation12 + $0xb0] sm:$0xf0] }
 0x51d   :  { %5910 = vst [vmem:[#allocation3 + $0x20] sm:$0xff] %v5909_v3   ;;  %v2175_v14 = vpack.c.b16 %v2174_v13, %v2173_v4  ;;  %v8916_v4 = vld [vmem:[#allocation70_spill] sm:$0xff] }
 0x51e   :  { %v547_v13 = vadd.f32 %v8916_v4, %v8884_v29 }
 0x51f   :  { %2185 = vmatmul.bf16.vlgmr.msrb.gmra.mxu0 %v2175_v14  ;;  %2199 = vmatmul.bf16.vlgmr.msrb.gmra.mxu1 %v2175_v14 }
 0x520   :  { %2213 = vmatmul.bf16.vlgmr.msrb.gmra.mxu2 %v2175_v14  ;;  %2227 = vmatmul.bf16.vlgmr.msrb.gmra.mxu3 %v2175_v14 }
 0x521   :  { %2862 = vmatpush.bf16.msrb.mxu0 %v5508_v38  ;;  %2911 = vmatpush.bf16.msrb.mxu1 %v5512_v57  ;;  %v5829_v57 = vld [vmem:[#allocation12 + $0xa4] sm:$0xf] }
 0x522   :  { %2960 = vmatpush.bf16.msrb.mxu2 %v5516_v63 }
 0x59c   :  { %v2186_v30 = vpop.f32.mrf.mxu0  ;;  %v2200_v35 = vpop.f32.mrf.mxu1 }
 0x59d   :  { %v2233_v40 = vadd.f32 %v2186_v30, %v447_v22  ;;  %v2234_v42 = vadd.f32 %v2200_v35, %v496_v27 }
 0x59f   :  { %v5349_v45 = vmul.f32 -1.442695, %v2233_v40  ;;  %v5351_v54 = vmul.f32 -1.442695, %v2234_v42 }
 0x5a1   :  { %6129 = vpow2.f32 %v5349_v45 }
 0x5a2   :  { %6131 = vpow2.f32 %v5351_v54 }
 0x5a3   :  { %v2228_v23 = vpop.f32.mrf.mxu3  ;;  %v2214_v1 = vpop.f32.mrf.mxu2 }
 0x5a4   :  { %v2236_v46 = vadd.f32 %v2228_v23, %v594_v62  ;;  %v2188_v44 = vpop.f32.mrf.mxu0  ;;  %v2202_v8 = vpop.f32.mrf.mxu1  ;;  %v2235_v50 = vadd.f32 %v2214_v1, %v545_v34  ;;  %v5838_v62 = vld [vmem:[#allocation12 + $0xec] sm:$0xf]  ;;  %v5835_v23 = vld [vmem:[#allocation12 + $0xcc] sm:$0xf0]  ;;  %v5836_v1 = vld [vmem:[#allocation12 + $0xd4] sm:$0xf0] }
 0x5a5   :  { %v2237_v56 = vadd.f32 %v2188_v44, %v449_v16  ;;  %v2238_v7 = vadd.f32 %v2202_v8, %v498_v28  ;;  %v5491_v28 = vld [vmem:[#allocation12 + $0xc0] sm:$0xf] }
 0x5a6   :  { %v5353_v15 = vmul.f32 -1.442695, %v2236_v46  ;;  %v5492_v38 = vor.u32 %v5835_v23, %v5491_v28  ;;  %v5825_v28 = vld [vmem:[#allocation12 + $0x84] sm:$0xf]  ;;  %v5461_v23 = vld [vmem:[#allocation12 + $0x90] sm:$0xf0] }
 0x5a7   :  { %v6130_v19 = vpop.eup %6129  ;;  %v5350_v31 = vmul.f32 -1.442695, %v2237_v56  ;;  %v5352_v6 = vmul.f32 -1.442695, %v2238_v7  ;;  %v5833_v56 = vld [vmem:[#allocation12 + $0xc4] sm:$0xf] }
 0x5a8   :  { %v6132_v5 = vpop.eup %6131  ;;  %v7539_v51 = vadd.f32 1.0, %v6130_v19  ;;  %6133 = vpow2.f32 %v5353_v15  ;;  %v5493_v7 = vld [vmem:[#allocation12 + $0xd0] sm:$0xf0]  ;;  %2863 = vmatpush.bf16.msrb.mxu0 %v5492_v38 }
 0x5a9   :  { %v7541_v36 = vadd.f32 1.0, %v6132_v5  ;;  %6135 = vpow2.f32 %v5350_v31  ;;  %v5520_v5 = vor.u32 %v5838_v62, %v5517_v10  ;;  %v5496_v25 = vor.u32 %v5833_v56, %v5493_v7 }
 0x5aa   :  { %6137 = vrcp.f32 %v7539_v51  ;;  %v2258_v53 = vand.u32 2147483647, %v7539_v51  ;;  %v2260_v39 = vand.u32 2147483648, %v7539_v51  ;;  %vm2254_vm2 = vweird.f32 %v7539_v51 }
 0x5ab   :  { %6139 = vrcp.f32 %v7541_v36  ;;  %v2230_v33 = vpop.f32.mrf.mxu3  ;;  %v2298_v59 = vand.u32 2147483648, %v7541_v36  ;;  %v2296_v17 = vand.u32 2147483647, %v7541_v36  ;;  %v2216_v42 = vpop.f32.mrf.mxu2  ;;  %vm2292_vm1 = vweird.f32 %v7541_v36  ;;  %3009 = vmatpush.bf16.msrb.mxu3 %v5520_v5  ;;  %2912 = vmatpush.bf16.msrb.mxu1 %v5496_v25  ;;  %v5828_v5 = vld [vmem:[#allocation12 + $0x94] sm:$0xf0] }
 0x5ac   :  { %6141 = vpow2.f32 %v5352_v6  ;;  %v2240_v49 = vadd.f32 %v2230_v33, %v596_v20  ;;  %vm7568_vm0 = vcmp.eq.f32.partialorder %v2258_v53, 8.507059e+37  ;;  %v2261_v30 = vor.u32 1.1754944e-38, %v2260_v39  ;;  %v5499_v6 = vld [vmem:[#allocation12 + $0xc8] sm:$0xf]  ;;  %v5834_v39 = vld [vmem:[#allocation12 + $0xcc] sm:$0xf] }
 0x5ad   :  { %v2299_v61 = vor.u32 1.1754944e-38, %v2298_v59  ;;  %vm7579_vm4 = vcmp.eq.f32.partialorder %v2296_v17, 8.507059e+37  ;;  %v2239_v8 = vadd.f32 %v2216_v42, %v547_v13  ;;  %v5500_v13 = vor.u32 %v5836_v1, %v5499_v6  ;;  %v5485_v17 = vld [vmem:[#allocation12 + $0xb8] sm:$0xf0]  ;;  %v5827_v42 = vld [vmem:[#allocation12 + $0x8c] sm:$0xf0] }
 0x5ae   :  { %v6134_v11 = vpop.eup %6133  ;;  %v5354_v45 = vmul.f32 -1.442695, %v2240_v49  ;;  %v5480_v62 = vor.u32 %v5829_v57, %v5477_v52  ;;  %v5822_v52 = vld [vmem:[#allocation12 + $0x6c] sm:$0xf] }
 0x5af   :  { %v6136_v41 = vpop.eup %6135  ;;  %v7551_v47 = vadd.f32 1.0, %v6134_v11  ;;  %2961 = vmatpush.bf16.msrb.mxu2 %v5500_v13  ;;  %v5453_v13 = vld [vmem:[#allocation12 + $0x78] sm:$0xf0] }
 0x5b0   :  { %v7553_v55 = vpop.eup %6137  ;;  %v7556_v60 = vadd.f32 1.0, %v6136_v41  ;;  %2913 = vmatpush.bf16.msrb.mxu1 %v5480_v62 }
 0x5b1   :  { %v7558_v3 = vpop.eup %6139  ;;  %v2250_v14 = vmul.f32 %v7553_v55, %v7539_v51  ;;  %6143 = vrcp.f32 %v7551_v47  ;;  %vm2255_vm3 = vweird.f32 %v7553_v55  ;;  %v2336_v44 = vand.u32 2147483647, %v7551_v47  ;;  %v5823_v51 = vld [vmem:[#allocation12 + $0x6c] sm:$0xf0] }
 0x5b2   :  { %v6142_v22 = vpop.eup %6141  ;;  %v2288_v26 = vmul.f32 %v7558_v3, %v7541_v36  ;;  %6145 = vtanh.f32 %v2235_v50  ;;  %vm2293_vm5 = vweird.f32 %v7558_v3  ;;  %v2273_v31 = vand.u32 2147483647, %v7556_v60  ;;  %vm7595_vm6 = vmor %vm2254_vm2, %vm2255_vm3 }
 0x5b3   :  { %v2251_v35 = vsub.f32 1.0, %v2250_v14  ;;  %6147 = vrcp.f32 %v7556_v60  ;;  %v7573_v40 = vadd.f32 1.0, %v6142_v22  ;;  %v2275_v20 = vand.u32 2147483648, %v7556_v60  ;;  %vm7612_vm7 = vmor %vm2292_vm1, %vm2293_vm5  ;;  %v5832_v14 = vld [vmem:[#allocation12 + $0xb4] sm:$0xf0] }
 0x5b4   :  { %v2289_v54 = vsub.f32 1.0, %v2288_v26  ;;  %vm2269_vm8 = vweird.f32 %v7556_v60  ;;  %vm7640_vm10 = vcmp.eq.f32.partialorder %v2273_v31, 8.507059e+37  ;;  %vm2332_vm1 = vweird.f32 %v7551_v47 }
 0x5b5   :  { %v2252_v16 = vmul.f32 %v7553_v55, %v2251_v35  ;;  %6149 = vrcp.f32 %v7573_v40  ;;  %v2313_v0 = vand.u32 2147483648, %v7573_v40  ;;  %v2311_v50 = vand.u32 2147483647, %v7573_v40  ;;  %v5459_v35 = vld [vmem:[#allocation12 + $0x80] sm:$0xf] }
 0x5b6   :  { %v2290_v46 = vmul.f32 %v7558_v3, %v2289_v54  ;;  %6151 = vpow2.f32 %v5354_v45  ;;  %v5504_v54 = vor.u32 %v5834_v39, %v5501_v12  ;;  %v5460_v7 = vor.u32 %v5827_v42, %v5459_v35  ;;  %v5443_v12 = vld [vmem:[#allocation12 + $0x60] sm:$0xf]  ;;  %v5820_v35 = vld [vmem:[#allocation12 + $0x54] sm:$0xf0] }
 0x5b7   :  { %v7587_v15 = vpop.eup %6143  ;;  %v2253_v19 = vadd.f32 %v7553_v55, %v2252_v16  ;;  %6153 = vtanh.f32 %v2239_v8  ;;  %v2276_v34 = vor.u32 1.1754944e-38, %v2275_v20  ;;  %vm2307_vm13 = vweird.f32 %v7573_v40 }
 0x5b8   :  { %v6146_v21 = vpop.eup %6145  ;;  %v2291_v53 = vadd.f32 %v7558_v3, %v2290_v46  ;;  %v7602_v33 = vmul.f32 %v7587_v15, %v7551_v47  ;;  %3010 = vmatpush.bf16.msrb.mxu3 %v5504_v54  ;;  %v5464_v20 = vor.u32 %v5825_v28, %v5461_v23  ;;  %vm2312_vm15 = vcmp.eq.f32.partialorder %v2311_v50, 8.507059e+37  ;;  %v5815_v28 = vld [vmem:[#allocation12 + $0x2c] sm:$0xf0]  ;;  %v5870_v23 = vld [vmem:[#allocation13 + $0xec] sm:$0xf] }
 0x5b9   :  { %v7606_v24 = vpop.eup %6147  ;;  %v2257_v11 = vsel %vm7595_vm6, %v7553_v55, %v2253_v19  ;;  %v5483_v55 = vld [vmem:[#allocation12 + $0xa8] sm:$0xf]  ;;  %vm7699_vm3 = vcmp.eq.f32.partialorder %v2336_v44, 8.507059e+37 }
 0x5ba   :  { %v2262_v41 = vsel %vm7568_vm0, %v2261_v30, %v2257_v11  ;;  %v2295_v36 = vsel %vm7612_vm7, %v7558_v3, %v2291_v53  ;;  %v2265_v49 = vmul.f32 %v7606_v24, %v7556_v60  ;;  %v5830_v3 = vld [vmem:[#allocation12 + $0xac] sm:$0xf]  ;;  %v2329_v26 = vsub.f32 1.0, %v7602_v33  ;;  %v5467_v19 = vld [vmem:[#allocation12 + $0x88] sm:$0xf]  ;;  %2914 = vmatpush.bf16.msrb.mxu1 %v5464_v20 }
 0x5bb   :  { %v7627_v59 = vpop.eup %6149  ;;  %v2300_v63 = vsel %vm7579_vm4, %v2299_v61, %v2295_v36  ;;  %v2359_v4 = vmul.f32 %v6146_v21, %v2262_v41  ;;  %vm2270_vm9 = vweird.f32 %v7606_v24  ;;  %v5476_v61 = vor.u32 %v5831_v58, %v5475_v43  ;;  %v5826_v53 = vld [vmem:[#allocation12 + $0x8c] sm:$0xf]  ;;  %v5469_v33 = vld [vmem:[#allocation12 + $0x98] sm:$0xf0]  ;;  %v5821_v11 = vld [vmem:[#allocation12 + $0x64] sm:$0xf] }
 0x5bc   :  { %v2357_v22 = vmul.f32 %v2300_v63, %v7511_v2  ;;  %v2266_v27 = vsub.f32 1.0, %v2265_v49  ;;  %v2303_v30 = vmul.f32 %v7627_v59, %v7573_v40  ;;  %v6152_v45 = vpop.eup %6151  ;;  %v5484_v8 = vor.u32 %v5832_v14, %v5483_v55  ;;  %vm7653_vm12 = vmor %vm2269_vm8, %vm2270_vm9  ;;  %v5445_v43 = vld [vmem:[#allocation12 + $0x70] sm:$0xf0]  ;;  %v5451_v58 = vld [vmem:[#allocation12 + $0x68] sm:$0xf] }
 0x5bd   :  { %v7644_v46 = vadd.f32 1.0, %v6152_v45  ;;  %2864 = vmatpush.bf16.msrb.mxu0 %v5476_v61  ;;  %v5488_v56 = vor.u32 %v5830_v3, %v5485_v17  ;;  %v6154_v6 = vpop.eup %6153  ;;  %vm2308_vm11 = vweird.f32 %v7627_v59  ;;  %v2330_v39 = vmul.f32 %v7587_v15, %v2329_v26  ;;  %v5824_v41 = vld [vmem:[#allocation12 + $0x74] sm:$0xf0]  ;;  %v5427_v14 = vld [vmem:[#allocation12 + $0x40] sm:$0xf] }
 0x5be   :  { %v7637_v10 = vadd.f32 %v2359_v4, %v2357_v22  ;;  %v2304_v16 = vsub.f32 1.0, %v2303_v30  ;;  %v2267_v2 = vmul.f32 %v7606_v24, %v2266_v27  ;;  %2962 = vmatpush.bf16.msrb.mxu2 %v5484_v8  ;;  %v5468_v25 = vor.u32 %v5828_v5, %v5467_v19  ;;  %vm7666_vm14 = vmor %vm2307_vm13, %vm2308_vm11  ;;  %v5817_v17 = vld [vmem:[#allocation12 + $0x44] sm:$0xf]  ;;  %v5429_v22 = vld [vmem:[#allocation12 + $0x50] sm:$0xf0] }
 0x5bf   :  { %6155 = vrcp.f32 %v7644_v46  ;;  %v2314_v49 = vor.u32 1.1754944e-38, %v2313_v0  ;;  %3011 = vmatpush.bf16.msrb.mxu3 %v5488_v56  ;;  %v5444_v4 = vor.u32 %v5823_v51, %v5443_v12  ;;  %v5819_v0 = vld [vmem:[#allocation12 + $0x4c] sm:$0xf0]  ;;  %v5448_v40 = vor.u32 %v5821_v11, %v5445_v43  ;;  %v5435_v30 = vld [vmem:[#allocation12 + $0x48] sm:$0xf] }
 0x5c0   :  { %v2305_v1 = vmul.f32 %v7627_v59, %v2304_v16  ;;  %v2268_v31 = vadd.f32 %v7606_v24, %v2267_v2  ;;  %6157 = vtanh.f32 %v7637_v10  ;;  %v5452_v50 = vor.u32 %v5824_v41, %v5451_v58  ;;  %v5818_v61 = vld [vmem:[#allocation12 + $0x4c] sm:$0xf]  ;;  %v5413_v19 = vld [vmem:[#allocation12 + $0x30] sm:$0xf0]  ;;  %v5816_v21 = vld [vmem:[#allocation12 + $0x34] sm:$0xf0] }
 0x5c1   :  { %2865 = vmatpush.bf16.msrb.mxu0 %v5460_v7  ;;  %v2331_v26 = vadd.f32 %v7587_v15, %v2330_v39  ;;  %vm2333_vm0 = vweird.f32 %v7587_v15  ;;  %v5456_v45 = vor.u32 %v5822_v52, %v5453_v13  ;;  %v5428_v54 = vor.u32 %v5819_v0, %v5427_v14  ;;  %2915 = vmatpush.bf16.msrb.mxu1 %v5448_v40  ;;  %v5813_v7 = vld [vmem:[#allocation12 + $0x24] sm:$0xf]  ;;  %v5814_v39 = vld [vmem:[#allocation12 + $0x2c] sm:$0xf]  ;;  %v5421_v51 = vld [vmem:[#allocation12 + $0x38] sm:$0xf0] }
 0x5c2   :  { %v2272_v60 = vsel %vm7653_vm12, %v7606_v24, %v2268_v31  ;;  %v2306_v38 = vadd.f32 %v7627_v59, %v2305_v1  ;;  %v5472_v24 = vor.u32 %v5826_v53, %v5469_v33  ;;  %2963 = vmatpush.bf16.msrb.mxu2 %v5468_v25  ;;  %v5432_v2 = vor.u32 %v5817_v17, %v5429_v22  ;;  %vm7693_vm2 = vmor %vm2332_vm1, %vm2333_vm0  ;;  %v5419_v31 = vld [vmem:[#allocation12 + $0x28] sm:$0xf]  ;;  %v5395_v11 = vld [vmem:[#allocation12] sm:$0xf] }
 0x5c3   :  { %v2277_v57 = vsel %vm7640_vm10, %v2276_v34, %v2272_v60  ;;  %v5436_v56 = vor.u32 %v5820_v35, %v5435_v30  ;;  %v2335_v5 = vsel %vm7693_vm2, %v7587_v15, %v2331_v26  ;;  %v2353_v44 = vand.u32 2147483648, %v7644_v46  ;;  %v5811_v60 = vld [vmem:[#allocation12 + $0xc] sm:$0xf0]  ;;  %v5809_v25 = vld [vmem:[#allocation12 + $0x4] sm:$0xf] }
 0x5c4   :  { %v2310_v55 = vsel %vm7666_vm14, %v7627_v59, %v2306_v38  ;;  %v2360_v63 = vmul.f32 %v6154_v6, %v2277_v57  ;;  %v2338_v59 = vand.u32 2147483648, %v7551_v47  ;;  %3012 = vmatpush.bf16.msrb.mxu3 %v5472_v24  ;;  %v2351_v47 = vand.u32 2147483647, %v7644_v46  ;;  %v5397_v43 = vld [vmem:[#allocation12 + $0x10] sm:$0xf0] }
 0x5c5   :  { %v2315_v3 = vsel %vm2312_vm15, %v2314_v49, %v2310_v55  ;;  %v7684_v42 = vpop.eup %6155  ;;  %2866 = vmatpush.bf16.msrb.mxu0 %v5444_v4  ;;  %v5440_v53 = vor.u32 %v5818_v61, %v5437_v18  ;;  %2916 = vmatpush.bf16.msrb.mxu1 %v5432_v2  ;;  %v5416_v15 = vor.u32 %v5813_v7, %v5413_v19  ;;  %vm2347_vm5 = vweird.f32 %v7644_v46  ;;  %v5403_v36 = vld [vmem:[#allocation12 + $0x8] sm:$0xf]  ;;  %v5812_v49 = vld [vmem:[#allocation12 + $0x14] sm:$0xf0]  ;;  %v5810_v13 = vld [vmem:[#allocation12 + $0xc] sm:$0xf] }
 0x5c6   :  { %v2358_v27 = vmul.f32 %v2315_v3, %v7525_v32  ;;  %v2343_v16 = vmul.f32 %v7684_v42, %v7644_v46  ;;  %v5411_v32 = vld [vmem:[#allocation12 + $0x20] sm:$0xf]  ;;  %2964 = vmatpush.bf16.msrb.mxu2 %v5452_v50  ;;  %v2339_v6 = vor.u32 1.1754944e-38, %v2338_v59  ;;  %v6158_v34 = vpop.eup %6157  ;;  %vm2348_vm4 = vweird.f32 %v7684_v42  ;;  %v5405_v14 = vld [vmem:[#allocation12 + $0x18] sm:$0xf0] }
 0x5c7   :  { %v5412_v33 = vor.u32 %v5815_v28, %v5411_v32  ;;  %v5420_v20 = vor.u32 %v5816_v21, %v5419_v31  ;;  %vm2349_vm6 = vmor %vm2347_vm5, %vm2348_vm4  ;;  %v2354_v57 = vor.u32 1.1754944e-38, %v2353_v44  ;;  %v5424_v24 = vor.u32 %v5814_v39, %v5421_v51  ;;  %v5871_v61 = vld [vmem:[#allocation13 + $0xec] sm:$0xf0]  ;;  %v5637_v18 = vld [vmem:[#allocation13 + $0xf0] sm:$0xf0] }
 0x5c8   :  { %v7687_v62 = vadd.f32 %v2360_v63, %v2358_v27  ;;  %v2344_v1 = vsub.f32 1.0, %v2343_v16  ;;  %3013 = vmatpush.bf16.msrb.mxu3 %v5456_v45  ;;  %v2340_v38 = vsel %vm7699_vm3, %v2339_v6, %v2335_v5  ;;  %v5396_v52 = vor.u32 %v5811_v60, %v5395_v11  ;;  %v5802_v45 = vld [vmem:[#allocation3] sm:$0xff]  ;;  %v5869_v16 = vld [vmem:[#allocation13 + $0xe4] sm:$0xf]  ;;  %v5803_v28 = vld [vmem:[#allocation3 + $0x18] sm:$0xff] }
 0x5c9   :  { %2867 = vmatpush.bf16.msrb.mxu0 %v5428_v54  ;;  %v2365_v41 = vmul.f32 %v6158_v34, %v2340_v38  ;;  %vm2352_vm7 = vcmp.eq.f32.partialorder %v2351_v47, 8.507059e+37  ;;  %2917 = vmatpush.bf16.msrb.mxu1 %v5416_v15  ;;  %v5400_v4 = vor.u32 %v5809_v25, %v5397_v43  ;;  %v5404_v0 = vor.u32 %v5812_v49, %v5403_v36  ;;  %v5635_v54 = vld [vmem:[#allocation13 + $0xe0] sm:$0xf]  ;;  %v5645_v8 = vld [vmem:[#allocation13 + $0xf8] sm:$0xf0]  ;;  %v5804_v44 = vld [vmem:[#allocation3 + $0x10] sm:$0xff] }
 0x5ca   :  { %6159 = vtanh.f32 %v7687_v62  ;;  %v2345_v12 = vmul.f32 %v7684_v42, %v2344_v1  ;;  %2965 = vmatpush.bf16.msrb.mxu2 %v5436_v56  ;;  %v5408_v50 = vor.u32 %v5810_v13, %v5405_v14  ;;  %v7718_v2 = vor.u32 %v5871_v61, %v5635_v54  ;;  %v5643_v56 = vld [vmem:[#allocation13 + $0xe8] sm:$0xf]  ;;  %v5872_v19 = vld [vmem:[#allocation13 + $0xf4] sm:$0xf0]  ;;  %v5619_v5 = vld [vmem:[#allocation13 + $0xc0] sm:$0xf] }
 0x5cb   :  { %v2367_v40 = vpack.c.bf16 %v2365_v41, %v2365_v41  ;;  %v2371_v22 = vmax.f32 %v2365_v41, 0.0  ;;  %v7720_v32 = vor.u32 %v5869_v16, %v5637_v18  ;;  %v7724_v7 = vor.u32 %v5870_v23, %v5645_v8  ;;  %v5867_v6 = vld [vmem:[#allocation13 + $0xcc] sm:$0xf0]  ;;  %v5865_v21 = vld [vmem:[#allocation13 + $0xc4] sm:$0xf]  ;;  %v8939_v18 = vld [vmem:[#allocation73_spill] sm:$0xff] }
 0x5cc   :  { %v2346_v58 = vadd.f32 %v7684_v42, %v2345_v12  ;;  %3014 = vmatpush.bf16.msrb.mxu3 %v5440_v53  ;;  %v7726_v1 = vor.u32 %v5872_v19, %v5643_v56  ;;  %v7728_v31 = vor.u32 %v5867_v6, %v5619_v5  ;;  %v5621_v34 = vld [vmem:[#allocation13 + $0xd0] sm:$0xf0]  ;;  %v5866_v53 = vld [vmem:[#allocation13 + $0xcc] sm:$0xf]  ;;  %v5627_v39 = vld [vmem:[#allocation13 + $0xc8] sm:$0xf] }
 0x5cd   :  { %2868 = vmatpush.bf16.msrb.mxu0 %v5412_v33  ;;  %2918 = vmatpush.bf16.msrb.mxu1 %v5400_v4  ;;  %v2391_v27 = vunpack.c.l.b16 %v2367_v40  ;;  %v7731_v47 = vor.u32 %v5865_v21, %v5621_v34  ;;  %v5629_v33 = vld [vmem:[#allocation13 + $0xd8] sm:$0xf0]  ;;  %v5868_v15 = vld [vmem:[#allocation13 + $0xd4] sm:$0xf0]  ;;  %v5603_v51 = vld [vmem:[#allocation13 + $0xa0] sm:$0xf] }
 0x5ce   :  { %v2350_v63 = vsel %vm2349_vm6, %v7684_v42, %v2346_v58  ;;  %2966 = vmatpush.bf16.msrb.mxu2 %v5420_v20  ;;  %v5801_v42 = vld [vmem:[#allocation3 + $0x30] sm:$0xff]  ;;  %v7736_v12 = vor.u32 %v5866_v53, %v5629_v33  ;;  %v7738_v60 = vor.u32 %v5868_v15, %v5627_v39  ;;  %v5861_v20 = vld [vmem:[#allocation13 + $0xa4] sm:$0xf]  ;;  %v5605_v25 = vld [vmem:[#allocation13 + $0xb0] sm:$0xf0] }
 0x5cf   :  { %v2355_v46 = vsel %vm2352_vm7, %v2354_v57, %v2350_v63  ;;  %v5863_v11 = vld [vmem:[#allocation13 + $0xac] sm:$0xf0]  ;;  %v7743_v43 = vor.u32 %v5861_v20, %v5605_v25  ;;  %v5805_v58 = vld [vmem:[#allocation3 + $0x8] sm:$0xff]  ;;  %v5862_v41 = vld [vmem:[#allocation13 + $0xac] sm:$0xf] }
 0x5d0   :  { %v6160_v55 = vpop.eup %6159  ;;  %3015 = vmatpush.bf16.msrb.mxu3 %v5424_v24  ;;  %v7740_v38 = vor.u32 %v5863_v11, %v5603_v51  ;;  %v5613_v36 = vld [vmem:[#allocation13 + $0xb8] sm:$0xf0]  ;;  %v5587_v63 = vld [vmem:[#allocation13 + $0x80] sm:$0xf]  ;;  %v5859_v13 = vld [vmem:[#allocation13 + $0x8c] sm:$0xf0] }
 0x5d1   :  { %v2366_v3 = vmul.f32 %v6160_v55, %v2355_v46  ;;  %2869 = vmatpush.bf16.msrb.mxu0 %v5396_v52  ;;  %v7748_v49 = vor.u32 %v5862_v41, %v5613_v36  ;;  %v5806_v57 = vld [vmem:[#allocation3 + $0x20] sm:$0xff]  ;;  %v5611_v52 = vld [vmem:[#allocation13 + $0xa8] sm:$0xf]  ;;  %v5864_v55 = vld [vmem:[#allocation13 + $0xb4] sm:$0xf0] }
 0x5d2   :  { %2967 = vmatpush.bf16.msrb.mxu2 %v5404_v0  ;;  %v7751_v4 = vor.u32 %v5864_v55, %v5611_v52  ;;  %v5857_v14 = vld [vmem:[#allocation13 + $0x84] sm:$0xf]  ;;  %v5589_v46 = vld [vmem:[#allocation13 + $0x90] sm:$0xf0]  ;;  %v7753_v0 = vor.u32 %v5859_v13, %v5587_v63  ;;  %v5597_v20 = vld [vmem:[#allocation13 + $0x98] sm:$0xf0] }
 0x5d3   :  { %v2368_v17 = vpack.c.bf16 %v2366_v3, %v2366_v3  ;;  %v2372_v26 = vmax.f32 %v2366_v3, 0.0  ;;  %v7755_v3 = vor.u32 %v5857_v14, %v5589_v46  ;;  %v8935_v40 = vld [vmem:[#allocation68_spill] sm:$0xff]  ;;  %v8941_v36 = vld [vmem:[#allocation77_spill] sm:$0xff]  ;;  %v8942_v55 = vld [vmem:[#allocation79_spill] sm:$0xff] }
 0x5d4   :  { %3016 = vmatpush.bf16.msrb.mxu3 %v5408_v50  ;;  %v452_v50 = vadd.f32 %v8935_v40, %v8898_v37  ;;  %v8938_v61 = vld [vmem:[#allocation72_spill] sm:$0xff]  ;;  %v552_v63 = vadd.f32 %v8942_v55, %v8884_v29 }
 0x5d5   :  { %v5914_v59 = vpack.c.bf16 %v2372_v26, %v2371_v22  ;;  %v2392_v30 = vunpack.c.l.b16 %v2368_v17  ;;  %v8936_v17 = vld [vmem:[#allocation69_spill] sm:$0xff]  ;;  %v454_v16 = vadd.f32 %v8938_v61, %v8898_v37  ;;  %v8940_v51 = vld [vmem:[#allocation76_spill] sm:$0xff] }
 0x5d6   :  { %v501_v22 = vadd.f32 %v8936_v17, %v8900_v48  ;;  %v550_v37 = vadd.f32 %v8940_v51, %v8884_v29  ;;  %v5595_v51 = vld [vmem:[#allocation13 + $0x88] sm:$0xf] }
 0x5d7   :  { %5915 = vst [vmem:[#allocation3 + $0x28] sm:$0xff] %v5914_v59   ;;  %v2393_v35 = vpack.c.b16 %v2392_v30, %v2391_v27 }
 0x5d9   :  { %2403 = vmatmul.bf16.vlgmr.msra.gmra.mxu0 %v2393_v35  ;;  %2417 = vmatmul.bf16.vlgmr.msra.gmra.mxu1 %v2393_v35 }
 0x5da   :  { %2431 = vmatmul.bf16.vlgmr.msra.gmra.mxu2 %v2393_v35  ;;  %2445 = vmatmul.bf16.vlgmr.msra.gmra.mxu3 %v2393_v35 }
 0x5db   :  { %3322 = vmatpush.bf16.msra.mxu0 %v7718_v2  ;;  %3336 = vmatpush.bf16.msra.mxu1 %v7720_v32 }
 0x5dc   :  { %3364 = vmatpush.bf16.msra.mxu3 %v7724_v7  ;;  %3350 = vmatpush.bf16.msra.mxu2 %v7726_v1 }
 0x5de   :  { %v5807_v24 = vld [vmem:[#allocation3 + $0x28] sm:$0xff] }
 0x5df   :  { %3323 = vmatpush.bf16.msra.mxu0 %v7728_v31  ;;  %3337 = vmatpush.bf16.msra.mxu1 %v7731_v47 }
 0x5e0   :  { %3365 = vmatpush.bf16.msra.mxu3 %v7736_v12  ;;  %3351 = vmatpush.bf16.msra.mxu2 %v7738_v60 }
 0x5e3   :  { %3324 = vmatpush.bf16.msra.mxu0 %v7740_v38  ;;  %3338 = vmatpush.bf16.msra.mxu1 %v7743_v43 }
 0x5e4   :  { %3366 = vmatpush.bf16.msra.mxu3 %v7748_v49  ;;  %3352 = vmatpush.bf16.msra.mxu2 %v7751_v4 }
 0x5e7   :  { %3325 = vmatpush.bf16.msra.mxu0 %v7753_v0  ;;  %3339 = vmatpush.bf16.msra.mxu1 %v7755_v3 }
 0x5e9   :  { %2870 = vmatmul.bf16.vlgmr.msrb.gmra.mxu0 %v5801_v42  ;;  %2919 = vmatmul.bf16.vlgmr.msrb.gmra.mxu1 %v5801_v42 }
 0x5ea   :  { %2968 = vmatmul.bf16.vlgmr.msrb.gmra.mxu2 %v5801_v42  ;;  %3017 = vmatmul.bf16.vlgmr.msrb.gmra.mxu3 %v5801_v42 }
 0x5f9   :  { %2875 = vmatmul.bf16.gmra.mxu0 %v5802_v45  ;;  %2924 = vmatmul.bf16.gmra.mxu1 %v5802_v45 }
 0x5fa   :  { %2973 = vmatmul.bf16.gmra.mxu2 %v5802_v45  ;;  %3022 = vmatmul.bf16.gmra.mxu3 %v5802_v45  ;;  %v8937_v45 = vld [vmem:[#allocation71_spill] sm:$0xff] }
 0x5fb   :  { %v599_v54 = vadd.f32 %v8937_v45, %v8902_v9 }
 0x609   :  { %2880 = vmatmul.bf16.gmra.mxu0 %v5803_v28  ;;  %2929 = vmatmul.bf16.gmra.mxu1 %v5803_v28 }
 0x60a   :  { %2978 = vmatmul.bf16.gmra.mxu2 %v5803_v28  ;;  %3027 = vmatmul.bf16.gmra.mxu3 %v5803_v28  ;;  %v503_v28 = vadd.f32 %v8939_v18, %v8900_v48  ;;  %v5858_v48 = vld [vmem:[#allocation13 + $0x8c] sm:$0xf] }
 0x619   :  { %2885 = vmatmul.bf16.gmra.mxu0 %v5804_v44  ;;  %2934 = vmatmul.bf16.gmra.mxu1 %v5804_v44 }
 0x61a   :  { %2983 = vmatmul.bf16.gmra.mxu2 %v5804_v44  ;;  %3032 = vmatmul.bf16.gmra.mxu3 %v5804_v44 }
 0x629   :  { %2890 = vmatmul.bf16.gmra.mxu0 %v5805_v58  ;;  %2939 = vmatmul.bf16.gmra.mxu1 %v5805_v58 }
 0x62a   :  { %2988 = vmatmul.bf16.gmra.mxu2 %v5805_v58  ;;  %3037 = vmatmul.bf16.gmra.mxu3 %v5805_v58  ;;  %v7775_v58 = vor.u32 %v5858_v48, %v5597_v20 }
 0x62c   :  { %3367 = vmatpush.bf16.msra.mxu3 %v7775_v58 }
 0x639   :  { %2895 = vmatmul.bf16.gmra.mxu0 %v5806_v57  ;;  %2944 = vmatmul.bf16.gmra.mxu1 %v5806_v57 }
 0x63a   :  { %2993 = vmatmul.bf16.gmra.mxu2 %v5806_v57  ;;  %3042 = vmatmul.bf16.gmra.mxu3 %v5806_v57  ;;  %v601_v57 = vadd.f32 %v8941_v36, %v8902_v9  ;;  %v5571_v36 = vld [vmem:[#allocation13 + $0x60] sm:$0xf] }
 0x649   :  { %2900 = vmatmul.bf16.gmra.mxu0 %v5807_v24  ;;  %2949 = vmatmul.bf16.gmra.mxu1 %v5807_v24 }
 0x64a   :  { %2998 = vmatmul.bf16.gmra.mxu2 %v5807_v24  ;;  %3047 = vmatmul.bf16.gmra.mxu3 %v5807_v24 }
 0x656   :  { %v2404_v26 = vpop.f32.mrf.mxu0  ;;  %v2418_v59 = vpop.f32.mrf.mxu1 }
 0x657   :  { %v2451_v27 = vadd.f32 %v2404_v26, %v452_v50  ;;  %v2452_v30 = vadd.f32 %v2418_v59, %v501_v22 }
 0x659   :  { %v5355_v35 = vmul.f32 -1.442695, %v2451_v27  ;;  %v5357_v42 = vmul.f32 -1.442695, %v2452_v30 }
 0x65b   :  { %6161 = vpow2.f32 %v5355_v35 }
 0x65c   :  { %6163 = vpow2.f32 %v5357_v42 }
 0x65d   :  { %v2446_v23 = vpop.f32.mrf.mxu3  ;;  %v2432_v5 = vpop.f32.mrf.mxu2 }
 0x65e   :  { %v2454_v8 = vadd.f32 %v2446_v23, %v599_v54  ;;  %v2406_v56 = vpop.f32.mrf.mxu0  ;;  %v2420_v19 = vpop.f32.mrf.mxu1  ;;  %v2453_v25 = vadd.f32 %v2432_v5, %v550_v37  ;;  %v5860_v37 = vld [vmem:[#allocation13 + $0x94] sm:$0xf0] }
 0x65f   :  { %v2455_v6 = vadd.f32 %v2406_v56, %v454_v16  ;;  %v2456_v21 = vadd.f32 %v2420_v19, %v503_v28 }
 0x660   :  { %v5359_v34 = vmul.f32 -1.442695, %v2454_v8 }
 0x661   :  { %v6162_v44 = vpop.eup %6161  ;;  %v5356_v53 = vmul.f32 -1.442695, %v2455_v6  ;;  %v5358_v15 = vmul.f32 -1.442695, %v2456_v21 }
 0x662   :  { %v6164_v33 = vpop.eup %6163  ;;  %v2465_v39 = vadd.f32 1.0, %v6162_v44  ;;  %6165 = vpow2.f32 %v5359_v34 }
 0x663   :  { %v7772_v11 = vadd.f32 1.0, %v6164_v33  ;;  %6167 = vpow2.f32 %v5356_v53 }
 0x664   :  { %6169 = vrcp.f32 %v2465_v39  ;;  %v2476_v17 = vand.u32 2147483647, %v2465_v39  ;;  %v2478_v22 = vand.u32 2147483648, %v2465_v39  ;;  %vm2472_vm8 = vweird.f32 %v2465_v39 }
 0x665   :  { %6171 = vrcp.f32 %v7772_v11  ;;  %v2448_v41 = vpop.f32.mrf.mxu3  ;;  %v2434_v14 = vpop.f32.mrf.mxu2  ;;  %v2516_v50 = vand.u32 2147483648, %v7772_v11  ;;  %vm2510_vm9 = vweird.f32 %v7772_v11  ;;  %v2514_v30 = vand.u32 2147483647, %v7772_v11 }
 0x666   :  { %6173 = vpow2.f32 %v5358_v15  ;;  %v2458_v46 = vadd.f32 %v2448_v41, %v601_v57  ;;  %v2457_v35 = vadd.f32 %v2434_v14, %v552_v63  ;;  %vm7794_vm10 = vcmp.eq.f32.partialorder %v2476_v17, 8.507059e+37  ;;  %v5855_v57 = vld [vmem:[#allocation13 + $0x6c] sm:$0xf0]  ;;  %v5853_v63 = vld [vmem:[#allocation13 + $0x64] sm:$0xf] }
 0x667   :  { %6175 = vtanh.f32 %v2453_v25  ;;  %v2517_v16 = vor.u32 1.1754944e-38, %v2516_v50  ;;  %v2479_v28 = vor.u32 1.1754944e-38, %v2478_v22  ;;  %vm7800_vm13 = vcmp.eq.f32.partialorder %v2514_v30, 8.507059e+37  ;;  %v5573_v14 = vld [vmem:[#allocation13 + $0x70] sm:$0xf0] }
 0x668   :  { %v6166_v24 = vpop.eup %6165  ;;  %v5360_v54 = vmul.f32 -1.442695, %v2458_v46  ;;  %v7827_v41 = vor.u32 %v5860_v37, %v5595_v51  ;;  %v7839_v17 = vor.u32 %v5855_v57, %v5571_v36  ;;  %v5854_v22 = vld [vmem:[#allocation13 + $0x6c] sm:$0xf]  ;;  %v5856_v51 = vld [vmem:[#allocation13 + $0x74] sm:$0xf0] }
 0x669   :  { %v6168_v52 = vpop.eup %6167  ;;  %v7782_v13 = vadd.f32 1.0, %v6166_v24  ;;  %v5555_v37 = vld [vmem:[#allocation13 + $0x40] sm:$0xf]  ;;  %v5849_v36 = vld [vmem:[#allocation13 + $0x44] sm:$0xf] }
 0x66a   :  { %v6170_v40 = vpop.eup %6169  ;;  %v7785_v26 = vadd.f32 1.0, %v6168_v52  ;;  %3353 = vmatpush.bf16.msra.mxu2 %v7827_v41  ;;  %3326 = vmatpush.bf16.msra.mxu0 %v7839_v17  ;;  %v5557_v57 = vld [vmem:[#allocation13 + $0x50] sm:$0xf0] }
 0x66b   :  { %v6172_v9 = vpop.eup %6171  ;;  %v2468_v59 = vmul.f32 %v6170_v40, %v2465_v39  ;;  %6177 = vrcp.f32 %v7782_v13  ;;  %vm2473_vm11 = vweird.f32 %v6170_v40  ;;  %v2556_v56 = vand.u32 2147483648, %v7782_v13 }
 0x66c   :  { %v6174_v27 = vpop.eup %6173  ;;  %v2506_v29 = vmul.f32 %v6172_v9, %v7772_v11  ;;  %6179 = vrcp.f32 %v7785_v26  ;;  %vm2511_vm12 = vweird.f32 %v6172_v9  ;;  %vm2550_vm14 = vweird.f32 %v7782_v13  ;;  %vm7809_vm15 = vmor %vm2472_vm8, %vm2473_vm11 }
 0x66d   :  { %v2469_v42 = vsub.f32 1.0, %v2468_v59  ;;  %v7792_v45 = vadd.f32 1.0, %v6174_v27  ;;  %v6176_v23 = vpop.eup %6175  ;;  %v2554_v34 = vand.u32 2147483647, %v7782_v13  ;;  %vm2487_vm0 = vweird.f32 %v7785_v26  ;;  %vm2512_vm1 = vmor %vm2510_vm9, %vm2511_vm12 }
 0x66e   :  { %v2507_v61 = vsub.f32 1.0, %v2506_v29  ;;  %v2491_v15 = vand.u32 2147483647, %v7785_v26  ;;  %v7824_v20 = vor.u32 1.1754944e-38, %v2556_v56  ;;  %v2493_v25 = vand.u32 2147483648, %v7785_v26 }
 0x66f   :  { %v2470_v8 = vmul.f32 %v6170_v40, %v2469_v42  ;;  %6181 = vrcp.f32 %v7792_v45  ;;  %vm2525_vm8 = vweird.f32 %v7792_v45  ;;  %vm2555_vm11 = vcmp.eq.f32.partialorder %v2554_v34, 8.507059e+37  ;;  %v5848_v34 = vld [vmem:[#allocation13 + $0x34] sm:$0xf0] }
 0x670   :  { %v2508_v19 = vmul.f32 %v6172_v9, %v2507_v61  ;;  %6183 = vtanh.f32 %v2457_v35  ;;  %v7848_v61 = vor.u32 %v5853_v63, %v5573_v14  ;;  %vm7864_vm6 = vcmp.eq.f32.partialorder %v2491_v15, 8.507059e+37 }
 0x671   :  { %v7804_v6 = vpop.eup %6177  ;;  %v2471_v21 = vadd.f32 %v6170_v40, %v2470_v8  ;;  %6185 = vpow2.f32 %v5360_v54  ;;  %v2531_v54 = vand.u32 2147483648, %v7792_v45  ;;  %v2494_v15 = vor.u32 1.1754944e-38, %v2493_v25 }
 0x672   :  { %v2509_v53 = vadd.f32 %v6172_v9, %v2508_v19  ;;  %v2546_v33 = vmul.f32 %v7804_v6, %v7782_v13  ;;  %v7817_v48 = vpop.eup %6179  ;;  %vm2551_vm2 = vweird.f32 %v7804_v6  ;;  %3340 = vmatpush.bf16.msra.mxu1 %v7848_v61  ;;  %v5547_v13 = vld [vmem:[#allocation13 + $0x28] sm:$0xf] }
 0x673   :  { %v2475_v39 = vsel %vm7809_vm15, %v6170_v40, %v2471_v21  ;;  %v2483_v11 = vmul.f32 %v7817_v48, %v7785_v26  ;;  %vm2488_vm3 = vweird.f32 %v7817_v48  ;;  %vm7859_vm4 = vmor %vm2550_vm14, %vm2551_vm2  ;;  %v5579_v21 = vld [vmem:[#allocation13 + $0x68] sm:$0xf]  ;;  %v2532_v26 = vor.u32 1.1754944e-38, %v2531_v54 }
 0x674   :  { %v2480_v24 = vsel %vm7794_vm10, %v2479_v28, %v2475_v39  ;;  %v2513_v52 = vsel %vm2512_vm1, %v6172_v9, %v2509_v53  ;;  %v2547_v55 = vsub.f32 1.0, %v2546_v33  ;;  %v5581_v9 = vld [vmem:[#allocation13 + $0x78] sm:$0xf0]  ;;  %vm7878_vm7 = vmor %vm2487_vm0, %vm2488_vm3  ;;  %v5851_v39 = vld [vmem:[#allocation13 + $0x4c] sm:$0xf0]  ;;  %v7915_v54 = vor.u32 %v5849_v36, %v5557_v57 }
 0x675   :  { %v7833_v46 = vpop.eup %6181  ;;  %v2518_v40 = vsel %vm7800_vm13, %v2517_v16, %v2513_v52  ;;  %v2577_v50 = vmul.f32 %v6176_v23, %v2480_v24  ;;  %v2484_v30 = vsub.f32 1.0, %v2483_v11  ;;  %v7850_v16 = vor.u32 %v5854_v22, %v5581_v9  ;;  %v5565_v11 = vld [vmem:[#allocation13 + $0x58] sm:$0xf0]  ;;  %v5852_v22 = vld [vmem:[#allocation13 + $0x54] sm:$0xf0] }
 0x676   :  { %v6184_v59 = vpop.eup %6183  ;;  %v2575_v27 = vmul.f32 %v2518_v40, %v7637_v10  ;;  %v2548_v29 = vmul.f32 %v7804_v6, %v2547_v55  ;;  %v2521_v35 = vmul.f32 %v7833_v46, %v7792_v45  ;;  %v2529_v23 = vand.u32 2147483647, %v7792_v45  ;;  %v5850_v55 = vld [vmem:[#allocation13 + $0x4c] sm:$0xf]  ;;  %3341 = vmatpush.bf16.msra.mxu1 %v7915_v54  ;;  %v5533_v57 = vld [vmem:[#allocation13 + $0x18] sm:$0xf0] }
 0x677   :  { %v6186_v42 = vpop.eup %6185  ;;  %v2485_v10 = vmul.f32 %v7817_v48, %v2484_v30  ;;  %vm2526_vm5 = vweird.f32 %v7833_v46  ;;  %3368 = vmatpush.bf16.msra.mxu3 %v7850_v16  ;;  %v7903_v40 = vor.u32 %v5856_v51, %v5579_v21  ;;  %v5847_v30 = vld [vmem:[#allocation13 + $0x2c] sm:$0xf0]  ;;  %v5841_v51 = vld [vmem:[#allocation13 + $0x4] sm:$0xf]  ;;  %v5842_v36 = vld [vmem:[#allocation13 + $0xc] sm:$0xf] }
 0x678   :  { %v2579_v18 = vadd.f32 %v2577_v50, %v2575_v27  ;;  %v2522_v28 = vsub.f32 1.0, %v2521_v35  ;;  %v2549_v8 = vadd.f32 %v7804_v6, %v2548_v29  ;;  %v7868_v5 = vadd.f32 1.0, %v6186_v42  ;;  %vm7886_vm9 = vmor %vm2525_vm8, %vm2526_vm5  ;;  %v5563_v50 = vld [vmem:[#allocation13 + $0x48] sm:$0xf]  ;;  %v5845_v35 = vld [vmem:[#allocation13 + $0x24] sm:$0xf] }
 0x679   :  { %v2486_v53 = vadd.f32 %v7817_v48, %v2485_v10  ;;  %vm7894_vm10 = vcmp.eq.f32.partialorder %v2529_v23, 8.507059e+37  ;;  %v7908_v29 = vor.u32 %v5851_v39, %v5555_v37  ;;  %v5541_v42 = vld [vmem:[#allocation13 + $0x30] sm:$0xf0]  ;;  %3354 = vmatpush.bf16.msra.mxu2 %v7903_v40  ;;  %v7920_v23 = vor.u32 %v5850_v55, %v5565_v11 }
 0x67a   :  { %6187 = vtanh.f32 %v2579_v18  ;;  %v2523_v44 = vmul.f32 %v7833_v46, %v2522_v28  ;;  %v2553_v63 = vsel %vm7859_vm4, %v7804_v6, %v2549_v8  ;;  %v5846_v18 = vld [vmem:[#allocation13 + $0x2c] sm:$0xf]  ;;  %v5549_v28 = vld [vmem:[#allocation13 + $0x38] sm:$0xf0]  ;;  %v7923_v19 = vor.u32 %v5852_v22, %v5563_v50  ;;  %v5525_v37 = vld [vmem:[#allocation13 + $0x10] sm:$0xf0] }
 0x67b   :  { %6189 = vrcp.f32 %v7868_v5  ;;  %v2490_v25 = vsel %vm7878_vm7, %v7817_v48, %v2486_v53  ;;  %v5539_v48 = vld [vmem:[#allocation13 + $0x20] sm:$0xf]  ;;  %3327 = vmatpush.bf16.msra.mxu0 %v7908_v29  ;;  %3369 = vmatpush.bf16.msra.mxu3 %v7920_v23  ;;  %v7934_v39 = vor.u32 %v5848_v34, %v5547_v13  ;;  %v2569_v55 = vand.u32 2147483647, %v7868_v5  ;;  %v7981_v13 = vpop.f32.mrf.mxu2 }
 0x67c   :  { %v2524_v52 = vadd.f32 %v7833_v46, %v2523_v44  ;;  %v2495_v14 = vsel %vm7864_vm6, %v2494_v15, %v2490_v25  ;;  %v7925_v21 = vor.u32 %v5847_v30, %v5539_v48  ;;  %v7927_v44 = vor.u32 %v5845_v35, %v5541_v42  ;;  %v5523_v53 = vld [vmem:[#allocation13] sm:$0xf] }
 0x67d   :  { %v2578_v27 = vmul.f32 %v6184_v59, %v2495_v14  ;;  %v7931_v15 = vor.u32 %v5846_v18, %v5549_v28  ;;  %3355 = vmatpush.bf16.msra.mxu2 %v7923_v19  ;;  %v2571_v25 = vand.u32 2147483648, %v7868_v5  ;;  %v7945_v11 = vor.u32 %v5842_v36, %v5533_v57  ;;  %v5844_v14 = vld [vmem:[#allocation13 + $0x14] sm:$0xf0]  ;;  %v7962_v18 = vpop.f32.mrf.mxu1 }
 0x67e   :  { %v2528_v9 = vsel %vm7886_vm9, %v7833_v46, %v2524_v52  ;;  %v2558_v46 = vsel %vm2555_vm11, %v7824_v20, %v2553_v63  ;;  %v5843_v20 = vld [vmem:[#allocation13 + $0xc] sm:$0xf0]  ;;  %3342 = vmatpush.bf16.msra.mxu1 %v7927_v44  ;;  %v7941_v52 = vor.u32 %v5841_v51, %v5525_v37  ;;  %v5531_v63 = vld [vmem:[#allocation13 + $0x8] sm:$0xf]  ;;  %vm2565_vm13 = vweird.f32 %v7868_v5 }
 0x67f   :  { %v2533_v6 = vsel %vm7894_vm10, %v2532_v26, %v2528_v9  ;;  %3328 = vmatpush.bf16.msra.mxu0 %v7925_v21  ;;  %v7937_v26 = vor.u32 %v5843_v20, %v5523_v53  ;;  %3370 = vmatpush.bf16.msra.mxu3 %v7931_v15  ;;  %v7948_v50 = vor.u32 %v5844_v14, %v5531_v63  ;;  %v2572_v48 = vor.u32 1.1754944e-38, %v2571_v25 }
 0x680   :  { %v6188_v10 = vpop.eup %6187  ;;  %v2576_v59 = vmul.f32 %v2533_v6, %v7687_v62  ;;  %vm2570_vm15 = vcmp.eq.f32.partialorder %v2569_v55, 8.507059e+37  ;;  %v7960_v6 = vpop.f32.mrf.mxu0 }
 0x681   :  { %v6190_v8 = vpop.eup %6189  ;;  %v2583_v56 = vmul.f32 %v6188_v10, %v2558_v46  ;;  %3356 = vmatpush.bf16.msra.mxu2 %v7934_v39  ;;  %v7971_v10 = vpop.f32.mrf.mxu3 }
 0x682   :  { %v2580_v33 = vadd.f32 %v2578_v27, %v2576_v59  ;;  %v2561_v62 = vmul.f32 %v6190_v8, %v7868_v5  ;;  %vm2566_vm12 = vweird.f32 %v6190_v8  ;;  %3343 = vmatpush.bf16.msra.mxu1 %v7941_v52 }
 0x683   :  { %3329 = vmatpush.bf16.msra.mxu0 %v7937_v26  ;;  %vm2567_vm14 = vmor %vm2565_vm13, %vm2566_vm12  ;;  %3371 = vmatpush.bf16.msra.mxu3 %v7945_v11  ;;  %v2589_v35 = vmax.f32 %v2583_v56, 0.0  ;;  %v7999_v20 = vpop.f32.mrf.mxu2 }
 0x684   :  { %6191 = vtanh.f32 %v2580_v33  ;;  %v2562_v24 = vsub.f32 1.0, %v2561_v62  ;;  %v8961_v62 = vmov 0  }
 0x685   :  { %3357 = vmatpush.bf16.msra.mxu2 %v7948_v50  ;;  %v7978_v59 = vpop.f32.mrf.mxu1 }
 0x686   :  { %v2563_v45 = vmul.f32 %v6190_v8, %v2562_v24  ;;  %3535 = vmatpush.bf16.msrb.mxu1 %v7720_v32 }
 0x687   :  { %3521 = vmatpush.bf16.msrb.mxu0 %v7718_v2  ;;  %3563 = vmatpush.bf16.msrb.mxu3 %v7724_v7 }
 0x688   :  { %v2564_v22 = vadd.f32 %v6190_v8, %v2563_v45  ;;  %v7976_v46 = vpop.f32.mrf.mxu0 }
 0x689   :  { %3549 = vmatpush.bf16.msrb.mxu2 %v7726_v1 }
 0x68a   :  { %v6192_v9 = vpop.eup %6191  ;;  %v2568_v27 = vsel %vm2567_vm14, %v6190_v8, %v2564_v22  ;;  %3536 = vmatpush.bf16.msrb.mxu1 %v7731_v47  ;;  %v7989_v8 = vpop.f32.mrf.mxu3 }
 0x68b   :  { %v2573_v30 = vsel %vm2570_vm15, %v2572_v48, %v2568_v27  ;;  %3522 = vmatpush.bf16.msrb.mxu0 %v7728_v31  ;;  %3564 = vmatpush.bf16.msrb.mxu3 %v7736_v12  ;;  %v8017_v36 = vpop.f32.mrf.mxu2 }
 0x68c   :  { %v2584_v5 = vmul.f32 %v6192_v9, %v2573_v30  ;;  %8964 = vst [vmem:[#allocation28_spill] sm:$0xff] %v8017_v36 }
 0x68d   :  { %3550 = vmatpush.bf16.msrb.mxu2 %v7738_v60  ;;  %v7995_v53 = vpop.f32.mrf.mxu1 }
 0x68e   :  { %v2590_v42 = vmax.f32 %v2584_v5, 0.0  ;;  %3537 = vmatpush.bf16.msrb.mxu1 %v7743_v43  ;;  %8959 = vst [vmem:[#allocation22_spill] sm:$0xff] %v7995_v53 }
 0x68f   :  { %3523 = vmatpush.bf16.msrb.mxu0 %v7740_v38  ;;  %3565 = vmatpush.bf16.msrb.mxu3 %v7748_v49 }
 0x690   :  { %v5919_v28 = vpack.c.bf16 %v2590_v42, %v2589_v35  ;;  %v7993_v56 = vpop.f32.mrf.mxu0 }
 0x691   :  { %3551 = vmatpush.bf16.msrb.mxu2 %v7751_v4 }
 0x692   :  { %5920 = vst [vmem:[#allocation3 + $0x38] sm:$0xff] %v5919_v28   ;;  %3538 = vmatpush.bf16.msrb.mxu1 %v7755_v3  ;;  %v8005_v33 = vpop.f32.mrf.mxu3 }
 0x693   :  { %3524 = vmatpush.bf16.msrb.mxu0 %v7753_v0  ;;  %3566 = vmatpush.bf16.msrb.mxu3 %v7775_v58  ;;  %8960 = vst [vmem:[#allocation24_spill] sm:$0xff] %v8005_v33  ;;  %v8037_v45 = vpop.f32.mrf.mxu2 }
 0x694   :  { %8968 = vst [vmem:[#allocation30_spill] sm:$0xff] %v8037_v45 }
 0x695   :  { %3552 = vmatpush.bf16.msrb.mxu2 %v7827_v41  ;;  %v8013_v37 = vpop.f32.mrf.mxu1 }
 0x696   :  { %3539 = vmatpush.bf16.msrb.mxu1 %v7848_v61  ;;  %8963 = vst [vmem:[#allocation26_spill] sm:$0xff] %v8013_v37 }
 0x697   :  { %3525 = vmatpush.bf16.msrb.mxu0 %v7839_v17  ;;  %3567 = vmatpush.bf16.msrb.mxu3 %v7850_v16 }
 0x698   :  { %v8011_v51 = vpop.f32.mrf.mxu0 }
 0x699   :  { %v5808_v34 = vld [vmem:[#allocation3 + $0x38] sm:$0xff]  ;;  %3553 = vmatpush.bf16.msrb.mxu2 %v7903_v40  ;;  %8962 = vst [vmem:[#allocation25_spill] sm:$0xff] %v8011_v51 }
 0x69a   :  { %2905 = vmatmul.bf16.gmra.mxu0 %v5808_v34  ;;  %2954 = vmatmul.bf16.gmra.mxu1 %v5808_v34  ;;  %v8027_v57 = vpop.f32.mrf.mxu3 }
 0x69b   :  { %3003 = vmatmul.bf16.gmra.mxu2 %v5808_v34  ;;  %3052 = vmatmul.bf16.gmra.mxu3 %v5808_v34  ;;  %8965 = vst [vmem:[#allocation23_spill] sm:$0xff] %v8027_v57  ;;  %v8053_v22 = vpop.f32.mrf.mxu2 }
 0x69c   :  { %3526 = vmatpush.bf16.msrb.mxu0 %v7908_v29  ;;  %3540 = vmatpush.bf16.msrb.mxu1 %v7915_v54  ;;  %8972 = vst [vmem:[#allocation36_spill] sm:$0xff] %v8053_v22 }
 0x69d   :  { %3554 = vmatpush.bf16.msrb.mxu2 %v7923_v19  ;;  %3568 = vmatpush.bf16.msrb.mxu3 %v7920_v23  ;;  %v8033_v25 = vpop.f32.mrf.mxu1 }
 0x69e   :  { %8967 = vst [vmem:[#allocation29_spill] sm:$0xff] %v8033_v25 }
 0x6a0   :  { %3527 = vmatpush.bf16.msrb.mxu0 %v7925_v21  ;;  %3541 = vmatpush.bf16.msrb.mxu1 %v7927_v44  ;;  %v8031_v24 = vpop.f32.mrf.mxu0 }
 0x6a1   :  { %3555 = vmatpush.bf16.msrb.mxu2 %v7934_v39  ;;  %3569 = vmatpush.bf16.msrb.mxu3 %v7931_v15  ;;  %8966 = vst [vmem:[#allocation27_spill] sm:$0xff] %v8031_v24 }
 0x6a2   :  { %v8043_v55 = vpop.f32.mrf.mxu3 }
 0x6a3   :  { %8969 = vst [vmem:[#allocation32_spill] sm:$0xff] %v8043_v55  ;;  %v8073_v30 = vpop.f32.mrf.mxu2 }
 0x6a4   :  { %3528 = vmatpush.bf16.msrb.mxu0 %v7937_v26  ;;  %3542 = vmatpush.bf16.msrb.mxu1 %v7941_v52  ;;  %8976 = vst [vmem:[#allocation38_spill] sm:$0xff] %v8073_v30 }
 0x6a5   :  { %3556 = vmatpush.bf16.msrb.mxu2 %v7948_v50  ;;  %3570 = vmatpush.bf16.msrb.mxu3 %v7945_v11  ;;  %v8051_v14 = vpop.f32.mrf.mxu1 }
 0x6a6   :  { %8971 = vst [vmem:[#allocation34_spill] sm:$0xff] %v8051_v14 }
 0x6a8   :  { %v8049_v63 = vpop.f32.mrf.mxu0 }
 0x6a9   :  { %8970 = vst [vmem:[#allocation33_spill] sm:$0xff] %v8049_v63 }
 0x6aa   :  { %3330 = vmatmul.bf16.vlgmr.msra.gmra.mxu0 %v8961_v62  ;;  %3344 = vmatmul.bf16.vlgmr.msra.gmra.mxu1 %v8961_v62  ;;  %v8063_v48 = vpop.f32.mrf.mxu3 }
 0x6ab   :  { %3358 = vmatmul.bf16.vlgmr.msra.gmra.mxu2 %v8961_v62  ;;  %3372 = vmatmul.bf16.vlgmr.msra.gmra.mxu3 %v8961_v62  ;;  %8973 = vst [vmem:[#allocation31_spill] sm:$0xff] %v8063_v48  ;;  %v8081_v28 = vpop.f32.mrf.mxu2 }
 0x6ac   :  { %3720 = vmatpush.bf16.msra.mxu0 %v7718_v2  ;;  %3734 = vmatpush.bf16.msra.mxu1 %v7720_v32  ;;  %8980 = vst [vmem:[#allocation44_spill] sm:$0xff] %v8081_v28 }
 0x6ad   :  { %3748 = vmatpush.bf16.msra.mxu2 %v7726_v1  ;;  %3762 = vmatpush.bf16.msra.mxu3 %v7724_v7  ;;  %v8069_v27 = vpop.f32.mrf.mxu1 }
 0x6ae   :  { %8975 = vst [vmem:[#allocation37_spill] sm:$0xff] %v8069_v27 }
 0x6b0   :  { %3721 = vmatpush.bf16.msra.mxu0 %v7728_v31  ;;  %3735 = vmatpush.bf16.msra.mxu1 %v7731_v47  ;;  %v8067_v9 = vpop.f32.mrf.mxu0 }
 0x6b1   :  { %3749 = vmatpush.bf16.msra.mxu2 %v7738_v60  ;;  %3763 = vmatpush.bf16.msra.mxu3 %v7736_v12  ;;  %8974 = vst [vmem:[#allocation35_spill] sm:$0xff] %v8067_v9 }
 0x6b2   :  { %v8075_v5 = vpop.f32.mrf.mxu3 }
 0x6b3   :  { %8977 = vst [vmem:[#allocation40_spill] sm:$0xff] %v8075_v5  ;;  %v8089_v27 = vpop.f32.mrf.mxu2 }
 0x6b4   :  { %3722 = vmatpush.bf16.msra.mxu0 %v7740_v38  ;;  %3736 = vmatpush.bf16.msra.mxu1 %v7743_v43  ;;  %8984 = vst [vmem:[#allocation45_spill] sm:$0xff] %v8089_v27 }
 0x6b5   :  { %3750 = vmatpush.bf16.msra.mxu2 %v7751_v4  ;;  %3764 = vmatpush.bf16.msra.mxu3 %v7748_v49  ;;  %v8079_v42 = vpop.f32.mrf.mxu1 }
 0x6b6   :  { %8979 = vst [vmem:[#allocation42_spill] sm:$0xff] %v8079_v42 }
 0x6b8   :  { %3723 = vmatpush.bf16.msra.mxu0 %v7753_v0  ;;  %3737 = vmatpush.bf16.msra.mxu1 %v7755_v3  ;;  %v8077_v35 = vpop.f32.mrf.mxu0 }
 0x6b9   :  { %3751 = vmatpush.bf16.msra.mxu2 %v7827_v41  ;;  %3765 = vmatpush.bf16.msra.mxu3 %v7775_v58  ;;  %8978 = vst [vmem:[#allocation41_spill] sm:$0xff] %v8077_v35 }
 0x6ba   :  { %v8083_v34 = vpop.f32.mrf.mxu3 }
 0x6bb   :  { %8981 = vst [vmem:[#allocation80_spill] sm:$0xff] %v8083_v34  ;;  %v8097_v5 = vpop.f32.mrf.mxu2 }
 0x6bc   :  { %3724 = vmatpush.bf16.msra.mxu0 %v7839_v17  ;;  %3738 = vmatpush.bf16.msra.mxu1 %v7848_v61  ;;  %8988 = vst [vmem:[#allocation50_spill] sm:$0xff] %v8097_v5 }
 0x6bd   :  { %3752 = vmatpush.bf16.msra.mxu2 %v7903_v40  ;;  %3766 = vmatpush.bf16.msra.mxu3 %v7850_v16  ;;  %v8087_v9 = vpop.f32.mrf.mxu1 }
 0x6be   :  { %8983 = vst [vmem:[#allocation43_spill] sm:$0xff] %v8087_v9 }
 0x6c0   :  { %3725 = vmatpush.bf16.msra.mxu0 %v7908_v29  ;;  %3739 = vmatpush.bf16.msra.mxu1 %v7915_v54  ;;  %v8085_v62 = vpop.f32.mrf.mxu0 }
 0x6c1   :  { %3753 = vmatpush.bf16.msra.mxu2 %v7923_v19  ;;  %3767 = vmatpush.bf16.msra.mxu3 %v7920_v23  ;;  %8982 = vst [vmem:[#allocation39_spill] sm:$0xff] %v8085_v62 }
 0x6c2   :  { %v8091_v48 = vpop.f32.mrf.mxu3 }
 0x6c3   :  { %8985 = vst [vmem:[#allocation46_spill] sm:$0xff] %v8091_v48  ;;  %v8105_v34 = vpop.f32.mrf.mxu2 }
 0x6c4   :  { %3726 = vmatpush.bf16.msra.mxu0 %v7925_v21  ;;  %3740 = vmatpush.bf16.msra.mxu1 %v7927_v44  ;;  %8992 = vst [vmem:[#allocation74_spill] sm:$0xff] %v8105_v34 }
 0x6c5   :  { %3754 = vmatpush.bf16.msra.mxu2 %v7934_v39  ;;  %3768 = vmatpush.bf16.msra.mxu3 %v7931_v15  ;;  %v8095_v30 = vpop.f32.mrf.mxu1 }
 0x6c6   :  { %8987 = vst [vmem:[#allocation49_spill] sm:$0xff] %v8095_v30 }
 0x6c8   :  { %3727 = vmatpush.bf16.msra.mxu0 %v7937_v26  ;;  %3741 = vmatpush.bf16.msra.mxu1 %v7941_v52  ;;  %v8093_v22 = vpop.f32.mrf.mxu0 }
 0x6c9   :  { %3755 = vmatpush.bf16.msra.mxu2 %v7948_v50  ;;  %3769 = vmatpush.bf16.msra.mxu3 %v7945_v11  ;;  %8986 = vst [vmem:[#allocation48_spill] sm:$0xff] %v8093_v22 }
 0x6ca   :  { %v8099_v35 = vpop.f32.mrf.mxu3 }
 0x6cb   :  { %8989 = vst [vmem:[#allocation52_spill] sm:$0xff] %v8099_v35  ;;  %v8113_v48 = vpop.f32.mrf.mxu2 }
 0x6cc   :  { %8996 = vst [vmem:[#allocation78_spill] sm:$0xff] %v8113_v48 }
 0x6cd   :  { %v8103_v28 = vpop.f32.mrf.mxu1 }
 0x6ce   :  { %8991 = vst [vmem:[#allocation51_spill] sm:$0xff] %v8103_v28 }
 0x6d0   :  { %v8101_v42 = vpop.f32.mrf.mxu0 }
 0x6d1   :  { %8990 = vst [vmem:[#allocation47_spill] sm:$0xff] %v8101_v42 }
 0x6d2   :  { %v8107_v62 = vpop.f32.mrf.mxu3 }
 0x6d3   :  { %8993 = vst [vmem:[#allocation53_spill] sm:$0xff] %v8107_v62  ;;  %v8121_v35 = vpop.f32.mrf.mxu2 }
 0x6d4   :  { %9000 = vst [vmem:[#allocation60_spill] sm:$0xff] %v8121_v35 }
 0x6d5   :  { %v8111_v27 = vpop.f32.mrf.mxu1 }
 0x6d6   :  { %8995 = vst [vmem:[#allocation54_spill] sm:$0xff] %v8111_v27 }
 0x6d8   :  { %v8109_v9 = vpop.f32.mrf.mxu0 }
 0x6d9   :  { %8994 = vst [vmem:[#allocation75_spill] sm:$0xff] %v8109_v9 }
 0x6da   :  { %v8115_v22 = vpop.f32.mrf.mxu3 }
 0x6db   :  { %8997 = vst [vmem:[#allocation56_spill] sm:$0xff] %v8115_v22  ;;  %v8129_v62 = vpop.f32.mrf.mxu2 }
 0x6dc   :  { %9004 = vst [vmem:[#allocation62_spill] sm:$0xff] %v8129_v62 }
 0x6dd   :  { %v8119_v5 = vpop.f32.mrf.mxu1 }
 0x6de   :  { %8999 = vst [vmem:[#allocation58_spill] sm:$0xff] %v8119_v5 }
 0x6e0   :  { %v8117_v30 = vpop.f32.mrf.mxu0 }
 0x6e1   :  { %8998 = vst [vmem:[#allocation57_spill] sm:$0xff] %v8117_v30 }
 0x6e2   :  { %v8123_v42 = vpop.f32.mrf.mxu3 }
 0x6e3   :  { %9001 = vst [vmem:[#allocation55_spill] sm:$0xff] %v8123_v42  ;;  %v8137_v22 = vpop.f32.mrf.mxu2  ;;  %v2644_v42 = vld [vmem:[%s8759_s6] sm:$0xf] }
 0x6e4   :  { %9008 = vst [vmem:[#allocation63_spill] sm:$0xff] %v8137_v22  ;;  %v8150_v62 = vperm.slane %v2644_v42, 1  ;;  %v8160_v63 = vperm.slane %v2644_v42, 3  ;;  %v8170_v45 = vperm.slane %v2644_v42, 2 }
 0x6e5   :  { %v8127_v34 = vpop.f32.mrf.mxu1 }
 0x6e6   :  { %9003 = vst [vmem:[#allocation61_spill] sm:$0xff] %v8127_v34  ;;  %v8148_v34 = vperm.slane %v2644_v42, 0 }
 0x6e7   :  { %9012 = vst [vmem:[#allocation69_spill] sm:$0xff] %v8150_v62 }
 0x6e8   :  { %v8125_v28 = vpop.f32.mrf.mxu0  ;;  %9015 = vst [vmem:[#allocation73_spill] sm:$0xff] %v8160_v63 }
 0x6e9   :  { %9002 = vst [vmem:[#allocation59_spill] sm:$0xff] %v8125_v28 }
 0x6ea   :  { %v8131_v9 = vpop.f32.mrf.mxu3  ;;  %9017 = vst [vmem:[#allocation77_spill] sm:$0xff] %v8170_v45 }
 0x6eb   :  { %9005 = vst [vmem:[#allocation64_spill] sm:$0xff] %v8131_v9 }
 0x717   :  { %v8133_v27 = vpop.f32.mrf.mxu0  ;;  %v8135_v48 = vpop.f32.mrf.mxu1 }
 0x718   :  { %9006 = vst [vmem:[#allocation65_spill] sm:$0xff] %v8133_v27 }
 0x719   :  { %9007 = vst [vmem:[#allocation66_spill] sm:$0xff] %v8135_v48  ;;  %v2872_v48 = vadd.f32 %v7960_v6, %v8148_v34  ;;  %v2874_v6 = vadd.f32 %v7976_v46, %v8148_v34 }
 0x71e   :  { %v8139_v30 = vpop.f32.mrf.mxu3  ;;  %v8152_v9 = vpop.f32.mrf.mxu2 }
 0x71f   :  { %9009 = vst [vmem:[#allocation67_spill] sm:$0xff] %v8139_v30  ;;  %v8144_v5 = vpop.f32.mrf.mxu0  ;;  %v8146_v28 = vpop.f32.mrf.mxu1  ;;  %v2921_v30 = vadd.f32 %v7962_v18, %v8150_v62  ;;  %v2923_v18 = vadd.f32 %v7978_v59, %v8150_v62  ;;  %v2970_v59 = vadd.f32 %v7981_v13, %v8170_v45 }
 0x720   :  { %9010 = vst [vmem:[#allocation70_spill] sm:$0xff] %v8144_v5 }
 0x721   :  { %9011 = vst [vmem:[#allocation68_spill] sm:$0xff] %v8146_v28 }
 0x722   :  { %9013 = vst [vmem:[#allocation71_spill] sm:$0xff] %v8152_v9  ;;  %v3019_v9 = vadd.f32 %v7971_v10, %v8160_v63 }
 0x726   :  { %v8158_v27 = vpop.f32.mrf.mxu3  ;;  %v8162_v25 = vpop.f32.mrf.mxu2 }
 0x727   :  { %9014 = vst [vmem:[#allocation72_spill] sm:$0xff] %v8158_v27  ;;  %v3331_v22 = vpop.f32.mrf.mxu0  ;;  %v3345_v35 = vpop.f32.mrf.mxu1 }
 0x728   :  { %v3378_v14 = vadd.f32 %v3331_v22, %v2872_v48  ;;  %v3379_v5 = vadd.f32 %v3345_v35, %v2921_v30  ;;  %9016 = vst [vmem:[#allocation76_spill] sm:$0xff] %v8162_v25 }
 0x72a   :  { %v5649_v28 = vmul.f32 -1.442695, %v3378_v14  ;;  %v5651_v55 = vmul.f32 -1.442695, %v3379_v5 }
 0x72c   :  { %6193 = vpow2.f32 %v5649_v28 }
 0x72d   :  { %6195 = vpow2.f32 %v5651_v55 }
 0x72e   :  { %v3373_v27 = vpop.f32.mrf.mxu3  ;;  %v3359_v46 = vpop.f32.mrf.mxu2 }
 0x72f   :  { %v3381_v22 = vadd.f32 %v3373_v27, %v3019_v9  ;;  %v3333_v48 = vpop.f32.mrf.mxu0  ;;  %v3347_v30 = vpop.f32.mrf.mxu1  ;;  %v3021_v27 = vadd.f32 %v7989_v8, %v8160_v63 }
 0x730   :  { %v3382_v35 = vadd.f32 %v3333_v48, %v2874_v6  ;;  %v3383_v14 = vadd.f32 %v3347_v30, %v2923_v18  ;;  %v3380_v18 = vadd.f32 %v3359_v46, %v2970_v59 }
 0x731   :  { %v5653_v5 = vmul.f32 -1.442695, %v3381_v22 }
 0x732   :  { %v6194_v24 = vpop.eup %6193  ;;  %v5650_v25 = vmul.f32 -1.442695, %v3382_v35  ;;  %v5652_v55 = vmul.f32 -1.442695, %v3383_v14 }
 0x733   :  { %v6196_v28 = vpop.eup %6195  ;;  %v3392_v10 = vadd.f32 1.0, %v6194_v24  ;;  %6197 = vpow2.f32 %v5653_v5 }
 0x734   :  { %v3430_v57 = vadd.f32 1.0, %v6196_v28  ;;  %6199 = vpow2.f32 %v5650_v25 }
 0x735   :  { %6201 = vrcp.f32 %v3392_v10  ;;  %v3403_v46 = vand.u32 2147483647, %v3392_v10  ;;  %v3405_v59 = vand.u32 2147483648, %v3392_v10  ;;  %vm3399_vm2 = vweird.f32 %v3392_v10 }
 0x736   :  { %6203 = vrcp.f32 %v3430_v57  ;;  %v3375_v9 = vpop.f32.mrf.mxu3  ;;  %vm3437_vm3 = vweird.f32 %v3430_v57 }
 0x737   :  { %6205 = vpow2.f32 %v5652_v55  ;;  %v3385_v22 = vadd.f32 %v3375_v9, %v3021_v27  ;;  %v3443_v9 = vand.u32 2147483648, %v3430_v57  ;;  %vm3404_vm5 = vcmp.eq.f32.partialorder %v3403_v46, 8.507059e+37 }
 0x738   :  { %6207 = vtanh.f32 %v3380_v18  ;;  %v3361_v18 = vpop.f32.mrf.mxu2 }
 0x739   :  { %v6198_v6 = vpop.eup %6197  ;;  %v5654_v8 = vmul.f32 -1.442695, %v3385_v22 }
 0x73a   :  { %v6200_v42 = vpop.eup %6199  ;;  %v8176_v48 = vadd.f32 1.0, %v6198_v6 }
 0x73b   :  { %v6202_v24 = vpop.eup %6201  ;;  %v8178_v30 = vadd.f32 1.0, %v6200_v42  ;;  %v3441_v42 = vand.u32 2147483647, %v3430_v57 }
 0x73c   :  { %v6204_v25 = vpop.eup %6203  ;;  %v3395_v35 = vmul.f32 %v6202_v24, %v3392_v10  ;;  %vm3400_vm0 = vweird.f32 %v6202_v24 }
 0x73d   :  { %v6206_v14 = vpop.eup %6205  ;;  %v3433_v5 = vmul.f32 %v6204_v25, %v3430_v57  ;;  %6209 = vrcp.f32 %v8178_v30  ;;  %vm3438_vm1 = vweird.f32 %v6204_v25  ;;  %vm3401_vm4 = vmor %vm3399_vm2, %vm3400_vm0  ;;  %vm3442_vm7 = vcmp.eq.f32.partialorder %v3441_v42, 8.507059e+37 }
 0x73e   :  { %v3396_v13 = vsub.f32 1.0, %v3395_v35  ;;  %v8181_v28 = vadd.f32 1.0, %v6206_v14  ;;  %6211 = vrcp.f32 %v8176_v48  ;;  %v2972_v35 = vadd.f32 %v7999_v20, %v8170_v45  ;;  %v6208_v22 = vpop.eup %6207  ;;  %vm3439_vm6 = vmor %vm3437_vm3, %vm3438_vm1 }
 0x73f   :  { %v3434_v55 = vsub.f32 1.0, %v3433_v5  ;;  %v3406_v5 = vor.u32 1.1754944e-38, %v3405_v59  ;;  %v3418_v46 = vand.u32 2147483647, %v8178_v30  ;;  %vm3414_vm9 = vweird.f32 %v8178_v30 }
 0x740   :  { %v3397_v27 = vmul.f32 %v6202_v24, %v3396_v13  ;;  %6213 = vrcp.f32 %v8181_v28  ;;  %v3444_v13 = vor.u32 1.1754944e-38, %v3443_v9  ;;  %vm3452_vm11 = vweird.f32 %v8181_v28 }
 0x741   :  { %v3435_v6 = vmul.f32 %v6204_v25, %v3434_v55  ;;  %6215 = vpow2.f32 %v5654_v8  ;;  %v3384_v55 = vadd.f32 %v3361_v18, %v2972_v35  ;;  %v3420_v18 = vand.u32 2147483648, %v8178_v30 }
 0x742   :  { %v3398_v14 = vadd.f32 %v6202_v24, %v3397_v27  ;;  %vm3419_vm13 = vcmp.eq.f32.partialorder %v3418_v46, 8.507059e+37  ;;  %vm3477_vm1 = vweird.f32 %v8176_v48 }
 0x743   :  { %v3436_v36 = vadd.f32 %v6204_v25, %v3435_v6  ;;  %v6210_v37 = vpop.eup %6209  ;;  %6217 = vtanh.f32 %v3384_v55 }
 0x744   :  { %v3402_v51 = vsel %vm3401_vm4, %v6202_v24, %v3398_v14  ;;  %v8188_v33 = vpop.eup %6211  ;;  %v3410_v20 = vmul.f32 %v6210_v37, %v8178_v30  ;;  %vm3415_vm8 = vweird.f32 %v6210_v37  ;;  %v3456_v14 = vand.u32 2147483647, %v8181_v28 }
 0x745   :  { %v3407_v63 = vsel %vm3404_vm5, %v3406_v5, %v3402_v51  ;;  %v3440_v53 = vsel %vm3439_vm6, %v6204_v25, %v3436_v36  ;;  %v3473_v24 = vmul.f32 %v8188_v33, %v8176_v48  ;;  %vm3416_vm12 = vmor %vm3414_vm9, %vm3415_vm8  ;;  %vm3478_vm0 = vweird.f32 %v8188_v33 }
 0x746   :  { %v6214_v10 = vpop.eup %6213  ;;  %v3445_v8 = vsel %vm3442_vm7, %v3444_v13, %v3440_v53  ;;  %v3504_v57 = vmul.f32 %v6208_v22, %v3407_v63  ;;  %v3411_v59 = vsub.f32 1.0, %v3410_v20  ;;  %v3458_v53 = vand.u32 2147483648, %v8181_v28  ;;  %vm3479_vm3 = vmor %vm3477_vm1, %vm3478_vm0 }
 0x747   :  { %v3502_v27 = vmul.f32 0.0, %v3445_v8  ;;  %v3448_v6 = vmul.f32 %v6214_v10, %v8181_v28  ;;  %v6216_v9 = vpop.eup %6215  ;;  %vm3453_vm10 = vweird.f32 %v6214_v10  ;;  %v3421_v22 = vor.u32 1.1754944e-38, %v3420_v18 }
 0x748   :  { %v3412_v25 = vmul.f32 %v6210_v37, %v3411_v59  ;;  %v3471_v63 = vadd.f32 1.0, %v6216_v9  ;;  %v3474_v5 = vsub.f32 1.0, %v3473_v24  ;;  %v3459_v8 = vor.u32 1.1754944e-38, %v3458_v53  ;;  %vm3454_vm14 = vmor %vm3452_vm11, %vm3453_vm10 }
 0x749   :  { %v8196_v51 = vadd.f32 %v3504_v57, %v3502_v27  ;;  %v3449_v36 = vsub.f32 1.0, %v3448_v6  ;;  %v6218_v20 = vpop.eup %6217  ;;  %vm3457_vm15 = vcmp.eq.f32.partialorder %v3456_v14, 8.507059e+37 }
 0x74a   :  { %v3413_v35 = vadd.f32 %v6210_v37, %v3412_v25  ;;  %6219 = vrcp.f32 %v3471_v63  ;;  %v3475_v6 = vmul.f32 %v8188_v33, %v3474_v5  ;;  %v3498_v46 = vand.u32 2147483648, %v3471_v63 }
 0x74b   :  { %v3450_v42 = vmul.f32 %v6214_v10, %v3449_v36  ;;  %6221 = vtanh.f32 %v8196_v51  ;;  %v3481_v25 = vand.u32 2147483647, %v8176_v48  ;;  %vm3492_vm4 = vweird.f32 %v3471_v63 }
 0x74c   :  { %v3417_v13 = vsel %vm3416_vm12, %v6210_v37, %v3413_v35  ;;  %v3476_v37 = vadd.f32 %v8188_v33, %v3475_v6 }
 0x74d   :  { %v3451_v55 = vadd.f32 %v6214_v10, %v3450_v42  ;;  %v3422_v57 = vsel %vm3419_vm13, %v3421_v22, %v3417_v13  ;;  %v3496_v42 = vand.u32 2147483647, %v3471_v63  ;;  %v3499_v13 = vor.u32 1.1754944e-38, %v3498_v46  ;;  %v9020_v46 = vld [vmem:[#allocation24_spill] sm:$0xff] }
 0x74e   :  { %v3505_v27 = vmul.f32 %v6218_v20, %v3422_v57  ;;  %v3480_v14 = vsel %vm3479_vm3, %v8188_v33, %v3476_v37  ;;  %vm3482_vm6 = vcmp.eq.f32.partialorder %v3481_v25, 8.507059e+37  ;;  %v2877_v33 = vadd.f32 %v7993_v56, %v8148_v34 }
 0x74f   :  { %v3455_v30 = vsel %vm3454_vm14, %v6214_v10, %v3451_v55  ;;  %v3483_v10 = vand.u32 2147483648, %v8176_v48  ;;  %vm3497_vm7 = vcmp.eq.f32.partialorder %v3496_v42, 8.507059e+37 }
 0x750   :  { %v3460_v59 = vsel %vm3457_vm15, %v3459_v8, %v3455_v30  ;;  %v6220_v36 = vpop.eup %6219 }
 0x751   :  { %v3503_v9 = vmul.f32 0.0, %v3460_v59  ;;  %v3488_v18 = vmul.f32 %v6220_v36, %v3471_v63  ;;  %vm3493_vm2 = vweird.f32 %v6220_v36  ;;  %v6222_v22 = vpop.eup %6221  ;;  %v3484_v5 = vor.u32 1.1754944e-38, %v3483_v10  ;;  %v9018_v63 = vld [vmem:[#allocation22_spill] sm:$0xff]  ;;  %v9019_v10 = vld [vmem:[#allocation73_spill] sm:$0xff] }
 0x752   :  { %vm3494_vm5 = vmor %vm3492_vm4, %vm3493_vm2  ;;  %v2926_v59 = vadd.f32 %v9018_v63, %v8150_v62  ;;  %v3024_v25 = vadd.f32 %v9020_v46, %v9019_v10 }
 0x753   :  { %v8203_v28 = vadd.f32 %v3505_v27, %v3503_v9  ;;  %v3489_v24 = vsub.f32 1.0, %v3488_v18  ;;  %v3485_v8 = vsel %vm3482_vm6, %v3484_v5, %v3480_v14 }
 0x754   :  { %v3510_v30 = vmul.f32 %v6222_v22, %v3485_v8 }
 0x755   :  { %6223 = vtanh.f32 %v8203_v28  ;;  %v3490_v53 = vmul.f32 %v6220_v36, %v3489_v24 }
 0x757   :  { %v3491_v35 = vadd.f32 %v6220_v36, %v3490_v53  ;;  %v9021_v53 = vld [vmem:[#allocation25_spill] sm:$0xff] }
 0x758   :  { %v2879_v42 = vadd.f32 %v9021_v53, %v8148_v34 }
 0x759   :  { %v3495_v20 = vsel %vm3494_vm5, %v6220_v36, %v3491_v35  ;;  %v9022_v35 = vld [vmem:[#allocation26_spill] sm:$0xff] }
 0x75a   :  { %v3500_v57 = vsel %vm3497_vm7, %v3499_v13, %v3495_v20  ;;  %v2928_v56 = vadd.f32 %v9022_v35, %v8150_v62 }
 0x75b   :  { %v6224_v55 = vpop.eup %6223 }
 0x75c   :  { %v3511_v48 = vmul.f32 %v6224_v55, %v3500_v57 }
 0x75e   :  { %v3512_v27 = vpack.c.bf16 %v3511_v48, %v3510_v30 }
 0x760   :  { %3529 = vmatmul.bf16.vlgmr.msrb.gmra.mxu0 %v3512_v27  ;;  %3543 = vmatmul.bf16.vlgmr.msrb.gmra.mxu1 %v3512_v27 }
 0x761   :  { %3557 = vmatmul.bf16.vlgmr.msrb.gmra.mxu2 %v3512_v27  ;;  %3571 = vmatmul.bf16.vlgmr.msrb.gmra.mxu3 %v3512_v27 }
 0x762   :  { %3919 = vmatpush.bf16.msrb.mxu0 %v7718_v2  ;;  %3933 = vmatpush.bf16.msrb.mxu1 %v7720_v32 }
 0x763   :  { %3947 = vmatpush.bf16.msrb.mxu2 %v7726_v1  ;;  %3961 = vmatpush.bf16.msrb.mxu3 %v7724_v7 }
 0x766   :  { %3920 = vmatpush.bf16.msrb.mxu0 %v7728_v31  ;;  %3934 = vmatpush.bf16.msrb.mxu1 %v7731_v47 }
 0x767   :  { %3948 = vmatpush.bf16.msrb.mxu2 %v7738_v60  ;;  %3962 = vmatpush.bf16.msrb.mxu3 %v7736_v12 }
 0x76a   :  { %3921 = vmatpush.bf16.msrb.mxu0 %v7740_v38  ;;  %3935 = vmatpush.bf16.msrb.mxu1 %v7743_v43 }
 0x76b   :  { %3949 = vmatpush.bf16.msrb.mxu2 %v7751_v4  ;;  %3963 = vmatpush.bf16.msrb.mxu3 %v7748_v49 }
 0x76e   :  { %3922 = vmatpush.bf16.msrb.mxu0 %v7753_v0  ;;  %3936 = vmatpush.bf16.msrb.mxu1 %v7755_v3 }
 0x76f   :  { %3950 = vmatpush.bf16.msrb.mxu2 %v7827_v41  ;;  %3964 = vmatpush.bf16.msrb.mxu3 %v7775_v58 }
 0x772   :  { %3923 = vmatpush.bf16.msrb.mxu0 %v7839_v17  ;;  %3937 = vmatpush.bf16.msrb.mxu1 %v7848_v61 }
 0x773   :  { %3951 = vmatpush.bf16.msrb.mxu2 %v7903_v40  ;;  %3965 = vmatpush.bf16.msrb.mxu3 %v7850_v16 }
 0x776   :  { %3924 = vmatpush.bf16.msrb.mxu0 %v7908_v29  ;;  %3938 = vmatpush.bf16.msrb.mxu1 %v7915_v54 }
 0x777   :  { %3952 = vmatpush.bf16.msrb.mxu2 %v7923_v19  ;;  %3966 = vmatpush.bf16.msrb.mxu3 %v7920_v23 }
 0x77a   :  { %3925 = vmatpush.bf16.msrb.mxu0 %v7925_v21  ;;  %3939 = vmatpush.bf16.msrb.mxu1 %v7927_v44 }
 0x77b   :  { %3953 = vmatpush.bf16.msrb.mxu2 %v7934_v39  ;;  %3967 = vmatpush.bf16.msrb.mxu3 %v7931_v15 }
 0x77e   :  { %3926 = vmatpush.bf16.msrb.mxu0 %v7937_v26  ;;  %3940 = vmatpush.bf16.msrb.mxu1 %v7941_v52 }
 0x77f   :  { %3954 = vmatpush.bf16.msrb.mxu2 %v7948_v50  ;;  %3968 = vmatpush.bf16.msrb.mxu3 %v7945_v11 }
 0x7dd   :  { %v3530_v6 = vpop.f32.mrf.mxu0  ;;  %v3544_v9 = vpop.f32.mrf.mxu1 }
 0x7de   :  { %v3577_v36 = vadd.f32 %v3530_v6, %v2877_v33  ;;  %v3578_v18 = vadd.f32 %v3544_v9, %v2926_v59  ;;  %v9023_v6 = vld [vmem:[#allocation28_spill] sm:$0xff] }
 0x7df   :  { %v2975_v9 = vadd.f32 %v9023_v6, %v8170_v45 }
 0x7e0   :  { %v5655_v37 = vmul.f32 -1.442695, %v3577_v36  ;;  %v5657_v24 = vmul.f32 -1.442695, %v3578_v18  ;;  %v9024_v18 = vld [vmem:[#allocation23_spill] sm:$0xff] }
 0x7e2   :  { %6225 = vpow2.f32 %v5655_v37  ;;  %v3026_v37 = vadd.f32 %v9024_v18, %v9019_v10  ;;  %v9025_v18 = vld [vmem:[#allocation30_spill] sm:$0xff] }
 0x7e3   :  { %6227 = vpow2.f32 %v5657_v24 }
 0x7e4   :  { %v3572_v14 = vpop.f32.mrf.mxu3  ;;  %v3558_v59 = vpop.f32.mrf.mxu2 }
 0x7e5   :  { %v3580_v22 = vadd.f32 %v3572_v14, %v3024_v25  ;;  %v3532_v5 = vpop.f32.mrf.mxu0  ;;  %v3546_v13 = vpop.f32.mrf.mxu1  ;;  %v3579_v46 = vadd.f32 %v3558_v59, %v2975_v9 }
 0x7e6   :  { %v3581_v55 = vadd.f32 %v3532_v5, %v2879_v42  ;;  %v3582_v20 = vadd.f32 %v3546_v13, %v2928_v56 }
 0x7e7   :  { %v5659_v8 = vmul.f32 -1.442695, %v3580_v22 }
 0x7e8   :  { %v6226_v57 = vpop.eup %6225  ;;  %v5656_v30 = vmul.f32 -1.442695, %v3581_v55  ;;  %v5658_v33 = vmul.f32 -1.442695, %v3582_v20 }
 0x7e9   :  { %v6228_v48 = vpop.eup %6227  ;;  %v3591_v27 = vadd.f32 1.0, %v6226_v57  ;;  %6229 = vpow2.f32 %v5659_v8 }
 0x7ea   :  { %v3629_v63 = vadd.f32 1.0, %v6228_v48  ;;  %6231 = vpow2.f32 %v5656_v30 }
 0x7eb   :  { %6233 = vrcp.f32 %v3591_v27  ;;  %v3602_v30 = vand.u32 2147483647, %v3591_v27  ;;  %v3604_v48 = vand.u32 2147483648, %v3591_v27  ;;  %vm3598_vm10 = vweird.f32 %v3591_v27 }
 0x7ec   :  { %6235 = vrcp.f32 %v3629_v63  ;;  %v3574_v36 = vpop.f32.mrf.mxu3  ;;  %v3640_v9 = vand.u32 2147483647, %v3629_v63  ;;  %vm3636_vm11 = vweird.f32 %v3629_v63 }
 0x7ed   :  { %6237 = vpow2.f32 %v5658_v33  ;;  %v3584_v53 = vadd.f32 %v3574_v36, %v3026_v37  ;;  %v3642_v33 = vand.u32 2147483648, %v3629_v63  ;;  %v3560_v36 = vpop.f32.mrf.mxu2  ;;  %v2977_v37 = vadd.f32 %v9025_v18, %v8170_v45 }
 0x7ee   :  { %6239 = vtanh.f32 %v3579_v46  ;;  %vm3603_vm14 = vcmp.eq.f32.partialorder %v3602_v30, 8.507059e+37  ;;  %vm3641_vm15 = vcmp.eq.f32.partialorder %v3640_v9, 8.507059e+37 }
 0x7ef   :  { %v6230_v24 = vpop.eup %6229  ;;  %v5660_v8 = vmul.f32 -1.442695, %v3584_v53 }
 0x7f0   :  { %v6232_v25 = vpop.eup %6231  ;;  %v8259_v35 = vadd.f32 1.0, %v6230_v24 }
 0x7f1   :  { %v6234_v42 = vpop.eup %6233  ;;  %v8261_v56 = vadd.f32 1.0, %v6232_v25  ;;  %v3605_v25 = vor.u32 1.1754944e-38, %v3604_v48 }
 0x7f2   :  { %v6236_v14 = vpop.eup %6235  ;;  %v3594_v22 = vmul.f32 %v6234_v42, %v3591_v27  ;;  %vm3599_vm8 = vweird.f32 %v6234_v42 }
 0x7f3   :  { %v6238_v5 = vpop.eup %6237  ;;  %v3632_v13 = vmul.f32 %v6236_v14, %v3629_v63  ;;  %6241 = vrcp.f32 %v8261_v56  ;;  %vm3637_vm9 = vweird.f32 %v6236_v14  ;;  %vm3600_vm12 = vmor %vm3598_vm10, %vm3599_vm8  ;;  %v3617_v30 = vand.u32 2147483647, %v8261_v56 }
 0x7f4   :  { %v3595_v55 = vsub.f32 1.0, %v3594_v22  ;;  %v8264_v20 = vadd.f32 1.0, %v6238_v5  ;;  %6243 = vrcp.f32 %v8259_v35  ;;  %v6240_v46 = vpop.eup %6239  ;;  %vm3638_vm13 = vmor %vm3636_vm11, %vm3637_vm9  ;;  %v3643_v5 = vor.u32 1.1754944e-38, %v3642_v33 }
 0x7f5   :  { %v3633_v57 = vsub.f32 1.0, %v3632_v13  ;;  %v3619_v33 = vand.u32 2147483648, %v8261_v56  ;;  %vm3613_vm1 = vweird.f32 %v8261_v56  ;;  %vm3618_vm5 = vcmp.eq.f32.partialorder %v3617_v30, 8.507059e+37 }
 0x7f6   :  { %v3596_v59 = vmul.f32 %v6234_v42, %v3595_v55  ;;  %6245 = vrcp.f32 %v8264_v20  ;;  %v3583_v55 = vadd.f32 %v3560_v36, %v2977_v37  ;;  %vm3651_vm3 = vweird.f32 %v8264_v20 }
 0x7f7   :  { %v3634_v6 = vmul.f32 %v6236_v14, %v3633_v57  ;;  %6247 = vpow2.f32 %v5660_v8  ;;  %vm3676_vm9 = vweird.f32 %v8259_v35 }
 0x7f8   :  { %v3597_v24 = vadd.f32 %v6234_v42, %v3596_v59  ;;  %6249 = vtanh.f32 %v3583_v55 }
 0x7f9   :  { %v3635_v53 = vadd.f32 %v6236_v14, %v3634_v6  ;;  %v6242_v22 = vpop.eup %6241 }
 0x7fa   :  { %v3601_v13 = vsel %vm3600_vm12, %v6234_v42, %v3597_v24  ;;  %v8270_v57 = vpop.eup %6243  ;;  %v3609_v59 = vmul.f32 %v6242_v22, %v8261_v56  ;;  %vm3614_vm0 = vweird.f32 %v6242_v22  ;;  %v3655_v24 = vand.u32 2147483647, %v8264_v20 }
 0x7fb   :  { %v3606_v10 = vsel %vm3603_vm14, %v3605_v25, %v3601_v13  ;;  %v3639_v62 = vsel %vm3638_vm13, %v6236_v14, %v3635_v53  ;;  %v3672_v42 = vmul.f32 %v8270_v57, %v8259_v35  ;;  %vm3615_vm4 = vmor %vm3613_vm1, %vm3614_vm0  ;;  %vm3677_vm8 = vweird.f32 %v8270_v57 }
 0x7fc   :  { %v6246_v27 = vpop.eup %6245  ;;  %v3644_v8 = vsel %vm3641_vm15, %v3643_v5, %v3639_v62  ;;  %v3703_v18 = vmul.f32 %v6240_v46, %v3606_v10  ;;  %v3610_v48 = vsub.f32 1.0, %v3609_v59  ;;  %v3657_v62 = vand.u32 2147483648, %v8264_v20  ;;  %vm3678_vm11 = vmor %vm3676_vm9, %vm3677_vm8 }
 0x7fd   :  { %v3701_v63 = vmul.f32 %v3644_v8, %v8196_v51  ;;  %v3647_v6 = vmul.f32 %v6246_v27, %v8264_v20  ;;  %v6248_v45 = vpop.eup %6247  ;;  %vm3652_vm2 = vweird.f32 %v6246_v27  ;;  %v3620_v46 = vor.u32 1.1754944e-38, %v3619_v33 }
 0x7fe   :  { %v3611_v36 = vmul.f32 %v6242_v22, %v3610_v48  ;;  %v3670_v51 = vadd.f32 1.0, %v6248_v45  ;;  %v3673_v25 = vsub.f32 1.0, %v3672_v42  ;;  %v6250_v13 = vpop.eup %6249  ;;  %vm3653_vm6 = vmor %vm3651_vm3, %vm3652_vm2  ;;  %v3658_v55 = vor.u32 1.1754944e-38, %v3657_v62 }
 0x7ff   :  { %v8279_v14 = vadd.f32 %v3703_v18, %v3701_v63  ;;  %v3648_v9 = vsub.f32 1.0, %v3647_v6  ;;  %vm3656_vm7 = vcmp.eq.f32.partialorder %v3655_v24, 8.507059e+37  ;;  %v3682_v42 = vand.u32 2147483648, %v8259_v35 }
 0x800   :  { %v3612_v37 = vadd.f32 %v6242_v22, %v3611_v36  ;;  %6251 = vrcp.f32 %v3670_v51  ;;  %v3674_v18 = vmul.f32 %v8270_v57, %v3673_v25  ;;  %v3697_v30 = vand.u32 2147483648, %v3670_v51 }
 0x801   :  { %v3649_v10 = vmul.f32 %v6246_v27, %v3648_v9  ;;  %6253 = vtanh.f32 %v8279_v14  ;;  %v3695_v9 = vand.u32 2147483647, %v3670_v51  ;;  %vm3691_vm12 = vweird.f32 %v3670_v51 }
 0x802   :  { %v3616_v53 = vsel %vm3615_vm4, %v6242_v22, %v3612_v37  ;;  %v3675_v22 = vadd.f32 %v8270_v57, %v3674_v18  ;;  %v3683_v37 = vor.u32 1.1754944e-38, %v3682_v42  ;;  %v3698_v24 = vor.u32 1.1754944e-38, %v3697_v30  ;;  %v9030_v42 = vld [vmem:[#allocation32_spill] sm:$0xff] }
 0x803   :  { %v3650_v5 = vadd.f32 %v6246_v27, %v3649_v10  ;;  %v3621_v59 = vsel %vm3618_vm5, %v3620_v46, %v3616_v53  ;;  %vm3696_vm15 = vcmp.eq.f32.partialorder %v3695_v9, 8.507059e+37  ;;  %v9032_v9 = vld [vmem:[#allocation34_spill] sm:$0xff] }
 0x804   :  { %v3704_v45 = vmul.f32 %v6250_v13, %v3621_v59  ;;  %v3679_v62 = vsel %vm3678_vm11, %v8270_v57, %v3675_v22  ;;  %v9026_v57 = vld [vmem:[#allocation27_spill] sm:$0xff]  ;;  %v9027_v59 = vld [vmem:[#allocation69_spill] sm:$0xff] }
 0x805   :  { %v3654_v56 = vsel %vm3653_vm6, %v6246_v27, %v3650_v5 }
 0x806   :  { %v3659_v8 = vsel %vm3656_vm7, %v3658_v55, %v3654_v56  ;;  %v6252_v20 = vpop.eup %6251  ;;  %v9028_v56 = vld [vmem:[#allocation29_spill] sm:$0xff] }
 0x807   :  { %v3702_v63 = vmul.f32 %v3659_v8, %v8203_v28  ;;  %v3687_v6 = vmul.f32 %v6252_v20, %v3670_v51  ;;  %v3680_v28 = vand.u32 2147483647, %v8259_v35  ;;  %vm3692_vm10 = vweird.f32 %v6252_v20  ;;  %v6254_v10 = vpop.eup %6253 }
 0x808   :  { %vm3693_vm13 = vmor %vm3691_vm12, %vm3692_vm10  ;;  %v2882_v51 = vadd.f32 %v9026_v57, %v8148_v34 }
 0x809   :  { %v8287_v48 = vadd.f32 %v3704_v45, %v3702_v63  ;;  %v3688_v27 = vsub.f32 1.0, %v3687_v6  ;;  %vm3681_vm14 = vcmp.eq.f32.partialorder %v3680_v28, 8.507059e+37  ;;  %v2931_v45 = vadd.f32 %v9028_v56, %v9027_v59  ;;  %v9031_v28 = vld [vmem:[#allocation33_spill] sm:$0xff] }
 0x80a   :  { %v3684_v53 = vsel %vm3681_vm14, %v3683_v37, %v3679_v62 }
 0x80b   :  { %6255 = vtanh.f32 %v8287_v48  ;;  %v3689_v33 = vmul.f32 %v6252_v20, %v3688_v27  ;;  %v3709_v13 = vmul.f32 %v6254_v10, %v3684_v53  ;;  %v9029_v27 = vld [vmem:[#allocation73_spill] sm:$0xff] }
 0x80c   :  { %v3029_v30 = vadd.f32 %v9030_v42, %v9029_v27 }
 0x80d   :  { %v3690_v36 = vadd.f32 %v6252_v20, %v3689_v33  ;;  %v2884_v33 = vadd.f32 %v9031_v28, %v8148_v34 }
 0x80f   :  { %v3694_v25 = vsel %vm3693_vm13, %v6252_v20, %v3690_v36  ;;  %v2933_v36 = vadd.f32 %v9032_v9, %v9027_v59 }
 0x810   :  { %v3699_v5 = vsel %vm3696_vm15, %v3698_v24, %v3694_v25 }
 0x811   :  { %v6256_v46 = vpop.eup %6255 }
 0x812   :  { %v3710_v35 = vmul.f32 %v6256_v46, %v3699_v5 }
 0x814   :  { %v3711_v55 = vpack.c.bf16 %v3710_v35, %v3709_v13 }
 0x816   :  { %3728 = vmatmul.bf16.vlgmr.msra.gmra.mxu0 %v3711_v55  ;;  %3742 = vmatmul.bf16.vlgmr.msra.gmra.mxu1 %v3711_v55 }
 0x817   :  { %3756 = vmatmul.bf16.vlgmr.msra.gmra.mxu2 %v3711_v55  ;;  %3770 = vmatmul.bf16.vlgmr.msra.gmra.mxu3 %v3711_v55 }
 0x818   :  { %4118 = vmatpush.bf16.msra.mxu0 %v7718_v2  ;;  %4132 = vmatpush.bf16.msra.mxu1 %v7720_v32 }
 0x819   :  { %4146 = vmatpush.bf16.msra.mxu2 %v7726_v1  ;;  %4160 = vmatpush.bf16.msra.mxu3 %v7724_v7 }
 0x81c   :  { %4119 = vmatpush.bf16.msra.mxu0 %v7728_v31  ;;  %4133 = vmatpush.bf16.msra.mxu1 %v7731_v47 }
 0x81d   :  { %4147 = vmatpush.bf16.msra.mxu2 %v7738_v60  ;;  %4161 = vmatpush.bf16.msra.mxu3 %v7736_v12 }
 0x820   :  { %4120 = vmatpush.bf16.msra.mxu0 %v7740_v38  ;;  %4134 = vmatpush.bf16.msra.mxu1 %v7743_v43 }
 0x821   :  { %4148 = vmatpush.bf16.msra.mxu2 %v7751_v4  ;;  %4162 = vmatpush.bf16.msra.mxu3 %v7748_v49 }
 0x824   :  { %4121 = vmatpush.bf16.msra.mxu0 %v7753_v0  ;;  %4135 = vmatpush.bf16.msra.mxu1 %v7755_v3 }
 0x825   :  { %4149 = vmatpush.bf16.msra.mxu2 %v7827_v41  ;;  %4163 = vmatpush.bf16.msra.mxu3 %v7775_v58 }
 0x828   :  { %4122 = vmatpush.bf16.msra.mxu0 %v7839_v17  ;;  %4136 = vmatpush.bf16.msra.mxu1 %v7848_v61 }
 0x829   :  { %4150 = vmatpush.bf16.msra.mxu2 %v7903_v40  ;;  %4164 = vmatpush.bf16.msra.mxu3 %v7850_v16 }
 0x82c   :  { %4123 = vmatpush.bf16.msra.mxu0 %v7908_v29  ;;  %4137 = vmatpush.bf16.msra.mxu1 %v7915_v54 }
 0x82d   :  { %4151 = vmatpush.bf16.msra.mxu2 %v7923_v19  ;;  %4165 = vmatpush.bf16.msra.mxu3 %v7920_v23 }
 0x830   :  { %4124 = vmatpush.bf16.msra.mxu0 %v7925_v21  ;;  %4138 = vmatpush.bf16.msra.mxu1 %v7927_v44 }
 0x831   :  { %4152 = vmatpush.bf16.msra.mxu2 %v7934_v39  ;;  %4166 = vmatpush.bf16.msra.mxu3 %v7931_v15 }
 0x834   :  { %4125 = vmatpush.bf16.msra.mxu0 %v7937_v26  ;;  %4139 = vmatpush.bf16.msra.mxu1 %v7941_v52 }
 0x835   :  { %4153 = vmatpush.bf16.msra.mxu2 %v7948_v50  ;;  %4167 = vmatpush.bf16.msra.mxu3 %v7945_v11 }
 0x893   :  { %v3729_v8 = vpop.f32.mrf.mxu0  ;;  %v3743_v18 = vpop.f32.mrf.mxu1 }
 0x894   :  { %v3776_v63 = vadd.f32 %v3729_v8, %v2882_v51  ;;  %v3777_v20 = vadd.f32 %v3743_v18, %v2931_v45  ;;  %v9033_v45 = vld [vmem:[#allocation77_spill] sm:$0xff]  ;;  %v9034_v8 = vld [vmem:[#allocation36_spill] sm:$0xff] }
 0x895   :  { %v2980_v18 = vadd.f32 %v9034_v8, %v9033_v45 }
 0x896   :  { %v5661_v6 = vmul.f32 -1.442695, %v3776_v63  ;;  %v5663_v22 = vmul.f32 -1.442695, %v3777_v20  ;;  %v9035_v20 = vld [vmem:[#allocation31_spill] sm:$0xff] }
 0x898   :  { %6257 = vpow2.f32 %v5661_v6  ;;  %v3031_v6 = vadd.f32 %v9035_v20, %v9029_v27  ;;  %v9036_v20 = vld [vmem:[#allocation38_spill] sm:$0xff] }
 0x899   :  { %6259 = vpow2.f32 %v5663_v22 }
 0x89a   :  { %v3771_v62 = vpop.f32.mrf.mxu3  ;;  %v3757_v56 = vpop.f32.mrf.mxu2 }
 0x89b   :  { %v3779_v10 = vadd.f32 %v3771_v62, %v3029_v30  ;;  %v3731_v37 = vpop.f32.mrf.mxu0  ;;  %v3745_v24 = vpop.f32.mrf.mxu1  ;;  %v3778_v42 = vadd.f32 %v3757_v56, %v2980_v18 }
 0x89c   :  { %v3780_v46 = vadd.f32 %v3731_v37, %v2884_v33  ;;  %v3781_v25 = vadd.f32 %v3745_v24, %v2933_v36 }
 0x89d   :  { %v5665_v53 = vmul.f32 -1.442695, %v3779_v10 }
 0x89e   :  { %v6258_v5 = vpop.eup %6257  ;;  %v5662_v13 = vmul.f32 -1.442695, %v3780_v46  ;;  %v5664_v57 = vmul.f32 -1.442695, %v3781_v25 }
 0x89f   :  { %v6260_v35 = vpop.eup %6259  ;;  %v3790_v55 = vadd.f32 1.0, %v6258_v5  ;;  %6261 = vpow2.f32 %v5665_v53 }
 0x8a0   :  { %v3828_v51 = vadd.f32 1.0, %v6260_v35  ;;  %6263 = vpow2.f32 %v5662_v13 }
 0x8a1   :  { %6265 = vrcp.f32 %v3790_v55  ;;  %v3801_v13 = vand.u32 2147483647, %v3790_v55  ;;  %v3803_v35 = vand.u32 2147483648, %v3790_v55  ;;  %vm3797_vm2 = vweird.f32 %v3790_v55 }
 0x8a2   :  { %6267 = vrcp.f32 %v3828_v51  ;;  %v3773_v63 = vpop.f32.mrf.mxu3  ;;  %v3839_v18 = vand.u32 2147483647, %v3828_v51  ;;  %vm3835_vm3 = vweird.f32 %v3828_v51 }
 0x8a3   :  { %6269 = vpow2.f32 %v5664_v57  ;;  %v3783_v28 = vadd.f32 %v3773_v63, %v3031_v6  ;;  %v3841_v57 = vand.u32 2147483648, %v3828_v51  ;;  %v3759_v63 = vpop.f32.mrf.mxu2  ;;  %v2982_v6 = vadd.f32 %v9036_v20, %v9033_v45 }
 0x8a4   :  { %6271 = vtanh.f32 %v3778_v42  ;;  %vm3802_vm6 = vcmp.eq.f32.partialorder %v3801_v13, 8.507059e+37  ;;  %vm3840_vm7 = vcmp.eq.f32.partialorder %v3839_v18, 8.507059e+37 }
 0x8a5   :  { %v6262_v22 = vpop.eup %6261  ;;  %v5666_v53 = vmul.f32 -1.442695, %v3783_v28 }
 0x8a6   :  { %v6264_v30 = vpop.eup %6263  ;;  %v8343_v9 = vadd.f32 1.0, %v6262_v22 }
 0x8a7   :  { %v6266_v33 = vpop.eup %6265  ;;  %v8345_v36 = vadd.f32 1.0, %v6264_v30  ;;  %v3804_v30 = vor.u32 1.1754944e-38, %v3803_v35 }
 0x8a8   :  { %v6268_v62 = vpop.eup %6267  ;;  %v3793_v10 = vmul.f32 %v6266_v33, %v3790_v55  ;;  %vm3798_vm0 = vweird.f32 %v6266_v33 }
 0x8a9   :  { %v6270_v37 = vpop.eup %6269  ;;  %v3831_v24 = vmul.f32 %v6268_v62, %v3828_v51  ;;  %6273 = vrcp.f32 %v8345_v36  ;;  %vm3836_vm1 = vweird.f32 %v6268_v62  ;;  %vm3799_vm4 = vmor %vm3797_vm2, %vm3798_vm0  ;;  %v3816_v13 = vand.u32 2147483647, %v8345_v36 }
 0x8aa   :  { %v3794_v46 = vsub.f32 1.0, %v3793_v10  ;;  %v8348_v25 = vadd.f32 1.0, %v6270_v37  ;;  %6275 = vrcp.f32 %v8343_v9  ;;  %v6272_v42 = vpop.eup %6271  ;;  %vm3837_vm5 = vmor %vm3835_vm3, %vm3836_vm1  ;;  %v3842_v37 = vor.u32 1.1754944e-38, %v3841_v57 }
 0x8ab   :  { %v3832_v5 = vsub.f32 1.0, %v3831_v24  ;;  %v3818_v57 = vand.u32 2147483648, %v8345_v36  ;;  %vm3812_vm9 = vweird.f32 %v8345_v36  ;;  %vm3817_vm13 = vcmp.eq.f32.partialorder %v3816_v13, 8.507059e+37 }
 0x8ac   :  { %v3795_v56 = vmul.f32 %v6266_v33, %v3794_v46  ;;  %6277 = vrcp.f32 %v8348_v25  ;;  %v3782_v46 = vadd.f32 %v3759_v63, %v2982_v6  ;;  %vm3850_vm11 = vweird.f32 %v8348_v25 }
 0x8ad   :  { %v3833_v8 = vmul.f32 %v6268_v62, %v3832_v5  ;;  %6279 = vpow2.f32 %v5666_v53  ;;  %vm3875_vm1 = vweird.f32 %v8343_v9 }
 0x8ae   :  { %v3796_v22 = vadd.f32 %v6266_v33, %v3795_v56  ;;  %6281 = vtanh.f32 %v3782_v46 }
 0x8af   :  { %v3834_v28 = vadd.f32 %v6268_v62, %v3833_v8  ;;  %v6274_v10 = vpop.eup %6273 }
 0x8b0   :  { %v3800_v24 = vsel %vm3799_vm4, %v6266_v33, %v3796_v22  ;;  %v8354_v5 = vpop.eup %6275  ;;  %v3808_v56 = vmul.f32 %v6274_v10, %v8345_v36  ;;  %vm3813_vm8 = vweird.f32 %v6274_v10  ;;  %v3854_v22 = vand.u32 2147483647, %v8348_v25 }
 0x8b1   :  { %v3805_v27 = vsel %vm3802_vm6, %v3804_v30, %v3800_v24  ;;  %v3838_v59 = vsel %vm3837_vm5, %v6268_v62, %v3834_v28  ;;  %v3871_v33 = vmul.f32 %v8354_v5, %v8343_v9  ;;  %vm3814_vm12 = vmor %vm3812_vm9, %vm3813_vm8  ;;  %vm3876_vm0 = vweird.f32 %v8354_v5 }
 0x8b2   :  { %v6278_v55 = vpop.eup %6277  ;;  %v3843_v53 = vsel %vm3840_vm7, %v3842_v37, %v3838_v59  ;;  %v3902_v20 = vmul.f32 %v6272_v42, %v3805_v27  ;;  %v3809_v35 = vsub.f32 1.0, %v3808_v56  ;;  %v3856_v59 = vand.u32 2147483648, %v8348_v25  ;;  %vm3877_vm3 = vmor %vm3875_vm1, %vm3876_vm0 }
 0x8b3   :  { %v3900_v51 = vmul.f32 %v3843_v53, %v8279_v14  ;;  %v3846_v8 = vmul.f32 %v6278_v55, %v8348_v25  ;;  %v6280_v45 = vpop.eup %6279  ;;  %vm3851_vm10 = vweird.f32 %v6278_v55  ;;  %v3819_v42 = vor.u32 1.1754944e-38, %v3818_v57 }
 0x8b4   :  { %v3810_v63 = vmul.f32 %v6274_v10, %v3809_v35  ;;  %v3869_v14 = vadd.f32 1.0, %v6280_v45  ;;  %v3872_v30 = vsub.f32 1.0, %v3871_v33  ;;  %v6282_v24 = vpop.eup %6281  ;;  %vm3852_vm14 = vmor %vm3850_vm11, %vm3851_vm10  ;;  %v3857_v46 = vor.u32 1.1754944e-38, %v3856_v59 }
 0x8b5   :  { %v8363_v62 = vadd.f32 %v3902_v20, %v3900_v51  ;;  %v3847_v18 = vsub.f32 1.0, %v3846_v8  ;;  %vm3855_vm15 = vcmp.eq.f32.partialorder %v3854_v22, 8.507059e+37  ;;  %v3881_v33 = vand.u32 2147483648, %v8343_v9 }
 0x8b6   :  { %v3811_v6 = vadd.f32 %v6274_v10, %v3810_v63  ;;  %6283 = vrcp.f32 %v3869_v14  ;;  %v3873_v20 = vmul.f32 %v8354_v5, %v3872_v30  ;;  %v3896_v13 = vand.u32 2147483648, %v3869_v14 }
 0x8b7   :  { %v3848_v27 = vmul.f32 %v6278_v55, %v3847_v18  ;;  %6285 = vtanh.f32 %v8363_v62  ;;  %v3894_v18 = vand.u32 2147483647, %v3869_v14  ;;  %vm3890_vm4 = vweird.f32 %v3869_v14 }
 0x8b8   :  { %v3815_v28 = vsel %vm3814_vm12, %v6274_v10, %v3811_v6  ;;  %v3874_v10 = vadd.f32 %v8354_v5, %v3873_v20  ;;  %v3882_v6 = vor.u32 1.1754944e-38, %v3881_v33  ;;  %v3897_v22 = vor.u32 1.1754944e-38, %v3896_v13  ;;  %v9041_v33 = vld [vmem:[#allocation40_spill] sm:$0xff] }
 0x8b9   :  { %v3849_v37 = vadd.f32 %v6278_v55, %v3848_v27  ;;  %v3820_v56 = vsel %vm3817_vm13, %v3819_v42, %v3815_v28  ;;  %vm3895_vm7 = vcmp.eq.f32.partialorder %v3894_v18, 8.507059e+37  ;;  %v9043_v18 = vld [vmem:[#allocation42_spill] sm:$0xff] }
 0x8ba   :  { %v3903_v45 = vmul.f32 %v6282_v24, %v3820_v56  ;;  %v3878_v59 = vsel %vm3877_vm3, %v8354_v5, %v3874_v10  ;;  %v9037_v5 = vld [vmem:[#allocation35_spill] sm:$0xff]  ;;  %v9038_v56 = vld [vmem:[#allocation69_spill] sm:$0xff] }
 0x8bb   :  { %v3853_v36 = vsel %vm3852_vm14, %v6278_v55, %v3849_v37 }
 0x8bc   :  { %v3858_v53 = vsel %vm3855_vm15, %v3857_v46, %v3853_v36  ;;  %v6284_v25 = vpop.eup %6283  ;;  %v9039_v36 = vld [vmem:[#allocation37_spill] sm:$0xff] }
 0x8bd   :  { %v3901_v51 = vmul.f32 %v3858_v53, %v8287_v48  ;;  %v3886_v8 = vmul.f32 %v6284_v25, %v3869_v14  ;;  %v3879_v48 = vand.u32 2147483647, %v8343_v9  ;;  %vm3891_vm2 = vweird.f32 %v6284_v25  ;;  %v6286_v27 = vpop.eup %6285 }
 0x8be   :  { %vm3892_vm5 = vmor %vm3890_vm4, %vm3891_vm2  ;;  %v2887_v14 = vadd.f32 %v9037_v5, %v8148_v34 }
 0x8bf   :  { %v8371_v35 = vadd.f32 %v3903_v45, %v3901_v51  ;;  %v3887_v55 = vsub.f32 1.0, %v3886_v8  ;;  %vm3880_vm6 = vcmp.eq.f32.partialorder %v3879_v48, 8.507059e+37  ;;  %v2936_v45 = vadd.f32 %v9039_v36, %v9038_v56  ;;  %v9042_v48 = vld [vmem:[#allocation41_spill] sm:$0xff] }
 0x8c0   :  { %v3883_v28 = vsel %vm3880_vm6, %v3882_v6, %v3878_v59 }
 0x8c1   :  { %6287 = vtanh.f32 %v8371_v35  ;;  %v3888_v57 = vmul.f32 %v6284_v25, %v3887_v55  ;;  %v3908_v24 = vmul.f32 %v6286_v27, %v3883_v28  ;;  %v9040_v55 = vld [vmem:[#allocation73_spill] sm:$0xff] }
 0x8c2   :  { %v3034_v13 = vadd.f32 %v9041_v33, %v9040_v55 }
 0x8c3   :  { %v3889_v63 = vadd.f32 %v6284_v25, %v3888_v57  ;;  %v2889_v57 = vadd.f32 %v9042_v48, %v8148_v34 }
 0x8c5   :  { %v3893_v30 = vsel %vm3892_vm5, %v6284_v25, %v3889_v63  ;;  %v2938_v63 = vadd.f32 %v9043_v18, %v9038_v56 }
 0x8c6   :  { %v3898_v37 = vsel %vm3895_vm7, %v3897_v22, %v3893_v30 }
 0x8c7   :  { %v6288_v42 = vpop.eup %6287 }
 0x8c8   :  { %v3909_v9 = vmul.f32 %v6288_v42, %v3898_v37 }
 0x8ca   :  { %v3910_v46 = vpack.c.bf16 %v3909_v9, %v3908_v24 }
 0x8cc   :  { %3927 = vmatmul.bf16.vlgmr.msrb.gmra.mxu0 %v3910_v46  ;;  %3941 = vmatmul.bf16.vlgmr.msrb.gmra.mxu1 %v3910_v46 }
 0x8cd   :  { %3955 = vmatmul.bf16.vlgmr.msrb.gmra.mxu2 %v3910_v46  ;;  %3969 = vmatmul.bf16.vlgmr.msrb.gmra.mxu3 %v3910_v46 }
 0x8ce   :  { %4317 = vmatpush.bf16.msrb.mxu0 %v7718_v2  ;;  %4331 = vmatpush.bf16.msrb.mxu1 %v7720_v32 }
 0x8cf   :  { %4345 = vmatpush.bf16.msrb.mxu2 %v7726_v1  ;;  %4359 = vmatpush.bf16.msrb.mxu3 %v7724_v7 }
 0x8d2   :  { %4318 = vmatpush.bf16.msrb.mxu0 %v7728_v31  ;;  %4332 = vmatpush.bf16.msrb.mxu1 %v7731_v47 }
 0x8d3   :  { %4346 = vmatpush.bf16.msrb.mxu2 %v7738_v60  ;;  %4360 = vmatpush.bf16.msrb.mxu3 %v7736_v12 }
 0x8d6   :  { %4319 = vmatpush.bf16.msrb.mxu0 %v7740_v38  ;;  %4333 = vmatpush.bf16.msrb.mxu1 %v7743_v43 }
 0x8d7   :  { %4347 = vmatpush.bf16.msrb.mxu2 %v7751_v4  ;;  %4361 = vmatpush.bf16.msrb.mxu3 %v7748_v49 }
 0x8da   :  { %4320 = vmatpush.bf16.msrb.mxu0 %v7753_v0  ;;  %4334 = vmatpush.bf16.msrb.mxu1 %v7755_v3 }
 0x8db   :  { %4348 = vmatpush.bf16.msrb.mxu2 %v7827_v41  ;;  %4362 = vmatpush.bf16.msrb.mxu3 %v7775_v58 }
 0x8de   :  { %4321 = vmatpush.bf16.msrb.mxu0 %v7839_v17  ;;  %4335 = vmatpush.bf16.msrb.mxu1 %v7848_v61 }
 0x8df   :  { %4349 = vmatpush.bf16.msrb.mxu2 %v7903_v40  ;;  %4363 = vmatpush.bf16.msrb.mxu3 %v7850_v16 }
 0x8e2   :  { %4322 = vmatpush.bf16.msrb.mxu0 %v7908_v29  ;;  %4336 = vmatpush.bf16.msrb.mxu1 %v7915_v54 }
 0x8e3   :  { %4350 = vmatpush.bf16.msrb.mxu2 %v7923_v19  ;;  %4364 = vmatpush.bf16.msrb.mxu3 %v7920_v23 }
 0x8e6   :  { %4323 = vmatpush.bf16.msrb.mxu0 %v7925_v21  ;;  %4337 = vmatpush.bf16.msrb.mxu1 %v7927_v44 }
 0x8e7   :  { %4351 = vmatpush.bf16.msrb.mxu2 %v7934_v39  ;;  %4365 = vmatpush.bf16.msrb.mxu3 %v7931_v15 }
 0x8ea   :  { %4324 = vmatpush.bf16.msrb.mxu0 %v7937_v26  ;;  %4338 = vmatpush.bf16.msrb.mxu1 %v7941_v52 }
 0x8eb   :  { %4352 = vmatpush.bf16.msrb.mxu2 %v7948_v50  ;;  %4366 = vmatpush.bf16.msrb.mxu3 %v7945_v11 }
 0x949   :  { %v3928_v53 = vpop.f32.mrf.mxu0  ;;  %v3942_v20 = vpop.f32.mrf.mxu1 }
 0x94a   :  { %v3975_v51 = vadd.f32 %v3928_v53, %v2887_v14  ;;  %v3976_v25 = vadd.f32 %v3942_v20, %v2936_v45  ;;  %v9044_v45 = vld [vmem:[#allocation77_spill] sm:$0xff]  ;;  %v9045_v53 = vld [vmem:[#allocation44_spill] sm:$0xff] }
 0x94b   :  { %v2985_v20 = vadd.f32 %v9045_v53, %v9044_v45 }
 0x94c   :  { %v5667_v8 = vmul.f32 -1.442695, %v3975_v51  ;;  %v5669_v10 = vmul.f32 -1.442695, %v3976_v25  ;;  %v9046_v25 = vld [vmem:[#allocation80_spill] sm:$0xff] }
 0x94e   :  { %6289 = vpow2.f32 %v5667_v8  ;;  %v3036_v8 = vadd.f32 %v9046_v25, %v9040_v55  ;;  %v9047_v25 = vld [vmem:[#allocation45_spill] sm:$0xff] }
 0x94f   :  { %6291 = vpow2.f32 %v5669_v10 }
 0x950   :  { %v3970_v59 = vpop.f32.mrf.mxu3  ;;  %v3956_v36 = vpop.f32.mrf.mxu2 }
 0x951   :  { %v3978_v27 = vadd.f32 %v3970_v59, %v3034_v13  ;;  %v3930_v6 = vpop.f32.mrf.mxu0  ;;  %v3944_v22 = vpop.f32.mrf.mxu1  ;;  %v3977_v33 = vadd.f32 %v3956_v36, %v2985_v20 }
 0x952   :  { %v3979_v42 = vadd.f32 %v3930_v6, %v2889_v57  ;;  %v3980_v30 = vadd.f32 %v3944_v22, %v2938_v63 }
 0x953   :  { %v5671_v28 = vmul.f32 -1.442695, %v3978_v27 }
 0x954   :  { %v6290_v37 = vpop.eup %6289  ;;  %v5668_v24 = vmul.f32 -1.442695, %v3979_v42  ;;  %v5670_v5 = vmul.f32 -1.442695, %v3980_v30 }
 0x955   :  { %v6292_v9 = vpop.eup %6291  ;;  %v3989_v46 = vadd.f32 1.0, %v6290_v37  ;;  %6293 = vpow2.f32 %v5671_v28 }
 0x956   :  { %v4027_v14 = vadd.f32 1.0, %v6292_v9  ;;  %6295 = vpow2.f32 %v5668_v24 }
 0x957   :  { %6297 = vrcp.f32 %v3989_v46  ;;  %v4000_v24 = vand.u32 2147483647, %v3989_v46  ;;  %v4002_v9 = vand.u32 2147483648, %v3989_v46  ;;  %vm3996_vm10 = vweird.f32 %v3989_v46 }
 0x958   :  { %6299 = vrcp.f32 %v4027_v14  ;;  %v3972_v51 = vpop.f32.mrf.mxu3  ;;  %v4038_v20 = vand.u32 2147483647, %v4027_v14  ;;  %vm4034_vm11 = vweird.f32 %v4027_v14 }
 0x959   :  { %6301 = vpow2.f32 %v5670_v5  ;;  %v3982_v48 = vadd.f32 %v3972_v51, %v3036_v8  ;;  %v4040_v5 = vand.u32 2147483648, %v4027_v14  ;;  %v3958_v51 = vpop.f32.mrf.mxu2  ;;  %v2987_v8 = vadd.f32 %v9047_v25, %v9044_v45 }
 0x95a   :  { %6303 = vtanh.f32 %v3977_v33  ;;  %vm4001_vm14 = vcmp.eq.f32.partialorder %v4000_v24, 8.507059e+37  ;;  %vm4039_vm15 = vcmp.eq.f32.partialorder %v4038_v20, 8.507059e+37 }
 0x95b   :  { %v6294_v10 = vpop.eup %6293  ;;  %v5672_v28 = vmul.f32 -1.442695, %v3982_v48 }
 0x95c   :  { %v6296_v13 = vpop.eup %6295  ;;  %v8427_v18 = vadd.f32 1.0, %v6294_v10 }
 0x95d   :  { %v6298_v57 = vpop.eup %6297  ;;  %v8429_v63 = vadd.f32 1.0, %v6296_v13  ;;  %v4003_v13 = vor.u32 1.1754944e-38, %v4002_v9 }
 0x95e   :  { %v6300_v59 = vpop.eup %6299  ;;  %v3992_v27 = vmul.f32 %v6298_v57, %v3989_v46  ;;  %vm3997_vm8 = vweird.f32 %v6298_v57 }
 0x95f   :  { %v6302_v6 = vpop.eup %6301  ;;  %v4030_v22 = vmul.f32 %v6300_v59, %v4027_v14  ;;  %6305 = vrcp.f32 %v8429_v63  ;;  %vm4035_vm9 = vweird.f32 %v6300_v59  ;;  %vm3998_vm12 = vmor %vm3996_vm10, %vm3997_vm8  ;;  %v4015_v24 = vand.u32 2147483647, %v8429_v63 }
 0x960   :  { %v3993_v42 = vsub.f32 1.0, %v3992_v27  ;;  %v8432_v30 = vadd.f32 1.0, %v6302_v6  ;;  %6307 = vrcp.f32 %v8427_v18  ;;  %v6304_v33 = vpop.eup %6303  ;;  %vm4036_vm13 = vmor %vm4034_vm11, %vm4035_vm9  ;;  %v4041_v6 = vor.u32 1.1754944e-38, %v4040_v5 }
 0x961   :  { %v4031_v37 = vsub.f32 1.0, %v4030_v22  ;;  %v4017_v5 = vand.u32 2147483648, %v8429_v63  ;;  %vm4011_vm1 = vweird.f32 %v8429_v63  ;;  %vm4016_vm5 = vcmp.eq.f32.partialorder %v4015_v24, 8.507059e+37 }
 0x962   :  { %v3994_v36 = vmul.f32 %v6298_v57, %v3993_v42  ;;  %6309 = vrcp.f32 %v8432_v30  ;;  %v3981_v42 = vadd.f32 %v3958_v51, %v2987_v8  ;;  %vm4049_vm3 = vweird.f32 %v8432_v30 }
 0x963   :  { %v4032_v53 = vmul.f32 %v6300_v59, %v4031_v37  ;;  %6311 = vpow2.f32 %v5672_v28  ;;  %vm4074_vm9 = vweird.f32 %v8427_v18 }
 0x964   :  { %v3995_v10 = vadd.f32 %v6298_v57, %v3994_v36  ;;  %6313 = vtanh.f32 %v3981_v42 }
 0x965   :  { %v4033_v48 = vadd.f32 %v6300_v59, %v4032_v53  ;;  %v6306_v27 = vpop.eup %6305 }
 0x966   :  { %v3999_v22 = vsel %vm3998_vm12, %v6298_v57, %v3995_v10  ;;  %v8438_v37 = vpop.eup %6307  ;;  %v4007_v36 = vmul.f32 %v6306_v27, %v8429_v63  ;;  %vm4012_vm0 = vweird.f32 %v6306_v27  ;;  %v4053_v10 = vand.u32 2147483647, %v8432_v30 }
 0x967   :  { %v4004_v55 = vsel %vm4001_vm14, %v4003_v13, %v3999_v22  ;;  %v4037_v56 = vsel %vm4036_vm13, %v6300_v59, %v4033_v48  ;;  %v4070_v57 = vmul.f32 %v8438_v37, %v8427_v18  ;;  %vm4013_vm4 = vmor %vm4011_vm1, %vm4012_vm0  ;;  %vm4075_vm8 = vweird.f32 %v8438_v37 }
 0x968   :  { %v6310_v46 = vpop.eup %6309  ;;  %v4042_v28 = vsel %vm4039_vm15, %v4041_v6, %v4037_v56  ;;  %v4101_v25 = vmul.f32 %v6304_v33, %v4004_v55  ;;  %v4008_v9 = vsub.f32 1.0, %v4007_v36  ;;  %v4055_v56 = vand.u32 2147483648, %v8432_v30  ;;  %vm4076_vm11 = vmor %vm4074_vm9, %vm4075_vm8 }
 0x969   :  { %v4099_v14 = vmul.f32 %v4042_v28, %v8363_v62  ;;  %v4045_v53 = vmul.f32 %v6310_v46, %v8432_v30  ;;  %v6312_v45 = vpop.eup %6311  ;;  %vm4050_vm2 = vweird.f32 %v6310_v46  ;;  %v4018_v33 = vor.u32 1.1754944e-38, %v4017_v5 }
 0x96a   :  { %v4009_v51 = vmul.f32 %v6306_v27, %v4008_v9  ;;  %v4068_v62 = vadd.f32 1.0, %v6312_v45  ;;  %v4071_v13 = vsub.f32 1.0, %v4070_v57  ;;  %v6314_v22 = vpop.eup %6313  ;;  %vm4051_vm6 = vmor %vm4049_vm3, %vm4050_vm2  ;;  %v4056_v42 = vor.u32 1.1754944e-38, %v4055_v56 }
 0x96b   :  { %v8447_v59 = vadd.f32 %v4101_v25, %v4099_v14  ;;  %v4046_v20 = vsub.f32 1.0, %v4045_v53  ;;  %vm4054_vm7 = vcmp.eq.f32.partialorder %v4053_v10, 8.507059e+37  ;;  %v4080_v57 = vand.u32 2147483648, %v8427_v18 }
 0x96c   :  { %v4010_v8 = vadd.f32 %v6306_v27, %v4009_v51  ;;  %6315 = vrcp.f32 %v4068_v62  ;;  %v4072_v25 = vmul.f32 %v8438_v37, %v4071_v13  ;;  %v4095_v24 = vand.u32 2147483648, %v4068_v62 }
 0x96d   :  { %v4047_v55 = vmul.f32 %v6310_v46, %v4046_v20  ;;  %6317 = vtanh.f32 %v8447_v59  ;;  %v4093_v20 = vand.u32 2147483647, %v4068_v62  ;;  %vm4089_vm12 = vweird.f32 %v4068_v62 }
 0x96e   :  { %v4014_v48 = vsel %vm4013_vm4, %v6306_v27, %v4010_v8  ;;  %v4073_v27 = vadd.f32 %v8438_v37, %v4072_v25  ;;  %v4081_v8 = vor.u32 1.1754944e-38, %v4080_v57  ;;  %v4096_v10 = vor.u32 1.1754944e-38, %v4095_v24  ;;  %v9052_v57 = vld [vmem:[#allocation46_spill] sm:$0xff] }
 0x96f   :  { %v4048_v6 = vadd.f32 %v6310_v46, %v4047_v55  ;;  %v4019_v36 = vsel %vm4016_vm5, %v4018_v33, %v4014_v48  ;;  %vm4094_vm15 = vcmp.eq.f32.partialorder %v4093_v20, 8.507059e+37  ;;  %v9054_v20 = vld [vmem:[#allocation49_spill] sm:$0xff] }
 0x970   :  { %v4102_v45 = vmul.f32 %v6314_v22, %v4019_v36  ;;  %v4077_v56 = vsel %vm4076_vm11, %v8438_v37, %v4073_v27  ;;  %v9048_v37 = vld [vmem:[#allocation39_spill] sm:$0xff]  ;;  %v9049_v36 = vld [vmem:[#allocation69_spill] sm:$0xff] }
 0x971   :  { %v4052_v63 = vsel %vm4051_vm6, %v6310_v46, %v4048_v6 }
 0x972   :  { %v4057_v28 = vsel %vm4054_vm7, %v4056_v42, %v4052_v63  ;;  %v6316_v30 = vpop.eup %6315  ;;  %v9050_v63 = vld [vmem:[#allocation43_spill] sm:$0xff] }
 0x973   :  { %v4100_v14 = vmul.f32 %v4057_v28, %v8371_v35  ;;  %v4085_v53 = vmul.f32 %v6316_v30, %v4068_v62  ;;  %v4078_v35 = vand.u32 2147483647, %v8427_v18  ;;  %vm4090_vm10 = vweird.f32 %v6316_v30  ;;  %v6318_v55 = vpop.eup %6317 }
 0x974   :  { %vm4091_vm13 = vmor %vm4089_vm12, %vm4090_vm10  ;;  %v2892_v62 = vadd.f32 %v9048_v37, %v8148_v34 }
 0x975   :  { %v8455_v9 = vadd.f32 %v4102_v45, %v4100_v14  ;;  %v4086_v46 = vsub.f32 1.0, %v4085_v53  ;;  %vm4079_vm14 = vcmp.eq.f32.partialorder %v4078_v35, 8.507059e+37  ;;  %v2941_v45 = vadd.f32 %v9050_v63, %v9049_v36  ;;  %v9053_v35 = vld [vmem:[#allocation48_spill] sm:$0xff] }
 0x976   :  { %v4082_v48 = vsel %vm4079_vm14, %v4081_v8, %v4077_v56 }
 0x977   :  { %6319 = vtanh.f32 %v8455_v9  ;;  %v4087_v5 = vmul.f32 %v6316_v30, %v4086_v46  ;;  %v4107_v22 = vmul.f32 %v6318_v55, %v4082_v48  ;;  %v9051_v46 = vld [vmem:[#allocation73_spill] sm:$0xff] }
 0x978   :  { %v3039_v24 = vadd.f32 %v9052_v57, %v9051_v46 }
 0x979   :  { %v4088_v51 = vadd.f32 %v6316_v30, %v4087_v5  ;;  %v2894_v5 = vadd.f32 %v9053_v35, %v8148_v34 }
 0x97b   :  { %v4092_v13 = vsel %vm4091_vm13, %v6316_v30, %v4088_v51  ;;  %v2943_v51 = vadd.f32 %v9054_v20, %v9049_v36 }
 0x97c   :  { %v4097_v6 = vsel %vm4094_vm15, %v4096_v10, %v4092_v13 }
 0x97d   :  { %v6320_v33 = vpop.eup %6319 }
 0x97e   :  { %v4108_v18 = vmul.f32 %v6320_v33, %v4097_v6 }
 0x980   :  { %v4109_v42 = vpack.c.bf16 %v4108_v18, %v4107_v22 }
 0x982   :  { %4126 = vmatmul.bf16.vlgmr.msra.gmra.mxu0 %v4109_v42  ;;  %4140 = vmatmul.bf16.vlgmr.msra.gmra.mxu1 %v4109_v42 }
 0x983   :  { %4154 = vmatmul.bf16.vlgmr.msra.gmra.mxu2 %v4109_v42  ;;  %4168 = vmatmul.bf16.vlgmr.msra.gmra.mxu3 %v4109_v42 }
 0x984   :  { %4516 = vmatpush.bf16.msra.mxu0 %v7718_v2  ;;  %4530 = vmatpush.bf16.msra.mxu1 %v7720_v32 }
 0x985   :  { %4544 = vmatpush.bf16.msra.mxu2 %v7726_v1  ;;  %4558 = vmatpush.bf16.msra.mxu3 %v7724_v7 }
 0x988   :  { %4517 = vmatpush.bf16.msra.mxu0 %v7728_v31  ;;  %4531 = vmatpush.bf16.msra.mxu1 %v7731_v47 }
 0x989   :  { %4545 = vmatpush.bf16.msra.mxu2 %v7738_v60  ;;  %4559 = vmatpush.bf16.msra.mxu3 %v7736_v12 }
 0x98c   :  { %4518 = vmatpush.bf16.msra.mxu0 %v7740_v38  ;;  %4532 = vmatpush.bf16.msra.mxu1 %v7743_v43 }
 0x98d   :  { %4546 = vmatpush.bf16.msra.mxu2 %v7751_v4  ;;  %4560 = vmatpush.bf16.msra.mxu3 %v7748_v49 }
 0x990   :  { %4519 = vmatpush.bf16.msra.mxu0 %v7753_v0  ;;  %4533 = vmatpush.bf16.msra.mxu1 %v7755_v3 }
 0x991   :  { %4547 = vmatpush.bf16.msra.mxu2 %v7827_v41  ;;  %4561 = vmatpush.bf16.msra.mxu3 %v7775_v58 }
 0x994   :  { %4520 = vmatpush.bf16.msra.mxu0 %v7839_v17  ;;  %4534 = vmatpush.bf16.msra.mxu1 %v7848_v61 }
 0x995   :  { %4548 = vmatpush.bf16.msra.mxu2 %v7903_v40  ;;  %4562 = vmatpush.bf16.msra.mxu3 %v7850_v16 }
 0x998   :  { %4521 = vmatpush.bf16.msra.mxu0 %v7908_v29  ;;  %4535 = vmatpush.bf16.msra.mxu1 %v7915_v54 }
 0x999   :  { %4549 = vmatpush.bf16.msra.mxu2 %v7923_v19  ;;  %4563 = vmatpush.bf16.msra.mxu3 %v7920_v23 }
 0x99c   :  { %4522 = vmatpush.bf16.msra.mxu0 %v7925_v21  ;;  %4536 = vmatpush.bf16.msra.mxu1 %v7927_v44 }
 0x99d   :  { %4550 = vmatpush.bf16.msra.mxu2 %v7934_v39  ;;  %4564 = vmatpush.bf16.msra.mxu3 %v7931_v15 }
 0x9a0   :  { %4523 = vmatpush.bf16.msra.mxu0 %v7937_v26  ;;  %4537 = vmatpush.bf16.msra.mxu1 %v7941_v52 }
 0x9a1   :  { %4551 = vmatpush.bf16.msra.mxu2 %v7948_v50  ;;  %4565 = vmatpush.bf16.msra.mxu3 %v7945_v11 }
 0x9ff   :  { %v4127_v28 = vpop.f32.mrf.mxu0  ;;  %v4141_v25 = vpop.f32.mrf.mxu1 }
 0xa00   :  { %v4174_v14 = vadd.f32 %v4127_v28, %v2892_v62  ;;  %v4175_v30 = vadd.f32 %v4141_v25, %v2941_v45  ;;  %v9055_v45 = vld [vmem:[#allocation77_spill] sm:$0xff]  ;;  %v9056_v28 = vld [vmem:[#allocation50_spill] sm:$0xff] }
 0xa01   :  { %v2990_v25 = vadd.f32 %v9056_v28, %v9055_v45 }
 0xa02   :  { %v5673_v53 = vmul.f32 -1.442695, %v4174_v14  ;;  %v5675_v27 = vmul.f32 -1.442695, %v4175_v30  ;;  %v9057_v30 = vld [vmem:[#allocation52_spill] sm:$0xff] }
 0xa04   :  { %6321 = vpow2.f32 %v5673_v53  ;;  %v3041_v53 = vadd.f32 %v9057_v30, %v9051_v46  ;;  %v9058_v30 = vld [vmem:[#allocation74_spill] sm:$0xff] }
 0xa05   :  { %6323 = vpow2.f32 %v5675_v27 }
 0xa06   :  { %v4169_v56 = vpop.f32.mrf.mxu3  ;;  %v4155_v63 = vpop.f32.mrf.mxu2 }
 0xa07   :  { %v4177_v55 = vadd.f32 %v4169_v56, %v3039_v24  ;;  %v4129_v8 = vpop.f32.mrf.mxu0  ;;  %v4143_v10 = vpop.f32.mrf.mxu1  ;;  %v4176_v57 = vadd.f32 %v4155_v63, %v2990_v25 }
 0xa08   :  { %v4178_v33 = vadd.f32 %v4129_v8, %v2894_v5  ;;  %v4179_v13 = vadd.f32 %v4143_v10, %v2943_v51 }
 0xa09   :  { %v5677_v48 = vmul.f32 -1.442695, %v4177_v55 }
 0xa0a   :  { %v6322_v6 = vpop.eup %6321  ;;  %v5674_v22 = vmul.f32 -1.442695, %v4178_v33  ;;  %v5676_v37 = vmul.f32 -1.442695, %v4179_v13 }
 0xa0b   :  { %v6324_v18 = vpop.eup %6323  ;;  %v4188_v42 = vadd.f32 1.0, %v6322_v6  ;;  %6325 = vpow2.f32 %v5677_v48 }
 0xa0c   :  { %v4226_v62 = vadd.f32 1.0, %v6324_v18  ;;  %6327 = vpow2.f32 %v5674_v22 }
 0xa0d   :  { %6329 = vrcp.f32 %v4188_v42  ;;  %v4199_v22 = vand.u32 2147483647, %v4188_v42  ;;  %v4201_v18 = vand.u32 2147483648, %v4188_v42  ;;  %vm4195_vm2 = vweird.f32 %v4188_v42 }
 0xa0e   :  { %6331 = vrcp.f32 %v4226_v62  ;;  %v4171_v14 = vpop.f32.mrf.mxu3  ;;  %v4237_v25 = vand.u32 2147483647, %v4226_v62  ;;  %vm4233_vm3 = vweird.f32 %v4226_v62 }
 0xa0f   :  { %6333 = vpow2.f32 %v5676_v37  ;;  %v4181_v35 = vadd.f32 %v4171_v14, %v3041_v53  ;;  %v4239_v37 = vand.u32 2147483648, %v4226_v62  ;;  %v4157_v14 = vpop.f32.mrf.mxu2  ;;  %v2992_v53 = vadd.f32 %v9058_v30, %v9055_v45 }
 0xa10   :  { %6335 = vtanh.f32 %v4176_v57  ;;  %vm4200_vm6 = vcmp.eq.f32.partialorder %v4199_v22, 8.507059e+37  ;;  %vm4238_vm7 = vcmp.eq.f32.partialorder %v4237_v25, 8.507059e+37 }
 0xa11   :  { %v6326_v27 = vpop.eup %6325  ;;  %v5678_v48 = vmul.f32 -1.442695, %v4181_v35 }
 0xa12   :  { %v6328_v24 = vpop.eup %6327  ;;  %v8511_v20 = vadd.f32 1.0, %v6326_v27 }
 0xa13   :  { %v6330_v5 = vpop.eup %6329  ;;  %v8513_v51 = vadd.f32 1.0, %v6328_v24  ;;  %v4202_v24 = vor.u32 1.1754944e-38, %v4201_v18 }
 0xa14   :  { %v6332_v56 = vpop.eup %6331  ;;  %v4191_v55 = vmul.f32 %v6330_v5, %v4188_v42  ;;  %vm4196_vm0 = vweird.f32 %v6330_v5 }
 0xa15   :  { %v6334_v8 = vpop.eup %6333  ;;  %v4229_v10 = vmul.f32 %v6332_v56, %v4226_v62  ;;  %6337 = vrcp.f32 %v8513_v51  ;;  %vm4234_vm1 = vweird.f32 %v6332_v56  ;;  %vm4197_vm4 = vmor %vm4195_vm2, %vm4196_vm0  ;;  %v4214_v22 = vand.u32 2147483647, %v8513_v51 }
 0xa16   :  { %v4192_v33 = vsub.f32 1.0, %v4191_v55  ;;  %v8516_v13 = vadd.f32 1.0, %v6334_v8  ;;  %6339 = vrcp.f32 %v8511_v20  ;;  %v6336_v57 = vpop.eup %6335  ;;  %vm4235_vm5 = vmor %vm4233_vm3, %vm4234_vm1  ;;  %v4240_v8 = vor.u32 1.1754944e-38, %v4239_v37 }
 0xa17   :  { %v4230_v6 = vsub.f32 1.0, %v4229_v10  ;;  %v4216_v37 = vand.u32 2147483648, %v8513_v51  ;;  %vm4210_vm9 = vweird.f32 %v8513_v51  ;;  %vm4215_vm13 = vcmp.eq.f32.partialorder %v4214_v22, 8.507059e+37 }
 0xa18   :  { %v4193_v63 = vmul.f32 %v6330_v5, %v4192_v33  ;;  %6341 = vrcp.f32 %v8516_v13  ;;  %v4180_v33 = vadd.f32 %v4157_v14, %v2992_v53  ;;  %vm4248_vm11 = vweird.f32 %v8516_v13 }
 0xa19   :  { %v4231_v28 = vmul.f32 %v6332_v56, %v4230_v6  ;;  %6343 = vpow2.f32 %v5678_v48  ;;  %vm4273_vm1 = vweird.f32 %v8511_v20 }
 0xa1a   :  { %v4194_v27 = vadd.f32 %v6330_v5, %v4193_v63  ;;  %6345 = vtanh.f32 %v4180_v33 }
 0xa1b   :  { %v4232_v35 = vadd.f32 %v6332_v56, %v4231_v28  ;;  %v6338_v55 = vpop.eup %6337 }
 0xa1c   :  { %v4198_v10 = vsel %vm4197_vm4, %v6330_v5, %v4194_v27  ;;  %v8522_v6 = vpop.eup %6339  ;;  %v4206_v63 = vmul.f32 %v6338_v55, %v8513_v51  ;;  %vm4211_vm8 = vweird.f32 %v6338_v55  ;;  %v4252_v27 = vand.u32 2147483647, %v8516_v13 }
 0xa1d   :  { %v4203_v46 = vsel %vm4200_vm6, %v4202_v24, %v4198_v10  ;;  %v4236_v36 = vsel %vm4235_vm5, %v6332_v56, %v4232_v35  ;;  %v4269_v5 = vmul.f32 %v8522_v6, %v8511_v20  ;;  %vm4212_vm12 = vmor %vm4210_vm9, %vm4211_vm8  ;;  %vm4274_vm0 = vweird.f32 %v8522_v6 }
 0xa1e   :  { %v6342_v42 = vpop.eup %6341  ;;  %v4241_v48 = vsel %vm4238_vm7, %v4240_v8, %v4236_v36  ;;  %v4300_v30 = vmul.f32 %v6336_v57, %v4203_v46  ;;  %v4207_v18 = vsub.f32 1.0, %v4206_v63  ;;  %v4254_v36 = vand.u32 2147483648, %v8516_v13  ;;  %vm4275_vm3 = vmor %vm4273_vm1, %vm4274_vm0 }
 0xa1f   :  { %v4298_v62 = vmul.f32 %v4241_v48, %v8447_v59  ;;  %v4244_v28 = vmul.f32 %v6342_v42, %v8516_v13  ;;  %v6344_v45 = vpop.eup %6343  ;;  %vm4249_vm10 = vweird.f32 %v6342_v42  ;;  %v4217_v57 = vor.u32 1.1754944e-38, %v4216_v37 }
 0xa20   :  { %v4208_v14 = vmul.f32 %v6338_v55, %v4207_v18  ;;  %v4267_v59 = vadd.f32 1.0, %v6344_v45  ;;  %v4270_v24 = vsub.f32 1.0, %v4269_v5  ;;  %v6346_v10 = vpop.eup %6345  ;;  %vm4250_vm14 = vmor %vm4248_vm11, %vm4249_vm10  ;;  %v4255_v33 = vor.u32 1.1754944e-38, %v4254_v36 }
 0xa21   :  { %v8531_v56 = vadd.f32 %v4300_v30, %v4298_v62  ;;  %v4245_v25 = vsub.f32 1.0, %v4244_v28  ;;  %vm4253_vm15 = vcmp.eq.f32.partialorder %v4252_v27, 8.507059e+37  ;;  %v4279_v5 = vand.u32 2147483648, %v8511_v20 }
 0xa22   :  { %v4209_v53 = vadd.f32 %v6338_v55, %v4208_v14  ;;  %6347 = vrcp.f32 %v4267_v59  ;;  %v4271_v30 = vmul.f32 %v8522_v6, %v4270_v24  ;;  %v4294_v22 = vand.u32 2147483648, %v4267_v59 }
 0xa23   :  { %v4246_v46 = vmul.f32 %v6342_v42, %v4245_v25  ;;  %6349 = vtanh.f32 %v8531_v56  ;;  %v4292_v25 = vand.u32 2147483647, %v4267_v59  ;;  %vm4288_vm4 = vweird.f32 %v4267_v59 }
 0xa24   :  { %v4213_v35 = vsel %vm4212_vm12, %v6338_v55, %v4209_v53  ;;  %v4272_v55 = vadd.f32 %v8522_v6, %v4271_v30  ;;  %v4280_v53 = vor.u32 1.1754944e-38, %v4279_v5  ;;  %v4295_v27 = vor.u32 1.1754944e-38, %v4294_v22 }
 0xa25   :  { %v4247_v8 = vadd.f32 %v6342_v42, %v4246_v46  ;;  %v4218_v63 = vsel %vm4215_vm13, %v4217_v57, %v4213_v35  ;;  %vm4293_vm7 = vcmp.eq.f32.partialorder %v4292_v25, 8.507059e+37 }
 0xa26   :  { %v4301_v45 = vmul.f32 %v6346_v10, %v4218_v63  ;;  %v4276_v36 = vsel %vm4275_vm3, %v8522_v6, %v4272_v55  ;;  %v9066_v6 = vld [vmem:[#allocation77_spill] sm:$0xff] }
 0xa27   :  { %v4251_v51 = vsel %vm4250_vm14, %v6342_v42, %v4247_v8 }
 0xa28   :  { %v4256_v48 = vsel %vm4253_vm15, %v4255_v33, %v4251_v51  ;;  %v6348_v13 = vpop.eup %6347 }
 0xa29   :  { %v4299_v62 = vmul.f32 %v4256_v48, %v8455_v9  ;;  %v4284_v28 = vmul.f32 %v6348_v13, %v4267_v59  ;;  %v4277_v9 = vand.u32 2147483647, %v8511_v20  ;;  %vm4289_vm2 = vweird.f32 %v6348_v13  ;;  %v6350_v46 = vpop.eup %6349  ;;  %v9067_v59 = vld [vmem:[#allocation78_spill] sm:$0xff] }
 0xa2a   :  { %vm4290_vm5 = vmor %vm4288_vm4, %vm4289_vm2  ;;  %v2995_v63 = vadd.f32 %v9067_v59, %v9066_v6 }
 0xa2b   :  { %v8539_v18 = vadd.f32 %v4301_v45, %v4299_v62  ;;  %v4285_v42 = vsub.f32 1.0, %v4284_v28  ;;  %vm4278_vm6 = vcmp.eq.f32.partialorder %v4277_v9, 8.507059e+37  ;;  %v9068_v45 = vld [vmem:[#allocation56_spill] sm:$0xff] }
 0xa2c   :  { %v4281_v35 = vsel %vm4278_vm6, %v4280_v53, %v4276_v36 }
 0xa2d   :  { %6351 = vtanh.f32 %v8539_v18  ;;  %v4286_v37 = vmul.f32 %v6348_v13, %v4285_v42  ;;  %v4306_v10 = vmul.f32 %v6350_v46, %v4281_v35 }
 0xa2f   :  { %v4287_v14 = vadd.f32 %v6348_v13, %v4286_v37 }
 0xa31   :  { %v4291_v24 = vsel %vm4290_vm5, %v6348_v13, %v4287_v14 }
 0xa32   :  { %v4296_v8 = vsel %vm4293_vm7, %v4295_v27, %v4291_v24 }
 0xa33   :  { %v6352_v57 = vpop.eup %6351 }
 0xa34   :  { %v4307_v20 = vmul.f32 %v6352_v57, %v4296_v8 }
 0xa36   :  { %v4308_v33 = vpack.c.bf16 %v4307_v20, %v4306_v10 }
 0xa38   :  { %4325 = vmatmul.bf16.vlgmr.msrb.gmra.mxu0 %v4308_v33  ;;  %4339 = vmatmul.bf16.vlgmr.msrb.gmra.mxu1 %v4308_v33 }
 0xa39   :  { %4353 = vmatmul.bf16.vlgmr.msrb.gmra.mxu2 %v4308_v33  ;;  %4367 = vmatmul.bf16.vlgmr.msrb.gmra.mxu3 %v4308_v33  ;;  %v9069_v33 = vld [vmem:[#allocation60_spill] sm:$0xff] }
 0xa3a   :  { %4715 = vmatpush.bf16.msrb.mxu0 %v7718_v2  ;;  %4729 = vmatpush.bf16.msrb.mxu1 %v7720_v32  ;;  %v9059_v2 = vld [vmem:[#allocation47_spill] sm:$0xff] }
 0xa3b   :  { %4743 = vmatpush.bf16.msrb.mxu2 %v7726_v1  ;;  %4757 = vmatpush.bf16.msrb.mxu3 %v7724_v7  ;;  %v2897_v32 = vadd.f32 %v9059_v2, %v8148_v34  ;;  %v9060_v7 = vld [vmem:[#allocation69_spill] sm:$0xff]  ;;  %v9061_v1 = vld [vmem:[#allocation51_spill] sm:$0xff]  ;;  %v2997_v2 = vadd.f32 %v9069_v33, %v9066_v6 }
 0xa3e   :  { %4716 = vmatpush.bf16.msrb.mxu0 %v7728_v31  ;;  %4730 = vmatpush.bf16.msrb.mxu1 %v7731_v47  ;;  %v2946_v31 = vadd.f32 %v9061_v1, %v9060_v7 }
 0xa3f   :  { %4744 = vmatpush.bf16.msrb.mxu2 %v7738_v60  ;;  %4758 = vmatpush.bf16.msrb.mxu3 %v7736_v12 }
 0xa42   :  { %4717 = vmatpush.bf16.msrb.mxu0 %v7740_v38  ;;  %4731 = vmatpush.bf16.msrb.mxu1 %v7743_v43 }
 0xa43   :  { %4745 = vmatpush.bf16.msrb.mxu2 %v7751_v4  ;;  %4759 = vmatpush.bf16.msrb.mxu3 %v7748_v49  ;;  %v9062_v4 = vld [vmem:[#allocation73_spill] sm:$0xff] }
 0xa44   :  { %v3046_v48 = vadd.f32 %v9068_v45, %v9062_v4 }
 0xa46   :  { %4718 = vmatpush.bf16.msrb.mxu0 %v7753_v0  ;;  %4732 = vmatpush.bf16.msrb.mxu1 %v7755_v3  ;;  %v9063_v0 = vld [vmem:[#allocation53_spill] sm:$0xff] }
 0xa47   :  { %4746 = vmatpush.bf16.msrb.mxu2 %v7827_v41  ;;  %4760 = vmatpush.bf16.msrb.mxu3 %v7775_v58  ;;  %v3044_v3 = vadd.f32 %v9063_v0, %v9062_v4  ;;  %v9064_v58 = vld [vmem:[#allocation75_spill] sm:$0xff] }
 0xa48   :  { %v2899_v41 = vadd.f32 %v9064_v58, %v8148_v34 }
 0xa4a   :  { %4719 = vmatpush.bf16.msrb.mxu0 %v7839_v17  ;;  %4733 = vmatpush.bf16.msrb.mxu1 %v7848_v61  ;;  %v9065_v17 = vld [vmem:[#allocation54_spill] sm:$0xff] }
 0xa4b   :  { %4747 = vmatpush.bf16.msrb.mxu2 %v7903_v40  ;;  %4761 = vmatpush.bf16.msrb.mxu3 %v7850_v16  ;;  %v2948_v61 = vadd.f32 %v9065_v17, %v9060_v7 }
 0xa4e   :  { %4720 = vmatpush.bf16.msrb.mxu0 %v7908_v29  ;;  %4734 = vmatpush.bf16.msrb.mxu1 %v7915_v54 }
 0xa4f   :  { %4748 = vmatpush.bf16.msrb.mxu2 %v7923_v19  ;;  %4762 = vmatpush.bf16.msrb.mxu3 %v7920_v23 }
 0xa52   :  { %4721 = vmatpush.bf16.msrb.mxu0 %v7925_v21  ;;  %4735 = vmatpush.bf16.msrb.mxu1 %v7927_v44 }
 0xa53   :  { %4749 = vmatpush.bf16.msrb.mxu2 %v7934_v39  ;;  %4763 = vmatpush.bf16.msrb.mxu3 %v7931_v15 }
 0xa56   :  { %4722 = vmatpush.bf16.msrb.mxu0 %v7937_v26  ;;  %4736 = vmatpush.bf16.msrb.mxu1 %v7941_v52 }
 0xa57   :  { %4750 = vmatpush.bf16.msrb.mxu2 %v7948_v50  ;;  %4764 = vmatpush.bf16.msrb.mxu3 %v7945_v11 }
 0xab5   :  { %v4326_v47 = vpop.f32.mrf.mxu0  ;;  %v4340_v12 = vpop.f32.mrf.mxu1 }
 0xab6   :  { %v4373_v60 = vadd.f32 %v4326_v47, %v2897_v32  ;;  %v4374_v38 = vadd.f32 %v4340_v12, %v2946_v31 }
 0xab8   :  { %v5679_v43 = vmul.f32 -1.442695, %v4373_v60  ;;  %v5681_v49 = vmul.f32 -1.442695, %v4374_v38 }
 0xaba   :  { %6353 = vpow2.f32 %v5679_v43 }
 0xabb   :  { %6355 = vpow2.f32 %v5681_v49 }
 0xabc   :  { %v4368_v16 = vpop.f32.mrf.mxu3  ;;  %v4354_v50 = vpop.f32.mrf.mxu2 }
 0xabd   :  { %v4376_v40 = vadd.f32 %v4368_v16, %v3044_v3  ;;  %v4328_v29 = vpop.f32.mrf.mxu0  ;;  %v4342_v54 = vpop.f32.mrf.mxu1  ;;  %v4375_v62 = vadd.f32 %v4354_v50, %v2995_v63 }
 0xabe   :  { %v4377_v23 = vadd.f32 %v4328_v29, %v2899_v41  ;;  %v4378_v19 = vadd.f32 %v4342_v54, %v2948_v61 }
 0xabf   :  { %v5683_v21 = vmul.f32 -1.442695, %v4376_v40 }
 0xac0   :  { %v6354_v44 = vpop.eup %6353  ;;  %v5680_v15 = vmul.f32 -1.442695, %v4377_v23  ;;  %v5682_v52 = vmul.f32 -1.442695, %v4378_v19 }
 0xac1   :  { %v6356_v39 = vpop.eup %6355  ;;  %v4387_v26 = vadd.f32 1.0, %v6354_v44  ;;  %6357 = vpow2.f32 %v5683_v21 }
 0xac2   :  { %v4425_v11 = vadd.f32 1.0, %v6356_v39  ;;  %6359 = vpow2.f32 %v5680_v15 }
 0xac3   :  { %6361 = vrcp.f32 %v4387_v26  ;;  %v4398_v27 = vand.u32 2147483647, %v4387_v26  ;;  %v4400_v57 = vand.u32 2147483648, %v4387_v26  ;;  %vm4394_vm10 = vweird.f32 %v4387_v26 }
 0xac4   :  { %6363 = vrcp.f32 %v4425_v11  ;;  %v4370_v51 = vpop.f32.mrf.mxu3  ;;  %v4438_v24 = vand.u32 2147483648, %v4425_v11  ;;  %v4436_v10 = vand.u32 2147483647, %v4425_v11  ;;  %v4356_v20 = vpop.f32.mrf.mxu2  ;;  %vm4432_vm11 = vweird.f32 %v4425_v11 }
 0xac5   :  { %6365 = vpow2.f32 %v5682_v52  ;;  %v4380_v28 = vadd.f32 %v4370_v51, %v3046_v48  ;;  %v4401_v31 = vor.u32 1.1754944e-38, %v4400_v57  ;;  %vm4399_vm14 = vcmp.eq.f32.partialorder %v4398_v27, 8.507059e+37 }
 0xac6   :  { %6367 = vtanh.f32 %v4375_v62  ;;  %v4439_v60 = vor.u32 1.1754944e-38, %v4438_v24  ;;  %v4379_v43 = vadd.f32 %v4356_v20, %v2997_v2  ;;  %vm4437_vm15 = vcmp.eq.f32.partialorder %v4436_v10, 8.507059e+37 }
 0xac7   :  { %v6358_v30 = vpop.eup %6357  ;;  %v5684_v46 = vmul.f32 -1.442695, %v4380_v28 }
 0xac8   :  { %v6360_v13 = vpop.eup %6359  ;;  %v8595_v42 = vadd.f32 1.0, %v6358_v30 }
 0xac9   :  { %v6362_v55 = vpop.eup %6361  ;;  %v8597_v5 = vadd.f32 1.0, %v6360_v13 }
 0xaca   :  { %v6364_v22 = vpop.eup %6363  ;;  %v4390_v9 = vmul.f32 %v6362_v55, %v4387_v26  ;;  %vm4395_vm8 = vweird.f32 %v6362_v55 }
 0xacb   :  { %v6366_v37 = vpop.eup %6365  ;;  %v4428_v25 = vmul.f32 %v6364_v22, %v4425_v11  ;;  %6369 = vrcp.f32 %v8597_v5  ;;  %vm4433_vm9 = vweird.f32 %v6364_v22  ;;  %vm4396_vm12 = vmor %vm4394_vm10, %vm4395_vm8  ;;  %v4413_v19 = vand.u32 2147483647, %v8597_v5 }
 0xacc   :  { %v4391_v14 = vsub.f32 1.0, %v4390_v9  ;;  %v8600_v36 = vadd.f32 1.0, %v6366_v37  ;;  %6371 = vrcp.f32 %v8595_v42  ;;  %v6368_v1 = vpop.eup %6367  ;;  %vm4434_vm13 = vmor %vm4432_vm11, %vm4433_vm9  ;;  %v4415_v21 = vand.u32 2147483648, %v8597_v5 }
 0xacd   :  { %v4429_v53 = vsub.f32 1.0, %v4428_v25  ;;  %vm4409_vm1 = vweird.f32 %v8597_v5  ;;  %vm4414_vm5 = vcmp.eq.f32.partialorder %v4413_v19, 8.507059e+37  ;;  %vm4472_vm9 = vweird.f32 %v8595_v42 }
 0xace   :  { %v4392_v35 = vmul.f32 %v6362_v55, %v4391_v14  ;;  %6373 = vrcp.f32 %v8600_v36  ;;  %v4453_v26 = vand.u32 2147483648, %v8600_v36  ;;  %v4451_v50 = vand.u32 2147483647, %v8600_v36 }
 0xacf   :  { %v4430_v8 = vmul.f32 %v6364_v22, %v4429_v53  ;;  %6375 = vpow2.f32 %v5684_v46  ;;  %vm4447_vm3 = vweird.f32 %v8600_v36  ;;  %v4416_v59 = vor.u32 1.1754944e-38, %v4415_v21 }
 0xad0   :  { %v4393_v32 = vadd.f32 %v6362_v55, %v4392_v35  ;;  %6377 = vtanh.f32 %v4379_v43  ;;  %v4454_v30 = vor.u32 1.1754944e-38, %v4453_v26  ;;  %vm4452_vm7 = vcmp.eq.f32.partialorder %v4451_v50, 8.507059e+37 }
 0xad1   :  { %v4431_v47 = vadd.f32 %v6364_v22, %v4430_v8  ;;  %v6370_v12 = vpop.eup %6369  ;;  %v4478_v46 = vand.u32 2147483648, %v8595_v42 }
 0xad2   :  { %v4397_v38 = vsel %vm4396_vm12, %v6362_v55, %v4393_v32  ;;  %v8606_v49 = vpop.eup %6371  ;;  %v4405_v58 = vmul.f32 %v6370_v12, %v8597_v5  ;;  %vm4410_vm0 = vweird.f32 %v6370_v12 }
 0xad3   :  { %v4402_v0 = vsel %vm4399_vm14, %v4401_v31, %v4397_v38  ;;  %v4435_v3 = vsel %vm4434_vm13, %v6364_v22, %v4431_v47  ;;  %v4468_v23 = vmul.f32 %v8606_v49, %v8595_v42  ;;  %vm4411_vm4 = vmor %vm4409_vm1, %vm4410_vm0  ;;  %vm4473_vm8 = vweird.f32 %v8606_v49  ;;  %v9071_v38 = vld [vmem:[#allocation58_spill] sm:$0xff] }
 0xad4   :  { %v6374_v41 = vpop.eup %6373  ;;  %v4440_v17 = vsel %vm4437_vm15, %v4439_v60, %v4435_v3  ;;  %v4499_v61 = vmul.f32 %v6368_v1, %v4402_v0  ;;  %v4406_v40 = vsub.f32 1.0, %v4405_v58  ;;  %vm4474_vm11 = vmor %vm4472_vm9, %vm4473_vm8  ;;  %v4479_v10 = vor.u32 1.1754944e-38, %v4478_v46 }
 0xad5   :  { %v4497_v16 = vmul.f32 %v4440_v17, %v8531_v56  ;;  %v4443_v29 = vmul.f32 %v6374_v41, %v8600_v36  ;;  %v6376_v54 = vpop.eup %6375  ;;  %vm4448_vm2 = vweird.f32 %v6374_v41  ;;  %v4469_v63 = vsub.f32 1.0, %v4468_v23 }
 0xad6   :  { %v4407_v39 = vmul.f32 %v6370_v12, %v4406_v40  ;;  %v4466_v56 = vadd.f32 1.0, %v6376_v54  ;;  %v6378_v48 = vpop.eup %6377  ;;  %vm4449_vm6 = vmor %vm4447_vm3, %vm4448_vm2  ;;  %v2951_v43 = vadd.f32 %v9071_v38, %v9060_v7  ;;  %v9073_v40 = vld [vmem:[#allocation59_spill] sm:$0xff]  ;;  %v9074_v54 = vld [vmem:[#allocation61_spill] sm:$0xff] }
 0xad7   :  { %v8615_v44 = vadd.f32 %v4499_v61, %v4497_v16  ;;  %v4444_v15 = vsub.f32 1.0, %v4443_v29  ;;  %v4470_v5 = vmul.f32 %v8606_v49, %v4469_v63  ;;  %v9072_v61 = vld [vmem:[#allocation55_spill] sm:$0xff]  ;;  %v2904_v29 = vadd.f32 %v9073_v40, %v8148_v34 }
 0xad8   :  { %v4408_v11 = vadd.f32 %v6370_v12, %v4407_v39  ;;  %6379 = vrcp.f32 %v4466_v56  ;;  %v4493_v53 = vand.u32 2147483648, %v4466_v56  ;;  %v4491_v57 = vand.u32 2147483647, %v4466_v56 }
 0xad9   :  { %v4445_v52 = vmul.f32 %v6374_v41, %v4444_v15  ;;  %6381 = vtanh.f32 %v8615_v44  ;;  %v4471_v14 = vadd.f32 %v8606_v49, %v4470_v5  ;;  %vm4487_vm12 = vweird.f32 %v4466_v56 }
 0xada   :  { %v4412_v51 = vsel %vm4411_vm4, %v6370_v12, %v4408_v11  ;;  %v4494_v20 = vor.u32 1.1754944e-38, %v4493_v53  ;;  %vm4492_vm15 = vcmp.eq.f32.partialorder %v4491_v57, 8.507059e+37  ;;  %v9070_v12 = vld [vmem:[#allocation57_spill] sm:$0xff]  ;;  %v3049_v16 = vadd.f32 %v9072_v61, %v9062_v4 }
 0xadb   :  { %v4446_v45 = vadd.f32 %v6374_v41, %v4445_v52  ;;  %v4417_v62 = vsel %vm4414_vm5, %v4416_v59, %v4412_v51  ;;  %v4475_v35 = vsel %vm4474_vm11, %v8606_v49, %v4471_v14  ;;  %v2902_v60 = vadd.f32 %v9070_v12, %v8148_v34 }
 0xadc   :  { %v4500_v28 = vmul.f32 %v6378_v48, %v4417_v62  ;;  %v2953_v23 = vadd.f32 %v9074_v54, %v9060_v7 }
 0xadd   :  { %v4450_v13 = vsel %vm4449_vm6, %v6374_v41, %v4446_v45 }
 0xade   :  { %v4455_v55 = vsel %vm4452_vm7, %v4454_v30, %v4450_v13  ;;  %v6380_v9 = vpop.eup %6379  ;;  %v9075_v30 = vld [vmem:[#allocation62_spill] sm:$0xff] }
 0xadf   :  { %v4498_v22 = vmul.f32 %v4455_v55, %v8539_v18  ;;  %v4483_v25 = vmul.f32 %v6380_v9, %v4466_v56  ;;  %v4476_v18 = vand.u32 2147483647, %v8595_v42  ;;  %vm4488_vm10 = vweird.f32 %v6380_v9  ;;  %v6382_v8 = vpop.eup %6381 }
 0xae0   :  { %vm4489_vm13 = vmor %vm4487_vm12, %vm4488_vm10  ;;  %v3000_v62 = vadd.f32 %v9075_v30, %v9066_v6 }
 0xae1   :  { %v8623_v37 = vadd.f32 %v4500_v28, %v4498_v22  ;;  %v4484_v36 = vsub.f32 1.0, %v4483_v25  ;;  %vm4477_vm14 = vcmp.eq.f32.partialorder %v4476_v18, 8.507059e+37  ;;  %v9076_v28 = vld [vmem:[#allocation64_spill] sm:$0xff] }
 0xae2   :  { %v4480_v32 = vsel %vm4477_vm14, %v4479_v10, %v4475_v35  ;;  %v3051_v55 = vadd.f32 %v9076_v28, %v9062_v4 }
 0xae3   :  { %6383 = vtanh.f32 %v8623_v37  ;;  %v4485_v27 = vmul.f32 %v6380_v9, %v4484_v36  ;;  %v4505_v31 = vmul.f32 %v6382_v8, %v4480_v32 }
 0xae5   :  { %v4486_v24 = vadd.f32 %v6380_v9, %v4485_v27 }
 0xae7   :  { %v4490_v2 = vsel %vm4489_vm13, %v6380_v9, %v4486_v24 }
 0xae8   :  { %v4495_v1 = vsel %vm4492_vm15, %v4494_v20, %v4490_v2 }
 0xae9   :  { %v6384_v33 = vpop.eup %6383 }
 0xaea   :  { %v4506_v42 = vmul.f32 %v6384_v33, %v4495_v1 }
 0xaec   :  { %v4507_v47 = vpack.c.bf16 %v4506_v42, %v4505_v31 }
 0xaee   :  { %4524 = vmatmul.bf16.vlgmr.msra.gmra.mxu0 %v4507_v47  ;;  %4538 = vmatmul.bf16.vlgmr.msra.gmra.mxu1 %v4507_v47 }
 0xaef   :  { %4552 = vmatmul.bf16.vlgmr.msra.gmra.mxu2 %v4507_v47  ;;  %4566 = vmatmul.bf16.vlgmr.msra.gmra.mxu3 %v4507_v47  ;;  %v9077_v47 = vld [vmem:[#allocation63_spill] sm:$0xff] }
 0xaf0   :  { %v3002_v12 = vadd.f32 %v9077_v47, %v9066_v6 }
 0xb6b   :  { %v4525_v49 = vpop.f32.mrf.mxu0  ;;  %v4539_v0 = vpop.f32.mrf.mxu1 }
 0xb6c   :  { %v4572_v3 = vadd.f32 %v4525_v49, %v2902_v60  ;;  %v4573_v58 = vadd.f32 %v4539_v0, %v2951_v43 }
 0xb6e   :  { %v5685_v41 = vmul.f32 -1.442695, %v4572_v3  ;;  %v5687_v17 = vmul.f32 -1.442695, %v4573_v58 }
 0xb70   :  { %6385 = vpow2.f32 %v5685_v41 }
 0xb71   :  { %6387 = vpow2.f32 %v5687_v17 }
 0xb72   :  { %v4567_v19 = vpop.f32.mrf.mxu3  ;;  %v4553_v48 = vpop.f32.mrf.mxu2 }
 0xb73   :  { %v4575_v21 = vadd.f32 %v4567_v19, %v3049_v16  ;;  %v4527_v15 = vpop.f32.mrf.mxu0  ;;  %v4541_v39 = vpop.f32.mrf.mxu1  ;;  %v4574_v22 = vadd.f32 %v4553_v48, %v3000_v62 }
 0xb74   :  { %v4576_v26 = vadd.f32 %v4527_v15, %v2904_v29  ;;  %v4577_v56 = vadd.f32 %v4541_v39, %v2953_v23 }
 0xb75   :  { %v5689_v52 = vmul.f32 -1.442695, %v4575_v21 }
 0xb76   :  { %v6386_v11 = vpop.eup %6385  ;;  %v5686_v50 = vmul.f32 -1.442695, %v4576_v26  ;;  %v5688_v51 = vmul.f32 -1.442695, %v4577_v56 }
 0xb77   :  { %v6388_v59 = vpop.eup %6387  ;;  %v4586_v63 = vadd.f32 1.0, %v6386_v11  ;;  %6389 = vpow2.f32 %v5689_v52 }
 0xb78   :  { %v4624_v45 = vadd.f32 1.0, %v6388_v59  ;;  %6391 = vpow2.f32 %v5686_v50 }
 0xb79   :  { %6393 = vrcp.f32 %v4586_v63  ;;  %v4597_v20 = vand.u32 2147483647, %v4586_v63  ;;  %v4599_v33 = vand.u32 2147483648, %v4586_v63  ;;  %vm4593_vm2 = vweird.f32 %v4586_v63 }
 0xb7a   :  { %6395 = vrcp.f32 %v4624_v45  ;;  %v4569_v13 = vpop.f32.mrf.mxu3  ;;  %v4637_v2 = vand.u32 2147483648, %v4624_v45  ;;  %v4635_v31 = vand.u32 2147483647, %v4624_v45  ;;  %v4555_v42 = vpop.f32.mrf.mxu2  ;;  %vm4631_vm3 = vweird.f32 %v4624_v45 }
 0xb7b   :  { %6397 = vpow2.f32 %v5688_v51  ;;  %v4579_v25 = vadd.f32 %v4569_v13, %v3051_v55  ;;  %v4600_v43 = vor.u32 1.1754944e-38, %v4599_v33  ;;  %vm4598_vm6 = vcmp.eq.f32.partialorder %v4597_v20, 8.507059e+37 }
 0xb7c   :  { %6399 = vtanh.f32 %v4574_v22  ;;  %v4638_v3 = vor.u32 1.1754944e-38, %v4637_v2  ;;  %v4578_v41 = vadd.f32 %v4555_v42, %v3002_v12  ;;  %vm4636_vm7 = vcmp.eq.f32.partialorder %v4635_v31, 8.507059e+37 }
 0xb7d   :  { %v6390_v5 = vpop.eup %6389  ;;  %v5690_v8 = vmul.f32 -1.442695, %v4579_v25 }
 0xb7e   :  { %v6392_v9 = vpop.eup %6391  ;;  %v8647_v36 = vadd.f32 1.0, %v6390_v5 }
 0xb7f   :  { %v6394_v14 = vpop.eup %6393  ;;  %v8649_v46 = vadd.f32 1.0, %v6392_v9 }
 0xb80   :  { %v6396_v53 = vpop.eup %6395  ;;  %v4589_v18 = vmul.f32 %v6394_v14, %v4586_v63  ;;  %vm4594_vm0 = vweird.f32 %v6394_v14 }
 0xb81   :  { %v6398_v27 = vpop.eup %6397  ;;  %v4627_v57 = vmul.f32 %v6396_v53, %v4624_v45  ;;  %6401 = vrcp.f32 %v8649_v46  ;;  %vm4632_vm1 = vweird.f32 %v6396_v53  ;;  %vm4595_vm4 = vmor %vm4593_vm2, %vm4594_vm0  ;;  %v4612_v56 = vand.u32 2147483647, %v8649_v46 }
 0xb82   :  { %v4590_v24 = vsub.f32 1.0, %v4589_v18  ;;  %v8652_v35 = vadd.f32 1.0, %v6398_v27  ;;  %6403 = vrcp.f32 %v8647_v36  ;;  %v6400_v38 = vpop.eup %6399  ;;  %vm4633_vm5 = vmor %vm4631_vm3, %vm4632_vm1  ;;  %v4614_v52 = vand.u32 2147483648, %v8649_v46 }
 0xb83   :  { %v4628_v10 = vsub.f32 1.0, %v4627_v57  ;;  %vm4608_vm9 = vweird.f32 %v8649_v46  ;;  %vm4613_vm13 = vcmp.eq.f32.partialorder %v4612_v56, 8.507059e+37  ;;  %vm4671_vm1 = vweird.f32 %v8647_v36  ;;  %v9082_v56 = vld [vmem:[#allocation68_spill] sm:$0xff] }
 0xb84   :  { %v4591_v32 = vmul.f32 %v6394_v14, %v4590_v24  ;;  %6405 = vrcp.f32 %v8652_v35  ;;  %v4652_v63 = vand.u32 2147483648, %v8652_v35  ;;  %v4650_v48 = vand.u32 2147483647, %v8652_v35 }
 0xb85   :  { %v4629_v1 = vmul.f32 %v6396_v53, %v4628_v10  ;;  %6407 = vpow2.f32 %v5690_v8  ;;  %vm4646_vm11 = vweird.f32 %v8652_v35  ;;  %v4615_v30 = vor.u32 1.1754944e-38, %v4614_v52 }
 0xb86   :  { %v4592_v60 = vadd.f32 %v6394_v14, %v4591_v32  ;;  %6409 = vtanh.f32 %v4578_v41  ;;  %v4653_v5 = vor.u32 1.1754944e-38, %v4652_v63  ;;  %vm4651_vm15 = vcmp.eq.f32.partialorder %v4650_v48, 8.507059e+37 }
 0xb87   :  { %v4630_v49 = vadd.f32 %v6396_v53, %v4629_v1  ;;  %v6402_v0 = vpop.eup %6401  ;;  %v4677_v8 = vand.u32 2147483648, %v8647_v36  ;;  %v2958_v52 = vadd.f32 %v9082_v56, %v9060_v7 }
 0xb88   :  { %v4596_v58 = vsel %vm4595_vm4, %v6394_v14, %v4592_v60  ;;  %v8658_v17 = vpop.eup %6403  ;;  %v4604_v40 = vmul.f32 %v6402_v0, %v8649_v46  ;;  %vm4609_vm8 = vweird.f32 %v6402_v0 }
 0xb89   :  { %v4601_v61 = vsel %vm4598_vm6, %v4600_v43, %v4596_v58  ;;  %v4634_v16 = vsel %vm4633_vm5, %v6396_v53, %v4630_v49  ;;  %v4667_v26 = vmul.f32 %v8658_v17, %v8647_v36  ;;  %vm4610_vm12 = vmor %vm4608_vm9, %vm4609_vm8  ;;  %vm4672_vm0 = vweird.f32 %v8658_v17  ;;  %v9079_v58 = vld [vmem:[#allocation66_spill] sm:$0xff] }
 0xb8a   :  { %v6406_v29 = vpop.eup %6405  ;;  %v4639_v54 = vsel %vm4636_vm7, %v4638_v3, %v4634_v16  ;;  %v4698_v23 = vmul.f32 %v6400_v38, %v4601_v61  ;;  %v4605_v21 = vsub.f32 1.0, %v4604_v40  ;;  %vm4673_vm3 = vmor %vm4671_vm1, %vm4672_vm0  ;;  %v4678_v31 = vor.u32 1.1754944e-38, %v4677_v8  ;;  %v5880_v16 = vld [vmem:[#allocation15 + $0x38] sm:$0xff] }
 0xb8b   :  { %v4696_v19 = vmul.f32 %v4639_v54, %v8615_v44  ;;  %v4642_v15 = vmul.f32 %v6406_v29, %v8652_v35  ;;  %v6408_v39 = vpop.eup %6407  ;;  %vm4647_vm10 = vweird.f32 %v6406_v29  ;;  %v4668_v62 = vsub.f32 1.0, %v4667_v26  ;;  %4980 = vmatpush.bf16.msra.mxu0 %v5880_v16 }
 0xb8c   :  { %v4606_v59 = vmul.f32 %v6402_v0, %v4605_v21  ;;  %v4665_v44 = vadd.f32 1.0, %v6408_v39  ;;  %v6410_v55 = vpop.eup %6409  ;;  %vm4648_vm14 = vmor %vm4646_vm11, %vm4647_vm10  ;;  %v2956_v41 = vadd.f32 %v9079_v58, %v9060_v7  ;;  %v9080_v21 = vld [vmem:[#allocation67_spill] sm:$0xff]  ;;  %v9081_v39 = vld [vmem:[#allocation70_spill] sm:$0xff] }
 0xb8d   :  { %v8667_v11 = vadd.f32 %v4698_v23, %v4696_v19  ;;  %v4643_v50 = vsub.f32 1.0, %v4642_v15  ;;  %v4669_v46 = vmul.f32 %v8658_v17, %v4668_v62  ;;  %v5879_v19 = vld [vmem:[#allocation15 + $0x30] sm:$0xff]  ;;  %v3054_v15 = vadd.f32 %v9080_v21, %v9062_v4 }
 0xb8e   :  { %v4607_v45 = vadd.f32 %v6402_v0, %v4606_v59  ;;  %6411 = vrcp.f32 %v4665_v44  ;;  %v4692_v10 = vand.u32 2147483648, %v4665_v44  ;;  %v4690_v33 = vand.u32 2147483647, %v4665_v44 }
 0xb8f   :  { %v4644_v51 = vmul.f32 %v6406_v29, %v4643_v50  ;;  %6413 = vtanh.f32 %v8667_v11  ;;  %v4670_v24 = vadd.f32 %v8658_v17, %v4669_v46  ;;  %vm4686_vm4 = vweird.f32 %v4665_v44  ;;  %4981 = vmatpush.bf16.msra.mxu0 %v5879_v19  ;;  %v5876_v46 = vld [vmem:[#allocation15 + $0x18] sm:$0xff] }
 0xb90   :  { %v4611_v13 = vsel %vm4610_vm12, %v6402_v0, %v4607_v45  ;;  %v4693_v42 = vor.u32 1.1754944e-38, %v4692_v10  ;;  %vm4691_vm7 = vcmp.eq.f32.partialorder %v4690_v33, 8.507059e+37  ;;  %v9078_v0 = vld [vmem:[#allocation65_spill] sm:$0xff]  ;;  %v2909_v26 = vadd.f32 %v9081_v39, %v8148_v34 }
 0xb91   :  { %v4645_v28 = vadd.f32 %v6406_v29, %v4644_v51  ;;  %v4616_v22 = vsel %vm4613_vm13, %v4615_v30, %v4611_v13  ;;  %v4674_v32 = vsel %vm4673_vm3, %v8658_v17, %v4670_v24  ;;  %v2907_v3 = vadd.f32 %v9078_v0, %v8148_v34  ;;  %v5878_v51 = vld [vmem:[#allocation15 + $0x28] sm:$0xff]  ;;  %v5877_v34 = vld [vmem:[#allocation15 + $0x20] sm:$0xff] }
 0xb92   :  { %v4699_v25 = vmul.f32 %v6410_v55, %v4616_v22 }
 0xb93   :  { %v4649_v9 = vsel %vm4648_vm14, %v6406_v29, %v4645_v28  ;;  %4982 = vmatpush.bf16.msra.mxu0 %v5878_v51 }
 0xb94   :  { %v4654_v14 = vsel %vm4651_vm15, %v4653_v5, %v4649_v9  ;;  %v6412_v18 = vpop.eup %6411  ;;  %v9083_v9 = vld [vmem:[#allocation71_spill] sm:$0xff] }
 0xb95   :  { %v4697_v53 = vmul.f32 %v4654_v14, %v8623_v37  ;;  %v4682_v57 = vmul.f32 %v6412_v18, %v4665_v44  ;;  %v4675_v37 = vand.u32 2147483647, %v8647_v36  ;;  %vm4687_vm2 = vweird.f32 %v6412_v18  ;;  %v6414_v1 = vpop.eup %6413 }
 0xb96   :  { %vm4688_vm5 = vmor %vm4686_vm4, %vm4687_vm2 }
 0xb97   :  { %v8675_v27 = vadd.f32 %v4699_v25, %v4697_v53  ;;  %v4683_v35 = vsub.f32 1.0, %v4682_v57  ;;  %vm4676_vm6 = vcmp.eq.f32.partialorder %v4675_v37, 8.507059e+37  ;;  %4983 = vmatpush.bf16.msra.mxu0 %v5877_v34  ;;  %v3005_v25 = vadd.f32 %v9083_v9, %v9066_v6  ;;  %v9084_v53 = vld [vmem:[#allocation72_spill] sm:$0xff] }
 0xb98   :  { %v4679_v60 = vsel %vm4676_vm6, %v4678_v31, %v4674_v32  ;;  %v9085_v31 = vld [vmem:[#allocation76_spill] sm:$0xff] }
 0xb99   :  { %6415 = vtanh.f32 %v8675_v27  ;;  %v4684_v20 = vmul.f32 %v6412_v18, %v4683_v35  ;;  %v4704_v43 = vmul.f32 %v6414_v1, %v4679_v60  ;;  %v5875_v35 = vld [vmem:[#allocation15 + $0x10] sm:$0xff] }
 0xb9b   :  { %v4685_v2 = vadd.f32 %v6412_v18, %v4684_v20  ;;  %4984 = vmatpush.bf16.msra.mxu0 %v5876_v46 }
 0xb9d   :  { %v4689_v12 = vsel %vm4688_vm5, %v6412_v18, %v4685_v2  ;;  %v3056_v18 = vadd.f32 %v9084_v53, %v9062_v4  ;;  %v3007_v4 = vadd.f32 %v9085_v31, %v9066_v6 }
 0xb9e   :  { %v4694_v38 = vsel %vm4691_vm7, %v4693_v42, %v4689_v12 }
 0xb9f   :  { %v6416_v47 = vpop.eup %6415  ;;  %4985 = vmatpush.bf16.msra.mxu0 %v5875_v35 }
 0xba0   :  { %v4705_v36 = vmul.f32 %v6416_v47, %v4694_v38  ;;  %v5874_v47 = vld [vmem:[#allocation15 + $0x8] sm:$0xff] }
 0xba2   :  { %v4706_v49 = vpack.c.bf16 %v4705_v36, %v4704_v43 }
 0xba3   :  { %4986 = vmatpush.bf16.msra.mxu0 %v5874_v47 }
 0xba4   :  { %4723 = vmatmul.bf16.vlgmr.msrb.gmra.mxu0 %v4706_v49  ;;  %4737 = vmatmul.bf16.vlgmr.msrb.gmra.mxu1 %v4706_v49 }
 0xba5   :  { %4751 = vmatmul.bf16.vlgmr.msrb.gmra.mxu2 %v4706_v49  ;;  %4765 = vmatmul.bf16.vlgmr.msrb.gmra.mxu3 %v4706_v49 }
 0xc21   :  { %v4724_v17 = vpop.f32.mrf.mxu0  ;;  %v4738_v61 = vpop.f32.mrf.mxu1 }
 0xc22   :  { %v4771_v40 = vadd.f32 %v4724_v17, %v2907_v3  ;;  %v4772_v29 = vadd.f32 %v4738_v61, %v2956_v41  ;;  %v5873_v17 = vld [vmem:[#allocation15] sm:$0xff] }
 0xc23   :  { %4987 = vmatpush.bf16.msra.mxu0 %v5873_v17 }
 0xc24   :  { %v5691_v54 = vmul.f32 -1.442695, %v4771_v40  ;;  %v5693_v23 = vmul.f32 -1.442695, %v4772_v29 }
 0xc26   :  { %6417 = vpow2.f32 %v5691_v54 }
 0xc27   :  { %6419 = vpow2.f32 %v5693_v23 }
 0xc28   :  { %v4766_v50 = vpop.f32.mrf.mxu3  ;;  %v4752_v7 = vpop.f32.mrf.mxu2 }
 0xc29   :  { %v4774_v59 = vadd.f32 %v4766_v50, %v3054_v15  ;;  %v4726_v63 = vpop.f32.mrf.mxu0  ;;  %v4740_v44 = vpop.f32.mrf.mxu1  ;;  %v4773_v24 = vadd.f32 %v4752_v7, %v3005_v25 }
 0xc2a   :  { %v4775_v45 = vadd.f32 %v4726_v63, %v2909_v26  ;;  %v4776_v48 = vadd.f32 %v4740_v44, %v2958_v52 }
 0xc2b   :  { %v5695_v30 = vmul.f32 -1.442695, %v4774_v59 }
 0xc2c   :  { %v6418_v62 = vpop.eup %6417  ;;  %v5692_v13 = vmul.f32 -1.442695, %v4775_v45  ;;  %v5694_v5 = vmul.f32 -1.442695, %v4776_v48 }
 0xc2d   :  { %v6420_v28 = vpop.eup %6419  ;;  %v8695_v55 = vadd.f32 1.0, %v6418_v62  ;;  %6421 = vpow2.f32 %v5695_v30 }
 0xc2e   :  { %v4823_v22 = vadd.f32 1.0, %v6420_v28  ;;  %6423 = vpow2.f32 %v5692_v13 }
 0xc2f   :  { %6425 = vrcp.f32 %v8695_v55  ;;  %v4796_v49 = vand.u32 2147483647, %v8695_v55  ;;  %v4798_v0 = vand.u32 2147483648, %v8695_v55  ;;  %vm4792_vm10 = vweird.f32 %v8695_v55 }
 0xc30   :  { %6427 = vrcp.f32 %v4823_v22  ;;  %v4768_v14 = vpop.f32.mrf.mxu3  ;;  %v4836_v36 = vand.u32 2147483648, %v4823_v22  ;;  %v4754_v3 = vpop.f32.mrf.mxu2  ;;  %v4834_v6 = vand.u32 2147483647, %v4823_v22  ;;  %vm4830_vm11 = vweird.f32 %v4823_v22 }
 0xc31   :  { %6429 = vpow2.f32 %v5694_v5  ;;  %v4778_v37 = vadd.f32 %v4768_v14, %v3056_v18  ;;  %v4777_v40 = vadd.f32 %v4754_v3, %v3007_v4  ;;  %v4799_v54 = vor.u32 1.1754944e-38, %v4798_v0 }
 0xc32   :  { %v4837_v15 = vor.u32 1.1754944e-38, %v4836_v36  ;;  %vm4797_vm14 = vcmp.eq.f32.partialorder %v4796_v49, 8.507059e+37  ;;  %vm4835_vm15 = vcmp.eq.f32.partialorder %v4834_v6, 8.507059e+37 }
 0xc33   :  { %v6422_v57 = vpop.eup %6421  ;;  %v5696_v38 = vmul.f32 -1.442695, %v4778_v37 }
 0xc34   :  { %v6424_v8 = vpop.eup %6423  ;;  %v8702_v10 = vadd.f32 1.0, %v6422_v57 }
 0xc35   :  { %v6426_v20 = vpop.eup %6425  ;;  %v8704_v33 = vadd.f32 1.0, %v6424_v8 }
 0xc36   :  { %v6428_v2 = vpop.eup %6427  ;;  %v4788_v32 = vmul.f32 %v6426_v20, %v8695_v55  ;;  %6431 = vrcp.f32 %v8702_v10  ;;  %vm4793_vm8 = vweird.f32 %v6426_v20  ;;  %v4876_v51 = vand.u32 2147483648, %v8702_v10 }
 0xc37   :  { %v6430_v1 = vpop.eup %6429  ;;  %v4826_v42 = vmul.f32 %v6428_v2, %v4823_v22  ;;  %6433 = vtanh.f32 %v4773_v24  ;;  %vm4831_vm9 = vweird.f32 %v6428_v2  ;;  %vm4794_vm12 = vmor %vm4792_vm10, %vm4793_vm8  ;;  %vm4807_vm0 = vweird.f32 %v8704_v33 }
 0xc38   :  { %v4789_v12 = vsub.f32 1.0, %v4788_v32  ;;  %6435 = vrcp.f32 %v8704_v33  ;;  %v8711_v60 = vadd.f32 1.0, %v6430_v1  ;;  %vm4832_vm13 = vmor %vm4830_vm11, %vm4831_vm9  ;;  %v4811_v55 = vand.u32 2147483647, %v8704_v33 }
 0xc39   :  { %v4827_v43 = vsub.f32 1.0, %v4826_v42  ;;  %v4813_v5 = vand.u32 2147483648, %v8704_v33  ;;  %vm4870_vm4 = vweird.f32 %v8702_v10  ;;  %v4874_v18 = vand.u32 2147483647, %v8702_v10 }
 0xc3a   :  { %v4790_v58 = vmul.f32 %v6426_v20, %v4789_v12  ;;  %6437 = vrcp.f32 %v8711_v60  ;;  %v4851_v28 = vand.u32 2147483648, %v8711_v60  ;;  %v4849_v9 = vand.u32 2147483647, %v8711_v60 }
 0xc3b   :  { %v4828_v41 = vmul.f32 %v6428_v2, %v4827_v43  ;;  %6439 = vpow2.f32 %v5696_v38  ;;  %v4814_v57 = vor.u32 1.1754944e-38, %v4813_v5  ;;  %vm4845_vm7 = vweird.f32 %v8711_v60 }
 0xc3c   :  { %v8716_v61 = vpop.eup %6431  ;;  %v4791_v16 = vadd.f32 %v6426_v20, %v4790_v58  ;;  %6441 = vtanh.f32 %v4777_v40  ;;  %vm4812_vm8 = vcmp.eq.f32.partialorder %v4811_v55, 8.507059e+37  ;;  %v4852_v37 = vor.u32 1.1754944e-38, %v4851_v28 }
 0xc3d   :  { %v6434_v29 = vpop.eup %6433  ;;  %v4829_v23 = vadd.f32 %v6428_v2, %v4828_v41  ;;  %v4866_v19 = vmul.f32 %v8716_v61, %v8702_v10  ;;  %vm4871_vm2 = vweird.f32 %v8716_v61  ;;  %vm4850_vm10 = vcmp.eq.f32.partialorder %v4849_v9, 8.507059e+37 }
 0xc3e   :  { %v6436_v21 = vpop.eup %6435  ;;  %v4795_v39 = vsel %vm4794_vm12, %v6426_v20, %v4791_v16  ;;  %vm8738_vm6 = vmor %vm4870_vm4, %vm4871_vm2  ;;  %vm4875_vm11 = vcmp.eq.f32.partialorder %v4874_v18, 8.507059e+37 }
 0xc3f   :  { %v4800_v26 = vsel %vm4797_vm14, %v4799_v54, %v4795_v39  ;;  %v4833_v56 = vsel %vm4832_vm13, %v6428_v2, %v4829_v23  ;;  %v4867_v52 = vsub.f32 1.0, %v4866_v19  ;;  %v4803_v50 = vmul.f32 %v6436_v21, %v8704_v33 }
 0xc40   :  { %v6438_v59 = vpop.eup %6437  ;;  %v4838_v63 = vsel %vm4835_vm15, %v4837_v15, %v4833_v56  ;;  %v4897_v44 = vmul.f32 %v6434_v29, %v4800_v26  ;;  %vm4808_vm1 = vweird.f32 %v6436_v21  ;;  %v4877_v33 = vor.u32 1.1754944e-38, %v4876_v51  ;;  %v5936_v29 = vld [vmem:[%s8761_s8] ss:$0 sm:$0xff] }
 0xc41   :  { %v4895_v45 = vmul.f32 %v4838_v63, %v8667_v11  ;;  %v4868_v48 = vmul.f32 %v8716_v61, %v4867_v52  ;;  %v4804_v30 = vsub.f32 1.0, %v4803_v50  ;;  %v4841_v62 = vmul.f32 %v6438_v59, %v8711_v60  ;;  %v6440_v13 = vpop.eup %6439  ;;  %vm4809_vm5 = vmor %vm4807_vm0, %vm4808_vm1 }
 0xc42   :  { %v4864_v25 = vadd.f32 1.0, %v6440_v13  ;;  %vm4846_vm3 = vweird.f32 %v6438_v59  ;;  %v6442_v53 = vpop.eup %6441 }
 0xc43   :  { %v4899_v34 = vadd.f32 %v4897_v44, %v4895_v45  ;;  %v4842_v22 = vsub.f32 1.0, %v4841_v62  ;;  %v4805_v7 = vmul.f32 %v6436_v21, %v4804_v30  ;;  %v4869_v11 = vadd.f32 %v8716_v61, %v4868_v48  ;;  %vm4847_vm9 = vmor %vm4845_vm7, %vm4846_vm3 }
 0xc44   :  { %v4891_v36 = vand.u32 2147483648, %v4864_v25  ;;  %v4889_v0 = vand.u32 2147483647, %v4864_v25  ;;  %vm4885_vm13 = vweird.f32 %v4864_v25 }
 0xc45   :  { %6443 = vtanh.f32 %v4899_v34  ;;  %v4843_v14 = vmul.f32 %v6438_v59, %v4842_v22  ;;  %v4806_v46 = vadd.f32 %v6436_v21, %v4805_v7  ;;  %v4873_v10 = vsel %vm8738_vm6, %v8716_v61, %v4869_v11 }
 0xc46   :  { %6445 = vrcp.f32 %v4864_v25  ;;  %v4878_v42 = vsel %vm4875_vm11, %v4877_v33, %v4873_v10  ;;  %v4892_v58 = vor.u32 1.1754944e-38, %v4891_v36  ;;  %vm4890_vm15 = vcmp.eq.f32.partialorder %v4889_v0, 8.507059e+37 }
 0xc47   :  { %v4810_v35 = vsel %vm4809_vm5, %v6436_v21, %v4806_v46  ;;  %v4844_v8 = vadd.f32 %v6438_v59, %v4843_v14 }
 0xc48   :  { %v4815_v20 = vsel %vm4812_vm8, %v4814_v57, %v4810_v35 }
 0xc49   :  { %v4848_v2 = vsel %vm4847_vm9, %v6438_v59, %v4844_v8  ;;  %v4898_v32 = vmul.f32 %v6442_v53, %v4815_v20 }
 0xc4a   :  { %v4853_v1 = vsel %vm4850_vm10, %v4852_v37, %v4848_v2 }
 0xc4b   :  { %v6444_v31 = vpop.eup %6443  ;;  %v4896_v4 = vmul.f32 %v4853_v1, %v8675_v27 }
 0xc4c   :  { %v6446_v47 = vpop.eup %6445  ;;  %v4903_v12 = vmul.f32 %v6444_v31, %v4878_v42 }
 0xc4d   :  { %v4900_v60 = vadd.f32 %v4898_v32, %v4896_v4  ;;  %v4881_v38 = vmul.f32 %v6446_v47, %v4864_v25  ;;  %vm4886_vm12 = vweird.f32 %v6446_v47 }
 0xc4e   :  { %vm4887_vm14 = vmor %vm4885_vm13, %vm4886_vm12  ;;  %v4909_v61 = vmax.f32 %v4903_v12, 0.0 }
 0xc4f   :  { %6447 = vtanh.f32 %v4900_v60  ;;  %v4882_v43 = vsub.f32 1.0, %v4881_v38 }
 0xc51   :  { %v4883_v49 = vmul.f32 %v6446_v47, %v4882_v43 }
 0xc53   :  { %v4884_v3 = vadd.f32 %v6446_v47, %v4883_v49 }
 0xc55   :  { %v6448_v6 = vpop.eup %6447  ;;  %v4888_v41 = vsel %vm4887_vm14, %v6446_v47, %v4884_v3 }
 0xc56   :  { %v4893_v17 = vsel %vm4890_vm15, %v4892_v58, %v4888_v41 }
 0xc57   :  { %v4904_v27 = vmul.f32 %v6448_v6, %v4893_v17 }
 0xc59   :  { %v4910_v16 = vmax.f32 %v4904_v27, 0.0 }
 0xc5b   :  { %v4911_v40 = vpack.c.bf16 %v4910_v16, %v4909_v61 }
 0xc5d   :  { %4988 = vmatmul.bf16.vlgmr.msra.gmra.mxu0 %v4911_v40 }
 0xcda   :  { %v4989_v54 = vpop.f32.mrf.mxu0 }
 0xcdb   :  { %v4990_v23 = vadd.f32 %v5936_v29, %v4989_v54 }
 0xcdd   :  { %4994 = vst [vmem:[#allocation16] sm:$0xff] %v4990_v23 }
 0xce2   :  { %v4991_v19 = vpop.f32.mrf.mxu0 }
 0xce3   :  { %v4992_v21 = vadd.f32 %v5936_v29, %v4991_v19 }
 0xce5   :  { %4995 = vst [vmem:[#allocation16 + $0x8] sm:$0xff] %v4992_v21 }
 0xce6   :  { %5008 = dma.vmem_to_hbm [thread:$0]  %s5001_s23, 256, %s5003_s25, [#allocation6], %s6664_s26, %s6664_s26, %s6665_s27  }
 0xce7   :  { %6649 = dma.done.wait [#allocation6], 256  }
 0xce8   :  { %6650 = vsyncadd [#allocation6], 4294967040 }
 0xce9   :  { %5013 = vsyncpa [#allocation5], 1 }
 0xcea   :  { %5014 = vsyncpa [#allocation8], 1 }
 0xceb   :  { %5015 = vsyncpa [#allocation11], 1 }
 0xcec   :  { %5016 = vsyncpa [#allocation14], 1 }
 0xced   :  { %5017 = vsyncpa [#allocation6], 1 }

</bundles_post_ra>
